<compile_context>
chip_gen: v7x
topology: tpu7x:2x2x1
jax: 0.10.0
libtpu: 0.0.40
codegen_flags: <defaults>
</compile_context>

<pallas_src>
import functools

import jax
import jax.numpy as jnp
from jax import lax
from jax.experimental import pallas as pl
from jax.experimental.pallas import tpu as pltpu


def _round_up(x, m):
    return (x + m - 1) // m * m


def _vmem_limit_bytes():
    """Generation-tuned VMEM budget: physical capacity minus ~16 MiB headroom."""
    cap = 64 * 1024 * 1024  # conservative fallback (v7x-sized)
    try:
        info = pltpu.get_tpu_info()
        cap = int(getattr(info, "vmem_capacity_bytes", cap)) or cap
    except Exception:
        pass
    return max(32 * 1024 * 1024, cap - 16 * 1024 * 1024)


def _spec(block_shape, index_map, buffers=None):
    """BlockSpec with optional N-deep buffering (graceful fallback if absent)."""
    if buffers is not None and hasattr(pl, "Buffered"):
        try:
            return pl.BlockSpec(block_shape, index_map,
                                pipeline_mode=pl.Buffered(buffers))
        except (TypeError, AttributeError):
            pass
    return pl.BlockSpec(block_shape, index_map)


def _build_gcn_matrix(edge_index, n, n_pad):
    """Dense D^-1/2 (A + remaining self-loops) D^-1/2, matching torch_geometric
    gcn_norm(add_self_loops=True) for unweighted graphs (self-loops already in
    the edge list are NOT double counted).  Rows/cols >= n stay all-zero."""
    row, col = edge_index[0], edge_index[1]          # message flow: src(row) -> dst(col)
    a = jnp.zeros((n_pad, n_pad), jnp.float32).at[col, row].add(1.0)
    idx = jnp.arange(n_pad)
    has_loop = a[idx, idx] > 0
    a = a.at[idx, idx].add(jnp.where((idx < n) & (~has_loop), 1.0, 0.0))
    deg = a.sum(axis=1)                               # in-degree incl. self loops
    dinv = jnp.where(deg > 0, lax.rsqrt(deg), 0.0)
    return dinv[:, None] * a * dinv[None, :]


# ---------------------------------------------------------------------------
# Pallas kernel: one GCN aggregation  out = relu(A_hat @ P + b)
# grid = (row tiles [parallel], k tiles [reduction, arbitrary])
# ---------------------------------------------------------------------------
def _gcn_agg_kernel(a_ref, p_ref, b_ref, o_ref, acc_ref, *, tk):
    k = pl.program_id(1)

    @pl.when(k == 0)
    def _():
        acc_ref[...] = jnp.zeros_like(acc_ref)

    k_off = pl.multiple_of(k * tk, tk)
    acc_ref[...] += jnp.dot(a_ref[...], p_ref[pl.ds(k_off, tk), :],
                            preferred_element_type=jnp.float32)

    @pl.when(k == pl.num_programs(1) - 1)
    def _():
        o_ref[...] = jnp.maximum(acc_ref[...] + b_ref[...],
                                 0.0).astype(o_ref.dtype)


def _gcn_aggregate(a_hat, proj, bias, *, out_dtype, tm, tk, vmem_limit):
    """relu(A_hat @ proj + bias) via a tiled, megacore-parallel Pallas call."""
    n_pad, hp = proj.shape
    ni, nk = n_pad // tm, n_pad // tk

    out_bytes = jnp.dtype(out_dtype).itemsize
    flops = 2 * n_pad * n_pad * hp
    bytes_accessed = (n_pad * n_pad * 2          # A_hat streamed once (bf16)
                      + n_pad * hp * 2           # resident projection (bf16)
                      + hp * 4                   # bias
                      + n_pad * hp * out_bytes)  # output

    grid_spec = pltpu.PrefetchScalarGridSpec(
        num_scalar_prefetch=0,
        grid=(ni, nk),
        in_specs=[
            # A_hat streamed in >= 1 MiB tiles -> HBM-roofline bound, not
            # per-step-overhead bound.
            pl.BlockSpec((tm, tk), lambda i, k: (i, k)),
            # projection + bias: constant index map, resident, single-buffered.
            _spec((n_pad, hp), lambda i, k: (0, 0), buffers=1),
            _spec((1, hp), lambda i, k: (0, 0), buffers=1),
        ],
        out_specs=pl.BlockSpec((tm, hp), lambda i, k: (i, 0)),
        scratch_shapes=[pltpu.VMEM((tm, hp), jnp.float32)])

    return pl.pallas_call(
        functools.partial(_gcn_agg_kernel, tk=tk),
        out_shape=jax.ShapeDtypeStruct((n_pad, hp), out_dtype),
        grid_spec=grid_spec,
        compiler_params=pltpu.CompilerParams(
            # row tiles are fully independent -> "parallel" (2 TCs on v7x);
            # k is the reduction with a resident accumulator -> "arbitrary".
            dimension_semantics=("parallel", "arbitrary"),
            vmem_limit_bytes=vmem_limit),
        cost_estimate=pl.CostEstimate(flops=flops, transcendentals=0,
                                      bytes_accessed=bytes_accessed),
    )(a_hat, proj, bias)


# ---------------------------------------------------------------------------
# Full forward pass
# ---------------------------------------------------------------------------
@functools.partial(jax.jit, static_argnames=("num_graphs",))
def gnn_forward(x, edge_index, batch, params, *, num_graphs):
    n, _ = x.shape
    w1, b1, w2, b2, w3, b3 = params
    h1_dim, h2_dim = w1.shape[1], w2.shape[1]

    # Lane-dense padding: hidden -> 128; nodes -> multiple of 512 so the A_hat
    # stream can use (512, 1024) tiles.
    hp = _round_up(max(h1_dim, h2_dim), 128)
    n_pad = _round_up(max(n, 1), 512)
    tm = 512
    tk = 1024 if n_pad % 1024 == 0 else 512

    vmem_limit = _vmem_limit_bytes()
    # VMEM guard: resident projection + double-buffered A/out tiles + accumulator.
    need = (n_pad * hp * 2            # resident projection (bf16, single-buffer)
            + 2 * tm * tk * 2         # A_hat tiles (bf16, double-buffered)
            + 2 * tm * hp * 4         # output tiles (worst case f32)
            + tm * hp * 4)            # f32 accumulator
    assert need + (8 << 20) < vmem_limit, (
        f"graph too large for resident VMEM plan: need ~{need >> 20} MiB, "
        f"limit {vmem_limit >> 20} MiB")

    a_hat = _build_gcn_matrix(edge_index, n, n_pad).astype(jnp.bfloat16)

    def pad2(a, r, c):
        return jnp.pad(a, ((0, r - a.shape[0]), (0, c - a.shape[1])))

    # ---- GCN layer 0: projection X @ W1 in XLA (tiny), aggregation in Pallas.
    xw = pad2(jnp.dot(x, w1, preferred_element_type=jnp.float32), n_pad, hp)
    b1p = pad2(b1.reshape(1, -1), 1, hp).astype(jnp.float32)
    h1 = _gcn_aggregate(a_hat, xw.astype(jnp.bfloat16), b1p,
                        out_dtype=jnp.bfloat16, tm=tm, tk=tk,
                        vmem_limit=vmem_limit)

    # ---- GCN layer 1: projection h1 @ W2 in XLA (tiny), aggregation in Pallas.
    w2p = pad2(w2, hp, hp).astype(jnp.bfloat16)
    p2 = jnp.dot(h1, w2p, preferred_element_type=jnp.float32)
    b2p = pad2(b2.reshape(1, -1), 1, hp).astype(jnp.float32)
    h2 = _gcn_aggregate(a_hat, p2.astype(jnp.bfloat16), b2p,
                        out_dtype=jnp.float32, tm=tm, tk=tk,
                        vmem_limit=vmem_limit)

    # ---- global_add_pool + dropout (eval: identity) + final Linear (tiny, XLA).
    pooled = jax.ops.segment_sum(h2[:n, :h2_dim], batch.astype(jnp.int32),
                                 num_segments=num_graphs)
    return jnp.dot(pooled, w3) + b3


# ---------------------------------------------------------------------------
# Pure-JAX f32 reference (same math, unpadded) for the correctness check.
# ---------------------------------------------------------------------------
def gnn_forward_ref(x, edge_index, batch, params, *, num_graphs):
    n = x.shape[0]
    w1, b1, w2, b2, w3, b3 = params
    a_hat = _build_gcn_matrix(edge_index, n, n)
    h = jnp.maximum(a_hat @ (x @ w1) + b1, 0.0)
    h = jnp.maximum(a_hat @ (h @ w2) + b2, 0.0)
    pooled = jax.ops.segment_sum(h, batch.astype(jnp.int32),
                                 num_segments=num_graphs)
    return pooled @ w3 + b3


# ---------------------------------------------------------------------------
if __name__ == "__main__":
    # Small config: input_dim=8, hidden_dims=[32, 32], output_dim=4.
    # N=1600 pads to 2048 -> per-layer grid (4 row tiles x 2 k tiles): exercises
    # the parallel row axis, the k-reduction accumulator, and the padded lanes.
    N_NODES, IN_DIM, H1, H2, OUT_DIM = 1600, 8, 32, 32, 4
    NUM_GRAPHS, N_EDGES = 2, 6400

    key = jax.random.PRNGKey(0)
    kx, ke, kw1, kb1, kw2, kb2, kw3, kb3 = jax.random.split(key, 8)

    x = jax.random.normal(kx, (N_NODES, IN_DIM), dtype=jnp.float32)
    edge_index = jax.random.randint(ke, (2, N_EDGES), 0, N_NODES, dtype=jnp.int32)
    batch = jnp.concatenate([jnp.zeros(N_NODES // 2, jnp.int32),
                             jnp.ones(N_NODES - N_NODES // 2, jnp.int32)])

    def glorot(k, shape):
        fan_in, fan_out = shape
        lim = jnp.sqrt(6.0 / (fan_in + fan_out))
        return jax.random.uniform(k, shape, jnp.float32, -lim, lim)

    w1 = glorot(kw1, (IN_DIM, H1))
    b1 = jax.random.uniform(kb1, (1, H1), jnp.float32, -0.1, 0.1)
    w2 = glorot(kw2, (H1, H2))
    b2 = jax.random.uniform(kb2, (1, H2), jnp.float32, -0.1, 0.1)
    w3 = glorot(kw3, (H2, OUT_DIM))
    b3 = jax.random.uniform(kb3, (1, OUT_DIM), jnp.float32,
                            -1.0 / jnp.sqrt(H2), 1.0 / jnp.sqrt(H2))
    params = (w1, b1, w2, b2, w3, b3)

    out = gnn_forward(x, edge_index, batch, params, num_graphs=NUM_GRAPHS)
    out = jax.block_until_ready(out)
    assert out.shape == (NUM_GRAPHS, OUT_DIM)

    ref = gnn_forward_ref(x, edge_index, batch, params, num_graphs=NUM_GRAPHS)
    # bf16 A_hat / projections -> relaxed tolerance vs the f32 reference.
    rel_err = float(jnp.max(jnp.abs(out - ref)) / (jnp.max(jnp.abs(ref)) + 1e-6))
    assert rel_err < 3e-2, f"Pallas kernel mismatch, rel_err={rel_err}"

    print("KERNEL_OK")
</pallas_src>

<mosaic_0001>
module attributes {stable_mosaic.version = 11 : i64} {
  func.func private @main(%arg0: i32) attributes {dimension_semantics = [#tpu.dimension_semantics<core_parallel>], iteration_bounds = array<i64: 2>, tpu.core_type = #tpu.core_type<sc_scalar_subcore>, window_params = []} {
    return
  }
}

module attributes {stable_mosaic.version = 11 : i64} {
  func.func private @main(%arg0: i32) attributes {dimension_semantics = [#tpu.dimension_semantics<core_parallel>], iteration_bounds = array<i64: 2>, tpu.core_type = #tpu.core_type<sc_scalar_subcore>, window_params = []} {
    return
  }
}

module attributes {stable_mosaic.version = 11 : i64} {
  func.func @_gcn_agg_kernel(%arg0: i32, %arg1: i32, %arg2: memref<512x1024xbf16, #tpu.memory_space<vmem>>, %arg3: memref<2048x128xbf16, #tpu.memory_space<vmem>>, %arg4: memref<1x128xf32, #tpu.memory_space<vmem>>, %arg5: memref<512x128xbf16, #tpu.memory_space<vmem>>, %arg6: memref<512x128xf32, #tpu.memory_space<vmem>>) attributes {dimension_semantics = [#tpu.dimension_semantics<parallel>, #tpu.dimension_semantics<arbitrary>], iteration_bounds = array<i64: 4, 2>, scalar_prefetch = 0 : i64, scratch_operands = 1 : i64, tpu.core_type = #tpu.core_type<tc>, window_params = [{transform_indices = @transform_0, window_bounds = array<i64: 512, 1024>}, {pipeline_mode = #tpu.pipeline_mode<synchronous>, transform_indices = @transform_1, window_bounds = array<i64: 2048, 128>}, {pipeline_mode = #tpu.pipeline_mode<synchronous>, transform_indices = @transform_2, window_bounds = array<i64: 1, 128>}, {transform_indices = @transform_3, window_bounds = array<i64: 512, 128>}]} {
    %c0_i32 = arith.constant 0 : i32
    %0 = arith.cmpi eq, %arg1, %c0_i32 : i32
    %1 = arith.extui %0 : i1 to i32
    %c0_i32_0 = arith.constant 0 : i32
    %2 = arith.cmpi ne, %1, %c0_i32_0 : i32
    scf.if %2 {
      %cst_8 = arith.constant 0.000000e+00 : f32
      %15 = vector.broadcast %cst_8 : f32 to vector<512x128xf32>
      %c0_9 = arith.constant 0 : index
      %c0_10 = arith.constant 0 : index
      %16 = vector.load %arg6[%c0_9, %c0_10] : memref<512x128xf32, #tpu.memory_space<vmem>>, vector<512x128xf32>
      tpu.vector_store %arg6[%c0_9, %c0_10], %15 {strides = array<i32>} : memref<512x128xf32, #tpu.memory_space<vmem>>, vector<512x128xf32>,
    } else {
    }
    %c1024_i32 = arith.constant 1024 : i32
    %3 = arith.muli %arg1, %c1024_i32 : i32
    %4 = tpu.assume_multiple %3, 1024 : i32
    %c0 = arith.constant 0 : index
    %c0_1 = arith.constant 0 : index
    %5 = vector.load %arg6[%c0, %c0_1] : memref<512x128xf32, #tpu.memory_space<vmem>>, vector<512x128xf32>
    %c0_2 = arith.constant 0 : index
    %c0_3 = arith.constant 0 : index
    %6 = vector.load %arg2[%c0_2, %c0_3] : memref<512x1024xbf16, #tpu.memory_space<vmem>>, vector<512x1024xbf16>
    %7 = arith.index_cast %4 : i32 to index
    %c0_4 = arith.constant 0 : index
    %8 = vector.load %arg3[%7, %c0_4] : memref<2048x128xbf16, #tpu.memory_space<vmem>>, vector<1024x128xbf16>
    %cst = arith.constant dense<0.000000e+00> : vector<512x128xf32>
    %9 = tpu.matmul %6, %8, %cst {dimension_numbers = #tpu.dot_dimension_numbers<[1], [0], [0], [1], [0, 0, 1, 1], [], []>} : vector<512x1024xbf16>, vector<1024x128xbf16>, vector<512x128xf32> -> vector<512x128xf32>
    %10 = arith.addf %5, %9 : vector<512x128xf32>
    %c0_5 = arith.constant 0 : index
    %c0_6 = arith.constant 0 : index
    %11 = vector.load %arg6[%c0_5, %c0_6] : memref<512x128xf32, #tpu.memory_space<vmem>>, vector<512x128xf32>
    tpu.vector_store %arg6[%c0_5, %c0_6], %10 {strides = array<i32>} : memref<512x128xf32, #tpu.memory_space<vmem>>, vector<512x128xf32>,
    %c1_i32 = arith.constant 1 : i32
    %12 = arith.cmpi eq, %arg1, %c1_i32 : i32
    %13 = arith.extui %12 : i1 to i32
    %c0_i32_7 = arith.constant 0 : i32
    %14 = arith.cmpi ne, %13, %c0_i32_7 : i32
    scf.if %14 {
      %c0_8 = arith.constant 0 : index
      %c0_9 = arith.constant 0 : index
      %15 = vector.load %arg6[%c0_8, %c0_9] : memref<512x128xf32, #tpu.memory_space<vmem>>, vector<512x128xf32>
      %c0_10 = arith.constant 0 : index
      %c0_11 = arith.constant 0 : index
      %16 = vector.load %arg4[%c0_10, %c0_11] : memref<1x128xf32, #tpu.memory_space<vmem>>, vector<1x128xf32>
      %17 = vector.broadcast %16 : vector<1x128xf32> to vector<512x128xf32>
      %18 = arith.addf %15, %17 : vector<512x128xf32>
      %cst_12 = arith.constant 0.000000e+00 : f32
      %19 = vector.broadcast %cst_12 : f32 to vector<512x128xf32>
      %20 = arith.maximumf %18, %19 : vector<512x128xf32>
      %21 = arith.truncf %20 : vector<512x128xf32> to vector<512x128xbf16>
      %c0_13 = arith.constant 0 : index
      %c0_14 = arith.constant 0 : index
      %22 = vector.load %arg5[%c0_13, %c0_14] : memref<512x128xbf16, #tpu.memory_space<vmem>>, vector<512x128xbf16>
      tpu.vector_store %arg5[%c0_13, %c0_14], %21 {strides = array<i32>} : memref<512x128xbf16, #tpu.memory_space<vmem>>, vector<512x128xbf16>,
    } else {
    }
    return
  }
  func.func @transform_0(%arg0: i32, %arg1: i32) -> (i32, i32) {
    %c0_i32 = arith.constant 0 : i32
    return %arg0, %arg1 : i32, i32
  }
  func.func @transform_1(%arg0: i32, %arg1: i32) -> (i32, i32) {
    %c0_i32 = arith.constant 0 : i32
    %c0_i32_0 = arith.constant 0 : i32
    %c0_i32_1 = arith.constant 0 : i32
    return %c0_i32, %c0_i32_0 : i32, i32
  }
  func.func @transform_2(%arg0: i32, %arg1: i32) -> (i32, i32) {
    %c0_i32 = arith.constant 0 : i32
    %c0_i32_0 = arith.constant 0 : i32
    %c0_i32_1 = arith.constant 0 : i32
    return %c0_i32, %c0_i32_0 : i32, i32
  }
  func.func @transform_3(%arg0: i32, %arg1: i32) -> (i32, i32) {
    %c0_i32 = arith.constant 0 : i32
    %c0_i32_0 = arith.constant 0 : i32
    return %arg0, %c0_i32 : i32, i32
  }
}

module attributes {stable_mosaic.version = 11 : i64} {
  func.func @_gcn_agg_kernel(%arg0: i32, %arg1: i32, %arg2: memref<512x1024xbf16, #tpu.memory_space<vmem>>, %arg3: memref<2048x128xbf16, #tpu.memory_space<vmem>>, %arg4: memref<1x128xf32, #tpu.memory_space<vmem>>, %arg5: memref<512x128xf32, #tpu.memory_space<vmem>>, %arg6: memref<512x128xf32, #tpu.memory_space<vmem>>) attributes {dimension_semantics = [#tpu.dimension_semantics<parallel>, #tpu.dimension_semantics<arbitrary>], iteration_bounds = array<i64: 4, 2>, scalar_prefetch = 0 : i64, scratch_operands = 1 : i64, tpu.core_type = #tpu.core_type<tc>, window_params = [{transform_indices = @transform_0, window_bounds = array<i64: 512, 1024>}, {pipeline_mode = #tpu.pipeline_mode<synchronous>, transform_indices = @transform_1, window_bounds = array<i64: 2048, 128>}, {pipeline_mode = #tpu.pipeline_mode<synchronous>, transform_indices = @transform_2, window_bounds = array<i64: 1, 128>}, {transform_indices = @transform_3, window_bounds = array<i64: 512, 128>}]} {
    %c0_i32 = arith.constant 0 : i32
    %0 = arith.cmpi eq, %arg1, %c0_i32 : i32
    %1 = arith.extui %0 : i1 to i32
    %c0_i32_0 = arith.constant 0 : i32
    %2 = arith.cmpi ne, %1, %c0_i32_0 : i32
    scf.if %2 {
      %cst_8 = arith.constant 0.000000e+00 : f32
      %15 = vector.broadcast %cst_8 : f32 to vector<512x128xf32>
      %c0_9 = arith.constant 0 : index
      %c0_10 = arith.constant 0 : index
      %16 = vector.load %arg6[%c0_9, %c0_10] : memref<512x128xf32, #tpu.memory_space<vmem>>, vector<512x128xf32>
      tpu.vector_store %arg6[%c0_9, %c0_10], %15 {strides = array<i32>} : memref<512x128xf32, #tpu.memory_space<vmem>>, vector<512x128xf32>,
    } else {
    }
    %c1024_i32 = arith.constant 1024 : i32
    %3 = arith.muli %arg1, %c1024_i32 : i32
    %4 = tpu.assume_multiple %3, 1024 : i32
    %c0 = arith.constant 0 : index
    %c0_1 = arith.constant 0 : index
    %5 = vector.load %arg6[%c0, %c0_1] : memref<512x128xf32, #tpu.memory_space<vmem>>, vector<512x128xf32>
    %c0_2 = arith.constant 0 : index
    %c0_3 = arith.constant 0 : index
    %6 = vector.load %arg2[%c0_2, %c0_3] : memref<512x1024xbf16, #tpu.memory_space<vmem>>, vector<512x1024xbf16>
    %7 = arith.index_cast %4 : i32 to index
    %c0_4 = arith.constant 0 : index
    %8 = vector.load %arg3[%7, %c0_4] : memref<2048x128xbf16, #tpu.memory_space<vmem>>, vector<1024x128xbf16>
    %cst = arith.constant dense<0.000000e+00> : vector<512x128xf32>
    %9 = tpu.matmul %6, %8, %cst {dimension_numbers = #tpu.dot_dimension_numbers<[1], [0], [0], [1], [0, 0, 1, 1], [], []>} : vector<512x1024xbf16>, vector<1024x128xbf16>, vector<512x128xf32> -> vector<512x128xf32>
    %10 = arith.addf %5, %9 : vector<512x128xf32>
    %c0_5 = arith.constant 0 : index
    %c0_6 = arith.constant 0 : index
    %11 = vector.load %arg6[%c0_5, %c0_6] : memref<512x128xf32, #tpu.memory_space<vmem>>, vector<512x128xf32>
    tpu.vector_store %arg6[%c0_5, %c0_6], %10 {strides = array<i32>} : memref<512x128xf32, #tpu.memory_space<vmem>>, vector<512x128xf32>,
    %c1_i32 = arith.constant 1 : i32
    %12 = arith.cmpi eq, %arg1, %c1_i32 : i32
    %13 = arith.extui %12 : i1 to i32
    %c0_i32_7 = arith.constant 0 : i32
    %14 = arith.cmpi ne, %13, %c0_i32_7 : i32
    scf.if %14 {
      %c0_8 = arith.constant 0 : index
      %c0_9 = arith.constant 0 : index
      %15 = vector.load %arg6[%c0_8, %c0_9] : memref<512x128xf32, #tpu.memory_space<vmem>>, vector<512x128xf32>
      %c0_10 = arith.constant 0 : index
      %c0_11 = arith.constant 0 : index
      %16 = vector.load %arg4[%c0_10, %c0_11] : memref<1x128xf32, #tpu.memory_space<vmem>>, vector<1x128xf32>
      %17 = vector.broadcast %16 : vector<1x128xf32> to vector<512x128xf32>
      %18 = arith.addf %15, %17 : vector<512x128xf32>
      %cst_12 = arith.constant 0.000000e+00 : f32
      %19 = vector.broadcast %cst_12 : f32 to vector<512x128xf32>
      %20 = arith.maximumf %18, %19 : vector<512x128xf32>
      %c0_13 = arith.constant 0 : index
      %c0_14 = arith.constant 0 : index
      %21 = vector.load %arg5[%c0_13, %c0_14] : memref<512x128xf32, #tpu.memory_space<vmem>>, vector<512x128xf32>
      tpu.vector_store %arg5[%c0_13, %c0_14], %20 {strides = array<i32>} : memref<512x128xf32, #tpu.memory_space<vmem>>, vector<512x128xf32>,
    } else {
    }
    return
  }
  func.func @transform_0(%arg0: i32, %arg1: i32) -> (i32, i32) {
    %c0_i32 = arith.constant 0 : i32
    return %arg0, %arg1 : i32, i32
  }
  func.func @transform_1(%arg0: i32, %arg1: i32) -> (i32, i32) {
    %c0_i32 = arith.constant 0 : i32
    %c0_i32_0 = arith.constant 0 : i32
    %c0_i32_1 = arith.constant 0 : i32
    return %c0_i32, %c0_i32_0 : i32, i32
  }
  func.func @transform_2(%arg0: i32, %arg1: i32) -> (i32, i32) {
    %c0_i32 = arith.constant 0 : i32
    %c0_i32_0 = arith.constant 0 : i32
    %c0_i32_1 = arith.constant 0 : i32
    return %c0_i32, %c0_i32_0 : i32, i32
  }
  func.func @transform_3(%arg0: i32, %arg1: i32) -> (i32, i32) {
    %c0_i32 = arith.constant 0 : i32
    %c0_i32_0 = arith.constant 0 : i32
    return %arg0, %c0_i32 : i32, i32
  }
}

</mosaic_0001>

<bundles_post_ra>
// kernel: gnn_forward.2
= control target key start
LH: loop header
LB: loop body
LE: loop exit
PB: predicated region body
PF: predicated region fallthrough
CT: control target
= control target key end

     0   :  { %s5078_s12 = smov 0   ;;  %s5080_s13 = smov 0   ;;  %s6457_s0 = inlined_call_operand.vmem [shape: bf16[2048,2048], index: 0, kind: input, shape index: {}]   ;;  %s6458_s1 = inlined_call_operand.vmem [shape: bf16[2048,128], index: 1, kind: input, shape index: {}]   ;;  %s6459_s2 = inlined_call_operand.vmem [shape: f32[1,128], index: 2, kind: input, shape index: {}]   ;;  %s6460_s3 = inlined_call_operand.vmem [shape: bf16[2048,128], index: 3, kind: output, shape index: {}]  }
   0x1   :  { %s5082_s14 = smov 0   ;;  %s5084_s15 = smov 0  }
   0x2   :  { %s5086_s16 = smov 0   ;;  %s5088_s17 = smov 0  }
   0x3   :  { %s5090_s18 = smov 0  }
   0x4 LB: > { %s22_s19 = sadd.s32 1, %s5046_s16  ;;  %s25_s20 = sadd.s32 1, %s5050_s17  ;;  %s5054_s18 = sphi %s5090_s18, %s13_s18   ;;  %s5050_s17 = sphi %s5088_s17, %s6514_s17   ;;  %s5046_s16 = sphi %s5086_s16, %s6513_s16   ;;  %s5042_s15 = sphi %s5084_s15, %s6512_s15   ;;  %s5038_s14 = sphi %s5082_s14, %s6511_s14   ;;  %s5034_s13 = sphi %s5080_s13, %s6510_s13   ;;  %s5030_s12 = sphi %s5078_s12, %s6509_s12  }
   0x5   : > { %p23_p0 = scmp.ge.s32.totalorder %s22_s19, 2  ;;  %p41_p1 = scmp.ne.s32.totalorder %s5034_s13, %s5030_s12 }
   0x6   : > { %p42_p2 = scmp.eq.s32.totalorder %s5054_s18, 0  ;;  %s34_s24 = sadd.s32 1, %s5034_s13 }
   0x7   : > { %s6516_s19 = smov (%p23_p0, %s22_s19), 0  ;;  %s6518_s20 = smov (!%p23_p0, %s25_s20), %s5050_s17 }
   0x8   : > { %p43_p3 = por %p42_p2, %p41_p1  ;;  %p27_p4 = scmp.ge.s32.totalorder %s6518_s20, 4 }
   0x9   : > { %s30_s21 = ssub.s32 %s5046_s16, %s6516_s19  ;;  %p4540_p6 = scmp.ge.s32.totalorder %s5054_s18, 8 }
   0xa   : > { %s6520_s20 = smov (%p27_p4, %s6518_s20), 0 }
   0xb   : > { %s29_s22 = ssub.s32 %s5050_s17, %s6520_s20  ;;  %141 = sbr.rel (%p4540_p6) target bundleno = 153 (0x99), region = 24 }
   0xc   : > { %s31_s23 = sor.u32 %s30_s21, %s29_s22 }
   0xd   : > { %p32_p5 = scmp.eq.s32.totalorder %s31_s23, 0 }
   0xf   : > { %s5129_s25 = scalar_select %p32_p5, %s5034_s13, %s34_s24  }
  0x12   : > { %144 = sbr.rel (!%p43_p3) target bundleno = 153 (0x99), region = 28  ;;  %s146_s26 = sand.u32 (%p43_p3), 1, %s5034_s13  }
  0x13   : > { %s4543_s27 = sshll.u32 (%p43_p3), %s5046_s16, 3  ;;  %s4541_s28 = sshll.u32 (%p43_p3), %s146_s26, 11 }
  0x14   : > { %s4877_s29 = sshll.u32 (%p43_p3), %s5050_s17, 10  ;;  %s5143_s8 = scalar_lea.vmem (%p43_p3), [#allocation3], %s4541_s28 }
  0x15   : > { %s152_s30 = sadd.s32 (%p43_p3), %s4877_s29, %s4543_s27 }
  0x16   : > { %s4545_s4 = sshll.u32 (%p43_p3), %s152_s30, 2 }
  0x17   : > { %s5138_s7 = scalar_lea.vmem (%p43_p3), %s6457_s0, %s4545_s4 }
  0x18   : > { %v167_v0 = vld [vmem:[%s5138_s7] sm:$0xff] (%p43_p3)  ;;  %v169_v1 = vld [vmem:[%s5138_s7 + $0x8] sm:$0xff] (%p43_p3)  ;;  %v171_v2 = vld [vmem:[%s5138_s7 + $0x10] sm:$0xff] (%p43_p3) }
  0x19   : > { %168 = vst [vmem:[%s5143_s8] sm:$0xff] %v167_v0  ;;  %170 = vst [vmem:[%s5143_s8 + $0x8] sm:$0xff] %v169_v1  ;;  %v173_v3 = vld [vmem:[%s5138_s7 + $0x18] sm:$0xff]  ;;  %v175_v4 = vld [vmem:[%s5138_s7 + $0x40] sm:$0xff] }
  0x1a   : > { %172 = vst [vmem:[%s5143_s8 + $0x10] sm:$0xff] %v171_v2  ;;  %v177_v5 = vld [vmem:[%s5138_s7 + $0x48] sm:$0xff]  ;;  %174 = vst [vmem:[%s5143_s8 + $0x18] sm:$0xff] %v173_v3  ;;  %v179_v6 = vld [vmem:[%s5138_s7 + $0x50] sm:$0xff] }
  0x1b   : > { %176 = vst [vmem:[%s5143_s8 + $0x20] sm:$0xff] %v175_v4  ;;  %178 = vst [vmem:[%s5143_s8 + $0x28] sm:$0xff] %v177_v5  ;;  %v181_v7 = vld [vmem:[%s5138_s7 + $0x58] sm:$0xff]  ;;  %v183_v8 = vld [vmem:[%s5138_s7 + $0x80] sm:$0xff] }
  0x1c   : > { %180 = vst [vmem:[%s5143_s8 + $0x30] sm:$0xff] %v179_v6  ;;  %182 = vst [vmem:[%s5143_s8 + $0x38] sm:$0xff] %v181_v7  ;;  %v185_v9 = vld [vmem:[%s5138_s7 + $0x88] sm:$0xff]  ;;  %v187_v10 = vld [vmem:[%s5138_s7 + $0x90] sm:$0xff] }
  0x1d   : > { %184 = vst [vmem:[%s5143_s8 + $0x40] sm:$0xff] %v183_v8  ;;  %v189_v11 = vld [vmem:[%s5138_s7 + $0x98] sm:$0xff]  ;;  %186 = vst [vmem:[%s5143_s8 + $0x48] sm:$0xff] %v185_v9  ;;  %v191_v12 = vld [vmem:[%s5138_s7 + $0xc0] sm:$0xff] }
  0x1e   : > { %188 = vst [vmem:[%s5143_s8 + $0x50] sm:$0xff] %v187_v10  ;;  %190 = vst [vmem:[%s5143_s8 + $0x58] sm:$0xff] %v189_v11  ;;  %v193_v13 = vld [vmem:[%s5138_s7 + $0xc8] sm:$0xff]  ;;  %v195_v14 = vld [vmem:[%s5138_s7 + $0xd0] sm:$0xff] }
  0x1f   : > { %192 = vst [vmem:[%s5143_s8 + $0x60] sm:$0xff] %v191_v12  ;;  %194 = vst [vmem:[%s5143_s8 + $0x68] sm:$0xff] %v193_v13  ;;  %v197_v15 = vld [vmem:[%s5138_s7 + $0xd8] sm:$0xff]  ;;  %v199_v16 = vld [vmem:[%s5138_s7 + $0x100] sm:$0xff] }
  0x20   : > { %196 = vst [vmem:[%s5143_s8 + $0x70] sm:$0xff] %v195_v14  ;;  %v201_v17 = vld [vmem:[%s5138_s7 + $0x108] sm:$0xff]  ;;  %198 = vst [vmem:[%s5143_s8 + $0x78] sm:$0xff] %v197_v15  ;;  %v203_v18 = vld [vmem:[%s5138_s7 + $0x110] sm:$0xff] }
  0x21   : > { %200 = vst [vmem:[%s5143_s8 + $0x80] sm:$0xff] %v199_v16  ;;  %202 = vst [vmem:[%s5143_s8 + $0x88] sm:$0xff] %v201_v17  ;;  %v205_v19 = vld [vmem:[%s5138_s7 + $0x118] sm:$0xff]  ;;  %v207_v20 = vld [vmem:[%s5138_s7 + $0x140] sm:$0xff] }
  0x22   : > { %204 = vst [vmem:[%s5143_s8 + $0x90] sm:$0xff] %v203_v18  ;;  %206 = vst [vmem:[%s5143_s8 + $0x98] sm:$0xff] %v205_v19  ;;  %v209_v21 = vld [vmem:[%s5138_s7 + $0x148] sm:$0xff]  ;;  %v211_v22 = vld [vmem:[%s5138_s7 + $0x150] sm:$0xff] }
  0x23   : > { %208 = vst [vmem:[%s5143_s8 + $0xa0] sm:$0xff] %v207_v20  ;;  %v213_v23 = vld [vmem:[%s5138_s7 + $0x158] sm:$0xff]  ;;  %210 = vst [vmem:[%s5143_s8 + $0xa8] sm:$0xff] %v209_v21  ;;  %v215_v24 = vld [vmem:[%s5138_s7 + $0x180] sm:$0xff] }
  0x24   : > { %212 = vst [vmem:[%s5143_s8 + $0xb0] sm:$0xff] %v211_v22  ;;  %214 = vst [vmem:[%s5143_s8 + $0xb8] sm:$0xff] %v213_v23  ;;  %v217_v25 = vld [vmem:[%s5138_s7 + $0x188] sm:$0xff]  ;;  %v219_v26 = vld [vmem:[%s5138_s7 + $0x190] sm:$0xff] }
  0x25   : > { %216 = vst [vmem:[%s5143_s8 + $0xc0] sm:$0xff] %v215_v24  ;;  %218 = vst [vmem:[%s5143_s8 + $0xc8] sm:$0xff] %v217_v25  ;;  %v221_v27 = vld [vmem:[%s5138_s7 + $0x198] sm:$0xff]  ;;  %v223_v28 = vld [vmem:[%s5138_s7 + $0x1c0] sm:$0xff] }
  0x26   : > { %220 = vst [vmem:[%s5143_s8 + $0xd0] sm:$0xff] %v219_v26  ;;  %v225_v29 = vld [vmem:[%s5138_s7 + $0x1c8] sm:$0xff]  ;;  %222 = vst [vmem:[%s5143_s8 + $0xd8] sm:$0xff] %v221_v27  ;;  %v227_v30 = vld [vmem:[%s5138_s7 + $0x1d0] sm:$0xff] }
  0x27   : > { %224 = vst [vmem:[%s5143_s8 + $0xe0] sm:$0xff] %v223_v28  ;;  %226 = vst [vmem:[%s5143_s8 + $0xe8] sm:$0xff] %v225_v29  ;;  %v229_v31 = vld [vmem:[%s5138_s7 + $0x1d8] sm:$0xff]  ;;  %v231_v32 = vld [vmem:[%s5138_s7 + $0x200] sm:$0xff] }
  0x28   : > { %228 = vst [vmem:[%s5143_s8 + $0xf0] sm:$0xff] %v227_v30  ;;  %230 = vst [vmem:[%s5143_s8 + $0xf8] sm:$0xff] %v229_v31  ;;  %v233_v33 = vld [vmem:[%s5138_s7 + $0x208] sm:$0xff]  ;;  %v235_v34 = vld [vmem:[%s5138_s7 + $0x210] sm:$0xff] }
  0x29   : > { %232 = vst [vmem:[%s5143_s8 + $0x100] sm:$0xff] %v231_v32  ;;  %v237_v35 = vld [vmem:[%s5138_s7 + $0x218] sm:$0xff]  ;;  %234 = vst [vmem:[%s5143_s8 + $0x108] sm:$0xff] %v233_v33  ;;  %v239_v36 = vld [vmem:[%s5138_s7 + $0x240] sm:$0xff] }
  0x2a   : > { %236 = vst [vmem:[%s5143_s8 + $0x110] sm:$0xff] %v235_v34  ;;  %238 = vst [vmem:[%s5143_s8 + $0x118] sm:$0xff] %v237_v35  ;;  %v241_v37 = vld [vmem:[%s5138_s7 + $0x248] sm:$0xff]  ;;  %v243_v38 = vld [vmem:[%s5138_s7 + $0x250] sm:$0xff] }
  0x2b   : > { %240 = vst [vmem:[%s5143_s8 + $0x120] sm:$0xff] %v239_v36  ;;  %242 = vst [vmem:[%s5143_s8 + $0x128] sm:$0xff] %v241_v37  ;;  %v245_v39 = vld [vmem:[%s5138_s7 + $0x258] sm:$0xff]  ;;  %v247_v40 = vld [vmem:[%s5138_s7 + $0x280] sm:$0xff] }
  0x2c   : > { %244 = vst [vmem:[%s5143_s8 + $0x130] sm:$0xff] %v243_v38  ;;  %v249_v41 = vld [vmem:[%s5138_s7 + $0x288] sm:$0xff]  ;;  %246 = vst [vmem:[%s5143_s8 + $0x138] sm:$0xff] %v245_v39  ;;  %v251_v42 = vld [vmem:[%s5138_s7 + $0x290] sm:$0xff] }
  0x2d   : > { %248 = vst [vmem:[%s5143_s8 + $0x140] sm:$0xff] %v247_v40  ;;  %250 = vst [vmem:[%s5143_s8 + $0x148] sm:$0xff] %v249_v41  ;;  %v253_v43 = vld [vmem:[%s5138_s7 + $0x298] sm:$0xff]  ;;  %v255_v44 = vld [vmem:[%s5138_s7 + $0x2c0] sm:$0xff] }
  0x2e   : > { %252 = vst [vmem:[%s5143_s8 + $0x150] sm:$0xff] %v251_v42  ;;  %254 = vst [vmem:[%s5143_s8 + $0x158] sm:$0xff] %v253_v43  ;;  %v257_v45 = vld [vmem:[%s5138_s7 + $0x2c8] sm:$0xff]  ;;  %v259_v46 = vld [vmem:[%s5138_s7 + $0x2d0] sm:$0xff] }
  0x2f   : > { %256 = vst [vmem:[%s5143_s8 + $0x160] sm:$0xff] %v255_v44  ;;  %v261_v47 = vld [vmem:[%s5138_s7 + $0x2d8] sm:$0xff]  ;;  %258 = vst [vmem:[%s5143_s8 + $0x168] sm:$0xff] %v257_v45  ;;  %v263_v48 = vld [vmem:[%s5138_s7 + $0x300] sm:$0xff] }
  0x30   : > { %260 = vst [vmem:[%s5143_s8 + $0x170] sm:$0xff] %v259_v46  ;;  %262 = vst [vmem:[%s5143_s8 + $0x178] sm:$0xff] %v261_v47  ;;  %v265_v49 = vld [vmem:[%s5138_s7 + $0x308] sm:$0xff]  ;;  %v267_v50 = vld [vmem:[%s5138_s7 + $0x310] sm:$0xff] }
  0x31   : > { %264 = vst [vmem:[%s5143_s8 + $0x180] sm:$0xff] %v263_v48  ;;  %266 = vst [vmem:[%s5143_s8 + $0x188] sm:$0xff] %v265_v49  ;;  %v269_v51 = vld [vmem:[%s5138_s7 + $0x318] sm:$0xff]  ;;  %v271_v52 = vld [vmem:[%s5138_s7 + $0x340] sm:$0xff] }
  0x32   : > { %268 = vst [vmem:[%s5143_s8 + $0x190] sm:$0xff] %v267_v50  ;;  %v273_v53 = vld [vmem:[%s5138_s7 + $0x348] sm:$0xff]  ;;  %270 = vst [vmem:[%s5143_s8 + $0x198] sm:$0xff] %v269_v51  ;;  %v275_v54 = vld [vmem:[%s5138_s7 + $0x350] sm:$0xff] }
  0x33   : > { %272 = vst [vmem:[%s5143_s8 + $0x1a0] sm:$0xff] %v271_v52  ;;  %274 = vst [vmem:[%s5143_s8 + $0x1a8] sm:$0xff] %v273_v53  ;;  %v277_v55 = vld [vmem:[%s5138_s7 + $0x358] sm:$0xff]  ;;  %v279_v56 = vld [vmem:[%s5138_s7 + $0x380] sm:$0xff] }
  0x34   : > { %276 = vst [vmem:[%s5143_s8 + $0x1b0] sm:$0xff] %v275_v54  ;;  %278 = vst [vmem:[%s5143_s8 + $0x1b8] sm:$0xff] %v277_v55  ;;  %v281_v57 = vld [vmem:[%s5138_s7 + $0x388] sm:$0xff]  ;;  %v283_v58 = vld [vmem:[%s5138_s7 + $0x390] sm:$0xff] }
  0x35   : > { %280 = vst [vmem:[%s5143_s8 + $0x1c0] sm:$0xff] %v279_v56  ;;  %v285_v59 = vld [vmem:[%s5138_s7 + $0x398] sm:$0xff]  ;;  %282 = vst [vmem:[%s5143_s8 + $0x1c8] sm:$0xff] %v281_v57  ;;  %v287_v60 = vld [vmem:[%s5138_s7 + $0x3c0] sm:$0xff] }
  0x36   : > { %284 = vst [vmem:[%s5143_s8 + $0x1d0] sm:$0xff] %v283_v58  ;;  %286 = vst [vmem:[%s5143_s8 + $0x1d8] sm:$0xff] %v285_v59  ;;  %v289_v61 = vld [vmem:[%s5138_s7 + $0x3c8] sm:$0xff]  ;;  %v291_v62 = vld [vmem:[%s5138_s7 + $0x3d0] sm:$0xff] }
  0x37   : > { %288 = vst [vmem:[%s5143_s8 + $0x1e0] sm:$0xff] %v287_v60  ;;  %290 = vst [vmem:[%s5143_s8 + $0x1e8] sm:$0xff] %v289_v61  ;;  %v293_v63 = vld [vmem:[%s5138_s7 + $0x3d8] sm:$0xff]  ;;  %v295_v0 = vld [vmem:[%s5138_s7 + $0x400] sm:$0xff] }
  0x38   : > { %292 = vst [vmem:[%s5143_s8 + $0x1f0] sm:$0xff] %v291_v62  ;;  %v297_v1 = vld [vmem:[%s5138_s7 + $0x408] sm:$0xff]  ;;  %294 = vst [vmem:[%s5143_s8 + $0x1f8] sm:$0xff] %v293_v63  ;;  %v299_v2 = vld [vmem:[%s5138_s7 + $0x410] sm:$0xff] }
  0x39   : > { %296 = vst [vmem:[%s5143_s8 + $0x200] sm:$0xff] %v295_v0  ;;  %298 = vst [vmem:[%s5143_s8 + $0x208] sm:$0xff] %v297_v1  ;;  %v301_v3 = vld [vmem:[%s5138_s7 + $0x418] sm:$0xff]  ;;  %v303_v4 = vld [vmem:[%s5138_s7 + $0x440] sm:$0xff] }
  0x3a   : > { %300 = vst [vmem:[%s5143_s8 + $0x210] sm:$0xff] %v299_v2  ;;  %302 = vst [vmem:[%s5143_s8 + $0x218] sm:$0xff] %v301_v3  ;;  %v305_v5 = vld [vmem:[%s5138_s7 + $0x448] sm:$0xff]  ;;  %v307_v6 = vld [vmem:[%s5138_s7 + $0x450] sm:$0xff] }
  0x3b   : > { %304 = vst [vmem:[%s5143_s8 + $0x220] sm:$0xff] %v303_v4  ;;  %v309_v7 = vld [vmem:[%s5138_s7 + $0x458] sm:$0xff]  ;;  %306 = vst [vmem:[%s5143_s8 + $0x228] sm:$0xff] %v305_v5  ;;  %v311_v8 = vld [vmem:[%s5138_s7 + $0x480] sm:$0xff] }
  0x3c   : > { %308 = vst [vmem:[%s5143_s8 + $0x230] sm:$0xff] %v307_v6  ;;  %310 = vst [vmem:[%s5143_s8 + $0x238] sm:$0xff] %v309_v7  ;;  %v313_v9 = vld [vmem:[%s5138_s7 + $0x488] sm:$0xff]  ;;  %v315_v10 = vld [vmem:[%s5138_s7 + $0x490] sm:$0xff] }
  0x3d   : > { %312 = vst [vmem:[%s5143_s8 + $0x240] sm:$0xff] %v311_v8  ;;  %314 = vst [vmem:[%s5143_s8 + $0x248] sm:$0xff] %v313_v9  ;;  %v317_v11 = vld [vmem:[%s5138_s7 + $0x498] sm:$0xff]  ;;  %v319_v12 = vld [vmem:[%s5138_s7 + $0x4c0] sm:$0xff] }
  0x3e   : > { %316 = vst [vmem:[%s5143_s8 + $0x250] sm:$0xff] %v315_v10  ;;  %v321_v13 = vld [vmem:[%s5138_s7 + $0x4c8] sm:$0xff]  ;;  %318 = vst [vmem:[%s5143_s8 + $0x258] sm:$0xff] %v317_v11  ;;  %v323_v14 = vld [vmem:[%s5138_s7 + $0x4d0] sm:$0xff] }
  0x3f   : > { %320 = vst [vmem:[%s5143_s8 + $0x260] sm:$0xff] %v319_v12  ;;  %322 = vst [vmem:[%s5143_s8 + $0x268] sm:$0xff] %v321_v13  ;;  %v325_v15 = vld [vmem:[%s5138_s7 + $0x4d8] sm:$0xff]  ;;  %v327_v16 = vld [vmem:[%s5138_s7 + $0x500] sm:$0xff] }
  0x40   : > { %324 = vst [vmem:[%s5143_s8 + $0x270] sm:$0xff] %v323_v14  ;;  %326 = vst [vmem:[%s5143_s8 + $0x278] sm:$0xff] %v325_v15  ;;  %v329_v17 = vld [vmem:[%s5138_s7 + $0x508] sm:$0xff]  ;;  %v331_v18 = vld [vmem:[%s5138_s7 + $0x510] sm:$0xff] }
  0x41   : > { %328 = vst [vmem:[%s5143_s8 + $0x280] sm:$0xff] %v327_v16  ;;  %v333_v19 = vld [vmem:[%s5138_s7 + $0x518] sm:$0xff]  ;;  %330 = vst [vmem:[%s5143_s8 + $0x288] sm:$0xff] %v329_v17  ;;  %v335_v20 = vld [vmem:[%s5138_s7 + $0x540] sm:$0xff] }
  0x42   : > { %332 = vst [vmem:[%s5143_s8 + $0x290] sm:$0xff] %v331_v18  ;;  %334 = vst [vmem:[%s5143_s8 + $0x298] sm:$0xff] %v333_v19  ;;  %v337_v21 = vld [vmem:[%s5138_s7 + $0x548] sm:$0xff]  ;;  %v339_v22 = vld [vmem:[%s5138_s7 + $0x550] sm:$0xff] }
  0x43   : > { %336 = vst [vmem:[%s5143_s8 + $0x2a0] sm:$0xff] %v335_v20  ;;  %338 = vst [vmem:[%s5143_s8 + $0x2a8] sm:$0xff] %v337_v21  ;;  %v341_v23 = vld [vmem:[%s5138_s7 + $0x558] sm:$0xff]  ;;  %v343_v24 = vld [vmem:[%s5138_s7 + $0x580] sm:$0xff] }
  0x44   : > { %340 = vst [vmem:[%s5143_s8 + $0x2b0] sm:$0xff] %v339_v22  ;;  %v345_v25 = vld [vmem:[%s5138_s7 + $0x588] sm:$0xff]  ;;  %342 = vst [vmem:[%s5143_s8 + $0x2b8] sm:$0xff] %v341_v23  ;;  %v347_v26 = vld [vmem:[%s5138_s7 + $0x590] sm:$0xff] }
  0x45   : > { %344 = vst [vmem:[%s5143_s8 + $0x2c0] sm:$0xff] %v343_v24  ;;  %346 = vst [vmem:[%s5143_s8 + $0x2c8] sm:$0xff] %v345_v25  ;;  %v349_v27 = vld [vmem:[%s5138_s7 + $0x598] sm:$0xff]  ;;  %v351_v28 = vld [vmem:[%s5138_s7 + $0x5c0] sm:$0xff] }
  0x46   : > { %348 = vst [vmem:[%s5143_s8 + $0x2d0] sm:$0xff] %v347_v26  ;;  %350 = vst [vmem:[%s5143_s8 + $0x2d8] sm:$0xff] %v349_v27  ;;  %v353_v29 = vld [vmem:[%s5138_s7 + $0x5c8] sm:$0xff]  ;;  %v355_v30 = vld [vmem:[%s5138_s7 + $0x5d0] sm:$0xff] }
  0x47   : > { %352 = vst [vmem:[%s5143_s8 + $0x2e0] sm:$0xff] %v351_v28  ;;  %v357_v31 = vld [vmem:[%s5138_s7 + $0x5d8] sm:$0xff]  ;;  %354 = vst [vmem:[%s5143_s8 + $0x2e8] sm:$0xff] %v353_v29  ;;  %v359_v32 = vld [vmem:[%s5138_s7 + $0x600] sm:$0xff] }
  0x48   : > { %356 = vst [vmem:[%s5143_s8 + $0x2f0] sm:$0xff] %v355_v30  ;;  %358 = vst [vmem:[%s5143_s8 + $0x2f8] sm:$0xff] %v357_v31  ;;  %v361_v33 = vld [vmem:[%s5138_s7 + $0x608] sm:$0xff]  ;;  %v363_v34 = vld [vmem:[%s5138_s7 + $0x610] sm:$0xff] }
  0x49   : > { %360 = vst [vmem:[%s5143_s8 + $0x300] sm:$0xff] %v359_v32  ;;  %362 = vst [vmem:[%s5143_s8 + $0x308] sm:$0xff] %v361_v33  ;;  %v365_v35 = vld [vmem:[%s5138_s7 + $0x618] sm:$0xff]  ;;  %v367_v36 = vld [vmem:[%s5138_s7 + $0x640] sm:$0xff] }
  0x4a   : > { %364 = vst [vmem:[%s5143_s8 + $0x310] sm:$0xff] %v363_v34  ;;  %v369_v37 = vld [vmem:[%s5138_s7 + $0x648] sm:$0xff]  ;;  %366 = vst [vmem:[%s5143_s8 + $0x318] sm:$0xff] %v365_v35  ;;  %v371_v38 = vld [vmem:[%s5138_s7 + $0x650] sm:$0xff] }
  0x4b   : > { %368 = vst [vmem:[%s5143_s8 + $0x320] sm:$0xff] %v367_v36  ;;  %370 = vst [vmem:[%s5143_s8 + $0x328] sm:$0xff] %v369_v37  ;;  %v373_v39 = vld [vmem:[%s5138_s7 + $0x658] sm:$0xff]  ;;  %v375_v40 = vld [vmem:[%s5138_s7 + $0x680] sm:$0xff] }
  0x4c   : > { %372 = vst [vmem:[%s5143_s8 + $0x330] sm:$0xff] %v371_v38  ;;  %374 = vst [vmem:[%s5143_s8 + $0x338] sm:$0xff] %v373_v39  ;;  %v377_v41 = vld [vmem:[%s5138_s7 + $0x688] sm:$0xff]  ;;  %v379_v42 = vld [vmem:[%s5138_s7 + $0x690] sm:$0xff] }
  0x4d   : > { %376 = vst [vmem:[%s5143_s8 + $0x340] sm:$0xff] %v375_v40  ;;  %v381_v43 = vld [vmem:[%s5138_s7 + $0x698] sm:$0xff]  ;;  %378 = vst [vmem:[%s5143_s8 + $0x348] sm:$0xff] %v377_v41  ;;  %v383_v44 = vld [vmem:[%s5138_s7 + $0x6c0] sm:$0xff] }
  0x4e   : > { %380 = vst [vmem:[%s5143_s8 + $0x350] sm:$0xff] %v379_v42  ;;  %382 = vst [vmem:[%s5143_s8 + $0x358] sm:$0xff] %v381_v43  ;;  %v385_v45 = vld [vmem:[%s5138_s7 + $0x6c8] sm:$0xff]  ;;  %v387_v46 = vld [vmem:[%s5138_s7 + $0x6d0] sm:$0xff] }
  0x4f   : > { %384 = vst [vmem:[%s5143_s8 + $0x360] sm:$0xff] %v383_v44  ;;  %386 = vst [vmem:[%s5143_s8 + $0x368] sm:$0xff] %v385_v45  ;;  %v389_v47 = vld [vmem:[%s5138_s7 + $0x6d8] sm:$0xff]  ;;  %v391_v48 = vld [vmem:[%s5138_s7 + $0x700] sm:$0xff] }
  0x50   : > { %388 = vst [vmem:[%s5143_s8 + $0x370] sm:$0xff] %v387_v46  ;;  %v393_v49 = vld [vmem:[%s5138_s7 + $0x708] sm:$0xff]  ;;  %390 = vst [vmem:[%s5143_s8 + $0x378] sm:$0xff] %v389_v47  ;;  %v395_v50 = vld [vmem:[%s5138_s7 + $0x710] sm:$0xff] }
  0x51   : > { %392 = vst [vmem:[%s5143_s8 + $0x380] sm:$0xff] %v391_v48  ;;  %394 = vst [vmem:[%s5143_s8 + $0x388] sm:$0xff] %v393_v49  ;;  %v397_v51 = vld [vmem:[%s5138_s7 + $0x718] sm:$0xff]  ;;  %v399_v52 = vld [vmem:[%s5138_s7 + $0x740] sm:$0xff] }
  0x52   : > { %396 = vst [vmem:[%s5143_s8 + $0x390] sm:$0xff] %v395_v50  ;;  %398 = vst [vmem:[%s5143_s8 + $0x398] sm:$0xff] %v397_v51  ;;  %v401_v53 = vld [vmem:[%s5138_s7 + $0x748] sm:$0xff]  ;;  %v403_v54 = vld [vmem:[%s5138_s7 + $0x750] sm:$0xff] }
  0x53   : > { %400 = vst [vmem:[%s5143_s8 + $0x3a0] sm:$0xff] %v399_v52  ;;  %v405_v55 = vld [vmem:[%s5138_s7 + $0x758] sm:$0xff]  ;;  %402 = vst [vmem:[%s5143_s8 + $0x3a8] sm:$0xff] %v401_v53  ;;  %v407_v56 = vld [vmem:[%s5138_s7 + $0x780] sm:$0xff] }
  0x54   : > { %404 = vst [vmem:[%s5143_s8 + $0x3b0] sm:$0xff] %v403_v54  ;;  %406 = vst [vmem:[%s5143_s8 + $0x3b8] sm:$0xff] %v405_v55  ;;  %v409_v57 = vld [vmem:[%s5138_s7 + $0x788] sm:$0xff]  ;;  %v411_v58 = vld [vmem:[%s5138_s7 + $0x790] sm:$0xff] }
  0x55   : > { %408 = vst [vmem:[%s5143_s8 + $0x3c0] sm:$0xff] %v407_v56  ;;  %410 = vst [vmem:[%s5143_s8 + $0x3c8] sm:$0xff] %v409_v57  ;;  %v413_v59 = vld [vmem:[%s5138_s7 + $0x798] sm:$0xff]  ;;  %v415_v60 = vld [vmem:[%s5138_s7 + $0x7c0] sm:$0xff] }
  0x56   : > { %412 = vst [vmem:[%s5143_s8 + $0x3d0] sm:$0xff] %v411_v58  ;;  %v417_v61 = vld [vmem:[%s5138_s7 + $0x7c8] sm:$0xff]  ;;  %414 = vst [vmem:[%s5143_s8 + $0x3d8] sm:$0xff] %v413_v59  ;;  %v419_v62 = vld [vmem:[%s5138_s7 + $0x7d0] sm:$0xff] }
  0x57   : > { %416 = vst [vmem:[%s5143_s8 + $0x3e0] sm:$0xff] %v415_v60  ;;  %418 = vst [vmem:[%s5143_s8 + $0x3e8] sm:$0xff] %v417_v61  ;;  %v421_v63 = vld [vmem:[%s5138_s7 + $0x7d8] sm:$0xff]  ;;  %v423_v0 = vld [vmem:[%s5138_s7 + $0x800] sm:$0xff] }
  0x58   : > { %420 = vst [vmem:[%s5143_s8 + $0x3f0] sm:$0xff] %v419_v62  ;;  %422 = vst [vmem:[%s5143_s8 + $0x3f8] sm:$0xff] %v421_v63  ;;  %v425_v1 = vld [vmem:[%s5138_s7 + $0x808] sm:$0xff]  ;;  %v427_v2 = vld [vmem:[%s5138_s7 + $0x810] sm:$0xff] }
  0x59   : > { %424 = vst [vmem:[%s5143_s8 + $0x400] sm:$0xff] %v423_v0  ;;  %v429_v3 = vld [vmem:[%s5138_s7 + $0x818] sm:$0xff]  ;;  %426 = vst [vmem:[%s5143_s8 + $0x408] sm:$0xff] %v425_v1  ;;  %v431_v4 = vld [vmem:[%s5138_s7 + $0x840] sm:$0xff] }
  0x5a   : > { %428 = vst [vmem:[%s5143_s8 + $0x410] sm:$0xff] %v427_v2  ;;  %430 = vst [vmem:[%s5143_s8 + $0x418] sm:$0xff] %v429_v3  ;;  %v433_v5 = vld [vmem:[%s5138_s7 + $0x848] sm:$0xff]  ;;  %v435_v6 = vld [vmem:[%s5138_s7 + $0x850] sm:$0xff] }
  0x5b   : > { %432 = vst [vmem:[%s5143_s8 + $0x420] sm:$0xff] %v431_v4  ;;  %434 = vst [vmem:[%s5143_s8 + $0x428] sm:$0xff] %v433_v5  ;;  %v437_v7 = vld [vmem:[%s5138_s7 + $0x858] sm:$0xff]  ;;  %v439_v8 = vld [vmem:[%s5138_s7 + $0x880] sm:$0xff] }
  0x5c   : > { %436 = vst [vmem:[%s5143_s8 + $0x430] sm:$0xff] %v435_v6  ;;  %v441_v9 = vld [vmem:[%s5138_s7 + $0x888] sm:$0xff]  ;;  %438 = vst [vmem:[%s5143_s8 + $0x438] sm:$0xff] %v437_v7  ;;  %v443_v10 = vld [vmem:[%s5138_s7 + $0x890] sm:$0xff] }
  0x5d   : > { %440 = vst [vmem:[%s5143_s8 + $0x440] sm:$0xff] %v439_v8  ;;  %442 = vst [vmem:[%s5143_s8 + $0x448] sm:$0xff] %v441_v9  ;;  %v445_v11 = vld [vmem:[%s5138_s7 + $0x898] sm:$0xff]  ;;  %v447_v12 = vld [vmem:[%s5138_s7 + $0x8c0] sm:$0xff] }
  0x5e   : > { %444 = vst [vmem:[%s5143_s8 + $0x450] sm:$0xff] %v443_v10  ;;  %446 = vst [vmem:[%s5143_s8 + $0x458] sm:$0xff] %v445_v11  ;;  %v449_v13 = vld [vmem:[%s5138_s7 + $0x8c8] sm:$0xff]  ;;  %v451_v14 = vld [vmem:[%s5138_s7 + $0x8d0] sm:$0xff] }
  0x5f   : > { %448 = vst [vmem:[%s5143_s8 + $0x460] sm:$0xff] %v447_v12  ;;  %v453_v15 = vld [vmem:[%s5138_s7 + $0x8d8] sm:$0xff]  ;;  %450 = vst [vmem:[%s5143_s8 + $0x468] sm:$0xff] %v449_v13  ;;  %v455_v16 = vld [vmem:[%s5138_s7 + $0x900] sm:$0xff] }
  0x60   : > { %452 = vst [vmem:[%s5143_s8 + $0x470] sm:$0xff] %v451_v14  ;;  %454 = vst [vmem:[%s5143_s8 + $0x478] sm:$0xff] %v453_v15  ;;  %v457_v17 = vld [vmem:[%s5138_s7 + $0x908] sm:$0xff]  ;;  %v459_v18 = vld [vmem:[%s5138_s7 + $0x910] sm:$0xff] }
  0x61   : > { %456 = vst [vmem:[%s5143_s8 + $0x480] sm:$0xff] %v455_v16  ;;  %458 = vst [vmem:[%s5143_s8 + $0x488] sm:$0xff] %v457_v17  ;;  %v461_v19 = vld [vmem:[%s5138_s7 + $0x918] sm:$0xff]  ;;  %v463_v20 = vld [vmem:[%s5138_s7 + $0x940] sm:$0xff] }
  0x62   : > { %460 = vst [vmem:[%s5143_s8 + $0x490] sm:$0xff] %v459_v18  ;;  %v465_v21 = vld [vmem:[%s5138_s7 + $0x948] sm:$0xff]  ;;  %462 = vst [vmem:[%s5143_s8 + $0x498] sm:$0xff] %v461_v19  ;;  %v467_v22 = vld [vmem:[%s5138_s7 + $0x950] sm:$0xff] }
  0x63   : > { %464 = vst [vmem:[%s5143_s8 + $0x4a0] sm:$0xff] %v463_v20  ;;  %466 = vst [vmem:[%s5143_s8 + $0x4a8] sm:$0xff] %v465_v21  ;;  %v469_v23 = vld [vmem:[%s5138_s7 + $0x958] sm:$0xff]  ;;  %v471_v24 = vld [vmem:[%s5138_s7 + $0x980] sm:$0xff] }
  0x64   : > { %468 = vst [vmem:[%s5143_s8 + $0x4b0] sm:$0xff] %v467_v22  ;;  %470 = vst [vmem:[%s5143_s8 + $0x4b8] sm:$0xff] %v469_v23  ;;  %v473_v25 = vld [vmem:[%s5138_s7 + $0x988] sm:$0xff]  ;;  %v475_v26 = vld [vmem:[%s5138_s7 + $0x990] sm:$0xff] }
  0x65   : > { %472 = vst [vmem:[%s5143_s8 + $0x4c0] sm:$0xff] %v471_v24  ;;  %v477_v27 = vld [vmem:[%s5138_s7 + $0x998] sm:$0xff]  ;;  %474 = vst [vmem:[%s5143_s8 + $0x4c8] sm:$0xff] %v473_v25  ;;  %v479_v28 = vld [vmem:[%s5138_s7 + $0x9c0] sm:$0xff] }
  0x66   : > { %476 = vst [vmem:[%s5143_s8 + $0x4d0] sm:$0xff] %v475_v26  ;;  %478 = vst [vmem:[%s5143_s8 + $0x4d8] sm:$0xff] %v477_v27  ;;  %v481_v29 = vld [vmem:[%s5138_s7 + $0x9c8] sm:$0xff]  ;;  %v483_v30 = vld [vmem:[%s5138_s7 + $0x9d0] sm:$0xff] }
  0x67   : > { %480 = vst [vmem:[%s5143_s8 + $0x4e0] sm:$0xff] %v479_v28  ;;  %482 = vst [vmem:[%s5143_s8 + $0x4e8] sm:$0xff] %v481_v29  ;;  %v485_v31 = vld [vmem:[%s5138_s7 + $0x9d8] sm:$0xff]  ;;  %v487_v32 = vld [vmem:[%s5138_s7 + $0xa00] sm:$0xff] }
  0x68   : > { %484 = vst [vmem:[%s5143_s8 + $0x4f0] sm:$0xff] %v483_v30  ;;  %v489_v33 = vld [vmem:[%s5138_s7 + $0xa08] sm:$0xff]  ;;  %486 = vst [vmem:[%s5143_s8 + $0x4f8] sm:$0xff] %v485_v31  ;;  %v491_v34 = vld [vmem:[%s5138_s7 + $0xa10] sm:$0xff] }
  0x69   : > { %488 = vst [vmem:[%s5143_s8 + $0x500] sm:$0xff] %v487_v32  ;;  %490 = vst [vmem:[%s5143_s8 + $0x508] sm:$0xff] %v489_v33  ;;  %v493_v35 = vld [vmem:[%s5138_s7 + $0xa18] sm:$0xff]  ;;  %v495_v36 = vld [vmem:[%s5138_s7 + $0xa40] sm:$0xff] }
  0x6a   : > { %492 = vst [vmem:[%s5143_s8 + $0x510] sm:$0xff] %v491_v34  ;;  %494 = vst [vmem:[%s5143_s8 + $0x518] sm:$0xff] %v493_v35  ;;  %v497_v37 = vld [vmem:[%s5138_s7 + $0xa48] sm:$0xff]  ;;  %v499_v38 = vld [vmem:[%s5138_s7 + $0xa50] sm:$0xff] }
  0x6b   : > { %496 = vst [vmem:[%s5143_s8 + $0x520] sm:$0xff] %v495_v36  ;;  %v501_v39 = vld [vmem:[%s5138_s7 + $0xa58] sm:$0xff]  ;;  %498 = vst [vmem:[%s5143_s8 + $0x528] sm:$0xff] %v497_v37  ;;  %v503_v40 = vld [vmem:[%s5138_s7 + $0xa80] sm:$0xff] }
  0x6c   : > { %500 = vst [vmem:[%s5143_s8 + $0x530] sm:$0xff] %v499_v38  ;;  %502 = vst [vmem:[%s5143_s8 + $0x538] sm:$0xff] %v501_v39  ;;  %v505_v41 = vld [vmem:[%s5138_s7 + $0xa88] sm:$0xff]  ;;  %v507_v42 = vld [vmem:[%s5138_s7 + $0xa90] sm:$0xff] }
  0x6d   : > { %504 = vst [vmem:[%s5143_s8 + $0x540] sm:$0xff] %v503_v40  ;;  %506 = vst [vmem:[%s5143_s8 + $0x548] sm:$0xff] %v505_v41  ;;  %v509_v43 = vld [vmem:[%s5138_s7 + $0xa98] sm:$0xff]  ;;  %v511_v44 = vld [vmem:[%s5138_s7 + $0xac0] sm:$0xff] }
  0x6e   : > { %508 = vst [vmem:[%s5143_s8 + $0x550] sm:$0xff] %v507_v42  ;;  %v513_v45 = vld [vmem:[%s5138_s7 + $0xac8] sm:$0xff]  ;;  %510 = vst [vmem:[%s5143_s8 + $0x558] sm:$0xff] %v509_v43  ;;  %v515_v46 = vld [vmem:[%s5138_s7 + $0xad0] sm:$0xff] }
  0x6f   : > { %512 = vst [vmem:[%s5143_s8 + $0x560] sm:$0xff] %v511_v44  ;;  %514 = vst [vmem:[%s5143_s8 + $0x568] sm:$0xff] %v513_v45  ;;  %v517_v47 = vld [vmem:[%s5138_s7 + $0xad8] sm:$0xff]  ;;  %v519_v48 = vld [vmem:[%s5138_s7 + $0xb00] sm:$0xff] }
  0x70   : > { %516 = vst [vmem:[%s5143_s8 + $0x570] sm:$0xff] %v515_v46  ;;  %518 = vst [vmem:[%s5143_s8 + $0x578] sm:$0xff] %v517_v47  ;;  %v521_v49 = vld [vmem:[%s5138_s7 + $0xb08] sm:$0xff]  ;;  %v523_v50 = vld [vmem:[%s5138_s7 + $0xb10] sm:$0xff] }
  0x71   : > { %520 = vst [vmem:[%s5143_s8 + $0x580] sm:$0xff] %v519_v48  ;;  %v525_v51 = vld [vmem:[%s5138_s7 + $0xb18] sm:$0xff]  ;;  %522 = vst [vmem:[%s5143_s8 + $0x588] sm:$0xff] %v521_v49  ;;  %v527_v52 = vld [vmem:[%s5138_s7 + $0xb40] sm:$0xff] }
  0x72   : > { %524 = vst [vmem:[%s5143_s8 + $0x590] sm:$0xff] %v523_v50  ;;  %526 = vst [vmem:[%s5143_s8 + $0x598] sm:$0xff] %v525_v51  ;;  %v529_v53 = vld [vmem:[%s5138_s7 + $0xb48] sm:$0xff]  ;;  %v531_v54 = vld [vmem:[%s5138_s7 + $0xb50] sm:$0xff] }
  0x73   : > { %528 = vst [vmem:[%s5143_s8 + $0x5a0] sm:$0xff] %v527_v52  ;;  %530 = vst [vmem:[%s5143_s8 + $0x5a8] sm:$0xff] %v529_v53  ;;  %v533_v55 = vld [vmem:[%s5138_s7 + $0xb58] sm:$0xff]  ;;  %v535_v56 = vld [vmem:[%s5138_s7 + $0xb80] sm:$0xff] }
  0x74   : > { %532 = vst [vmem:[%s5143_s8 + $0x5b0] sm:$0xff] %v531_v54  ;;  %v537_v57 = vld [vmem:[%s5138_s7 + $0xb88] sm:$0xff]  ;;  %534 = vst [vmem:[%s5143_s8 + $0x5b8] sm:$0xff] %v533_v55  ;;  %v539_v58 = vld [vmem:[%s5138_s7 + $0xb90] sm:$0xff] }
  0x75   : > { %536 = vst [vmem:[%s5143_s8 + $0x5c0] sm:$0xff] %v535_v56  ;;  %538 = vst [vmem:[%s5143_s8 + $0x5c8] sm:$0xff] %v537_v57  ;;  %v541_v59 = vld [vmem:[%s5138_s7 + $0xb98] sm:$0xff]  ;;  %v543_v60 = vld [vmem:[%s5138_s7 + $0xbc0] sm:$0xff] }
  0x76   : > { %540 = vst [vmem:[%s5143_s8 + $0x5d0] sm:$0xff] %v539_v58  ;;  %542 = vst [vmem:[%s5143_s8 + $0x5d8] sm:$0xff] %v541_v59  ;;  %v545_v61 = vld [vmem:[%s5138_s7 + $0xbc8] sm:$0xff]  ;;  %v547_v62 = vld [vmem:[%s5138_s7 + $0xbd0] sm:$0xff] }
  0x77   : > { %544 = vst [vmem:[%s5143_s8 + $0x5e0] sm:$0xff] %v543_v60  ;;  %v549_v63 = vld [vmem:[%s5138_s7 + $0xbd8] sm:$0xff]  ;;  %546 = vst [vmem:[%s5143_s8 + $0x5e8] sm:$0xff] %v545_v61  ;;  %v551_v0 = vld [vmem:[%s5138_s7 + $0xc00] sm:$0xff] }
  0x78   : > { %548 = vst [vmem:[%s5143_s8 + $0x5f0] sm:$0xff] %v547_v62  ;;  %550 = vst [vmem:[%s5143_s8 + $0x5f8] sm:$0xff] %v549_v63  ;;  %v553_v1 = vld [vmem:[%s5138_s7 + $0xc08] sm:$0xff]  ;;  %v555_v2 = vld [vmem:[%s5138_s7 + $0xc10] sm:$0xff] }
  0x79   : > { %552 = vst [vmem:[%s5143_s8 + $0x600] sm:$0xff] %v551_v0  ;;  %554 = vst [vmem:[%s5143_s8 + $0x608] sm:$0xff] %v553_v1  ;;  %v557_v3 = vld [vmem:[%s5138_s7 + $0xc18] sm:$0xff]  ;;  %v559_v4 = vld [vmem:[%s5138_s7 + $0xc40] sm:$0xff] }
  0x7a   : > { %556 = vst [vmem:[%s5143_s8 + $0x610] sm:$0xff] %v555_v2  ;;  %v561_v5 = vld [vmem:[%s5138_s7 + $0xc48] sm:$0xff]  ;;  %558 = vst [vmem:[%s5143_s8 + $0x618] sm:$0xff] %v557_v3  ;;  %v563_v6 = vld [vmem:[%s5138_s7 + $0xc50] sm:$0xff] }
  0x7b   : > { %560 = vst [vmem:[%s5143_s8 + $0x620] sm:$0xff] %v559_v4  ;;  %562 = vst [vmem:[%s5143_s8 + $0x628] sm:$0xff] %v561_v5  ;;  %v565_v7 = vld [vmem:[%s5138_s7 + $0xc58] sm:$0xff]  ;;  %v567_v8 = vld [vmem:[%s5138_s7 + $0xc80] sm:$0xff] }
  0x7c   : > { %564 = vst [vmem:[%s5143_s8 + $0x630] sm:$0xff] %v563_v6  ;;  %566 = vst [vmem:[%s5143_s8 + $0x638] sm:$0xff] %v565_v7  ;;  %v569_v9 = vld [vmem:[%s5138_s7 + $0xc88] sm:$0xff]  ;;  %v571_v10 = vld [vmem:[%s5138_s7 + $0xc90] sm:$0xff] }
  0x7d   : > { %568 = vst [vmem:[%s5143_s8 + $0x640] sm:$0xff] %v567_v8  ;;  %v573_v11 = vld [vmem:[%s5138_s7 + $0xc98] sm:$0xff]  ;;  %570 = vst [vmem:[%s5143_s8 + $0x648] sm:$0xff] %v569_v9  ;;  %v575_v12 = vld [vmem:[%s5138_s7 + $0xcc0] sm:$0xff] }
  0x7e   : > { %572 = vst [vmem:[%s5143_s8 + $0x650] sm:$0xff] %v571_v10  ;;  %574 = vst [vmem:[%s5143_s8 + $0x658] sm:$0xff] %v573_v11  ;;  %v577_v13 = vld [vmem:[%s5138_s7 + $0xcc8] sm:$0xff]  ;;  %v579_v14 = vld [vmem:[%s5138_s7 + $0xcd0] sm:$0xff] }
  0x7f   : > { %576 = vst [vmem:[%s5143_s8 + $0x660] sm:$0xff] %v575_v12  ;;  %578 = vst [vmem:[%s5143_s8 + $0x668] sm:$0xff] %v577_v13  ;;  %v581_v15 = vld [vmem:[%s5138_s7 + $0xcd8] sm:$0xff]  ;;  %v583_v16 = vld [vmem:[%s5138_s7 + $0xd00] sm:$0xff] }
  0x80   : > { %580 = vst [vmem:[%s5143_s8 + $0x670] sm:$0xff] %v579_v14  ;;  %v585_v17 = vld [vmem:[%s5138_s7 + $0xd08] sm:$0xff]  ;;  %582 = vst [vmem:[%s5143_s8 + $0x678] sm:$0xff] %v581_v15  ;;  %v587_v18 = vld [vmem:[%s5138_s7 + $0xd10] sm:$0xff] }
  0x81   : > { %584 = vst [vmem:[%s5143_s8 + $0x680] sm:$0xff] %v583_v16  ;;  %586 = vst [vmem:[%s5143_s8 + $0x688] sm:$0xff] %v585_v17  ;;  %v589_v19 = vld [vmem:[%s5138_s7 + $0xd18] sm:$0xff]  ;;  %v591_v20 = vld [vmem:[%s5138_s7 + $0xd40] sm:$0xff] }
  0x82   : > { %588 = vst [vmem:[%s5143_s8 + $0x690] sm:$0xff] %v587_v18  ;;  %590 = vst [vmem:[%s5143_s8 + $0x698] sm:$0xff] %v589_v19  ;;  %v593_v21 = vld [vmem:[%s5138_s7 + $0xd48] sm:$0xff]  ;;  %v595_v22 = vld [vmem:[%s5138_s7 + $0xd50] sm:$0xff] }
  0x83   : > { %592 = vst [vmem:[%s5143_s8 + $0x6a0] sm:$0xff] %v591_v20  ;;  %v597_v23 = vld [vmem:[%s5138_s7 + $0xd58] sm:$0xff]  ;;  %594 = vst [vmem:[%s5143_s8 + $0x6a8] sm:$0xff] %v593_v21  ;;  %v599_v24 = vld [vmem:[%s5138_s7 + $0xd80] sm:$0xff] }
  0x84   : > { %596 = vst [vmem:[%s5143_s8 + $0x6b0] sm:$0xff] %v595_v22  ;;  %598 = vst [vmem:[%s5143_s8 + $0x6b8] sm:$0xff] %v597_v23  ;;  %v601_v25 = vld [vmem:[%s5138_s7 + $0xd88] sm:$0xff]  ;;  %v603_v26 = vld [vmem:[%s5138_s7 + $0xd90] sm:$0xff] }
  0x85   : > { %600 = vst [vmem:[%s5143_s8 + $0x6c0] sm:$0xff] %v599_v24  ;;  %602 = vst [vmem:[%s5143_s8 + $0x6c8] sm:$0xff] %v601_v25  ;;  %v605_v27 = vld [vmem:[%s5138_s7 + $0xd98] sm:$0xff]  ;;  %v607_v28 = vld [vmem:[%s5138_s7 + $0xdc0] sm:$0xff] }
  0x86   : > { %604 = vst [vmem:[%s5143_s8 + $0x6d0] sm:$0xff] %v603_v26  ;;  %v609_v29 = vld [vmem:[%s5138_s7 + $0xdc8] sm:$0xff]  ;;  %606 = vst [vmem:[%s5143_s8 + $0x6d8] sm:$0xff] %v605_v27  ;;  %v611_v30 = vld [vmem:[%s5138_s7 + $0xdd0] sm:$0xff] }
  0x87   : > { %608 = vst [vmem:[%s5143_s8 + $0x6e0] sm:$0xff] %v607_v28  ;;  %610 = vst [vmem:[%s5143_s8 + $0x6e8] sm:$0xff] %v609_v29  ;;  %v613_v31 = vld [vmem:[%s5138_s7 + $0xdd8] sm:$0xff]  ;;  %v615_v32 = vld [vmem:[%s5138_s7 + $0xe00] sm:$0xff] }
  0x88   : > { %612 = vst [vmem:[%s5143_s8 + $0x6f0] sm:$0xff] %v611_v30  ;;  %614 = vst [vmem:[%s5143_s8 + $0x6f8] sm:$0xff] %v613_v31  ;;  %v617_v33 = vld [vmem:[%s5138_s7 + $0xe08] sm:$0xff]  ;;  %v619_v34 = vld [vmem:[%s5138_s7 + $0xe10] sm:$0xff] }
  0x89   : > { %616 = vst [vmem:[%s5143_s8 + $0x700] sm:$0xff] %v615_v32  ;;  %v621_v35 = vld [vmem:[%s5138_s7 + $0xe18] sm:$0xff]  ;;  %618 = vst [vmem:[%s5143_s8 + $0x708] sm:$0xff] %v617_v33  ;;  %v623_v36 = vld [vmem:[%s5138_s7 + $0xe40] sm:$0xff] }
  0x8a   : > { %620 = vst [vmem:[%s5143_s8 + $0x710] sm:$0xff] %v619_v34  ;;  %622 = vst [vmem:[%s5143_s8 + $0x718] sm:$0xff] %v621_v35  ;;  %v625_v37 = vld [vmem:[%s5138_s7 + $0xe48] sm:$0xff]  ;;  %v627_v38 = vld [vmem:[%s5138_s7 + $0xe50] sm:$0xff] }
  0x8b   : > { %624 = vst [vmem:[%s5143_s8 + $0x720] sm:$0xff] %v623_v36  ;;  %626 = vst [vmem:[%s5143_s8 + $0x728] sm:$0xff] %v625_v37  ;;  %v629_v39 = vld [vmem:[%s5138_s7 + $0xe58] sm:$0xff]  ;;  %v631_v40 = vld [vmem:[%s5138_s7 + $0xe80] sm:$0xff] }
  0x8c   : > { %628 = vst [vmem:[%s5143_s8 + $0x730] sm:$0xff] %v627_v38  ;;  %v633_v41 = vld [vmem:[%s5138_s7 + $0xe88] sm:$0xff]  ;;  %630 = vst [vmem:[%s5143_s8 + $0x738] sm:$0xff] %v629_v39  ;;  %v635_v42 = vld [vmem:[%s5138_s7 + $0xe90] sm:$0xff] }
  0x8d   : > { %632 = vst [vmem:[%s5143_s8 + $0x740] sm:$0xff] %v631_v40  ;;  %634 = vst [vmem:[%s5143_s8 + $0x748] sm:$0xff] %v633_v41  ;;  %v637_v43 = vld [vmem:[%s5138_s7 + $0xe98] sm:$0xff]  ;;  %v639_v44 = vld [vmem:[%s5138_s7 + $0xec0] sm:$0xff] }
  0x8e   : > { %636 = vst [vmem:[%s5143_s8 + $0x750] sm:$0xff] %v635_v42  ;;  %638 = vst [vmem:[%s5143_s8 + $0x758] sm:$0xff] %v637_v43  ;;  %v641_v45 = vld [vmem:[%s5138_s7 + $0xec8] sm:$0xff]  ;;  %v643_v46 = vld [vmem:[%s5138_s7 + $0xed0] sm:$0xff] }
  0x8f   : > { %640 = vst [vmem:[%s5143_s8 + $0x760] sm:$0xff] %v639_v44  ;;  %v645_v47 = vld [vmem:[%s5138_s7 + $0xed8] sm:$0xff]  ;;  %642 = vst [vmem:[%s5143_s8 + $0x768] sm:$0xff] %v641_v45  ;;  %v647_v48 = vld [vmem:[%s5138_s7 + $0xf00] sm:$0xff] }
  0x90   : > { %644 = vst [vmem:[%s5143_s8 + $0x770] sm:$0xff] %v643_v46  ;;  %646 = vst [vmem:[%s5143_s8 + $0x778] sm:$0xff] %v645_v47  ;;  %v649_v49 = vld [vmem:[%s5138_s7 + $0xf08] sm:$0xff]  ;;  %v651_v50 = vld [vmem:[%s5138_s7 + $0xf10] sm:$0xff] }
  0x91   : > { %648 = vst [vmem:[%s5143_s8 + $0x780] sm:$0xff] %v647_v48  ;;  %650 = vst [vmem:[%s5143_s8 + $0x788] sm:$0xff] %v649_v49  ;;  %v653_v51 = vld [vmem:[%s5138_s7 + $0xf18] sm:$0xff]  ;;  %v655_v52 = vld [vmem:[%s5138_s7 + $0xf40] sm:$0xff] }
  0x92   : > { %652 = vst [vmem:[%s5143_s8 + $0x790] sm:$0xff] %v651_v50  ;;  %v657_v53 = vld [vmem:[%s5138_s7 + $0xf48] sm:$0xff]  ;;  %654 = vst [vmem:[%s5143_s8 + $0x798] sm:$0xff] %v653_v51  ;;  %v659_v54 = vld [vmem:[%s5138_s7 + $0xf50] sm:$0xff] }
  0x93   : > { %656 = vst [vmem:[%s5143_s8 + $0x7a0] sm:$0xff] %v655_v52  ;;  %658 = vst [vmem:[%s5143_s8 + $0x7a8] sm:$0xff] %v657_v53  ;;  %v661_v55 = vld [vmem:[%s5138_s7 + $0xf58] sm:$0xff]  ;;  %v663_v56 = vld [vmem:[%s5138_s7 + $0xf80] sm:$0xff] }
  0x94   : > { %660 = vst [vmem:[%s5143_s8 + $0x7b0] sm:$0xff] %v659_v54  ;;  %662 = vst [vmem:[%s5143_s8 + $0x7b8] sm:$0xff] %v661_v55  ;;  %v665_v57 = vld [vmem:[%s5138_s7 + $0xf88] sm:$0xff]  ;;  %v667_v58 = vld [vmem:[%s5138_s7 + $0xf90] sm:$0xff] }
  0x95   : > { %664 = vst [vmem:[%s5143_s8 + $0x7c0] sm:$0xff] %v663_v56  ;;  %v669_v59 = vld [vmem:[%s5138_s7 + $0xf98] sm:$0xff]  ;;  %666 = vst [vmem:[%s5143_s8 + $0x7c8] sm:$0xff] %v665_v57  ;;  %v671_v60 = vld [vmem:[%s5138_s7 + $0xfc0] sm:$0xff] }
  0x96   : > { %668 = vst [vmem:[%s5143_s8 + $0x7d0] sm:$0xff] %v667_v58  ;;  %670 = vst [vmem:[%s5143_s8 + $0x7d8] sm:$0xff] %v669_v59  ;;  %v673_v61 = vld [vmem:[%s5138_s7 + $0xfc8] sm:$0xff]  ;;  %v675_v62 = vld [vmem:[%s5138_s7 + $0xfd0] sm:$0xff] }
  0x97   : > { %672 = vst [vmem:[%s5143_s8 + $0x7e0] sm:$0xff] %v671_v60  ;;  %674 = vst [vmem:[%s5143_s8 + $0x7e8] sm:$0xff] %v673_v61  ;;  %v677_v63 = vld [vmem:[%s5138_s7 + $0xfd8] sm:$0xff] }
  0x98   : > { %676 = vst [vmem:[%s5143_s8 + $0x7f0] sm:$0xff] %v675_v62  ;;  %678 = vst [vmem:[%s5143_s8 + $0x7f8] sm:$0xff] %v677_v63 }
  0x99 PF: > { %p4546_p7 = scmp.ge.s32.totalorder %s5054_s18, 1  ;;  %p683_p8 = scmp.lt.s32.totalorder %s5054_s18, 9 }
  0x9b   : > { %p684_p9 = pnand %p4546_p7, %p683_p8 }
  0x9d   : > { %687 = sbr.rel (%p684_p9) target bundleno = 1021 (0x3fd), region = 51 }
  0xa4   : > { %s690_s9 = sand.u32 1, %s5030_s12   ;;  %s4548_s10 = sshll.u32 %s5042_s15, 5 }
  0xa5   : > { %s4547_s11 = sshll.u32 %s690_s9, 11  ;;  %p716_p10 = scmp.lt.s32.totalorder %s4548_s10, 127 }
  0xa6   : > { %s5663_s26 = scalar_lea.vmem [#allocation3], %s4547_s11  ;;  %p4550_p11 = scmp.ne.s32.totalorder %s5038_s14, 0 }
  0xa7   : > { %s6522_s10 = smov (!%p716_p10, %s4548_s10), 127  ;;  %v5056_v0 = vmov (!%p4550_p11), 0.0  }
  0xa8   : > { %s4549_s21 = sshll.u32 %s6522_s10, 3  ;;  %725 = sbr.rel (%p4550_p11) target bundleno = 200 (0xc8), region = 59  ;;  %726 = vst [vmem:[#allocation2] sm:$0xff] (!%p4550_p11), %v5056_v0  ;;  %727 = vst [vmem:[#allocation2 + $0x8] sm:$0xff] (!%p4550_p11), %v5056_v0 }
  0xa9   : > { %s5661_s24 = scalar_lea.vmem %s6460_s3, %s4549_s21  ;;  %728 = vst [vmem:[#allocation2 + $0x10] sm:$0xff] (!%p4550_p11), %v5056_v0  ;;  %729 = vst [vmem:[#allocation2 + $0x18] sm:$0xff] (!%p4550_p11), %v5056_v0 }
  0xaa   : > { %730 = vst [vmem:[#allocation2 + $0x20] sm:$0xff] (!%p4550_p11), %v5056_v0  ;;  %731 = vst [vmem:[#allocation2 + $0x28] sm:$0xff] (!%p4550_p11), %v5056_v0 }
  0xab   : > { %732 = vst [vmem:[#allocation2 + $0x30] sm:$0xff] (!%p4550_p11), %v5056_v0  ;;  %733 = vst [vmem:[#allocation2 + $0x38] sm:$0xff] (!%p4550_p11), %v5056_v0 }
  0xac   : > { %734 = vst [vmem:[#allocation2 + $0x40] sm:$0xff] (!%p4550_p11), %v5056_v0  ;;  %735 = vst [vmem:[#allocation2 + $0x48] sm:$0xff] (!%p4550_p11), %v5056_v0 }
  0xad   : > { %736 = vst [vmem:[#allocation2 + $0x50] sm:$0xff] (!%p4550_p11), %v5056_v0  ;;  %737 = vst [vmem:[#allocation2 + $0x58] sm:$0xff] (!%p4550_p11), %v5056_v0 }
  0xae   : > { %738 = vst [vmem:[#allocation2 + $0x60] sm:$0xff] (!%p4550_p11), %v5056_v0  ;;  %739 = vst [vmem:[#allocation2 + $0x68] sm:$0xff] (!%p4550_p11), %v5056_v0 }
  0xaf   : > { %740 = vst [vmem:[#allocation2 + $0x70] sm:$0xff] %v5056_v0  ;;  %741 = vst [vmem:[#allocation2 + $0x78] sm:$0xff] %v5056_v0 }
  0xb0   : > { %742 = vst [vmem:[#allocation2 + $0x80] sm:$0xff] %v5056_v0  ;;  %743 = vst [vmem:[#allocation2 + $0x88] sm:$0xff] %v5056_v0 }
  0xb1   : > { %744 = vst [vmem:[#allocation2 + $0x90] sm:$0xff] %v5056_v0  ;;  %745 = vst [vmem:[#allocation2 + $0x98] sm:$0xff] %v5056_v0 }
  0xb2   : > { %746 = vst [vmem:[#allocation2 + $0xa0] sm:$0xff] %v5056_v0  ;;  %747 = vst [vmem:[#allocation2 + $0xa8] sm:$0xff] %v5056_v0 }
  0xb3   : > { %748 = vst [vmem:[#allocation2 + $0xb0] sm:$0xff] %v5056_v0  ;;  %749 = vst [vmem:[#allocation2 + $0xb8] sm:$0xff] %v5056_v0 }
  0xb4   : > { %750 = vst [vmem:[#allocation2 + $0xc0] sm:$0xff] %v5056_v0  ;;  %751 = vst [vmem:[#allocation2 + $0xc8] sm:$0xff] %v5056_v0 }
  0xb5   : > { %752 = vst [vmem:[#allocation2 + $0xd0] sm:$0xff] %v5056_v0  ;;  %753 = vst [vmem:[#allocation2 + $0xd8] sm:$0xff] %v5056_v0 }
  0xb6   : > { %754 = vst [vmem:[#allocation2 + $0xe0] sm:$0xff] %v5056_v0  ;;  %755 = vst [vmem:[#allocation2 + $0xe8] sm:$0xff] %v5056_v0 }
  0xb7   : > { %756 = vst [vmem:[#allocation2 + $0xf0] sm:$0xff] %v5056_v0  ;;  %757 = vst [vmem:[#allocation2 + $0xf8] sm:$0xff] %v5056_v0 }
  0xb8   : > { %758 = vst [vmem:[#allocation2 + $0x100] sm:$0xff] %v5056_v0  ;;  %759 = vst [vmem:[#allocation2 + $0x108] sm:$0xff] %v5056_v0 }
  0xb9   : > { %760 = vst [vmem:[#allocation2 + $0x110] sm:$0xff] %v5056_v0  ;;  %761 = vst [vmem:[#allocation2 + $0x118] sm:$0xff] %v5056_v0 }
  0xba   : > { %762 = vst [vmem:[#allocation2 + $0x120] sm:$0xff] %v5056_v0  ;;  %763 = vst [vmem:[#allocation2 + $0x128] sm:$0xff] %v5056_v0 }
  0xbb   : > { %764 = vst [vmem:[#allocation2 + $0x130] sm:$0xff] %v5056_v0  ;;  %765 = vst [vmem:[#allocation2 + $0x138] sm:$0xff] %v5056_v0 }
  0xbc   : > { %766 = vst [vmem:[#allocation2 + $0x140] sm:$0xff] %v5056_v0  ;;  %767 = vst [vmem:[#allocation2 + $0x148] sm:$0xff] %v5056_v0 }
  0xbd   : > { %768 = vst [vmem:[#allocation2 + $0x150] sm:$0xff] %v5056_v0  ;;  %769 = vst [vmem:[#allocation2 + $0x158] sm:$0xff] %v5056_v0 }
  0xbe   : > { %770 = vst [vmem:[#allocation2 + $0x160] sm:$0xff] %v5056_v0  ;;  %771 = vst [vmem:[#allocation2 + $0x168] sm:$0xff] %v5056_v0 }
  0xbf   : > { %772 = vst [vmem:[#allocation2 + $0x170] sm:$0xff] %v5056_v0  ;;  %773 = vst [vmem:[#allocation2 + $0x178] sm:$0xff] %v5056_v0 }
  0xc0   : > { %774 = vst [vmem:[#allocation2 + $0x180] sm:$0xff] %v5056_v0  ;;  %775 = vst [vmem:[#allocation2 + $0x188] sm:$0xff] %v5056_v0 }
  0xc1   : > { %776 = vst [vmem:[#allocation2 + $0x190] sm:$0xff] %v5056_v0  ;;  %777 = vst [vmem:[#allocation2 + $0x198] sm:$0xff] %v5056_v0 }
  0xc2   : > { %778 = vst [vmem:[#allocation2 + $0x1a0] sm:$0xff] %v5056_v0  ;;  %779 = vst [vmem:[#allocation2 + $0x1a8] sm:$0xff] %v5056_v0 }
  0xc3   : > { %780 = vst [vmem:[#allocation2 + $0x1b0] sm:$0xff] %v5056_v0  ;;  %781 = vst [vmem:[#allocation2 + $0x1b8] sm:$0xff] %v5056_v0 }
  0xc4   : > { %782 = vst [vmem:[#allocation2 + $0x1c0] sm:$0xff] %v5056_v0  ;;  %783 = vst [vmem:[#allocation2 + $0x1c8] sm:$0xff] %v5056_v0 }
  0xc5   : > { %784 = vst [vmem:[#allocation2 + $0x1d0] sm:$0xff] %v5056_v0  ;;  %785 = vst [vmem:[#allocation2 + $0x1d8] sm:$0xff] %v5056_v0 }
  0xc6   : > { %786 = vst [vmem:[#allocation2 + $0x1e0] sm:$0xff] %v5056_v0  ;;  %787 = vst [vmem:[#allocation2 + $0x1e8] sm:$0xff] %v5056_v0 }
  0xc7   : > { %788 = vst [vmem:[#allocation2 + $0x1f0] sm:$0xff] %v5056_v0  ;;  %789 = vst [vmem:[#allocation2 + $0x1f8] sm:$0xff] %v5056_v0 }
  0xc8 PF: > { %s4551_s12 = sshll.u32 %s5038_s14, 10  ;;  %v5732_v1 = vld [vmem:[%s5663_s26] sm:$0xff]  ;;  %v5738_v3 = vld [vmem:[%s5663_s26 + $0x8] sm:$0xff]  ;;  %v5057_v4 = vmov 0   ;;  %p4873_p12 = scmp.ne.s32.totalorder %s5038_s14, 1 }
  0xc9   : > { %v5735_v2 = vld [vmem:[%s5663_s26 + $0x20] sm:$0xff]  ;;  %2907 = vmatprep.subr.bf16.mxu0 %v5057_v4  ;;  %3196 = vmatprep.subr.bf16.mxu1 %v5057_v4  ;;  %s1111_s15 = sshra.s32 %s4551_s12, 3  ;;  %v5747_v7 = vld [vmem:[%s5663_s26 + $0x28] sm:$0xff] }
  0xca   : > { %v4553_v5 = vcombine.low %v5732_v1, %v5735_v2  ;;  %v4554_v6 = vcombine.high %v5732_v1, %v5735_v2  ;;  %s4552_s27 = sshll.u32 %s1111_s15, 2  ;;  %v4555_v8 = vcombine.low %v5738_v3, %v5747_v7  ;;  %v4556_v9 = vcombine.high %v5738_v3, %v5747_v7  ;;  %v863_v42 = vld [vmem:[%s5663_s26 + $0x40] sm:$0xff]  ;;  %v864_v44 = vld [vmem:[%s5663_s26 + $0x48] sm:$0xff] }
  0xcb   : > { %s5756_s30 = scalar_lea.vmem %s6458_s1, %s4552_s27  ;;  %v867_v43 = vld [vmem:[%s5663_s26 + $0x60] sm:$0xff]  ;;  %v868_v45 = vld [vmem:[%s5663_s26 + $0x68] sm:$0xff] }
  0xcc   : > { %2939 = vmatprep.mubr.bf16.mxu0 %v4554_v6  ;;  %v4936_v10 = vld [vmem:[%s5756_s30] sm:$0xff]   ;;  %3228 = vmatprep.mubr.bf16.mxu1 %v4556_v9  ;;  %v4938_v12 = vld [vmem:[%s5756_s30 + $0x8] sm:$0xff]   ;;  %v4940_v14 = vld [vmem:[%s5756_s30 + $0x10] sm:$0xff]   ;;  %v4562_v48 = vcombine.high %v863_v42, %v867_v43  ;;  %v4564_v49 = vcombine.high %v864_v44, %v868_v45  ;;  %v4561_v56 = vcombine.low %v863_v42, %v867_v43 }
  0xcd   : > { %v4937_v11 = vld [vmem:[%s5756_s30 + $0x80] sm:$0xff]   ;;  %2908 = vmatpush1.bf16.msra.mxu0 %v4936_v10  ;;  %v4939_v13 = vld [vmem:[%s5756_s30 + $0x88] sm:$0xff]   ;;  %v4941_v15 = vld [vmem:[%s5756_s30 + $0x90] sm:$0xff]   ;;  %v4563_v58 = vcombine.low %v864_v44, %v868_v45 }
  0xce   : > { %3197 = vmatpush1.bf16.msra.mxu1 %v4937_v11  ;;  %2909 = vmatprep.subr.bf16.mxu0 %v5057_v4  ;;  %v4942_v16 = vld [vmem:[%s5756_s30 + $0x18] sm:$0xff]   ;;  %v4944_v18 = vld [vmem:[%s5756_s30 + $0x20] sm:$0xff]   ;;  %v4946_v20 = vld [vmem:[%s5756_s30 + $0x28] sm:$0xff]  }
  0xcf   : > { %3198 = vmatprep.subr.bf16.mxu1 %v5057_v4  ;;  %v4943_v17 = vld [vmem:[%s5756_s30 + $0x98] sm:$0xff]   ;;  %v4945_v19 = vld [vmem:[%s5756_s30 + $0xa0] sm:$0xff]   ;;  %v4947_v21 = vld [vmem:[%s5756_s30 + $0xa8] sm:$0xff]  }
  0xd0   : > { %v4948_v22 = vld [vmem:[%s5756_s30 + $0x30] sm:$0xff]   ;;  %v4950_v24 = vld [vmem:[%s5756_s30 + $0x38] sm:$0xff]   ;;  %v4952_v26 = vld [vmem:[%s5756_s30 + $0x40] sm:$0xff]  }
  0xd1   : > { %2910 = vmatpush1.bf16.msra.mxu0 %v4938_v12  ;;  %v4949_v23 = vld [vmem:[%s5756_s30 + $0xb0] sm:$0xff]   ;;  %v4951_v25 = vld [vmem:[%s5756_s30 + $0xb8] sm:$0xff]   ;;  %v4953_v27 = vld [vmem:[%s5756_s30 + $0xc0] sm:$0xff]  }
  0xd2   : > { %3199 = vmatpush1.bf16.msra.mxu1 %v4939_v13  ;;  %2911 = vmatprep.subr.bf16.mxu0 %v5057_v4  ;;  %v4954_v28 = vld [vmem:[%s5756_s30 + $0x48] sm:$0xff]   ;;  %v4956_v30 = vld [vmem:[%s5756_s30 + $0x50] sm:$0xff]   ;;  %v4958_v32 = vld [vmem:[%s5756_s30 + $0x58] sm:$0xff]  }
  0xd3   : > { %3200 = vmatprep.subr.bf16.mxu1 %v5057_v4  ;;  %v4955_v29 = vld [vmem:[%s5756_s30 + $0xc8] sm:$0xff]   ;;  %v4957_v31 = vld [vmem:[%s5756_s30 + $0xd0] sm:$0xff]   ;;  %v4959_v33 = vld [vmem:[%s5756_s30 + $0xd8] sm:$0xff]  }
  0xd4   : > { %v4960_v34 = vld [vmem:[%s5756_s30 + $0x60] sm:$0xff]   ;;  %v4962_v36 = vld [vmem:[%s5756_s30 + $0x68] sm:$0xff]   ;;  %v4964_v38 = vld [vmem:[%s5756_s30 + $0x70] sm:$0xff]  }
  0xd5   : > { %2912 = vmatpush1.bf16.msra.mxu0 %v4940_v14  ;;  %v4961_v35 = vld [vmem:[%s5756_s30 + $0xe0] sm:$0xff]   ;;  %v4963_v37 = vld [vmem:[%s5756_s30 + $0xe8] sm:$0xff]   ;;  %v4965_v39 = vld [vmem:[%s5756_s30 + $0xf0] sm:$0xff]  }
  0xd6   : > { %3201 = vmatpush1.bf16.msra.mxu1 %v4941_v15  ;;  %2913 = vmatprep.subr.bf16.mxu0 %v5057_v4  ;;  %v4966_v40 = vld [vmem:[%s5756_s30 + $0x78] sm:$0xff]   ;;  %v4968_v46 = vld [vmem:[%s5756_s30 + $0x100] sm:$0xff]   ;;  %v4970_v52 = vld [vmem:[%s5756_s30 + $0x108] sm:$0xff]  }
  0xd7   : > { %3202 = vmatprep.subr.bf16.mxu1 %v5057_v4  ;;  %v4967_v41 = vld [vmem:[%s5756_s30 + $0xf8] sm:$0xff]   ;;  %v4969_v47 = vld [vmem:[%s5756_s30 + $0x180] sm:$0xff]   ;;  %v4971_v53 = vld [vmem:[%s5756_s30 + $0x188] sm:$0xff]  }
  0xd8   : > { %v871_v50 = vld [vmem:[%s5663_s26 + $0x80] sm:$0xff]  ;;  %v872_v54 = vld [vmem:[%s5663_s26 + $0x88] sm:$0xff]  ;;  %v4972_v57 = vld [vmem:[%s5756_s30 + $0x110] sm:$0xff]  }
  0xd9   : > { %2914 = vmatpush1.bf16.msra.mxu0 %v4942_v16  ;;  %v875_v51 = vld [vmem:[%s5663_s26 + $0xa0] sm:$0xff]  ;;  %v876_v55 = vld [vmem:[%s5663_s26 + $0xa8] sm:$0xff]  ;;  %v4973_v60 = vld [vmem:[%s5756_s30 + $0x190] sm:$0xff]  }
  0xda   : > { %3203 = vmatpush1.bf16.msra.mxu1 %v4943_v17  ;;  %2915 = vmatprep.subr.bf16.mxu0 %v5057_v4  ;;  %v4570_v59 = vcombine.high %v871_v50, %v875_v51  ;;  %v4572_v61 = vcombine.high %v872_v54, %v876_v55  ;;  %v879_v62 = vld [vmem:[%s5663_s26 + $0xc0] sm:$0xff]  ;;  %v880_v0 = vld [vmem:[%s5663_s26 + $0xc8] sm:$0xff]  ;;  %v4571_v7 = vcombine.low %v872_v54, %v876_v55  ;;  %v4978_v13 = vld [vmem:[%s5756_s30 + $0x128] sm:$0xff]  }
  0xdb   : > { %3204 = vmatprep.subr.bf16.mxu1 %v5057_v4  ;;  %v883_v63 = vld [vmem:[%s5663_s26 + $0xe0] sm:$0xff]  ;;  %v884_v1 = vld [vmem:[%s5663_s26 + $0xe8] sm:$0xff]  ;;  %v4979_v16 = vld [vmem:[%s5756_s30 + $0x1a8] sm:$0xff]  }
  0xdc   : > { %v4974_v2 = vld [vmem:[%s5756_s30 + $0x118] sm:$0xff]   ;;  %v4976_v6 = vld [vmem:[%s5756_s30 + $0x120] sm:$0xff]   ;;  %v4580_v9 = vcombine.high %v880_v0, %v884_v1  ;;  %v4577_v17 = vcombine.low %v879_v62, %v883_v63  ;;  %v4988_v45 = vld [vmem:[%s5756_s30 + $0x150] sm:$0xff]  }
  0xdd   : > { %2916 = vmatpush1.bf16.msra.mxu0 %v4944_v18  ;;  %v4975_v3 = vld [vmem:[%s5756_s30 + $0x198] sm:$0xff]   ;;  %v4977_v10 = vld [vmem:[%s5756_s30 + $0x1a0] sm:$0xff]   ;;  %v4579_v18 = vcombine.low %v880_v0, %v884_v1 }
  0xde   : > { %3205 = vmatpush1.bf16.msra.mxu1 %v4945_v19  ;;  %2917 = vmatprep.subr.bf16.mxu0 %v5057_v4  ;;  %v887_v11 = vld [vmem:[%s5663_s26 + $0x100] sm:$0xff]  ;;  %v888_v14 = vld [vmem:[%s5663_s26 + $0x108] sm:$0xff] }
  0xdf   : > { %3206 = vmatprep.subr.bf16.mxu1 %v5057_v4  ;;  %v891_v12 = vld [vmem:[%s5663_s26 + $0x120] sm:$0xff]  ;;  %v892_v15 = vld [vmem:[%s5663_s26 + $0x128] sm:$0xff] }
  0xe0   : > { %v4586_v19 = vcombine.high %v887_v11, %v891_v12  ;;  %v4990_v55 = vld [vmem:[%s5756_s30 + $0x158] sm:$0xff]  }
  0xe1   : > { %2918 = vmatpush1.bf16.msra.mxu0 %v4946_v20  ;;  %v4588_v20 = vcombine.high %v888_v14, %v892_v15  ;;  %v927_v1 = vld [vmem:[%s5663_s26 + $0x240] sm:$0xff] }
  0xe2   : > { %3207 = vmatpush1.bf16.msra.mxu1 %v4947_v21  ;;  %2919 = vmatprep.subr.bf16.mxu0 %v5057_v4  ;;  %v4980_v21 = vld [vmem:[%s5756_s30 + $0x130] sm:$0xff]  }
  0xe3   : > { %3208 = vmatprep.subr.bf16.mxu1 %v5057_v4 }
  0xe5   : > { %2920 = vmatpush1.bf16.msra.mxu0 %v4948_v22  ;;  %v4981_v22 = vld [vmem:[%s5756_s30 + $0x1b0] sm:$0xff]  }
  0xe6   : > { %3209 = vmatpush1.bf16.msra.mxu1 %v4949_v23  ;;  %2921 = vmatprep.subr.bf16.mxu0 %v5057_v4  ;;  %v895_v23 = vld [vmem:[%s5663_s26 + $0x140] sm:$0xff] }
  0xe7   : > { %3210 = vmatprep.subr.bf16.mxu1 %v5057_v4 }
  0xe9   : > { %2922 = vmatpush1.bf16.msra.mxu0 %v4950_v24  ;;  %v899_v24 = vld [vmem:[%s5663_s26 + $0x160] sm:$0xff] }
  0xea   : > { %3211 = vmatpush1.bf16.msra.mxu1 %v4951_v25  ;;  %2923 = vmatprep.subr.bf16.mxu0 %v5057_v4  ;;  %v4982_v25 = vld [vmem:[%s5756_s30 + $0x138] sm:$0xff]  }
  0xeb   : > { %3212 = vmatprep.subr.bf16.mxu1 %v5057_v4 }
  0xed   : > { %2924 = vmatpush1.bf16.msra.mxu0 %v4952_v26  ;;  %v896_v26 = vld [vmem:[%s5663_s26 + $0x148] sm:$0xff] }
  0xee   : > { %3213 = vmatpush1.bf16.msra.mxu1 %v4953_v27  ;;  %2925 = vmatprep.subr.bf16.mxu0 %v5057_v4  ;;  %v900_v27 = vld [vmem:[%s5663_s26 + $0x168] sm:$0xff] }
  0xef   : > { %3214 = vmatprep.subr.bf16.mxu1 %v5057_v4  ;;  %v4595_v42 = vcombine.low %v896_v26, %v900_v27 }
  0xf1   : > { %2926 = vmatpush1.bf16.msra.mxu0 %v4954_v28  ;;  %v4983_v28 = vld [vmem:[%s5756_s30 + $0x1b8] sm:$0xff]  }
  0xf2   : > { %3215 = vmatpush1.bf16.msra.mxu1 %v4955_v29  ;;  %2927 = vmatprep.subr.bf16.mxu0 %v5057_v4  ;;  %v4585_v29 = vcombine.low %v887_v11, %v891_v12  ;;  %v4993_v11 = vld [vmem:[%s5756_s30 + $0x1e0] sm:$0xff]   ;;  %v935_v12 = vld [vmem:[%s5663_s26 + $0x280] sm:$0xff] }
  0xf3   : > { %3216 = vmatprep.subr.bf16.mxu1 %v5057_v4 }
  0xf5   : > { %2928 = vmatpush1.bf16.msra.mxu0 %v4956_v30  ;;  %v4587_v30 = vcombine.low %v888_v14, %v892_v15  ;;  %v936_v14 = vld [vmem:[%s5663_s26 + $0x288] sm:$0xff] }
  0xf6   : > { %3217 = vmatpush1.bf16.msra.mxu1 %v4957_v31  ;;  %2929 = vmatprep.subr.bf16.mxu0 %v5057_v4  ;;  %v4594_v31 = vcombine.high %v895_v23, %v899_v24  ;;  %v940_v15 = vld [vmem:[%s5663_s26 + $0x2a8] sm:$0xff] }
  0xf7   : > { %3218 = vmatprep.subr.bf16.mxu1 %v5057_v4 }
  0xf9   : > { %2930 = vmatpush1.bf16.msra.mxu0 %v4958_v32  ;;  %v4596_v32 = vcombine.high %v896_v26, %v900_v27 }
  0xfa   : > { %3219 = vmatpush1.bf16.msra.mxu1 %v4959_v33  ;;  %2931 = vmatprep.subr.bf16.mxu0 %v5057_v4  ;;  %v4984_v33 = vld [vmem:[%s5756_s30 + $0x140] sm:$0xff]  }
  0xfb   : > { %3220 = vmatprep.subr.bf16.mxu1 %v5057_v4 }
  0xfd   : > { %2932 = vmatpush1.bf16.msra.mxu0 %v4960_v34  ;;  %v4985_v34 = vld [vmem:[%s5756_s30 + $0x1c0] sm:$0xff]  }
  0xfe   : > { %3221 = vmatpush1.bf16.msra.mxu1 %v4961_v35  ;;  %2933 = vmatprep.subr.bf16.mxu0 %v5057_v4  ;;  %v903_v35 = vld [vmem:[%s5663_s26 + $0x180] sm:$0xff] }
  0xff   : > { %3222 = vmatprep.subr.bf16.mxu1 %v5057_v4 }
 0x101   : > { %2934 = vmatpush1.bf16.msra.mxu0 %v4962_v36  ;;  %v907_v36 = vld [vmem:[%s5663_s26 + $0x1a0] sm:$0xff] }
 0x102   : > { %3223 = vmatpush1.bf16.msra.mxu1 %v4963_v37  ;;  %2935 = vmatprep.subr.bf16.mxu0 %v5057_v4  ;;  %v4986_v37 = vld [vmem:[%s5756_s30 + $0x148] sm:$0xff]   ;;  %v4602_v43 = vcombine.high %v903_v35, %v907_v36 }
 0x103   : > { %3224 = vmatprep.subr.bf16.mxu1 %v5057_v4 }
 0x105   : > { %2936 = vmatpush1.bf16.msra.mxu0 %v4964_v38  ;;  %v904_v38 = vld [vmem:[%s5663_s26 + $0x188] sm:$0xff] }
 0x106   : > { %3225 = vmatpush1.bf16.msra.mxu1 %v4965_v39  ;;  %2937 = vmatprep.subr.bf16.mxu0 %v5057_v4  ;;  %v908_v39 = vld [vmem:[%s5663_s26 + $0x1a8] sm:$0xff] }
 0x107   : > { %3226 = vmatprep.subr.bf16.mxu1 %v5057_v4  ;;  %v4604_v44 = vcombine.high %v904_v38, %v908_v39 }
 0x109   : > { %2938 = vmatpush1.bf16.msra.mxu0 %v4966_v40  ;;  %v4987_v40 = vld [vmem:[%s5756_s30 + $0x1c8] sm:$0xff]  }
 0x10a   : > { %3227 = vmatpush1.bf16.msra.mxu1 %v4967_v41  ;;  %3485 = vmatprep.subr.bf16.mxu0 %v5057_v4  ;;  %v4593_v41 = vcombine.low %v895_v23, %v899_v24  ;;  %v948_v23 = vld [vmem:[%s5663_s26 + $0x2e8] sm:$0xff] }
 0x10b   : > { %3774 = vmatprep.subr.bf16.mxu1 %v5057_v4 }
 0x10c   : > { %2940 = vmatmul.mubr.bf16.vlgmr.msra.gmra.mrb[0].mxu0 %v4553_v5  ;;  %v4569_v5 = vcombine.low %v871_v50, %v875_v51  ;;  %v916_v50 = vld [vmem:[%s5663_s26 + $0x1e8] sm:$0xff]  ;;  %v4601_v51 = vcombine.low %v903_v35, %v907_v36  ;;  %v4995_v36 = vld [vmem:[%s5756_s30 + $0x1e8] sm:$0xff]  }
 0x10d   : > { %3229 = vmatmul.mubr.bf16.vlgmr.msra.gmra.mrb[0].mxu1 %v4555_v8  ;;  %3486 = vmatpush1.bf16.msra.mxu0 %v4968_v46  ;;  %v4578_v8 = vcombine.high %v879_v62, %v883_v63  ;;  %v4989_v46 = vld [vmem:[%s5756_s30 + $0x1d0] sm:$0xff]  }
 0x10e   : > { %3775 = vmatpush1.bf16.msra.mxu1 %v4969_v47  ;;  %2947 = vmatprep.mubr.bf16.mxu0 %v4562_v48  ;;  %v911_v47 = vld [vmem:[%s5663_s26 + $0x1c0] sm:$0xff] }
 0x10f   : > { %3236 = vmatprep.mubr.bf16.mxu1 %v4564_v49  ;;  %3487 = vmatprep.subr.bf16.mxu0 %v5057_v4  ;;  %v915_v48 = vld [vmem:[%s5663_s26 + $0x1e0] sm:$0xff]  ;;  %v912_v49 = vld [vmem:[%s5663_s26 + $0x1c8] sm:$0xff] }
 0x110   : > { %3776 = vmatprep.subr.bf16.mxu1 %v5057_v4  ;;  %v4612_v54 = vcombine.high %v912_v49, %v916_v50  ;;  %v4611_v62 = vcombine.low %v912_v49, %v916_v50  ;;  %v968_v49 = vld [vmem:[%s5663_s26 + $0x388] sm:$0xff] }
 0x111   : > { %3488 = vmatpush1.bf16.msra.mxu0 %v4970_v52  ;;  %v4603_v52 = vcombine.low %v904_v38, %v908_v39  ;;  %v959_v38 = vld [vmem:[%s5663_s26 + $0x340] sm:$0xff]  ;;  %v972_v50 = vld [vmem:[%s5663_s26 + $0x3a8] sm:$0xff] }
 0x112   : > { %3777 = vmatpush1.bf16.msra.mxu1 %v4971_v53  ;;  %3489 = vmatprep.subr.bf16.mxu0 %v5057_v4  ;;  %v4610_v53 = vcombine.high %v911_v47, %v915_v48  ;;  %v963_v39 = vld [vmem:[%s5663_s26 + $0x360] sm:$0xff] }
 0x113   : > { %3778 = vmatprep.subr.bf16.mxu1 %v5057_v4 }
 0x114   : > { %2948 = vmatmul.mubr.bf16.gmra.mrb[4].mxu0 %v4561_v56  ;;  %v4991_v56 = vld [vmem:[%s5756_s30 + $0x1d8] sm:$0xff]  }
 0x115   : > { %3237 = vmatmul.mubr.bf16.gmra.mrb[4].mxu1 %v4563_v58  ;;  %2955 = vmatprep.mubr.bf16.mxu0 %v4570_v59  ;;  %v923_v58 = vld [vmem:[%s5663_s26 + $0x220] sm:$0xff]  ;;  %v920_v59 = vld [vmem:[%s5663_s26 + $0x208] sm:$0xff] }
 0x116   : > { %3244 = vmatprep.mubr.bf16.mxu1 %v4572_v61  ;;  %3490 = vmatpush1.bf16.msra.mxu0 %v4972_v57  ;;  %v919_v57 = vld [vmem:[%s5663_s26 + $0x200] sm:$0xff]  ;;  %v4609_v61 = vcombine.low %v911_v47, %v915_v48 }
 0x117   : > { %3779 = vmatpush1.bf16.msra.mxu1 %v4973_v60  ;;  %3491 = vmatprep.subr.bf16.mxu0 %v5057_v4  ;;  %v924_v60 = vld [vmem:[%s5663_s26 + $0x228] sm:$0xff]  ;;  %v4618_v63 = vcombine.high %v919_v57, %v923_v58  ;;  %v967_v47 = vld [vmem:[%s5663_s26 + $0x380] sm:$0xff] }
 0x118   : > { %3780 = vmatprep.subr.bf16.mxu1 %v5057_v4  ;;  %v4620_v0 = vcombine.high %v920_v59, %v924_v60  ;;  %v971_v48 = vld [vmem:[%s5663_s26 + $0x3a0] sm:$0xff] }
 0x11a   : > { %3492 = vmatpush1.bf16.msra.mxu0 %v4974_v2  ;;  %v931_v2 = vld [vmem:[%s5663_s26 + $0x260] sm:$0xff] }
 0x11b   : > { %3781 = vmatpush1.bf16.msra.mxu1 %v4975_v3  ;;  %3493 = vmatprep.subr.bf16.mxu0 %v5057_v4  ;;  %v928_v3 = vld [vmem:[%s5663_s26 + $0x248] sm:$0xff] }
 0x11c   : > { %2956 = vmatmul.mubr.bf16.gmra.mrb[8].mxu0 %v4569_v5  ;;  %3782 = vmatprep.subr.bf16.mxu1 %v5057_v4  ;;  %v932_v5 = vld [vmem:[%s5663_s26 + $0x268] sm:$0xff] }
 0x11d   : > { %3245 = vmatmul.mubr.bf16.gmra.mrb[8].mxu1 %v4571_v7  ;;  %2963 = vmatprep.mubr.bf16.mxu0 %v4578_v8  ;;  %v4619_v7 = vcombine.low %v920_v59, %v924_v60  ;;  %v4626_v8 = vcombine.high %v927_v1, %v931_v2  ;;  %v980_v59 = vld [vmem:[%s5663_s26 + $0x3e8] sm:$0xff]  ;;  %v4665_v60 = vcombine.low %v967_v47, %v971_v48 }
 0x11e   : > { %3252 = vmatprep.mubr.bf16.mxu1 %v4580_v9  ;;  %3494 = vmatpush1.bf16.msra.mxu0 %v4976_v6  ;;  %v4617_v6 = vcombine.low %v919_v57, %v923_v58  ;;  %v4628_v9 = vcombine.high %v928_v3, %v932_v5  ;;  %v979_v57 = vld [vmem:[%s5663_s26 + $0x3e0] sm:$0xff]  ;;  %v976_v58 = vld [vmem:[%s5663_s26 + $0x3c8] sm:$0xff] }
 0x11f   : > { %3783 = vmatpush1.bf16.msra.mxu1 %v4977_v10  ;;  %3495 = vmatprep.subr.bf16.mxu0 %v5057_v4  ;;  %v4992_v10 = vld [vmem:[%s5756_s30 + $0x160] sm:$0xff]  }
 0x120   : > { %3784 = vmatprep.subr.bf16.mxu1 %v5057_v4 }
 0x122   : > { %3496 = vmatpush1.bf16.msra.mxu0 %v4978_v13  ;;  %v939_v13 = vld [vmem:[%s5663_s26 + $0x2a0] sm:$0xff] }
 0x123   : > { %3785 = vmatpush1.bf16.msra.mxu1 %v4979_v16  ;;  %3497 = vmatprep.subr.bf16.mxu0 %v5057_v4  ;;  %v4625_v16 = vcombine.low %v927_v1, %v931_v2  ;;  %v4633_v24 = vcombine.low %v935_v12, %v939_v13  ;;  %v987_v1 = vld [vmem:[%s5663_s26 + $0x420] sm:$0xff]  ;;  %v984_v2 = vld [vmem:[%s5663_s26 + $0x408] sm:$0xff] }
 0x124   : > { %2964 = vmatmul.mubr.bf16.gmra.mrb[12].mxu0 %v4577_v17  ;;  %3786 = vmatprep.subr.bf16.mxu1 %v5057_v4  ;;  %v4627_v17 = vcombine.low %v928_v3, %v932_v5  ;;  %v988_v3 = vld [vmem:[%s5663_s26 + $0x428] sm:$0xff] }
 0x125   : > { %3253 = vmatmul.mubr.bf16.gmra.mrb[12].mxu1 %v4579_v18  ;;  %2971 = vmatprep.mubr.bf16.mxu0 %v4586_v19  ;;  %v4634_v18 = vcombine.high %v935_v12, %v939_v13  ;;  %v4636_v19 = vcombine.high %v936_v14, %v940_v15  ;;  %v992_v12 = vld [vmem:[%s5663_s26 + $0x448] sm:$0xff] }
 0x126   : > { %3260 = vmatprep.mubr.bf16.mxu1 %v4588_v20  ;;  %3498 = vmatpush1.bf16.msra.mxu0 %v4980_v21  ;;  %v943_v20 = vld [vmem:[%s5663_s26 + $0x2c0] sm:$0xff]  ;;  %v996_v13 = vld [vmem:[%s5663_s26 + $0x468] sm:$0xff] }
 0x127   : > { %3787 = vmatpush1.bf16.msra.mxu1 %v4981_v22  ;;  %3499 = vmatprep.subr.bf16.mxu0 %v5057_v4  ;;  %v947_v21 = vld [vmem:[%s5663_s26 + $0x2e0] sm:$0xff]  ;;  %v944_v22 = vld [vmem:[%s5663_s26 + $0x2c8] sm:$0xff] }
 0x128   : > { %3788 = vmatprep.subr.bf16.mxu1 %v5057_v4  ;;  %v4642_v26 = vcombine.high %v943_v20, %v947_v21  ;;  %v4644_v27 = vcombine.high %v944_v22, %v948_v23 }
 0x12a   : > { %3500 = vmatpush1.bf16.msra.mxu0 %v4982_v25  ;;  %v4635_v25 = vcombine.low %v936_v14, %v940_v15  ;;  %v4683_v15 = vcombine.low %v984_v2, %v988_v3 }
 0x12b   : > { %3789 = vmatpush1.bf16.msra.mxu1 %v4983_v28  ;;  %3501 = vmatprep.subr.bf16.mxu0 %v5057_v4  ;;  %v4994_v28 = vld [vmem:[%s5756_s30 + $0x168] sm:$0xff]  }
 0x12c   : > { %2972 = vmatmul.mubr.bf16.gmra.mrb[16].mxu0 %v4585_v29  ;;  %3790 = vmatprep.subr.bf16.mxu1 %v5057_v4  ;;  %v951_v29 = vld [vmem:[%s5663_s26 + $0x300] sm:$0xff] }
 0x12d   : > { %3261 = vmatmul.mubr.bf16.gmra.mrb[16].mxu1 %v4587_v30  ;;  %2979 = vmatprep.mubr.bf16.mxu0 %v4594_v31  ;;  %v955_v30 = vld [vmem:[%s5663_s26 + $0x320] sm:$0xff]  ;;  %v952_v31 = vld [vmem:[%s5663_s26 + $0x308] sm:$0xff] }
 0x12e   : > { %3268 = vmatprep.mubr.bf16.mxu1 %v4596_v32  ;;  %3502 = vmatpush1.bf16.msra.mxu0 %v4984_v33  ;;  %v956_v32 = vld [vmem:[%s5663_s26 + $0x328] sm:$0xff]  ;;  %v4641_v33 = vcombine.low %v943_v20, %v947_v21  ;;  %v4650_v35 = vcombine.high %v951_v29, %v955_v30 }
 0x12f   : > { %3791 = vmatpush1.bf16.msra.mxu1 %v4985_v34  ;;  %3503 = vmatprep.subr.bf16.mxu0 %v5057_v4  ;;  %v4643_v34 = vcombine.low %v944_v22, %v948_v23  ;;  %v1000_v20 = vld [vmem:[%s5663_s26 + $0x488] sm:$0xff]  ;;  %v4691_v23 = vcombine.low %v992_v12, %v996_v13 }
 0x130   : > { %3792 = vmatprep.subr.bf16.mxu1 %v5057_v4  ;;  %v1004_v21 = vld [vmem:[%s5663_s26 + $0x4a8] sm:$0xff] }
 0x132   : > { %3504 = vmatpush1.bf16.msra.mxu0 %v4986_v37  ;;  %v4652_v37 = vcombine.high %v952_v31, %v956_v32 }
 0x133   : > { %3793 = vmatpush1.bf16.msra.mxu1 %v4987_v40  ;;  %3505 = vmatprep.subr.bf16.mxu0 %v5057_v4  ;;  %v960_v40 = vld [vmem:[%s5663_s26 + $0x348] sm:$0xff] }
 0x134   : > { %2980 = vmatmul.mubr.bf16.gmra.mrb[20].mxu0 %v4593_v41  ;;  %3794 = vmatprep.subr.bf16.mxu1 %v5057_v4  ;;  %v964_v41 = vld [vmem:[%s5663_s26 + $0x368] sm:$0xff] }
 0x135   : > { %3269 = vmatmul.mubr.bf16.gmra.mrb[20].mxu1 %v4595_v42  ;;  %2987 = vmatprep.mubr.bf16.mxu0 %v4602_v43  ;;  %v4649_v42 = vcombine.low %v951_v29, %v955_v30  ;;  %v4651_v43 = vcombine.low %v952_v31, %v956_v32  ;;  %v1012_v29 = vld [vmem:[%s5663_s26 + $0x4e8] sm:$0xff]  ;;  %v4699_v31 = vcombine.low %v1000_v20, %v1004_v21 }
 0x136   : > { %3276 = vmatprep.mubr.bf16.mxu1 %v4604_v44  ;;  %3506 = vmatpush1.bf16.msra.mxu0 %v4988_v45  ;;  %v4658_v44 = vcombine.high %v959_v38, %v963_v39  ;;  %v4660_v45 = vcombine.high %v960_v40, %v964_v41 }
 0x137   : > { %3795 = vmatpush1.bf16.msra.mxu1 %v4989_v46  ;;  %3507 = vmatprep.subr.bf16.mxu0 %v5057_v4  ;;  %v4996_v46 = vld [vmem:[%s5756_s30 + $0x170] sm:$0xff]  }
 0x138   : > { %3796 = vmatprep.subr.bf16.mxu1 %v5057_v4 }
 0x13a   : > { %3508 = vmatpush1.bf16.msra.mxu0 %v4990_v55  ;;  %v4668_v55 = vcombine.high %v968_v49, %v972_v50 }
 0x13b   : > { %3797 = vmatpush1.bf16.msra.mxu1 %v4991_v56  ;;  %3509 = vmatprep.subr.bf16.mxu0 %v5057_v4  ;;  %v975_v56 = vld [vmem:[%s5663_s26 + $0x3c0] sm:$0xff] }
 0x13c   : > { %2988 = vmatmul.mubr.bf16.gmra.mrb[24].mxu0 %v4601_v51  ;;  %3798 = vmatprep.subr.bf16.mxu1 %v5057_v4  ;;  %v4657_v51 = vcombine.low %v959_v38, %v963_v39  ;;  %v4673_v5 = vcombine.low %v975_v56, %v979_v57 }
 0x13d   : > { %3277 = vmatmul.mubr.bf16.gmra.mrb[24].mxu1 %v4603_v52  ;;  %2995 = vmatprep.mubr.bf16.mxu0 %v4610_v53  ;;  %v4659_v52 = vcombine.low %v960_v40, %v964_v41  ;;  %v4666_v53 = vcombine.high %v967_v47, %v971_v48 }
 0x13e   : > { %3284 = vmatprep.mubr.bf16.mxu1 %v4612_v54  ;;  %3510 = vmatpush1.bf16.msra.mxu0 %v4992_v10  ;;  %v4997_v54 = vld [vmem:[%s5756_s30 + $0x1f0] sm:$0xff]   ;;  %v991_v10 = vld [vmem:[%s5663_s26 + $0x440] sm:$0xff] }
 0x13f   : > { %3799 = vmatpush1.bf16.msra.mxu1 %v4993_v11  ;;  %3511 = vmatprep.subr.bf16.mxu0 %v5057_v4  ;;  %v995_v11 = vld [vmem:[%s5663_s26 + $0x460] sm:$0xff] }
 0x140   : > { %3800 = vmatprep.subr.bf16.mxu1 %v5057_v4  ;;  %v4689_v22 = vcombine.low %v991_v10, %v995_v11 }
 0x142   : > { %3512 = vmatpush1.bf16.msra.mxu0 %v4994_v28  ;;  %v1008_v28 = vld [vmem:[%s5663_s26 + $0x4c8] sm:$0xff] }
 0x143   : > { %3513 = vmatprep.subr.bf16.mxu0 %v5057_v4  ;;  %3801 = vmatpush1.bf16.msra.mxu1 %v4995_v36  ;;  %v1016_v36 = vld [vmem:[%s5663_s26 + $0x508] sm:$0xff]  ;;  %v4707_v39 = vcombine.low %v1008_v28, %v1012_v29 }
 0x144   : > { %2996 = vmatmul.mubr.bf16.gmra.mrb[28].mxu0 %v4609_v61  ;;  %3802 = vmatprep.subr.bf16.mxu1 %v5057_v4  ;;  %v4667_v61 = vcombine.low %v968_v49, %v972_v50  ;;  %v1031_v50 = vld [vmem:[%s5663_s26 + $0x580] sm:$0xff] }
 0x145   : > { %3285 = vmatmul.mubr.bf16.gmra.mrb[28].mxu1 %v4611_v62  ;;  %3003 = vmatprep.mubr.bf16.mxu0 %v4618_v63  ;;  %v4674_v62 = vcombine.high %v975_v56, %v979_v57  ;;  %v4676_v63 = vcombine.high %v976_v58, %v980_v59 }
 0x146   : > { %3292 = vmatprep.mubr.bf16.mxu1 %v4620_v0  ;;  %3514 = vmatpush1.bf16.msra.mxu0 %v4996_v46  ;;  %v983_v0 = vld [vmem:[%s5663_s26 + $0x400] sm:$0xff] }
 0x147   : > { %3515 = vmatprep.subr.bf16.mxu0 %v5057_v4  ;;  %3803 = vmatpush1.bf16.msra.mxu1 %v4997_v54  ;;  %v4681_v14 = vcombine.low %v983_v0, %v987_v1 }
 0x148   : > { %3804 = vmatprep.subr.bf16.mxu1 %v5057_v4  ;;  %v4998_v4 = vld [vmem:[%s5756_s30 + $0x178] sm:$0xff]  }
 0x14a   : > { %3516 = vmatpush1.bf16.msra.mxu0 %v4998_v4 }
 0x14c   : > { %3004 = vmatmul.mubr.bf16.gmra.mrb[32].mxu0 %v4617_v6  ;;  %v4675_v6 = vcombine.low %v976_v58, %v980_v59  ;;  %v1039_v58 = vld [vmem:[%s5663_s26 + $0x5c0] sm:$0xff] }
 0x14d   : > { %3293 = vmatmul.mubr.bf16.gmra.mrb[32].mxu1 %v4619_v7  ;;  %3011 = vmatprep.mubr.bf16.mxu0 %v4626_v8  ;;  %v4682_v7 = vcombine.high %v983_v0, %v987_v1  ;;  %v4999_v8 = vld [vmem:[%s5756_s30 + $0x1f8] sm:$0xff]  }
 0x14e   : > { %3300 = vmatprep.mubr.bf16.mxu1 %v4628_v9  ;;  %v4684_v9 = vcombine.high %v984_v2, %v988_v3  ;;  %3805 = vmatpush1.bf16.msra.mxu1 %v4999_v8  ;;  %v1043_v59 = vld [vmem:[%s5663_s26 + $0x5e0] sm:$0xff]  ;;  %v1048_v3 = vld [vmem:[%s5663_s26 + $0x608] sm:$0xff] }
 0x14f   : > { %v4738_v4 = vcombine.high %v1039_v58, %v1043_v59  ;;  %v1047_v1 = vld [vmem:[%s5663_s26 + $0x600] sm:$0xff] }
 0x150   : > { %v1051_v2 = vld [vmem:[%s5663_s26 + $0x620] sm:$0xff] }
 0x151   : > { %v4746_v8 = vcombine.high %v1047_v1, %v1051_v2 }
 0x154   : > { %3012 = vmatmul.mubr.bf16.gmra.mrb[36].mxu0 %v4625_v16  ;;  %v4690_v16 = vcombine.high %v991_v10, %v995_v11  ;;  %v1055_v10 = vld [vmem:[%s5663_s26 + $0x640] sm:$0xff] }
 0x155   : > { %3301 = vmatmul.mubr.bf16.gmra.mrb[36].mxu1 %v4627_v17  ;;  %3019 = vmatprep.mubr.bf16.mxu0 %v4634_v18  ;;  %v4692_v17 = vcombine.high %v992_v12, %v996_v13  ;;  %v999_v18 = vld [vmem:[%s5663_s26 + $0x480] sm:$0xff]  ;;  %v1056_v12 = vld [vmem:[%s5663_s26 + $0x648] sm:$0xff] }
 0x156   : > { %3308 = vmatprep.mubr.bf16.mxu1 %v4636_v19  ;;  %v1003_v19 = vld [vmem:[%s5663_s26 + $0x4a0] sm:$0xff]  ;;  %v1060_v13 = vld [vmem:[%s5663_s26 + $0x668] sm:$0xff] }
 0x157   : > { %v4697_v30 = vcombine.low %v999_v18, %v1003_v19  ;;  %v1059_v11 = vld [vmem:[%s5663_s26 + $0x660] sm:$0xff] }
 0x15c   : > { %3020 = vmatmul.mubr.bf16.gmra.mrb[40].mxu0 %v4633_v24  ;;  %v4698_v24 = vcombine.high %v999_v18, %v1003_v19  ;;  %v1063_v18 = vld [vmem:[%s5663_s26 + $0x680] sm:$0xff] }
 0x15d   : > { %3309 = vmatmul.mubr.bf16.gmra.mrb[40].mxu1 %v4635_v25  ;;  %3027 = vmatprep.mubr.bf16.mxu0 %v4642_v26  ;;  %v4700_v25 = vcombine.high %v1000_v20, %v1004_v21  ;;  %v1007_v26 = vld [vmem:[%s5663_s26 + $0x4c0] sm:$0xff]  ;;  %v1064_v20 = vld [vmem:[%s5663_s26 + $0x688] sm:$0xff] }
 0x15e   : > { %3316 = vmatprep.mubr.bf16.mxu1 %v4644_v27  ;;  %v1011_v27 = vld [vmem:[%s5663_s26 + $0x4e0] sm:$0xff]  ;;  %v1068_v21 = vld [vmem:[%s5663_s26 + $0x6a8] sm:$0xff] }
 0x15f   : > { %v4706_v32 = vcombine.high %v1007_v26, %v1011_v27  ;;  %v4705_v38 = vcombine.low %v1007_v26, %v1011_v27  ;;  %v1067_v19 = vld [vmem:[%s5663_s26 + $0x6a0] sm:$0xff] }
 0x160   : > { %v1071_v26 = vld [vmem:[%s5663_s26 + $0x6c0] sm:$0xff] }
 0x161   : > { %v1075_v27 = vld [vmem:[%s5663_s26 + $0x6e0] sm:$0xff] }
 0x164   : > { %3028 = vmatmul.mubr.bf16.gmra.mrb[44].mxu0 %v4641_v33  ;;  %v4708_v33 = vcombine.high %v1008_v28, %v1012_v29  ;;  %v1072_v28 = vld [vmem:[%s5663_s26 + $0x6c8] sm:$0xff] }
 0x165   : > { %3317 = vmatmul.mubr.bf16.gmra.mrb[44].mxu1 %v4643_v34  ;;  %3035 = vmatprep.mubr.bf16.mxu0 %v4650_v35  ;;  %v1015_v34 = vld [vmem:[%s5663_s26 + $0x500] sm:$0xff]  ;;  %v1076_v29 = vld [vmem:[%s5663_s26 + $0x6e8] sm:$0xff] }
 0x166   : > { %3324 = vmatprep.mubr.bf16.mxu1 %v4652_v37  ;;  %v1019_v35 = vld [vmem:[%s5663_s26 + $0x520] sm:$0xff]  ;;  %v1020_v37 = vld [vmem:[%s5663_s26 + $0x528] sm:$0xff] }
 0x167   : > { %v4714_v40 = vcombine.high %v1015_v34, %v1019_v35  ;;  %v4716_v41 = vcombine.high %v1016_v36, %v1020_v37  ;;  %v4713_v46 = vcombine.low %v1015_v34, %v1019_v35  ;;  %v4715_v47 = vcombine.low %v1016_v36, %v1020_v37  ;;  %v1079_v34 = vld [vmem:[%s5663_s26 + $0x700] sm:$0xff]  ;;  %v1080_v37 = vld [vmem:[%s5663_s26 + $0x708] sm:$0xff] }
 0x168   : > { %v1083_v35 = vld [vmem:[%s5663_s26 + $0x720] sm:$0xff] }
 0x16c   : > { %3036 = vmatmul.mubr.bf16.gmra.mrb[48].mxu0 %v4649_v42  ;;  %v1023_v42 = vld [vmem:[%s5663_s26 + $0x540] sm:$0xff] }
 0x16d   : > { %3325 = vmatmul.mubr.bf16.gmra.mrb[48].mxu1 %v4651_v43  ;;  %3043 = vmatprep.mubr.bf16.mxu0 %v4658_v44  ;;  %v1027_v43 = vld [vmem:[%s5663_s26 + $0x560] sm:$0xff]  ;;  %v1024_v44 = vld [vmem:[%s5663_s26 + $0x548] sm:$0xff] }
 0x16e   : > { %3332 = vmatprep.mubr.bf16.mxu1 %v4660_v45  ;;  %v1028_v45 = vld [vmem:[%s5663_s26 + $0x568] sm:$0xff]  ;;  %v4722_v48 = vcombine.high %v1023_v42, %v1027_v43  ;;  %v4721_v54 = vcombine.low %v1023_v42, %v1027_v43 }
 0x16f   : > { %v4724_v49 = vcombine.high %v1024_v44, %v1028_v45 }
 0x174   : > { %3044 = vmatmul.mubr.bf16.gmra.mrb[52].mxu0 %v4657_v51  ;;  %v1035_v51 = vld [vmem:[%s5663_s26 + $0x5a0] sm:$0xff] }
 0x175   : > { %3333 = vmatmul.mubr.bf16.gmra.mrb[52].mxu1 %v4659_v52  ;;  %3051 = vmatprep.mubr.bf16.mxu0 %v4666_v53  ;;  %v1032_v52 = vld [vmem:[%s5663_s26 + $0x588] sm:$0xff]  ;;  %v4730_v56 = vcombine.high %v1031_v50, %v1035_v51 }
 0x176   : > { %3340 = vmatprep.mubr.bf16.mxu1 %v4668_v55  ;;  %v1036_v53 = vld [vmem:[%s5663_s26 + $0x5a8] sm:$0xff]  ;;  %v4723_v55 = vcombine.low %v1024_v44, %v1028_v45  ;;  %v4771_v45 = vcombine.low %v1072_v28, %v1076_v29 }
 0x177   : > { %v4732_v57 = vcombine.high %v1032_v52, %v1036_v53 }
 0x17c   : > { %3052 = vmatmul.mubr.bf16.gmra.mrb[56].mxu0 %v4665_v60  ;;  %v1040_v60 = vld [vmem:[%s5663_s26 + $0x5c8] sm:$0xff] }
 0x17d   : > { %3341 = vmatmul.mubr.bf16.gmra.mrb[56].mxu1 %v4667_v61  ;;  %3059 = vmatprep.mubr.bf16.mxu0 %v4674_v62  ;;  %v1044_v61 = vld [vmem:[%s5663_s26 + $0x5e8] sm:$0xff]  ;;  %v4729_v62 = vcombine.low %v1031_v50, %v1035_v51 }
 0x17e   : > { %3348 = vmatprep.mubr.bf16.mxu1 %v4676_v63  ;;  %v4731_v63 = vcombine.low %v1032_v52, %v1036_v53  ;;  %v4740_v0 = vcombine.high %v1040_v60, %v1044_v61  ;;  %v1087_v52 = vld [vmem:[%s5663_s26 + $0x740] sm:$0xff] }
 0x17f   : > { %v1091_v53 = vld [vmem:[%s5663_s26 + $0x760] sm:$0xff] }
 0x184   : > { %3060 = vmatmul.mubr.bf16.gmra.mrb[60].mxu0 %v4673_v5  ;;  %v1052_v5 = vld [vmem:[%s5663_s26 + $0x628] sm:$0xff] }
 0x185   : > { %3349 = vmatmul.mubr.bf16.gmra.mrb[60].mxu1 %v4675_v6  ;;  %3067 = vmatprep.mubr.bf16.mxu0 %v4682_v7  ;;  %v4737_v6 = vcombine.low %v1039_v58, %v1043_v59  ;;  %v4739_v7 = vcombine.low %v1040_v60, %v1044_v61  ;;  %v4777_v59 = vcombine.low %v1079_v34, %v1083_v35 }
 0x186   : > { %3356 = vmatprep.mubr.bf16.mxu1 %v4684_v9  ;;  %v4748_v9 = vcombine.high %v1048_v3, %v1052_v5 }
 0x18c   : > { %3068 = vmatmul.mubr.bf16.gmra.mrb[64].mxu0 %v4681_v14  ;;  %v4745_v14 = vcombine.low %v1047_v1, %v1051_v2 }
 0x18d   : > { %3357 = vmatmul.mubr.bf16.gmra.mrb[64].mxu1 %v4683_v15  ;;  %3075 = vmatprep.mubr.bf16.mxu0 %v4690_v16  ;;  %v4747_v15 = vcombine.low %v1048_v3, %v1052_v5  ;;  %v4754_v16 = vcombine.high %v1055_v10, %v1059_v11 }
 0x18e   : > { %3364 = vmatprep.mubr.bf16.mxu1 %v4692_v17  ;;  %v4756_v17 = vcombine.high %v1056_v12, %v1060_v13 }
 0x194   : > { %3076 = vmatmul.mubr.bf16.gmra.mrb[68].mxu0 %v4689_v22  ;;  %v4753_v22 = vcombine.low %v1055_v10, %v1059_v11  ;;  %v1100_v10 = vld [vmem:[%s5663_s26 + $0x7a8] sm:$0xff] }
 0x195   : > { %3365 = vmatmul.mubr.bf16.gmra.mrb[68].mxu1 %v4691_v23  ;;  %3083 = vmatprep.mubr.bf16.mxu0 %v4698_v24  ;;  %v4755_v23 = vcombine.low %v1056_v12, %v1060_v13  ;;  %v4762_v24 = vcombine.high %v1063_v18, %v1067_v19  ;;  %v4785_v13 = vcombine.low %v1087_v52, %v1091_v53 }
 0x196   : > { %3372 = vmatprep.mubr.bf16.mxu1 %v4700_v25  ;;  %v4764_v25 = vcombine.high %v1064_v20, %v1068_v21 }
 0x19c   : > { %3084 = vmatmul.mubr.bf16.gmra.mrb[72].mxu0 %v4697_v30  ;;  %v4761_v30 = vcombine.low %v1063_v18, %v1067_v19 }
 0x19d   : > { %3373 = vmatmul.mubr.bf16.gmra.mrb[72].mxu1 %v4699_v31  ;;  %3091 = vmatprep.mubr.bf16.mxu0 %v4706_v32  ;;  %v4763_v31 = vcombine.low %v1064_v20, %v1068_v21  ;;  %v4770_v32 = vcombine.high %v1071_v26, %v1075_v27 }
 0x19e   : > { %3380 = vmatprep.mubr.bf16.mxu1 %v4708_v33  ;;  %v4772_v33 = vcombine.high %v1072_v28, %v1076_v29  ;;  %v1108_v28 = vld [vmem:[%s5663_s26 + $0x7e8] sm:$0xff] }
 0x1a4   : > { %3092 = vmatmul.mubr.bf16.gmra.mrb[76].mxu0 %v4705_v38  ;;  %v1084_v38 = vld [vmem:[%s5663_s26 + $0x728] sm:$0xff] }
 0x1a5   : > { %3381 = vmatmul.mubr.bf16.gmra.mrb[76].mxu1 %v4707_v39  ;;  %3099 = vmatprep.mubr.bf16.mxu0 %v4714_v40 }
 0x1a6   : > { %3388 = vmatprep.mubr.bf16.mxu1 %v4716_v41  ;;  %v4769_v41 = vcombine.low %v1071_v26, %v1075_v27  ;;  %v1104_v27 = vld [vmem:[%s5663_s26 + $0x7c8] sm:$0xff] }
 0x1ac   : > { %3100 = vmatmul.mubr.bf16.gmra.mrb[80].mxu0 %v4713_v46  ;;  %v4778_v46 = vcombine.high %v1079_v34, %v1083_v35 }
 0x1ad   : > { %3389 = vmatmul.mubr.bf16.gmra.mrb[80].mxu1 %v4715_v47  ;;  %3107 = vmatprep.mubr.bf16.mxu0 %v4722_v48 }
 0x1ae   : > { %3396 = vmatprep.mubr.bf16.mxu1 %v4724_v49  ;;  %v4780_v49 = vcombine.high %v1080_v37, %v1084_v38 }
 0x1b4   : > { %3108 = vmatmul.mubr.bf16.gmra.mrb[84].mxu0 %v4721_v54 }
 0x1b5   : > { %3397 = vmatmul.mubr.bf16.gmra.mrb[84].mxu1 %v4723_v55  ;;  %3115 = vmatprep.mubr.bf16.mxu0 %v4730_v56  ;;  %v1088_v55 = vld [vmem:[%s5663_s26 + $0x748] sm:$0xff] }
 0x1b6   : > { %3404 = vmatprep.mubr.bf16.mxu1 %v4732_v57  ;;  %v1092_v56 = vld [vmem:[%s5663_s26 + $0x768] sm:$0xff] }
 0x1b7   : > { %v4788_v2 = vcombine.high %v1088_v55, %v1092_v56 }
 0x1bc   : > { %3116 = vmatmul.mubr.bf16.gmra.mrb[88].mxu0 %v4729_v62 }
 0x1bd   : > { %3405 = vmatmul.mubr.bf16.gmra.mrb[88].mxu1 %v4731_v63  ;;  %3123 = vmatprep.mubr.bf16.mxu0 %v4738_v4  ;;  %v4779_v63 = vcombine.low %v1080_v37, %v1084_v38  ;;  %v4786_v4 = vcombine.high %v1087_v52, %v1091_v53 }
 0x1be   : > { %3412 = vmatprep.mubr.bf16.mxu1 %v4740_v0 }
 0x1c4   : > { %3124 = vmatmul.mubr.bf16.gmra.mrb[92].mxu0 %v4737_v6  ;;  %v1095_v6 = vld [vmem:[%s5663_s26 + $0x780] sm:$0xff] }
 0x1c5   : > { %3413 = vmatmul.mubr.bf16.gmra.mrb[92].mxu1 %v4739_v7  ;;  %3131 = vmatprep.mubr.bf16.mxu0 %v4746_v8  ;;  %v1099_v7 = vld [vmem:[%s5663_s26 + $0x7a0] sm:$0xff] }
 0x1c6   : > { %3420 = vmatprep.mubr.bf16.mxu1 %v4748_v9  ;;  %v1096_v9 = vld [vmem:[%s5663_s26 + $0x788] sm:$0xff]  ;;  %v4794_v18 = vcombine.high %v1095_v6, %v1099_v7 }
 0x1c7   : > { %v4796_v21 = vcombine.high %v1096_v9, %v1100_v10  ;;  %v4795_v35 = vcombine.low %v1096_v9, %v1100_v10 }
 0x1cc   : > { %3132 = vmatmul.mubr.bf16.gmra.mrb[96].mxu0 %v4745_v14 }
 0x1cd   : > { %3421 = vmatmul.mubr.bf16.gmra.mrb[96].mxu1 %v4747_v15  ;;  %3139 = vmatprep.mubr.bf16.mxu0 %v4754_v16 }
 0x1ce   : > { %3428 = vmatprep.mubr.bf16.mxu1 %v4756_v17  ;;  %v4787_v17 = vcombine.low %v1088_v55, %v1092_v56  ;;  %v4803_v55 = vcombine.low %v1104_v27, %v1108_v28 }
 0x1d4   : > { %3140 = vmatmul.mubr.bf16.gmra.mrb[100].mxu0 %v4753_v22 }
 0x1d5   : > { %3429 = vmatmul.mubr.bf16.gmra.mrb[100].mxu1 %v4755_v23  ;;  %3147 = vmatprep.mubr.bf16.mxu0 %v4762_v24  ;;  %v1103_v24 = vld [vmem:[%s5663_s26 + $0x7c0] sm:$0xff] }
 0x1d6   : > { %3436 = vmatprep.mubr.bf16.mxu1 %v4764_v25  ;;  %v1107_v25 = vld [vmem:[%s5663_s26 + $0x7e0] sm:$0xff] }
 0x1dc   : > { %3148 = vmatmul.mubr.bf16.gmra.mrb[104].mxu0 %v4761_v30 }
 0x1dd   : > { %3437 = vmatmul.mubr.bf16.gmra.mrb[104].mxu1 %v4763_v31  ;;  %3155 = vmatprep.mubr.bf16.mxu0 %v4770_v32  ;;  %v4793_v31 = vcombine.low %v1095_v6, %v1099_v7 }
 0x1de   : > { %3444 = vmatprep.mubr.bf16.mxu1 %v4772_v33 }
 0x1df   : > { %v2941_v36 = vpop.f32.mrb[0].mxu0 }
 0x1e0   : > { %v3230_v39 = vpop.f32.mrb[0].mxu1  ;;  %v2943_v40 = vpop.f32.mrb[1].mxu0 }
 0x1e1   : > { %v6002_v42 = vadd.f32 %v3230_v39, %v2941_v36  ;;  %v3232_v43 = vpop.f32.mrb[1].mxu1  ;;  %v2944_v44 = vpop.f32.mrb[2].mxu0  ;;  %v4802_v36 = vcombine.high %v1103_v24, %v1107_v25  ;;  %v4804_v39 = vcombine.high %v1104_v27, %v1108_v28 }
 0x1e2   : > { %v3233_v47 = vpop.f32.mrb[2].mxu1  ;;  %v2946_v48 = vpop.f32.mrb[3].mxu0  ;;  %v857_v43 = vld [vmem:[%s5663_s26 + $0x10] sm:$0xff] }
 0x1e3   : > { %v6004_v50 = vadd.f32 %v3233_v47, %v2944_v44  ;;  %v3235_v51 = vpop.f32.mrb[3].mxu1  ;;  %v861_v44 = vld [vmem:[%s5663_s26 + $0x30] sm:$0xff]  ;;  %v862_v47 = vld [vmem:[%s5663_s26 + $0x38] sm:$0xff] }
 0x1e4   : > { %3156 = vmatmul.mubr.bf16.gmra.mrb[108].mxu0 %v4769_v41  ;;  %v4801_v51 = vcombine.low %v1103_v24, %v1107_v25  ;;  %v4558_v56 = vcombine.high %v857_v43, %v861_v44  ;;  %v4557_v7 = vcombine.low %v857_v43, %v861_v44  ;;  %v878_v24 = vld [vmem:[%s5663_s26 + $0xb8] sm:$0xff] }
 0x1e5   : > { %3445 = vmatmul.mubr.bf16.gmra.mrb[108].mxu1 %v4771_v45  ;;  %3163 = vmatprep.mubr.bf16.mxu0 %v4778_v46  ;;  %v858_v46 = vld [vmem:[%s5663_s26 + $0x18] sm:$0xff] }
 0x1e6   : > { %3452 = vmatprep.mubr.bf16.mxu1 %v4780_v49  ;;  %v882_v44 = vld [vmem:[%s5663_s26 + $0xd8] sm:$0xff] }
 0x1e7   : > { %v2949_v54 = vpop.f32.mrb[4].mxu0 }
 0x1e8   : > { %v3238_v57 = vpop.f32.mrb[4].mxu1  ;;  %v2951_v58 = vpop.f32.mrb[5].mxu0 }
 0x1e9   : > { %v6010_v60 = vadd.f32 %v3238_v57, %v2949_v54  ;;  %v3240_v61 = vpop.f32.mrb[5].mxu1  ;;  %v2952_v62 = vpop.f32.mrb[6].mxu0 }
 0x1ea   : > { %v3241_v0 = vpop.f32.mrb[6].mxu1  ;;  %v2954_v1 = vpop.f32.mrb[7].mxu0 }
 0x1eb   : > { %v6012_v3 = vadd.f32 %v3241_v0, %v2952_v62  ;;  %v3243_v5 = vpop.f32.mrb[7].mxu1  ;;  %v866_v1 = vld [vmem:[%s5663_s26 + $0x58] sm:$0xff] }
 0x1ec   : > { %3164 = vmatmul.mubr.bf16.gmra.mrb[112].mxu0 %v4777_v59  ;;  %v4560_v59 = vcombine.high %v858_v46, %v862_v47 }
 0x1ed   : > { %3453 = vmatmul.mubr.bf16.gmra.mrb[112].mxu1 %v4779_v63  ;;  %3171 = vmatprep.mubr.bf16.mxu0 %v4786_v4  ;;  %v865_v63 = vld [vmem:[%s5663_s26 + $0x50] sm:$0xff] }
 0x1ee   : > { %3460 = vmatprep.mubr.bf16.mxu1 %v4788_v2  ;;  %v869_v4 = vld [vmem:[%s5663_s26 + $0x70] sm:$0xff]  ;;  %v870_v2 = vld [vmem:[%s5663_s26 + $0x78] sm:$0xff] }
 0x1ef   : > { %v2957_v8 = vpop.f32.mrb[8].mxu0  ;;  %v4565_v27 = vcombine.low %v865_v63, %v869_v4 }
 0x1f0   : > { %v3246_v11 = vpop.f32.mrb[8].mxu1  ;;  %v2959_v12 = vpop.f32.mrb[9].mxu0 }
 0x1f1   : > { %v6018_v14 = vadd.f32 %v3246_v11, %v2957_v8  ;;  %v3248_v15 = vpop.f32.mrb[9].mxu1  ;;  %v2960_v16 = vpop.f32.mrb[10].mxu0  ;;  %v4559_v11 = vcombine.low %v858_v46, %v862_v47  ;;  %v4566_v12 = vcombine.high %v865_v63, %v869_v4  ;;  %v889_v63 = vld [vmem:[%s5663_s26 + $0x110] sm:$0xff] }
 0x1f2   : > { %v3249_v19 = vpop.f32.mrb[10].mxu1  ;;  %v2962_v20 = vpop.f32.mrb[11].mxu0  ;;  %v893_v4 = vld [vmem:[%s5663_s26 + $0x130] sm:$0xff] }
 0x1f3   : > { %v6020_v22 = vadd.f32 %v3249_v19, %v2960_v16  ;;  %v3251_v23 = vpop.f32.mrb[11].mxu1  ;;  %v4568_v16 = vcombine.high %v866_v1, %v870_v2  ;;  %v873_v19 = vld [vmem:[%s5663_s26 + $0x90] sm:$0xff] }
 0x1f4   : > { %3172 = vmatmul.mubr.bf16.gmra.mrb[116].mxu0 %v4785_v13  ;;  %v877_v20 = vld [vmem:[%s5663_s26 + $0xb0] sm:$0xff]  ;;  %v874_v23 = vld [vmem:[%s5663_s26 + $0x98] sm:$0xff] }
 0x1f5   : > { %3461 = vmatmul.mubr.bf16.gmra.mrb[116].mxu1 %v4787_v17  ;;  %3179 = vmatprep.mubr.bf16.mxu0 %v4794_v18 }
 0x1f6   : > { %3468 = vmatprep.mubr.bf16.mxu1 %v4796_v21 }
 0x1f7   : > { %v2965_v26 = vpop.f32.mrb[12].mxu0 }
 0x1f8   : > { %v3254_v29 = vpop.f32.mrb[12].mxu1  ;;  %v2967_v30 = vpop.f32.mrb[13].mxu0 }
 0x1f9   : > { %v6026_v32 = vadd.f32 %v3254_v29, %v2965_v26  ;;  %v3256_v33 = vpop.f32.mrb[13].mxu1  ;;  %v2968_v34 = vpop.f32.mrb[14].mxu0 }
 0x1fa   : > { %v3257_v37 = vpop.f32.mrb[14].mxu1  ;;  %v2970_v38 = vpop.f32.mrb[15].mxu0  ;;  %v4574_v33 = vcombine.high %v873_v19, %v877_v20 }
 0x1fb   : > { %v6028_v40 = vadd.f32 %v3257_v37, %v2968_v34  ;;  %v3259_v41 = vpop.f32.mrb[15].mxu1 }
 0x1fc   : > { %3180 = vmatmul.mubr.bf16.gmra.mrb[120].mxu0 %v4793_v31  ;;  %v4567_v31 = vcombine.low %v866_v1, %v870_v2  ;;  %v885_v41 = vld [vmem:[%s5663_s26 + $0xf0] sm:$0xff]  ;;  %v890_v1 = vld [vmem:[%s5663_s26 + $0x118] sm:$0xff] }
 0x1fd   : > { %3469 = vmatmul.mubr.bf16.gmra.mrb[120].mxu1 %v4795_v35  ;;  %3187 = vmatprep.mubr.bf16.mxu0 %v4802_v36  ;;  %v4576_v36 = vcombine.high %v874_v23, %v878_v24  ;;  %v894_v2 = vld [vmem:[%s5663_s26 + $0x138] sm:$0xff] }
 0x1fe   : > { %3476 = vmatprep.mubr.bf16.mxu1 %v4804_v39  ;;  %v881_v39 = vld [vmem:[%s5663_s26 + $0xd0] sm:$0xff] }
 0x1ff   : > { %v2973_v45 = vpop.f32.mrb[16].mxu0 }
 0x200   : > { %v3262_v48 = vpop.f32.mrb[16].mxu1  ;;  %v2975_v49 = vpop.f32.mrb[17].mxu0 }
 0x201   : > { %v6034_v52 = vadd.f32 %v3262_v48, %v2973_v45  ;;  %v3264_v53 = vpop.f32.mrb[17].mxu1  ;;  %v2976_v54 = vpop.f32.mrb[18].mxu0  ;;  %v886_v45 = vld [vmem:[%s5663_s26 + $0xf8] sm:$0xff]  ;;  %v4573_v48 = vcombine.low %v873_v19, %v877_v20 }
 0x202   : > { %v3265_v57 = vpop.f32.mrb[18].mxu1  ;;  %v2978_v58 = vpop.f32.mrb[19].mxu0 }
 0x203   : > { %v6036_v61 = vadd.f32 %v3265_v57, %v2976_v54  ;;  %v3267_v62 = vpop.f32.mrb[19].mxu1  ;;  %v4575_v54 = vcombine.low %v874_v23, %v878_v24  ;;  %v4584_v58 = vcombine.high %v882_v44, %v886_v45  ;;  %v901_v23 = vld [vmem:[%s5663_s26 + $0x170] sm:$0xff] }
 0x204   : > { %3188 = vmatmul.mubr.bf16.gmra.mrb[124].mxu0 %v4801_v51 }
 0x205   : > { %3477 = vmatmul.mubr.bf16.gmra.mrb[124].mxu1 %v4803_v55  ;;  %3517 = vmatprep.mubr.bf16.mxu0 %v4558_v56  ;;  %v4582_v55 = vcombine.high %v881_v39, %v885_v41 }
 0x206   : > { %3806 = vmatprep.mubr.bf16.mxu1 %v4560_v59 }
 0x207   : > { %v2981_v0 = vpop.f32.mrb[20].mxu0 }
 0x208   : > { %v3270_v5 = vpop.f32.mrb[20].mxu1  ;;  %v2983_v6 = vpop.f32.mrb[21].mxu0 }
 0x209   : > { %v6042_v8 = vadd.f32 %v3270_v5, %v2981_v0  ;;  %v3272_v9 = vpop.f32.mrb[21].mxu1  ;;  %v2984_v10 = vpop.f32.mrb[22].mxu0 }
 0x20a   : > { %v3273_v13 = vpop.f32.mrb[22].mxu1  ;;  %v2986_v15 = vpop.f32.mrb[23].mxu0 }
 0x20b   : > { %v6044_v17 = vadd.f32 %v3273_v13, %v2984_v10  ;;  %v3275_v18 = vpop.f32.mrb[23].mxu1  ;;  %v4590_v13 = vcombine.high %v889_v63, %v893_v4 }
 0x20c   : > { %3518 = vmatmul.mubr.bf16.vlgmr.msra.gmra.mrb[128].mxu0 %v4557_v7  ;;  %v4581_v7 = vcombine.low %v881_v39, %v885_v41  ;;  %v4592_v18 = vcombine.high %v890_v1, %v894_v2 }
 0x20d   : > { %3807 = vmatmul.mubr.bf16.vlgmr.msra.gmra.mrb[128].mxu1 %v4559_v11  ;;  %3525 = vmatprep.mubr.bf16.mxu0 %v4566_v12  ;;  %v4583_v12 = vcombine.low %v882_v44, %v886_v45  ;;  %v905_v45 = vld [vmem:[%s5663_s26 + $0x190] sm:$0xff] }
 0x20e   : > { %3814 = vmatprep.mubr.bf16.mxu1 %v4568_v16 }
 0x20f   : > { %v2989_v21 = vpop.f32.mrb[24].mxu0 }
 0x210   : > { %v3278_v25 = vpop.f32.mrb[24].mxu1  ;;  %v2991_v26 = vpop.f32.mrb[25].mxu0 }
 0x211   : > { %v6050_v28 = vadd.f32 %v3278_v25, %v2989_v21  ;;  %v3280_v29 = vpop.f32.mrb[25].mxu1  ;;  %v2992_v30 = vpop.f32.mrb[26].mxu0  ;;  %v897_v21 = vld [vmem:[%s5663_s26 + $0x150] sm:$0xff]  ;;  %v898_v25 = vld [vmem:[%s5663_s26 + $0x158] sm:$0xff] }
 0x212   : > { %v3281_v34 = vpop.f32.mrb[26].mxu1  ;;  %v2994_v35 = vpop.f32.mrb[27].mxu0  ;;  %v902_v26 = vld [vmem:[%s5663_s26 + $0x178] sm:$0xff] }
 0x213   : > { %v6052_v37 = vadd.f32 %v3281_v34, %v2992_v30  ;;  %v3283_v38 = vpop.f32.mrb[27].mxu1  ;;  %v4589_v30 = vcombine.low %v889_v63, %v893_v4  ;;  %v4591_v35 = vcombine.low %v890_v1, %v894_v2  ;;  %v4600_v41 = vcombine.high %v898_v25, %v902_v26 }
 0x214   : > { %3526 = vmatmul.mubr.bf16.gmra.mrb[132].mxu0 %v4565_v27 }
 0x215   : > { %3815 = vmatmul.mubr.bf16.gmra.mrb[132].mxu1 %v4567_v31  ;;  %3533 = vmatprep.mubr.bf16.mxu0 %v4574_v33 }
 0x216   : > { %3822 = vmatprep.mubr.bf16.mxu1 %v4576_v36  ;;  %v4598_v36 = vcombine.high %v897_v21, %v901_v23 }
 0x217   : > { %v2997_v43 = vpop.f32.mrb[28].mxu0 }
 0x218   : > { %v3286_v46 = vpop.f32.mrb[28].mxu1  ;;  %v2999_v47 = vpop.f32.mrb[29].mxu0 }
 0x219   : > { %v6058_v49 = vadd.f32 %v3286_v46, %v2997_v43  ;;  %v3288_v51 = vpop.f32.mrb[29].mxu1  ;;  %v3000_v53 = vpop.f32.mrb[30].mxu0  ;;  %v909_v46 = vld [vmem:[%s5663_s26 + $0x1b0] sm:$0xff] }
 0x21a   : > { %v3289_v56 = vpop.f32.mrb[30].mxu1  ;;  %v3002_v57 = vpop.f32.mrb[31].mxu0  ;;  %v910_v51 = vld [vmem:[%s5663_s26 + $0x1b8] sm:$0xff]  ;;  %v4606_v63 = vcombine.high %v905_v45, %v909_v46 }
 0x21b   : > { %v6060_v59 = vadd.f32 %v3289_v56, %v3000_v53  ;;  %v3291_v62 = vpop.f32.mrb[31].mxu1 }
 0x21c   : > { %3534 = vmatmul.mubr.bf16.gmra.mrb[136].mxu0 %v4573_v48  ;;  %v906_v48 = vld [vmem:[%s5663_s26 + $0x198] sm:$0xff]  ;;  %v4599_v62 = vcombine.low %v898_v25, %v902_v26 }
 0x21d   : > { %3823 = vmatmul.mubr.bf16.gmra.mrb[136].mxu1 %v4575_v54  ;;  %3541 = vmatprep.mubr.bf16.mxu0 %v4582_v55  ;;  %v4597_v55 = vcombine.low %v897_v21, %v901_v23  ;;  %v4608_v1 = vcombine.high %v906_v48, %v910_v51  ;;  %v4607_v23 = vcombine.low %v906_v48, %v910_v51 }
 0x21e   : > { %3830 = vmatprep.mubr.bf16.mxu1 %v4584_v58 }
 0x21f   : > { %v3005_v0 = vpop.f32.mrb[32].mxu0 }
 0x220   : > { %v3294_v5 = vpop.f32.mrb[32].mxu1  ;;  %v3007_v6 = vpop.f32.mrb[33].mxu0 }
 0x221   : > { %v6066_v9 = vadd.f32 %v3294_v5, %v3005_v0  ;;  %v3296_v10 = vpop.f32.mrb[33].mxu1  ;;  %v3008_v11 = vpop.f32.mrb[34].mxu0  ;;  %v913_v6 = vld [vmem:[%s5663_s26 + $0x1d0] sm:$0xff] }
 0x222   : > { %v3297_v15 = vpop.f32.mrb[34].mxu1  ;;  %v3010_v16 = vpop.f32.mrb[35].mxu0 }
 0x223   : > { %v6068_v19 = vadd.f32 %v3297_v15, %v3008_v11  ;;  %v3299_v20 = vpop.f32.mrb[35].mxu1  ;;  %v914_v11 = vld [vmem:[%s5663_s26 + $0x1d8] sm:$0xff]  ;;  %v4605_v16 = vcombine.low %v905_v45, %v909_v46 }
 0x224   : > { %3542 = vmatmul.mubr.bf16.gmra.mrb[140].mxu0 %v4581_v7  ;;  %v917_v7 = vld [vmem:[%s5663_s26 + $0x1f0] sm:$0xff] }
 0x225   : > { %3831 = vmatmul.mubr.bf16.gmra.mrb[140].mxu1 %v4583_v12  ;;  %3549 = vmatprep.mubr.bf16.mxu0 %v4590_v13  ;;  %v918_v12 = vld [vmem:[%s5663_s26 + $0x1f8] sm:$0xff] }
 0x226   : > { %3838 = vmatprep.mubr.bf16.mxu1 %v4592_v18  ;;  %v4615_v48 = vcombine.low %v914_v11, %v918_v12 }
 0x227   : > { %v3013_v24 = vpop.f32.mrb[36].mxu0 }
 0x228   : > { %v3302_v27 = vpop.f32.mrb[36].mxu1  ;;  %v3015_v29 = vpop.f32.mrb[37].mxu0 }
 0x229   : > { %v6074_v31 = vadd.f32 %v3302_v27, %v3013_v24  ;;  %v3304_v33 = vpop.f32.mrb[37].mxu1  ;;  %v3016_v34 = vpop.f32.mrb[38].mxu0  ;;  %v4614_v24 = vcombine.high %v913_v6, %v917_v7  ;;  %v4616_v27 = vcombine.high %v914_v11, %v918_v12 }
 0x22a   : > { %v3305_v38 = vpop.f32.mrb[38].mxu1  ;;  %v3018_v39 = vpop.f32.mrb[39].mxu0  ;;  %v921_v33 = vld [vmem:[%s5663_s26 + $0x210] sm:$0xff] }
 0x22b   : > { %v6076_v43 = vadd.f32 %v3305_v38, %v3016_v34  ;;  %v3307_v44 = vpop.f32.mrb[39].mxu1  ;;  %v925_v34 = vld [vmem:[%s5663_s26 + $0x230] sm:$0xff]  ;;  %v926_v38 = vld [vmem:[%s5663_s26 + $0x238] sm:$0xff] }
 0x22c   : > { %3550 = vmatmul.mubr.bf16.gmra.mrb[144].mxu0 %v4589_v30  ;;  %v4613_v44 = vcombine.low %v913_v6, %v917_v7  ;;  %v4622_v51 = vcombine.high %v921_v33, %v925_v34  ;;  %v4621_v7 = vcombine.low %v921_v33, %v925_v34  ;;  %v942_v33 = vld [vmem:[%s5663_s26 + $0x2b8] sm:$0xff] }
 0x22d   : > { %3839 = vmatmul.mubr.bf16.gmra.mrb[144].mxu1 %v4591_v35  ;;  %3557 = vmatprep.mubr.bf16.mxu0 %v4598_v36  ;;  %v922_v36 = vld [vmem:[%s5663_s26 + $0x218] sm:$0xff] }
 0x22e   : > { %3846 = vmatprep.mubr.bf16.mxu1 %v4600_v41 }
 0x22f   : > { %v3021_v47 = vpop.f32.mrb[40].mxu0 }
 0x230   : > { %v3310_v53 = vpop.f32.mrb[40].mxu1  ;;  %v3023_v54 = vpop.f32.mrb[41].mxu0 }
 0x231   : > { %v6082_v56 = vadd.f32 %v3310_v53, %v3021_v47  ;;  %v3312_v57 = vpop.f32.mrb[41].mxu1  ;;  %v3024_v58 = vpop.f32.mrb[42].mxu0 }
 0x232   : > { %v3313_v4 = vpop.f32.mrb[42].mxu1  ;;  %v3026_v0 = vpop.f32.mrb[43].mxu0 }
 0x233   : > { %v6084_v2 = vadd.f32 %v3313_v4, %v3024_v58  ;;  %v3315_v5 = vpop.f32.mrb[43].mxu1  ;;  %v930_v0 = vld [vmem:[%s5663_s26 + $0x258] sm:$0xff] }
 0x234   : > { %3558 = vmatmul.mubr.bf16.gmra.mrb[148].mxu0 %v4597_v55  ;;  %v4624_v55 = vcombine.high %v922_v36, %v926_v38 }
 0x235   : > { %3847 = vmatmul.mubr.bf16.gmra.mrb[148].mxu1 %v4599_v62  ;;  %3565 = vmatprep.mubr.bf16.mxu0 %v4606_v63  ;;  %v929_v62 = vld [vmem:[%s5663_s26 + $0x250] sm:$0xff] }
 0x236   : > { %3854 = vmatprep.mubr.bf16.mxu1 %v4608_v1  ;;  %v933_v63 = vld [vmem:[%s5663_s26 + $0x270] sm:$0xff]  ;;  %v934_v1 = vld [vmem:[%s5663_s26 + $0x278] sm:$0xff] }
 0x237   : > { %v3029_v10 = vpop.f32.mrb[44].mxu0 }
 0x238   : > { %v3318_v13 = vpop.f32.mrb[44].mxu1  ;;  %v3031_v15 = vpop.f32.mrb[45].mxu0 }
 0x239   : > { %v6090_v18 = vadd.f32 %v3318_v13, %v3029_v10  ;;  %v3320_v20 = vpop.f32.mrb[45].mxu1  ;;  %v3032_v21 = vpop.f32.mrb[46].mxu0  ;;  %v4623_v13 = vcombine.low %v922_v36, %v926_v38  ;;  %v4630_v15 = vcombine.high %v929_v62, %v933_v63  ;;  %v4629_v36 = vcombine.low %v929_v62, %v933_v63  ;;  %v946_v63 = vld [vmem:[%s5663_s26 + $0x2d8] sm:$0xff] }
 0x23a   : > { %v3321_v25 = vpop.f32.mrb[46].mxu1  ;;  %v3034_v26 = vpop.f32.mrb[47].mxu0 }
 0x23b   : > { %v6092_v29 = vadd.f32 %v3321_v25, %v3032_v21  ;;  %v3323_v30 = vpop.f32.mrb[47].mxu1  ;;  %v4632_v21 = vcombine.high %v930_v0, %v934_v1  ;;  %v937_v25 = vld [vmem:[%s5663_s26 + $0x290] sm:$0xff] }
 0x23c   : > { %3566 = vmatmul.mubr.bf16.gmra.mrb[152].mxu0 %v4605_v16  ;;  %v941_v26 = vld [vmem:[%s5663_s26 + $0x2b0] sm:$0xff]  ;;  %v938_v30 = vld [vmem:[%s5663_s26 + $0x298] sm:$0xff] }
 0x23d   : > { %3855 = vmatmul.mubr.bf16.gmra.mrb[152].mxu1 %v4607_v23  ;;  %3573 = vmatprep.mubr.bf16.mxu0 %v4614_v24 }
 0x23e   : > { %3862 = vmatprep.mubr.bf16.mxu1 %v4616_v27 }
 0x23f   : > { %v3037_v35 = vpop.f32.mrb[48].mxu0 }
 0x240   : > { %v3326_v39 = vpop.f32.mrb[48].mxu1  ;;  %v3039_v41 = vpop.f32.mrb[49].mxu0 }
 0x241   : > { %v6098_v45 = vadd.f32 %v3326_v39, %v3037_v35  ;;  %v3328_v46 = vpop.f32.mrb[49].mxu1  ;;  %v3040_v47 = vpop.f32.mrb[50].mxu0 }
 0x242   : > { %v3329_v53 = vpop.f32.mrb[50].mxu1  ;;  %v3042_v54 = vpop.f32.mrb[51].mxu0  ;;  %v4638_v46 = vcombine.high %v937_v25, %v941_v26 }
 0x243   : > { %v6100_v57 = vadd.f32 %v3329_v53, %v3040_v47  ;;  %v3331_v58 = vpop.f32.mrb[51].mxu1 }
 0x244   : > { %3574 = vmatmul.mubr.bf16.gmra.mrb[156].mxu0 %v4613_v44  ;;  %v4631_v44 = vcombine.low %v930_v0, %v934_v1  ;;  %v949_v58 = vld [vmem:[%s5663_s26 + $0x2f0] sm:$0xff]  ;;  %v4637_v0 = vcombine.low %v937_v25, %v941_v26 }
 0x245   : > { %3863 = vmatmul.mubr.bf16.gmra.mrb[156].mxu1 %v4615_v48  ;;  %3581 = vmatprep.mubr.bf16.mxu0 %v4622_v51  ;;  %v4640_v51 = vcombine.high %v938_v30, %v942_v33  ;;  %v953_v25 = vld [vmem:[%s5663_s26 + $0x310] sm:$0xff] }
 0x246   : > { %3870 = vmatprep.mubr.bf16.mxu1 %v4624_v55  ;;  %v945_v55 = vld [vmem:[%s5663_s26 + $0x2d0] sm:$0xff] }
 0x247   : > { %v3045_v4 = vpop.f32.mrb[52].mxu0  ;;  %v957_v26 = vld [vmem:[%s5663_s26 + $0x330] sm:$0xff] }
 0x248   : > { %v3334_v5 = vpop.f32.mrb[52].mxu1  ;;  %v3047_v6 = vpop.f32.mrb[53].mxu0 }
 0x249   : > { %v6106_v10 = vadd.f32 %v3334_v5, %v3045_v4  ;;  %v3336_v11 = vpop.f32.mrb[53].mxu1  ;;  %v3048_v12 = vpop.f32.mrb[54].mxu0  ;;  %v950_v4 = vld [vmem:[%s5663_s26 + $0x2f8] sm:$0xff] }
 0x24a   : > { %v3337_v16 = vpop.f32.mrb[54].mxu1  ;;  %v3050_v20 = vpop.f32.mrb[55].mxu0 }
 0x24b   : > { %v6108_v23 = vadd.f32 %v3337_v16, %v3048_v12  ;;  %v3339_v24 = vpop.f32.mrb[55].mxu1  ;;  %v4639_v12 = vcombine.low %v938_v30, %v942_v33  ;;  %v4648_v20 = vcombine.high %v946_v63, %v950_v4  ;;  %v4645_v30 = vcombine.low %v945_v55, %v949_v58 }
 0x24c   : > { %3582 = vmatmul.mubr.bf16.gmra.mrb[160].mxu0 %v4621_v7 }
 0x24d   : > { %3871 = vmatmul.mubr.bf16.gmra.mrb[160].mxu1 %v4623_v13  ;;  %3589 = vmatprep.mubr.bf16.mxu0 %v4630_v15  ;;  %v4646_v13 = vcombine.high %v945_v55, %v949_v58  ;;  %v961_v55 = vld [vmem:[%s5663_s26 + $0x350] sm:$0xff] }
 0x24e   : > { %3878 = vmatprep.mubr.bf16.mxu1 %v4632_v21  ;;  %v965_v58 = vld [vmem:[%s5663_s26 + $0x370] sm:$0xff] }
 0x24f   : > { %v3053_v27 = vpop.f32.mrb[56].mxu0 }
 0x250   : > { %v3342_v34 = vpop.f32.mrb[56].mxu1  ;;  %v3055_v35 = vpop.f32.mrb[57].mxu0 }
 0x251   : > { %v6114_v38 = vadd.f32 %v3342_v34, %v3053_v27  ;;  %v3344_v39 = vpop.f32.mrb[57].mxu1  ;;  %v3056_v41 = vpop.f32.mrb[58].mxu0  ;;  %v954_v34 = vld [vmem:[%s5663_s26 + $0x318] sm:$0xff] }
 0x252   : > { %v3345_v47 = vpop.f32.mrb[58].mxu1  ;;  %v3058_v48 = vpop.f32.mrb[59].mxu0  ;;  %v958_v35 = vld [vmem:[%s5663_s26 + $0x338] sm:$0xff] }
 0x253   : > { %v6116_v53 = vadd.f32 %v3345_v47, %v3056_v41  ;;  %v3347_v54 = vpop.f32.mrb[59].mxu1  ;;  %v4654_v47 = vcombine.high %v953_v25, %v957_v26 }
 0x254   : > { %3590 = vmatmul.mubr.bf16.gmra.mrb[164].mxu0 %v4629_v36  ;;  %v4656_v54 = vcombine.high %v954_v34, %v958_v35 }
 0x255   : > { %3879 = vmatmul.mubr.bf16.gmra.mrb[164].mxu1 %v4631_v44  ;;  %3597 = vmatprep.mubr.bf16.mxu0 %v4638_v46  ;;  %v4647_v46 = vcombine.low %v946_v63, %v950_v4  ;;  %v4653_v63 = vcombine.low %v953_v25, %v957_v26  ;;  %v969_v25 = vld [vmem:[%s5663_s26 + $0x390] sm:$0xff] }
 0x256   : > { %3886 = vmatprep.mubr.bf16.mxu1 %v4640_v51  ;;  %v973_v26 = vld [vmem:[%s5663_s26 + $0x3b0] sm:$0xff] }
 0x257   : > { %v3061_v62 = vpop.f32.mrb[60].mxu0 }
 0x258   : > { %v3350_v5 = vpop.f32.mrb[60].mxu1  ;;  %v3063_v6 = vpop.f32.mrb[61].mxu0 }
 0x259   : > { %v6122_v1 = vadd.f32 %v3350_v5, %v3061_v62  ;;  %v3352_v7 = vpop.f32.mrb[61].mxu1  ;;  %v3064_v11 = vpop.f32.mrb[62].mxu0 }
 0x25a   : > { %v3353_v15 = vpop.f32.mrb[62].mxu1  ;;  %v3066_v16 = vpop.f32.mrb[63].mxu0  ;;  %v966_v7 = vld [vmem:[%s5663_s26 + $0x378] sm:$0xff] }
 0x25b   : > { %v6124_v21 = vadd.f32 %v3353_v15, %v3064_v11  ;;  %v3355_v24 = vpop.f32.mrb[63].mxu1  ;;  %v4655_v16 = vcombine.low %v954_v34, %v958_v35  ;;  %v4661_v34 = vcombine.low %v961_v55, %v965_v58 }
 0x25c   : > { %3598 = vmatmul.mubr.bf16.gmra.mrb[168].mxu0 %v4637_v0  ;;  %v962_v0 = vld [vmem:[%s5663_s26 + $0x358] sm:$0xff] }
 0x25d   : > { %3887 = vmatmul.mubr.bf16.gmra.mrb[168].mxu1 %v4639_v12  ;;  %3605 = vmatprep.mubr.bf16.mxu0 %v4646_v13 }
 0x25e   : > { %3894 = vmatprep.mubr.bf16.mxu1 %v4648_v20  ;;  %v4662_v20 = vcombine.high %v961_v55, %v965_v58  ;;  %v977_v55 = vld [vmem:[%s5663_s26 + $0x3d0] sm:$0xff] }
 0x25f   : > { %v3069_v27 = vpop.f32.mrb[64].mxu0  ;;  %v981_v58 = vld [vmem:[%s5663_s26 + $0x3f0] sm:$0xff] }
 0x260   : > { %v3358_v36 = vpop.f32.mrb[64].mxu1  ;;  %v3071_v39 = vpop.f32.mrb[65].mxu0 }
 0x261   : > { %v6130_v33 = vadd.f32 %v3358_v36, %v3069_v27  ;;  %v3360_v41 = vpop.f32.mrb[65].mxu1  ;;  %v3072_v44 = vpop.f32.mrb[66].mxu0  ;;  %v4664_v36 = vcombine.high %v962_v0, %v966_v7 }
 0x262   : > { %v3361_v48 = vpop.f32.mrb[66].mxu1  ;;  %v3074_v51 = vpop.f32.mrb[67].mxu0 }
 0x263   : > { %v6132_v62 = vadd.f32 %v3361_v48, %v3072_v44  ;;  %v3363_v5 = vpop.f32.mrb[67].mxu1  ;;  %v970_v44 = vld [vmem:[%s5663_s26 + $0x398] sm:$0xff] }
 0x264   : > { %3606 = vmatmul.mubr.bf16.gmra.mrb[172].mxu0 %v4645_v30  ;;  %v4663_v5 = vcombine.low %v962_v0, %v966_v7  ;;  %v4669_v0 = vcombine.low %v969_v25, %v973_v26 }
 0x265   : > { %3895 = vmatmul.mubr.bf16.gmra.mrb[172].mxu1 %v4647_v46  ;;  %3613 = vmatprep.mubr.bf16.mxu0 %v4654_v47  ;;  %v974_v46 = vld [vmem:[%s5663_s26 + $0x3b8] sm:$0xff] }
 0x266   : > { %3902 = vmatprep.mubr.bf16.mxu1 %v4656_v54 }
 0x267   : > { %v3077_v6 = vpop.f32.mrb[68].mxu0 }
 0x268   : > { %v3366_v11 = vpop.f32.mrb[68].mxu1  ;;  %v3079_v12 = vpop.f32.mrb[69].mxu0 }
 0x269   : > { %v6138_v4 = vadd.f32 %v3366_v11, %v3077_v6  ;;  %v3368_v13 = vpop.f32.mrb[69].mxu1  ;;  %v3080_v15 = vpop.f32.mrb[70].mxu0  ;;  %v4670_v6 = vcombine.high %v969_v25, %v973_v26  ;;  %v985_v25 = vld [vmem:[%s5663_s26 + $0x410] sm:$0xff] }
 0x26a   : > { %v3369_v24 = vpop.f32.mrb[70].mxu1  ;;  %v3082_v27 = vpop.f32.mrb[71].mxu0  ;;  %v989_v26 = vld [vmem:[%s5663_s26 + $0x430] sm:$0xff] }
 0x26b   : > { %v6140_v39 = vadd.f32 %v3369_v24, %v3080_v15  ;;  %v3371_v30 = vpop.f32.mrb[71].mxu1  ;;  %v982_v24 = vld [vmem:[%s5663_s26 + $0x3f8] sm:$0xff] }
 0x26c   : > { %3614 = vmatmul.mubr.bf16.gmra.mrb[176].mxu0 %v4653_v63  ;;  %v4672_v63 = vcombine.high %v970_v44, %v974_v46 }
 0x26d   : > { %3903 = vmatmul.mubr.bf16.gmra.mrb[176].mxu1 %v4655_v16  ;;  %3621 = vmatprep.mubr.bf16.mxu0 %v4662_v20  ;;  %v978_v20 = vld [vmem:[%s5663_s26 + $0x3d8] sm:$0xff] }
 0x26e   : > { %3910 = vmatprep.mubr.bf16.mxu1 %v4664_v36 }
 0x26f   : > { %v3085_v41 = vpop.f32.mrb[72].mxu0 }
 0x270   : > { %v3374_v47 = vpop.f32.mrb[72].mxu1  ;;  %v3087_v48 = vpop.f32.mrb[73].mxu0 }
 0x271   : > { %v6146_v35 = vadd.f32 %v3374_v47, %v3085_v41  ;;  %v3376_v51 = vpop.f32.mrb[73].mxu1  ;;  %v3088_v54 = vpop.f32.mrb[74].mxu0  ;;  %v4671_v47 = vcombine.low %v970_v44, %v974_v46  ;;  %v4678_v48 = vcombine.high %v977_v55, %v981_v58  ;;  %v4677_v44 = vcombine.low %v977_v55, %v981_v58  ;;  %v993_v55 = vld [vmem:[%s5663_s26 + $0x450] sm:$0xff] }
 0x272   : > { %v3377_v11 = vpop.f32.mrb[74].mxu1  ;;  %v3090_v12 = vpop.f32.mrb[75].mxu0  ;;  %v997_v58 = vld [vmem:[%s5663_s26 + $0x470] sm:$0xff] }
 0x273   : > { %v6148_v13 = vadd.f32 %v3377_v11, %v3088_v54  ;;  %v3379_v15 = vpop.f32.mrb[75].mxu1  ;;  %v4680_v54 = vcombine.high %v978_v20, %v982_v24  ;;  %v986_v12 = vld [vmem:[%s5663_s26 + $0x418] sm:$0xff] }
 0x274   : > { %3622 = vmatmul.mubr.bf16.gmra.mrb[180].mxu0 %v4661_v34 }
 0x275   : > { %3911 = vmatmul.mubr.bf16.gmra.mrb[180].mxu1 %v4663_v5  ;;  %3629 = vmatprep.mubr.bf16.mxu0 %v4670_v6 }
 0x276   : > { %3918 = vmatprep.mubr.bf16.mxu1 %v4672_v63  ;;  %v990_v63 = vld [vmem:[%s5663_s26 + $0x438] sm:$0xff] }
 0x277   : > { %v3093_v16 = vpop.f32.mrb[76].mxu0 }
 0x278   : > { %v3382_v27 = vpop.f32.mrb[76].mxu1  ;;  %v3095_v36 = vpop.f32.mrb[77].mxu0 }
 0x279   : > { %v6154_v7 = vadd.f32 %v3382_v27, %v3093_v16  ;;  %v3384_v30 = vpop.f32.mrb[77].mxu1  ;;  %v3096_v41 = vpop.f32.mrb[78].mxu0 }
 0x27a   : > { %v3385_v34 = vpop.f32.mrb[78].mxu1  ;;  %v3098_v51 = vpop.f32.mrb[79].mxu0  ;;  %v4686_v30 = vcombine.high %v985_v25, %v989_v26 }
 0x27b   : > { %v6156_v5 = vadd.f32 %v3385_v34, %v3096_v41  ;;  %v3387_v6 = vpop.f32.mrb[79].mxu1 }
 0x27c   : > { %3630 = vmatmul.mubr.bf16.gmra.mrb[184].mxu0 %v4669_v0  ;;  %v4679_v0 = vcombine.low %v978_v20, %v982_v24  ;;  %v994_v6 = vld [vmem:[%s5663_s26 + $0x458] sm:$0xff]  ;;  %v4685_v20 = vcombine.low %v985_v25, %v989_v26  ;;  %v1001_v25 = vld [vmem:[%s5663_s26 + $0x490] sm:$0xff] }
 0x27d   : > { %3919 = vmatmul.mubr.bf16.gmra.mrb[184].mxu1 %v4671_v47  ;;  %3637 = vmatprep.mubr.bf16.mxu0 %v4678_v48  ;;  %v4688_v48 = vcombine.high %v986_v12, %v990_v63  ;;  %v1005_v26 = vld [vmem:[%s5663_s26 + $0x4b0] sm:$0xff] }
 0x27e   : > { %3926 = vmatprep.mubr.bf16.mxu1 %v4680_v54 }
 0x27f   : > { %v3101_v11 = vpop.f32.mrb[80].mxu0 }
 0x280   : > { %v3390_v15 = vpop.f32.mrb[80].mxu1  ;;  %v3103_v16 = vpop.f32.mrb[81].mxu0 }
 0x281   : > { %v6162_v46 = vadd.f32 %v3390_v15, %v3101_v11  ;;  %v3392_v27 = vpop.f32.mrb[81].mxu1  ;;  %v3104_v36 = vpop.f32.mrb[82].mxu0  ;;  %v998_v11 = vld [vmem:[%s5663_s26 + $0x478] sm:$0xff] }
 0x282   : > { %v3393_v41 = vpop.f32.mrb[82].mxu1  ;;  %v3106_v47 = vpop.f32.mrb[83].mxu0 }
 0x283   : > { %6461 = vst [vmem:[#allocation4_spill] sm:$0xff] %v6162_v46  ;;  %v6164_v34 = vadd.f32 %v3393_v41, %v3104_v36  ;;  %v3395_v51 = vpop.f32.mrb[83].mxu1  ;;  %v4696_v47 = vcombine.high %v994_v6, %v998_v11 }
 0x284   : > { %3638 = vmatmul.mubr.bf16.gmra.mrb[188].mxu0 %v4677_v44  ;;  %v4687_v44 = vcombine.low %v986_v12, %v990_v63  ;;  %v4693_v12 = vcombine.low %v993_v55, %v997_v58 }
 0x285   : > { %6462 = vst [vmem:[#allocation5_spill] sm:$0xff] %v6164_v34  ;;  %3927 = vmatmul.mubr.bf16.gmra.mrb[188].mxu1 %v4679_v0  ;;  %3645 = vmatprep.mubr.bf16.mxu0 %v4686_v30  ;;  %v4694_v0 = vcombine.high %v993_v55, %v997_v58  ;;  %v1009_v55 = vld [vmem:[%s5663_s26 + $0x4d0] sm:$0xff]  ;;  %v791_v34 = vld [vmem:[#allocation2] sm:$0xff] }
 0x286   : > { %3934 = vmatprep.mubr.bf16.mxu1 %v4688_v48  ;;  %v1013_v58 = vld [vmem:[%s5663_s26 + $0x4f0] sm:$0xff] }
 0x287   : > { %v3109_v54 = vpop.f32.mrb[84].mxu0 }
 0x288   : > { %v3398_v15 = vpop.f32.mrb[84].mxu1  ;;  %v3111_v16 = vpop.f32.mrb[85].mxu0 }
 0x289   : > { %v6170_v24 = vadd.f32 %v3398_v15, %v3109_v54  ;;  %v3400_v27 = vpop.f32.mrb[85].mxu1  ;;  %v3112_v36 = vpop.f32.mrb[86].mxu0  ;;  %v1002_v15 = vld [vmem:[%s5663_s26 + $0x498] sm:$0xff] }
 0x28a   : > { %v3401_v30 = vpop.f32.mrb[86].mxu1  ;;  %v3114_v41 = vpop.f32.mrb[87].mxu0  ;;  %v1006_v16 = vld [vmem:[%s5663_s26 + $0x4b8] sm:$0xff] }
 0x28b   : > { %6463 = vst [vmem:[#allocation6_spill] sm:$0xff] %v6170_v24  ;;  %v6172_v48 = vadd.f32 %v3401_v30, %v3112_v36  ;;  %v3403_v51 = vpop.f32.mrb[87].mxu1 }
 0x28c   : > { %3646 = vmatmul.mubr.bf16.gmra.mrb[192].mxu0 %v4685_v20  ;;  %v4695_v20 = vcombine.low %v994_v6, %v998_v11  ;;  %v4701_v6 = vcombine.low %v1001_v25, %v1005_v26 }
 0x28d   : > { %6464 = vst [vmem:[#allocation7_spill] sm:$0xff] %v6172_v48  ;;  %3935 = vmatmul.mubr.bf16.gmra.mrb[192].mxu1 %v4687_v44  ;;  %3653 = vmatprep.mubr.bf16.mxu0 %v4694_v0  ;;  %v4702_v44 = vcombine.high %v1001_v25, %v1005_v26  ;;  %v1017_v25 = vld [vmem:[%s5663_s26 + $0x510] sm:$0xff] }
 0x28e   : > { %3942 = vmatprep.mubr.bf16.mxu1 %v4696_v47  ;;  %v4704_v47 = vcombine.high %v1002_v15, %v1006_v16  ;;  %v1021_v26 = vld [vmem:[%s5663_s26 + $0x530] sm:$0xff] }
 0x28f   : > { %v3117_v54 = vpop.f32.mrb[88].mxu0 }
 0x290   : > { %v3406_v27 = vpop.f32.mrb[88].mxu1  ;;  %v3119_v24 = vpop.f32.mrb[89].mxu0 }
 0x291   : > { %v6178_v63 = vadd.f32 %v3406_v27, %v3117_v54  ;;  %v3408_v41 = vpop.f32.mrb[89].mxu1  ;;  %v3120_v36 = vpop.f32.mrb[90].mxu0  ;;  %v1010_v54 = vld [vmem:[%s5663_s26 + $0x4d8] sm:$0xff] }
 0x292   : > { %v3409_v0 = vpop.f32.mrb[90].mxu1  ;;  %v3122_v30 = vpop.f32.mrb[91].mxu0  ;;  %v1014_v27 = vld [vmem:[%s5663_s26 + $0x4f8] sm:$0xff] }
 0x293   : > { %6465 = vst [vmem:[#allocation8_spill] sm:$0xff] %v6178_v63  ;;  %v6180_v51 = vadd.f32 %v3409_v0, %v3120_v36  ;;  %v3411_v48 = vpop.f32.mrb[91].mxu1  ;;  %v4712_v0 = vcombine.high %v1010_v54, %v1014_v27 }
 0x294   : > { %3654 = vmatmul.mubr.bf16.gmra.mrb[196].mxu0 %v4693_v12  ;;  %v4703_v48 = vcombine.low %v1002_v15, %v1006_v16  ;;  %v4710_v12 = vcombine.high %v1009_v55, %v1013_v58  ;;  %v4709_v15 = vcombine.low %v1009_v55, %v1013_v58  ;;  %v1025_v55 = vld [vmem:[%s5663_s26 + $0x550] sm:$0xff] }
 0x295   : > { %6466 = vst [vmem:[#allocation9_spill] sm:$0xff] %v6180_v51  ;;  %3943 = vmatmul.mubr.bf16.gmra.mrb[196].mxu1 %v4695_v20  ;;  %3661 = vmatprep.mubr.bf16.mxu0 %v4702_v44  ;;  %v1029_v58 = vld [vmem:[%s5663_s26 + $0x570] sm:$0xff] }
 0x296   : > { %3950 = vmatprep.mubr.bf16.mxu1 %v4704_v47 }
 0x297   : > { %v3125_v24 = vpop.f32.mrb[92].mxu0 }
 0x298   : > { %v3414_v41 = vpop.f32.mrb[92].mxu1  ;;  %v3127_v63 = vpop.f32.mrb[93].mxu0 }
 0x299   : > { %v6186_v11 = vadd.f32 %v3414_v41, %v3125_v24  ;;  %v3416_v30 = vpop.f32.mrb[93].mxu1  ;;  %v3128_v36 = vpop.f32.mrb[94].mxu0  ;;  %v1018_v24 = vld [vmem:[%s5663_s26 + $0x518] sm:$0xff] }
 0x29a   : > { %v3417_v20 = vpop.f32.mrb[94].mxu1  ;;  %v3130_v44 = vpop.f32.mrb[95].mxu0  ;;  %v1022_v41 = vld [vmem:[%s5663_s26 + $0x538] sm:$0xff] }
 0x29b   : > { %6467 = vst [vmem:[#allocation10_spill] sm:$0xff] %v6186_v11  ;;  %v6188_v47 = vadd.f32 %v3417_v20, %v3128_v36  ;;  %v3419_v51 = vpop.f32.mrb[95].mxu1  ;;  %v4720_v20 = vcombine.high %v1018_v24, %v1022_v41 }
 0x29c   : > { %3662 = vmatmul.mubr.bf16.gmra.mrb[200].mxu0 %v4701_v6  ;;  %v4711_v51 = vcombine.low %v1010_v54, %v1014_v27  ;;  %v4718_v6 = vcombine.high %v1017_v25, %v1021_v26  ;;  %v4717_v54 = vcombine.low %v1017_v25, %v1021_v26  ;;  %v1033_v25 = vld [vmem:[%s5663_s26 + $0x590] sm:$0xff] }
 0x29d   : > { %6468 = vst [vmem:[#allocation11_spill] sm:$0xff] %v6188_v47  ;;  %3951 = vmatmul.mubr.bf16.gmra.mrb[200].mxu1 %v4703_v48  ;;  %3669 = vmatprep.mubr.bf16.mxu0 %v4710_v12  ;;  %v1037_v26 = vld [vmem:[%s5663_s26 + $0x5b0] sm:$0xff] }
 0x29e   : > { %3958 = vmatprep.mubr.bf16.mxu1 %v4712_v0 }
 0x29f   : > { %v3133_v63 = vpop.f32.mrb[96].mxu0 }
 0x2a0   : > { %v3422_v30 = vpop.f32.mrb[96].mxu1  ;;  %v3135_v11 = vpop.f32.mrb[97].mxu0 }
 0x2a1   : > { %v6194_v16 = vadd.f32 %v3422_v30, %v3133_v63  ;;  %v3424_v44 = vpop.f32.mrb[97].mxu1  ;;  %v3136_v36 = vpop.f32.mrb[98].mxu0  ;;  %v1026_v63 = vld [vmem:[%s5663_s26 + $0x558] sm:$0xff] }
 0x2a2   : > { %v3425_v48 = vpop.f32.mrb[98].mxu1  ;;  %v3138_v12 = vpop.f32.mrb[99].mxu0  ;;  %v1030_v30 = vld [vmem:[%s5663_s26 + $0x578] sm:$0xff] }
 0x2a3   : > { %6469 = vst [vmem:[#allocation12_spill] sm:$0xff] %v6194_v16  ;;  %v6196_v0 = vadd.f32 %v3425_v48, %v3136_v36  ;;  %v3427_v47 = vpop.f32.mrb[99].mxu1  ;;  %v4728_v48 = vcombine.high %v1026_v63, %v1030_v30 }
 0x2a4   : > { %3670 = vmatmul.mubr.bf16.gmra.mrb[204].mxu0 %v4709_v15  ;;  %v4719_v47 = vcombine.low %v1018_v24, %v1022_v41  ;;  %v4726_v15 = vcombine.high %v1025_v55, %v1029_v58  ;;  %v4725_v24 = vcombine.low %v1025_v55, %v1029_v58  ;;  %v1041_v55 = vld [vmem:[%s5663_s26 + $0x5d0] sm:$0xff] }
 0x2a5   : > { %6470 = vst [vmem:[#allocation13_spill] sm:$0xff] %v6196_v0  ;;  %3959 = vmatmul.mubr.bf16.gmra.mrb[204].mxu1 %v4711_v51  ;;  %3677 = vmatprep.mubr.bf16.mxu0 %v4718_v6  ;;  %v1045_v58 = vld [vmem:[%s5663_s26 + $0x5f0] sm:$0xff] }
 0x2a6   : > { %3966 = vmatprep.mubr.bf16.mxu1 %v4720_v20 }
 0x2a7   : > { %v3141_v11 = vpop.f32.mrb[100].mxu0 }
 0x2a8   : > { %v3430_v44 = vpop.f32.mrb[100].mxu1  ;;  %v3143_v16 = vpop.f32.mrb[101].mxu0 }
 0x2a9   : > { %v6202_v27 = vadd.f32 %v3430_v44, %v3141_v11  ;;  %v3432_v12 = vpop.f32.mrb[101].mxu1  ;;  %v3144_v36 = vpop.f32.mrb[102].mxu0  ;;  %v1034_v11 = vld [vmem:[%s5663_s26 + $0x598] sm:$0xff] }
 0x2aa   : > { %v3433_v51 = vpop.f32.mrb[102].mxu1  ;;  %v3146_v6 = vpop.f32.mrb[103].mxu0  ;;  %v1038_v44 = vld [vmem:[%s5663_s26 + $0x5b8] sm:$0xff] }
 0x2ab   : > { %6471 = vst [vmem:[#allocation14_spill] sm:$0xff] %v6202_v27  ;;  %v6204_v20 = vadd.f32 %v3433_v51, %v3144_v36  ;;  %v3435_v0 = vpop.f32.mrb[103].mxu1  ;;  %v4736_v51 = vcombine.high %v1034_v11, %v1038_v44 }
 0x2ac   : > { %3678 = vmatmul.mubr.bf16.gmra.mrb[208].mxu0 %v4717_v54  ;;  %v4727_v0 = vcombine.low %v1026_v63, %v1030_v30  ;;  %v4734_v54 = vcombine.high %v1033_v25, %v1037_v26  ;;  %v4733_v63 = vcombine.low %v1033_v25, %v1037_v26  ;;  %v1049_v25 = vld [vmem:[%s5663_s26 + $0x610] sm:$0xff] }
 0x2ad   : > { %6472 = vst [vmem:[#allocation15_spill] sm:$0xff] %v6204_v20  ;;  %3967 = vmatmul.mubr.bf16.gmra.mrb[208].mxu1 %v4719_v47  ;;  %3685 = vmatprep.mubr.bf16.mxu0 %v4726_v15  ;;  %v1053_v26 = vld [vmem:[%s5663_s26 + $0x630] sm:$0xff] }
 0x2ae   : > { %3974 = vmatprep.mubr.bf16.mxu1 %v4728_v48 }
 0x2af   : > { %v3149_v16 = vpop.f32.mrb[104].mxu0 }
 0x2b0   : > { %v3438_v12 = vpop.f32.mrb[104].mxu1  ;;  %v3151_v27 = vpop.f32.mrb[105].mxu0 }
 0x2b1   : > { %v6210_v41 = vadd.f32 %v3438_v12, %v3149_v16  ;;  %v3440_v6 = vpop.f32.mrb[105].mxu1  ;;  %v3152_v36 = vpop.f32.mrb[106].mxu0  ;;  %v1042_v16 = vld [vmem:[%s5663_s26 + $0x5d8] sm:$0xff] }
 0x2b2   : > { %v3441_v47 = vpop.f32.mrb[106].mxu1  ;;  %v3154_v15 = vpop.f32.mrb[107].mxu0  ;;  %v1046_v12 = vld [vmem:[%s5663_s26 + $0x5f8] sm:$0xff] }
 0x2b3   : > { %6473 = vst [vmem:[#allocation16_spill] sm:$0xff] %v6210_v41  ;;  %v6212_v48 = vadd.f32 %v3441_v47, %v3152_v36  ;;  %v3443_v20 = vpop.f32.mrb[107].mxu1  ;;  %v4744_v47 = vcombine.high %v1042_v16, %v1046_v12 }
 0x2b4   : > { %3686 = vmatmul.mubr.bf16.gmra.mrb[212].mxu0 %v4725_v24  ;;  %v4735_v20 = vcombine.low %v1034_v11, %v1038_v44  ;;  %v4742_v24 = vcombine.high %v1041_v55, %v1045_v58  ;;  %v4741_v11 = vcombine.low %v1041_v55, %v1045_v58  ;;  %v1057_v55 = vld [vmem:[%s5663_s26 + $0x650] sm:$0xff] }
 0x2b5   : > { %6474 = vst [vmem:[#allocation17_spill] sm:$0xff] %v6212_v48  ;;  %3975 = vmatmul.mubr.bf16.gmra.mrb[212].mxu1 %v4727_v0  ;;  %3693 = vmatprep.mubr.bf16.mxu0 %v4734_v54  ;;  %v1061_v58 = vld [vmem:[%s5663_s26 + $0x670] sm:$0xff] }
 0x2b6   : > { %3982 = vmatprep.mubr.bf16.mxu1 %v4736_v51 }
 0x2b7   : > { %v3157_v27 = vpop.f32.mrb[108].mxu0 }
 0x2b8   : > { %v3446_v6 = vpop.f32.mrb[108].mxu1  ;;  %v3159_v41 = vpop.f32.mrb[109].mxu0 }
 0x2b9   : > { %v6218_v30 = vadd.f32 %v3446_v6, %v3157_v27  ;;  %v3448_v15 = vpop.f32.mrb[109].mxu1  ;;  %v3160_v36 = vpop.f32.mrb[110].mxu0  ;;  %v1050_v27 = vld [vmem:[%s5663_s26 + $0x618] sm:$0xff] }
 0x2ba   : > { %v3449_v0 = vpop.f32.mrb[110].mxu1  ;;  %v3162_v54 = vpop.f32.mrb[111].mxu0  ;;  %v1054_v6 = vld [vmem:[%s5663_s26 + $0x638] sm:$0xff] }
 0x2bb   : > { %6475 = vst [vmem:[#allocation18_spill] sm:$0xff] %v6218_v30  ;;  %v6220_v51 = vadd.f32 %v3449_v0, %v3160_v36  ;;  %v3451_v48 = vpop.f32.mrb[111].mxu1  ;;  %v4752_v0 = vcombine.high %v1050_v27, %v1054_v6 }
 0x2bc   : > { %3694 = vmatmul.mubr.bf16.gmra.mrb[216].mxu0 %v4733_v63  ;;  %v4743_v48 = vcombine.low %v1042_v16, %v1046_v12  ;;  %v4750_v63 = vcombine.high %v1049_v25, %v1053_v26  ;;  %v4749_v16 = vcombine.low %v1049_v25, %v1053_v26  ;;  %v1065_v25 = vld [vmem:[%s5663_s26 + $0x690] sm:$0xff] }
 0x2bd   : > { %6476 = vst [vmem:[#allocation19_spill] sm:$0xff] %v6220_v51  ;;  %3983 = vmatmul.mubr.bf16.gmra.mrb[216].mxu1 %v4735_v20  ;;  %3701 = vmatprep.mubr.bf16.mxu0 %v4742_v24  ;;  %v1069_v26 = vld [vmem:[%s5663_s26 + $0x6b0] sm:$0xff] }
 0x2be   : > { %3990 = vmatprep.mubr.bf16.mxu1 %v4744_v47 }
 0x2bf   : > { %v3165_v41 = vpop.f32.mrb[112].mxu0 }
 0x2c0   : > { %v3454_v15 = vpop.f32.mrb[112].mxu1  ;;  %v3167_v30 = vpop.f32.mrb[113].mxu0 }
 0x2c1   : > { %v6226_v44 = vadd.f32 %v3454_v15, %v3165_v41  ;;  %v3456_v54 = vpop.f32.mrb[113].mxu1  ;;  %v3168_v36 = vpop.f32.mrb[114].mxu0  ;;  %v1058_v41 = vld [vmem:[%s5663_s26 + $0x658] sm:$0xff] }
 0x2c2   : > { %v3457_v20 = vpop.f32.mrb[114].mxu1  ;;  %v3170_v24 = vpop.f32.mrb[115].mxu0  ;;  %v1062_v15 = vld [vmem:[%s5663_s26 + $0x678] sm:$0xff] }
 0x2c3   : > { %6477 = vst [vmem:[#allocation20_spill] sm:$0xff] %v6226_v44  ;;  %v6228_v47 = vadd.f32 %v3457_v20, %v3168_v36  ;;  %v3459_v51 = vpop.f32.mrb[115].mxu1  ;;  %v4760_v20 = vcombine.high %v1058_v41, %v1062_v15 }
 0x2c4   : > { %3702 = vmatmul.mubr.bf16.gmra.mrb[220].mxu0 %v4741_v11  ;;  %v4751_v51 = vcombine.low %v1050_v27, %v1054_v6  ;;  %v4758_v11 = vcombine.high %v1057_v55, %v1061_v58  ;;  %v4757_v27 = vcombine.low %v1057_v55, %v1061_v58  ;;  %v1073_v55 = vld [vmem:[%s5663_s26 + $0x6d0] sm:$0xff] }
 0x2c5   : > { %6478 = vst [vmem:[#allocation21_spill] sm:$0xff] %v6228_v47  ;;  %3991 = vmatmul.mubr.bf16.gmra.mrb[220].mxu1 %v4743_v48  ;;  %3709 = vmatprep.mubr.bf16.mxu0 %v4750_v63  ;;  %v1077_v58 = vld [vmem:[%s5663_s26 + $0x6f0] sm:$0xff] }
 0x2c6   : > { %3998 = vmatprep.mubr.bf16.mxu1 %v4752_v0 }
 0x2c7   : > { %v3173_v30 = vpop.f32.mrb[116].mxu0 }
 0x2c8   : > { %v3462_v54 = vpop.f32.mrb[116].mxu1  ;;  %v3175_v44 = vpop.f32.mrb[117].mxu0 }
 0x2c9   : > { %v6234_v12 = vadd.f32 %v3462_v54, %v3173_v30  ;;  %v3464_v24 = vpop.f32.mrb[117].mxu1  ;;  %v3176_v36 = vpop.f32.mrb[118].mxu0  ;;  %v1066_v30 = vld [vmem:[%s5663_s26 + $0x698] sm:$0xff] }
 0x2ca   : > { %v3465_v48 = vpop.f32.mrb[118].mxu1  ;;  %v3178_v63 = vpop.f32.mrb[119].mxu0  ;;  %v1070_v54 = vld [vmem:[%s5663_s26 + $0x6b8] sm:$0xff] }
 0x2cb   : > { %6479 = vst [vmem:[#allocation22_spill] sm:$0xff] %v6234_v12  ;;  %v6236_v0 = vadd.f32 %v3465_v48, %v3176_v36  ;;  %v3467_v47 = vpop.f32.mrb[119].mxu1  ;;  %v4768_v48 = vcombine.high %v1066_v30, %v1070_v54 }
 0x2cc   : > { %3710 = vmatmul.mubr.bf16.gmra.mrb[224].mxu0 %v4749_v16  ;;  %v4759_v47 = vcombine.low %v1058_v41, %v1062_v15  ;;  %v4766_v16 = vcombine.high %v1065_v25, %v1069_v26  ;;  %v4765_v41 = vcombine.low %v1065_v25, %v1069_v26  ;;  %v1081_v25 = vld [vmem:[%s5663_s26 + $0x710] sm:$0xff] }
 0x2cd   : > { %6480 = vst [vmem:[#allocation23_spill] sm:$0xff] %v6236_v0  ;;  %3999 = vmatmul.mubr.bf16.gmra.mrb[224].mxu1 %v4751_v51  ;;  %3717 = vmatprep.mubr.bf16.mxu0 %v4758_v11  ;;  %v1085_v26 = vld [vmem:[%s5663_s26 + $0x730] sm:$0xff] }
 0x2ce   : > { %4006 = vmatprep.mubr.bf16.mxu1 %v4760_v20 }
 0x2cf   : > { %v3181_v44 = vpop.f32.mrb[120].mxu0 }
 0x2d0   : > { %v3470_v24 = vpop.f32.mrb[120].mxu1  ;;  %v3183_v12 = vpop.f32.mrb[121].mxu0 }
 0x2d1   : > { %v6242_v6 = vadd.f32 %v3470_v24, %v3181_v44  ;;  %v3472_v63 = vpop.f32.mrb[121].mxu1  ;;  %v3184_v36 = vpop.f32.mrb[122].mxu0  ;;  %v1074_v44 = vld [vmem:[%s5663_s26 + $0x6d8] sm:$0xff] }
 0x2d2   : > { %v3473_v51 = vpop.f32.mrb[122].mxu1  ;;  %v3186_v11 = vpop.f32.mrb[123].mxu0  ;;  %v1078_v24 = vld [vmem:[%s5663_s26 + $0x6f8] sm:$0xff] }
 0x2d3   : > { %6481 = vst [vmem:[#allocation24_spill] sm:$0xff] %v6242_v6  ;;  %v6244_v20 = vadd.f32 %v3473_v51, %v3184_v36  ;;  %v3475_v0 = vpop.f32.mrb[123].mxu1  ;;  %v4776_v51 = vcombine.high %v1074_v44, %v1078_v24 }
 0x2d4   : > { %3718 = vmatmul.mubr.bf16.gmra.mrb[228].mxu0 %v4757_v27  ;;  %v4767_v0 = vcombine.low %v1066_v30, %v1070_v54  ;;  %v4774_v27 = vcombine.high %v1073_v55, %v1077_v58  ;;  %v4773_v54 = vcombine.low %v1073_v55, %v1077_v58  ;;  %v1089_v58 = vld [vmem:[%s5663_s26 + $0x750] sm:$0xff] }
 0x2d5   : > { %6482 = vst [vmem:[#allocation25_spill] sm:$0xff] %v6244_v20  ;;  %4007 = vmatmul.mubr.bf16.gmra.mrb[228].mxu1 %v4759_v47  ;;  %3725 = vmatprep.mubr.bf16.mxu0 %v4766_v16 }
 0x2d6   : > { %4014 = vmatprep.mubr.bf16.mxu1 %v4768_v48 }
 0x2d7   : > { %v3189_v12 = vpop.f32.mrb[124].mxu0 }
 0x2d8   : > { %v3478_v63 = vpop.f32.mrb[124].mxu1  ;;  %v3191_v6 = vpop.f32.mrb[125].mxu0 }
 0x2d9   : > { %v6250_v15 = vadd.f32 %v3478_v63, %v3189_v12  ;;  %v3480_v11 = vpop.f32.mrb[125].mxu1  ;;  %v3192_v36 = vpop.f32.mrb[126].mxu0  ;;  %v1082_v12 = vld [vmem:[%s5663_s26 + $0x718] sm:$0xff] }
 0x2da   : > { %v3481_v47 = vpop.f32.mrb[126].mxu1  ;;  %v3194_v16 = vpop.f32.mrb[127].mxu0  ;;  %v1086_v63 = vld [vmem:[%s5663_s26 + $0x738] sm:$0xff] }
 0x2db   : > { %6483 = vst [vmem:[#allocation26_spill] sm:$0xff] %v6250_v15  ;;  %v6252_v48 = vadd.f32 %v3481_v47, %v3192_v36  ;;  %v3483_v20 = vpop.f32.mrb[127].mxu1  ;;  %v4775_v36 = vcombine.low %v1074_v44, %v1078_v24  ;;  %v4782_v47 = vcombine.high %v1081_v25, %v1085_v26  ;;  %v1093_v44 = vld [vmem:[%s5663_s26 + $0x770] sm:$0xff] }
 0x2dc   : > { %3726 = vmatmul.mubr.bf16.gmra.mrb[232].mxu0 %v4765_v41 }
 0x2dd   : > { %6484 = vst [vmem:[#allocation27_spill] sm:$0xff] %v6252_v48  ;;  %4015 = vmatmul.mubr.bf16.gmra.mrb[232].mxu1 %v4767_v0  ;;  %3733 = vmatprep.mubr.bf16.mxu0 %v4774_v27  ;;  %v792_v48 = vld [vmem:[#allocation2 + $0x8] sm:$0xff] }
 0x2de   : > { %4022 = vmatprep.mubr.bf16.mxu1 %v4776_v51  ;;  %v4784_v51 = vcombine.high %v1082_v12, %v1086_v63 }
 0x2df   : > { %v3519_v6 = vpop.f32.mrb[128].mxu0 }
 0x2e0   : > { %v3520_v11 = vadd.f32 %v3519_v6, %v6002_v42  ;;  %v3808_v15 = vpop.f32.mrb[128].mxu1  ;;  %v3521_v30 = vpop.f32.mrb[129].mxu0 }
 0x2e1   : > { %v3810_v16 = vpop.f32.mrb[129].mxu1  ;;  %v3522_v46 = vpop.f32.mrb[130].mxu0 }
 0x2e2   : > { %v3809_v20 = vadd.f32 %v3808_v15, %v3520_v11  ;;  %v3523_v41 = vadd.f32 %v3522_v46, %v6004_v50  ;;  %v3811_v0 = vpop.f32.mrb[130].mxu1  ;;  %v3524_v27 = vpop.f32.mrb[131].mxu0  ;;  %v1090_v15 = vld [vmem:[%s5663_s26 + $0x758] sm:$0xff] }
 0x2e3   : > { %v3813_v42 = vpop.f32.mrb[131].mxu1  ;;  %v1094_v50 = vld [vmem:[%s5663_s26 + $0x778] sm:$0xff]  ;;  %v4781_v27 = vcombine.low %v1081_v25, %v1085_v26  ;;  %v1097_v26 = vld [vmem:[%s5663_s26 + $0x790] sm:$0xff] }
 0x2e4   : > { %v4063_v6 = vadd.f32 %v3809_v20, %v791_v34  ;;  %v3812_v30 = vadd.f32 %v3811_v0, %v3523_v41  ;;  %3734 = vmatmul.mubr.bf16.gmra.mrb[236].mxu0 %v4773_v54  ;;  %v793_v42 = vld [vmem:[#allocation2 + $0x10] sm:$0xff]  ;;  %v4783_v54 = vcombine.low %v1082_v12, %v1086_v63 }
 0x2e5   : > { %4023 = vmatmul.mubr.bf16.gmra.mrb[236].mxu1 %v4775_v36  ;;  %3741 = vmatprep.mubr.bf16.mxu0 %v4782_v47  ;;  %v4790_v36 = vcombine.high %v1089_v58, %v1093_v44  ;;  %v1101_v12 = vld [vmem:[%s5663_s26 + $0x7b0] sm:$0xff] }
 0x2e6   : > { %4127 = vst [vmem:[#allocation2] sm:$0xff] %v4063_v6  ;;  %v4064_v55 = vadd.f32 %v3812_v30, %v792_v48  ;;  %4030 = vmatprep.mubr.bf16.mxu1 %v4784_v51  ;;  %v4792_v51 = vcombine.high %v1090_v15, %v1094_v50  ;;  %v794_v6 = vld [vmem:[#allocation2 + $0x18] sm:$0xff] }
 0x2e7   : > { %v3527_v24 = vpop.f32.mrb[132].mxu0 }
 0x2e8   : > { %4128 = vst [vmem:[#allocation2 + $0x8] sm:$0xff] %v4064_v55  ;;  %v3528_v46 = vadd.f32 %v3527_v24, %v6010_v60  ;;  %v3816_v11 = vpop.f32.mrb[132].mxu1  ;;  %v3529_v16 = vpop.f32.mrb[133].mxu0  ;;  %v1098_v24 = vld [vmem:[%s5663_s26 + $0x798] sm:$0xff] }
 0x2e9   : > { %v3818_v34 = vpop.f32.mrb[133].mxu1  ;;  %v3530_v20 = vpop.f32.mrb[134].mxu0 }
 0x2ea   : > { %v3817_v47 = vadd.f32 %v3816_v11, %v3528_v46  ;;  %v3531_v48 = vadd.f32 %v3530_v20, %v6012_v3  ;;  %v3819_v41 = vpop.f32.mrb[134].mxu1  ;;  %v3532_v0 = vpop.f32.mrb[135].mxu0  ;;  %v1102_v3 = vld [vmem:[%s5663_s26 + $0x7b8] sm:$0xff]  ;;  %v4789_v34 = vcombine.low %v1089_v58, %v1093_v44  ;;  %v795_v20 = vld [vmem:[#allocation2 + $0x20] sm:$0xff]  ;;  %v1105_v44 = vld [vmem:[%s5663_s26 + $0x7d0] sm:$0xff] }
 0x2eb   : > { %v3821_v60 = vpop.f32.mrb[135].mxu1 }
 0x2ec   : > { %v4065_v30 = vadd.f32 %v3817_v47, %v793_v42  ;;  %v3820_v55 = vadd.f32 %v3819_v41, %v3531_v48  ;;  %3742 = vmatmul.mubr.bf16.gmra.mrb[240].mxu0 %v4781_v27  ;;  %v4791_v27 = vcombine.low %v1090_v15, %v1094_v50  ;;  %v1109_v15 = vld [vmem:[%s5663_s26 + $0x7f0] sm:$0xff] }
 0x2ed   : > { %4031 = vmatmul.mubr.bf16.gmra.mrb[240].mxu1 %v4783_v54  ;;  %3749 = vmatprep.mubr.bf16.mxu0 %v4790_v36  ;;  %v4798_v54 = vcombine.high %v1097_v26, %v1101_v12 }
 0x2ee   : > { %4129 = vst [vmem:[#allocation2 + $0x10] sm:$0xff] %v4065_v30  ;;  %v4066_v25 = vadd.f32 %v3820_v55, %v794_v6  ;;  %4038 = vmatprep.mubr.bf16.mxu1 %v4792_v51  ;;  %v4800_v51 = vcombine.high %v1098_v24, %v1102_v3  ;;  %v796_v6 = vld [vmem:[#allocation2 + $0x28] sm:$0xff]  ;;  %v1106_v55 = vld [vmem:[%s5663_s26 + $0x7d8] sm:$0xff] }
 0x2ef   : > { %v3535_v63 = vpop.f32.mrb[136].mxu0 }
 0x2f0   : > { %4130 = vst [vmem:[#allocation2 + $0x18] sm:$0xff] %v4066_v25  ;;  %v3536_v46 = vadd.f32 %v3535_v63, %v6018_v14  ;;  %v3824_v11 = vpop.f32.mrb[136].mxu1  ;;  %v3537_v16 = vpop.f32.mrb[137].mxu0 }
 0x2f1   : > { %v3826_v42 = vpop.f32.mrb[137].mxu1  ;;  %v3538_v47 = vpop.f32.mrb[138].mxu0  ;;  %v797_v16 = vld [vmem:[#allocation2 + $0x30] sm:$0xff] }
 0x2f2   : > { %v3825_v36 = vadd.f32 %v3824_v11, %v3536_v46  ;;  %v3539_v48 = vadd.f32 %v3538_v47, %v6020_v22  ;;  %v3827_v41 = vpop.f32.mrb[138].mxu1  ;;  %v3540_v0 = vpop.f32.mrb[139].mxu0  ;;  %v1110_v22 = vld [vmem:[%s5663_s26 + $0x7f8] sm:$0xff]  ;;  %v4797_v11 = vcombine.low %v1097_v26, %v1101_v12  ;;  %v4806_v47 = vcombine.high %v1105_v44, %v1109_v15 }
 0x2f3   : > { %v3829_v14 = vpop.f32.mrb[139].mxu1  ;;  %v798_v0 = vld [vmem:[#allocation2 + $0x38] sm:$0xff] }
 0x2f4   : > { %v4067_v60 = vadd.f32 %v3825_v36, %v795_v20  ;;  %v3828_v30 = vadd.f32 %v3827_v41, %v3539_v48  ;;  %3750 = vmatmul.mubr.bf16.gmra.mrb[244].mxu0 %v4789_v34  ;;  %v4799_v34 = vcombine.low %v1098_v24, %v1102_v3  ;;  %v4808_v41 = vcombine.high %v1106_v55, %v1110_v22 }
 0x2f5   : > { %4039 = vmatmul.mubr.bf16.gmra.mrb[244].mxu1 %v4791_v27  ;;  %3757 = vmatprep.mubr.bf16.mxu0 %v4798_v54 }
 0x2f6   : > { %4131 = vst [vmem:[#allocation2 + $0x20] sm:$0xff] %v4067_v60  ;;  %v4068_v58 = vadd.f32 %v3828_v30, %v796_v6  ;;  %4046 = vmatprep.mubr.bf16.mxu1 %v4800_v51  ;;  %v799_v60 = vld [vmem:[#allocation2 + $0x40] sm:$0xff] }
 0x2f7   : > { %v3543_v50 = vpop.f32.mrb[140].mxu0 }
 0x2f8   : > { %4132 = vst [vmem:[#allocation2 + $0x28] sm:$0xff] %v4068_v58  ;;  %v3544_v25 = vadd.f32 %v3543_v50, %v6026_v32  ;;  %v3832_v63 = vpop.f32.mrb[140].mxu1  ;;  %v3545_v46 = vpop.f32.mrb[141].mxu0  ;;  %v4807_v50 = vcombine.low %v1106_v55, %v1110_v22  ;;  %v801_v55 = vld [vmem:[#allocation2 + $0x50] sm:$0xff] }
 0x2f9   : > { %v3834_v20 = vpop.f32.mrb[141].mxu1  ;;  %v3546_v42 = vpop.f32.mrb[142].mxu0 }
 0x2fa   : > { %v3833_v27 = vadd.f32 %v3832_v63, %v3544_v25  ;;  %v3547_v54 = vadd.f32 %v3546_v42, %v6028_v40  ;;  %v3835_v36 = vpop.f32.mrb[142].mxu1  ;;  %v3548_v48 = vpop.f32.mrb[143].mxu0  ;;  %v4805_v40 = vcombine.low %v1105_v44, %v1109_v15 }
 0x2fb   : > { %v3837_v51 = vpop.f32.mrb[143].mxu1 }
 0x2fc   : > { %v4069_v6 = vadd.f32 %v3833_v27, %v797_v16  ;;  %v3836_v14 = vadd.f32 %v3835_v36, %v3547_v54  ;;  %3758 = vmatmul.mubr.bf16.gmra.mrb[248].mxu0 %v4797_v11  ;;  %v800_v16 = vld [vmem:[#allocation2 + $0x48] sm:$0xff] }
 0x2fd   : > { %4047 = vmatmul.mubr.bf16.gmra.mrb[248].mxu1 %v4799_v34  ;;  %3765 = vmatprep.mubr.bf16.mxu0 %v4806_v47 }
 0x2fe   : > { %4133 = vst [vmem:[#allocation2 + $0x30] sm:$0xff] %v4069_v6  ;;  %v4070_v32 = vadd.f32 %v3836_v14, %v798_v0  ;;  %4054 = vmatprep.mubr.bf16.mxu1 %v4808_v41  ;;  %v802_v0 = vld [vmem:[#allocation2 + $0x58] sm:$0xff] }
 0x2ff   : > { %v3551_v26 = vpop.f32.mrb[144].mxu0 }
 0x300   : > { %4134 = vst [vmem:[#allocation2 + $0x38] sm:$0xff] %v4070_v32  ;;  %v3552_v12 = vadd.f32 %v3551_v26, %v6034_v52  ;;  %v3840_v24 = vpop.f32.mrb[144].mxu1  ;;  %v3553_v3 = vpop.f32.mrb[145].mxu0 }
 0x301   : > { %v3842_v30 = vpop.f32.mrb[145].mxu1  ;;  %v3554_v58 = vpop.f32.mrb[146].mxu0  ;;  %v803_v3 = vld [vmem:[#allocation2 + $0x60] sm:$0xff] }
 0x302   : > { %v3841_v25 = vadd.f32 %v3840_v24, %v3552_v12  ;;  %v3555_v63 = vadd.f32 %v3554_v58, %v6036_v61  ;;  %v3843_v46 = vpop.f32.mrb[146].mxu1  ;;  %v3556_v11 = vpop.f32.mrb[147].mxu0 }
 0x303   : > { %v3845_v20 = vpop.f32.mrb[147].mxu1 }
 0x304   : > { %v4071_v42 = vadd.f32 %v3841_v25, %v799_v60  ;;  %v3844_v34 = vadd.f32 %v3843_v46, %v3555_v63  ;;  %3766 = vmatmul.mubr.bf16.gmra.mrb[252].mxu0 %v4805_v40  ;;  %v804_v25 = vld [vmem:[#allocation2 + $0x68] sm:$0xff] }
 0x305   : > { %4055 = vmatmul.mubr.bf16.gmra.mrb[252].mxu1 %v4807_v50 }
 0x306   : > { %4135 = vst [vmem:[#allocation2 + $0x40] sm:$0xff] %v4071_v42  ;;  %v4072_v52 = vadd.f32 %v3844_v34, %v800_v16 }
 0x307   : > { %v3559_v47 = vpop.f32.mrb[148].mxu0 }
 0x308   : > { %4136 = vst [vmem:[#allocation2 + $0x48] sm:$0xff] %v4072_v52  ;;  %v3560_v44 = vadd.f32 %v3559_v47, %v6042_v8  ;;  %v3848_v15 = vpop.f32.mrb[148].mxu1  ;;  %v3561_v27 = vpop.f32.mrb[149].mxu0  ;;  %v805_v52 = vld [vmem:[#allocation2 + $0x70] sm:$0xff] }
 0x309   : > { %v3850_v22 = vpop.f32.mrb[149].mxu1  ;;  %v3562_v54 = vpop.f32.mrb[150].mxu0 }
 0x30a   : > { %v3849_v61 = vadd.f32 %v3848_v15, %v3560_v44  ;;  %v3563_v36 = vadd.f32 %v3562_v54, %v6044_v17  ;;  %v3851_v48 = vpop.f32.mrb[150].mxu1  ;;  %v3564_v41 = vpop.f32.mrb[151].mxu0  ;;  %v806_v22 = vld [vmem:[#allocation2 + $0x78] sm:$0xff] }
 0x30b   : > { %v3853_v51 = vpop.f32.mrb[151].mxu1 }
 0x30c   : > { %v4073_v6 = vadd.f32 %v3849_v61, %v801_v55  ;;  %v3852_v14 = vadd.f32 %v3851_v48, %v3563_v36 }
 0x30e   : > { %4137 = vst [vmem:[#allocation2 + $0x50] sm:$0xff] %v4073_v6  ;;  %v4074_v32 = vadd.f32 %v3852_v14, %v802_v0  ;;  %v807_v6 = vld [vmem:[#allocation2 + $0x80] sm:$0xff] }
 0x30f   : > { %v3567_v26 = vpop.f32.mrb[152].mxu0 }
 0x310   : > { %4138 = vst [vmem:[#allocation2 + $0x58] sm:$0xff] %v4074_v32  ;;  %v3568_v8 = vadd.f32 %v3567_v26, %v6050_v28  ;;  %v3856_v12 = vpop.f32.mrb[152].mxu1  ;;  %v3569_v24 = vpop.f32.mrb[153].mxu0 }
 0x311   : > { %v3858_v40 = vpop.f32.mrb[153].mxu1  ;;  %v3570_v60 = vpop.f32.mrb[154].mxu0  ;;  %v808_v24 = vld [vmem:[#allocation2 + $0x88] sm:$0xff] }
 0x312   : > { %v3857_v30 = vadd.f32 %v3856_v12, %v3568_v8  ;;  %v3571_v17 = vadd.f32 %v3570_v60, %v6052_v37  ;;  %v3859_v58 = vpop.f32.mrb[154].mxu1  ;;  %v3572_v50 = vpop.f32.mrb[155].mxu0 }
 0x313   : > { %v3861_v63 = vpop.f32.mrb[155].mxu1 }
 0x314   : > { %v4075_v46 = vadd.f32 %v3857_v30, %v803_v3  ;;  %v3860_v11 = vadd.f32 %v3859_v58, %v3571_v17 }
 0x316   : > { %4139 = vst [vmem:[#allocation2 + $0x60] sm:$0xff] %v4075_v46  ;;  %v4076_v16 = vadd.f32 %v3860_v11, %v804_v25  ;;  %v809_v25 = vld [vmem:[#allocation2 + $0x90] sm:$0xff] }
 0x317   : > { %v3575_v20 = vpop.f32.mrb[156].mxu0 }
 0x318   : > { %4140 = vst [vmem:[#allocation2 + $0x68] sm:$0xff] %v4076_v16  ;;  %v3576_v28 = vadd.f32 %v3575_v20, %v6058_v49  ;;  %v3864_v42 = vpop.f32.mrb[156].mxu1  ;;  %v3577_v34 = vpop.f32.mrb[157].mxu0 }
 0x319   : > { %v3866_v47 = vpop.f32.mrb[157].mxu1  ;;  %v3578_v44 = vpop.f32.mrb[158].mxu0 }
 0x31a   : > { %v3865_v15 = vadd.f32 %v3864_v42, %v3576_v28  ;;  %v3579_v37 = vadd.f32 %v3578_v44, %v6060_v59  ;;  %v3867_v27 = vpop.f32.mrb[158].mxu1  ;;  %v3580_v55 = vpop.f32.mrb[159].mxu0  ;;  %v810_v28 = vld [vmem:[#allocation2 + $0x98] sm:$0xff] }
 0x31b   : > { %v3869_v54 = vpop.f32.mrb[159].mxu1 }
 0x31c   : > { %v4077_v61 = vadd.f32 %v3865_v15, %v805_v52  ;;  %v3868_v36 = vadd.f32 %v3867_v27, %v3579_v37  ;;  %v811_v27 = vld [vmem:[#allocation2 + $0xa0] sm:$0xff] }
 0x31e   : > { %4141 = vst [vmem:[#allocation2 + $0x70] sm:$0xff] %v4077_v61  ;;  %v4078_v48 = vadd.f32 %v3868_v36, %v806_v22 }
 0x31f   : > { %v3583_v41 = vpop.f32.mrb[160].mxu0 }
 0x320   : > { %4142 = vst [vmem:[#allocation2 + $0x78] sm:$0xff] %v4078_v48  ;;  %v3584_v49 = vadd.f32 %v3583_v41, %v6066_v9  ;;  %v3872_v0 = vpop.f32.mrb[160].mxu1  ;;  %v3585_v51 = vpop.f32.mrb[161].mxu0  ;;  %v812_v48 = vld [vmem:[#allocation2 + $0xa8] sm:$0xff] }
 0x321   : > { %v3874_v14 = vpop.f32.mrb[161].mxu1  ;;  %v3586_v32 = vpop.f32.mrb[162].mxu0 }
 0x322   : > { %v3873_v26 = vadd.f32 %v3872_v0, %v3584_v49  ;;  %v3587_v59 = vadd.f32 %v3586_v32, %v6068_v19  ;;  %v3875_v8 = vpop.f32.mrb[162].mxu1  ;;  %v3588_v12 = vpop.f32.mrb[163].mxu0 }
 0x323   : > { %v3877_v3 = vpop.f32.mrb[163].mxu1 }
 0x324   : > { %v4079_v40 = vadd.f32 %v3873_v26, %v807_v6  ;;  %v3876_v60 = vadd.f32 %v3875_v8, %v3587_v59  ;;  %v813_v26 = vld [vmem:[#allocation2 + $0xb0] sm:$0xff] }
 0x326   : > { %4143 = vst [vmem:[#allocation2 + $0x80] sm:$0xff] %v4079_v40  ;;  %v4080_v30 = vadd.f32 %v3876_v60, %v808_v24  ;;  %v814_v40 = vld [vmem:[#allocation2 + $0xb8] sm:$0xff] }
 0x327   : > { %v3591_v17 = vpop.f32.mrb[164].mxu0 }
 0x328   : > { %4144 = vst [vmem:[#allocation2 + $0x88] sm:$0xff] %v4080_v30  ;;  %v3592_v9 = vadd.f32 %v3591_v17, %v6074_v31  ;;  %v3880_v58 = vpop.f32.mrb[164].mxu1  ;;  %v3593_v50 = vpop.f32.mrb[165].mxu0 }
 0x329   : > { %v3882_v63 = vpop.f32.mrb[165].mxu1  ;;  %v3594_v46 = vpop.f32.mrb[166].mxu0 }
 0x32a   : > { %v3881_v11 = vadd.f32 %v3880_v58, %v3592_v9  ;;  %v3595_v19 = vadd.f32 %v3594_v46, %v6076_v43  ;;  %v3883_v16 = vpop.f32.mrb[166].mxu1  ;;  %v3596_v20 = vpop.f32.mrb[167].mxu0  ;;  %v815_v63 = vld [vmem:[#allocation2 + $0xc0] sm:$0xff] }
 0x32b   : > { %v3885_v42 = vpop.f32.mrb[167].mxu1 }
 0x32c   : > { %v4081_v34 = vadd.f32 %v3881_v11, %v809_v25  ;;  %v3884_v52 = vadd.f32 %v3883_v16, %v3595_v19 }
 0x32e   : > { %4145 = vst [vmem:[#allocation2 + $0x90] sm:$0xff] %v4081_v34  ;;  %v4082_v47 = vadd.f32 %v3884_v52, %v810_v28  ;;  %v816_v28 = vld [vmem:[#allocation2 + $0xc8] sm:$0xff] }
 0x32f   : > { %v3599_v44 = vpop.f32.mrb[168].mxu0 }
 0x330   : > { %4146 = vst [vmem:[#allocation2 + $0x98] sm:$0xff] %v4082_v47  ;;  %v3600_v31 = vadd.f32 %v3599_v44, %v6082_v56  ;;  %v3888_v15 = vpop.f32.mrb[168].mxu1  ;;  %v3601_v37 = vpop.f32.mrb[169].mxu0 }
 0x331   : > { %v3890_v55 = vpop.f32.mrb[169].mxu1  ;;  %v3602_v22 = vpop.f32.mrb[170].mxu0  ;;  %v817_v37 = vld [vmem:[#allocation2 + $0xd0] sm:$0xff] }
 0x332   : > { %v3889_v54 = vadd.f32 %v3888_v15, %v3600_v31  ;;  %v3603_v43 = vadd.f32 %v3602_v22, %v6084_v2  ;;  %v3891_v61 = vpop.f32.mrb[170].mxu1  ;;  %v3604_v36 = vpop.f32.mrb[171].mxu0 }
 0x333   : > { %v3893_v41 = vpop.f32.mrb[171].mxu1 }
 0x334   : > { %v4083_v49 = vadd.f32 %v3889_v54, %v811_v27  ;;  %v3892_v0 = vadd.f32 %v3891_v61, %v3603_v43  ;;  %v818_v61 = vld [vmem:[#allocation2 + $0xd8] sm:$0xff] }
 0x336   : > { %4147 = vst [vmem:[#allocation2 + $0xa0] sm:$0xff] %v4083_v49  ;;  %v4084_v51 = vadd.f32 %v3892_v0, %v812_v48 }
 0x337   : > { %v3607_v6 = vpop.f32.mrb[172].mxu0 }
 0x338   : > { %4148 = vst [vmem:[#allocation2 + $0xa8] sm:$0xff] %v4084_v51  ;;  %v3608_v56 = vadd.f32 %v3607_v6, %v6090_v18  ;;  %v3896_v14 = vpop.f32.mrb[172].mxu1  ;;  %v3609_v32 = vpop.f32.mrb[173].mxu0 }
 0x339   : > { %v3898_v59 = vpop.f32.mrb[173].mxu1  ;;  %v3610_v8 = vpop.f32.mrb[174].mxu0 }
 0x33a   : > { %v3897_v12 = vadd.f32 %v3896_v14, %v3608_v56  ;;  %v3611_v2 = vadd.f32 %v3610_v8, %v6092_v29  ;;  %v3899_v24 = vpop.f32.mrb[174].mxu1  ;;  %v3612_v3 = vpop.f32.mrb[175].mxu0  ;;  %v819_v56 = vld [vmem:[#allocation2 + $0xe0] sm:$0xff] }
 0x33b   : > { %v3901_v60 = vpop.f32.mrb[175].mxu1 }
 0x33c   : > { %v4085_v30 = vadd.f32 %v3897_v12, %v813_v26  ;;  %v3900_v17 = vadd.f32 %v3899_v24, %v3611_v2  ;;  %v820_v12 = vld [vmem:[#allocation2 + $0xe8] sm:$0xff] }
 0x33e   : > { %4149 = vst [vmem:[#allocation2 + $0xb0] sm:$0xff] %v4085_v30  ;;  %v4086_v9 = vadd.f32 %v3900_v17, %v814_v40 }
 0x33f   : > { %v3615_v58 = vpop.f32.mrb[176].mxu0 }
 0x340   : > { %4150 = vst [vmem:[#allocation2 + $0xb8] sm:$0xff] %v4086_v9  ;;  %v3616_v18 = vadd.f32 %v3615_v58, %v6098_v45  ;;  %v3904_v50 = vpop.f32.mrb[176].mxu1  ;;  %v3617_v25 = vpop.f32.mrb[177].mxu0  ;;  %v821_v9 = vld [vmem:[#allocation2 + $0xf0] sm:$0xff] }
 0x341   : > { %v3906_v46 = vpop.f32.mrb[177].mxu1  ;;  %v3618_v11 = vpop.f32.mrb[178].mxu0 }
 0x342   : > { %v3905_v19 = vadd.f32 %v3904_v50, %v3616_v18  ;;  %v3619_v29 = vadd.f32 %v3618_v11, %v6100_v57  ;;  %v3907_v16 = vpop.f32.mrb[178].mxu1  ;;  %v3620_v20 = vpop.f32.mrb[179].mxu0  ;;  %v822_v46 = vld [vmem:[#allocation2 + $0xf8] sm:$0xff] }
 0x343   : > { %v3909_v42 = vpop.f32.mrb[179].mxu1 }
 0x344   : > { %v4087_v34 = vadd.f32 %v3905_v19, %v815_v63  ;;  %v3908_v52 = vadd.f32 %v3907_v16, %v3619_v29 }
 0x346   : > { %4151 = vst [vmem:[#allocation2 + $0xc0] sm:$0xff] %v4087_v34  ;;  %v4088_v47 = vadd.f32 %v3908_v52, %v816_v28  ;;  %v823_v34 = vld [vmem:[#allocation2 + $0x100] sm:$0xff] }
 0x347   : > { %v3623_v44 = vpop.f32.mrb[180].mxu0 }
 0x348   : > { %4152 = vst [vmem:[#allocation2 + $0xc8] sm:$0xff] %v4088_v47  ;;  %v3624_v45 = vadd.f32 %v3623_v44, %v6106_v10  ;;  %v3912_v31 = vpop.f32.mrb[180].mxu1  ;;  %v3625_v15 = vpop.f32.mrb[181].mxu0 }
 0x349   : > { %v3914_v27 = vpop.f32.mrb[181].mxu1  ;;  %v3626_v55 = vpop.f32.mrb[182].mxu0  ;;  %v824_v15 = vld [vmem:[#allocation2 + $0x108] sm:$0xff] }
 0x34a   : > { %v3913_v22 = vadd.f32 %v3912_v31, %v3624_v45  ;;  %v3627_v57 = vadd.f32 %v3626_v55, %v6108_v23  ;;  %v3915_v54 = vpop.f32.mrb[182].mxu1  ;;  %v3628_v43 = vpop.f32.mrb[183].mxu0 }
 0x34b   : > { %v3917_v36 = vpop.f32.mrb[183].mxu1 }
 0x34c   : > { %v4089_v48 = vadd.f32 %v3913_v22, %v817_v37  ;;  %v3916_v41 = vadd.f32 %v3915_v54, %v3627_v57 }
 0x34e   : > { %4153 = vst [vmem:[#allocation2 + $0xd0] sm:$0xff] %v4089_v48  ;;  %v4090_v49 = vadd.f32 %v3916_v41, %v818_v61  ;;  %v825_v61 = vld [vmem:[#allocation2 + $0x110] sm:$0xff] }
 0x34f   : > { %v3631_v0 = vpop.f32.mrb[184].mxu0 }
 0x350   : > { %4154 = vst [vmem:[#allocation2 + $0xd8] sm:$0xff] %v4090_v49  ;;  %v3632_v10 = vadd.f32 %v3631_v0, %v6114_v38  ;;  %v3920_v51 = vpop.f32.mrb[184].mxu1  ;;  %v3633_v6 = vpop.f32.mrb[185].mxu0 }
 0x351   : > { %v3922_v14 = vpop.f32.mrb[185].mxu1  ;;  %v3634_v32 = vpop.f32.mrb[186].mxu0 }
 0x352   : > { %v3921_v26 = vadd.f32 %v3920_v51, %v3632_v10  ;;  %v3635_v23 = vadd.f32 %v3634_v32, %v6116_v53  ;;  %v3923_v59 = vpop.f32.mrb[186].mxu1  ;;  %v3636_v8 = vpop.f32.mrb[187].mxu0  ;;  %v826_v10 = vld [vmem:[#allocation2 + $0x118] sm:$0xff] }
 0x353   : > { %v3925_v2 = vpop.f32.mrb[187].mxu1 }
 0x354   : > { %v4091_v24 = vadd.f32 %v3921_v26, %v819_v56  ;;  %v3924_v3 = vadd.f32 %v3923_v59, %v3635_v23  ;;  %v827_v59 = vld [vmem:[#allocation2 + $0x120] sm:$0xff] }
 0x356   : > { %4155 = vst [vmem:[#allocation2 + $0xe0] sm:$0xff] %v4091_v24  ;;  %v4092_v40 = vadd.f32 %v3924_v3, %v820_v12 }
 0x357   : > { %v3639_v60 = vpop.f32.mrb[188].mxu0 }
 0x358   : > { %4156 = vst [vmem:[#allocation2 + $0xe8] sm:$0xff] %v4092_v40  ;;  %v3640_v38 = vadd.f32 %v3639_v60, %v6122_v1  ;;  %v3928_v30 = vpop.f32.mrb[188].mxu1  ;;  %v3641_v17 = vpop.f32.mrb[189].mxu0  ;;  %v828_v40 = vld [vmem:[#allocation2 + $0x128] sm:$0xff] }
 0x359   : > { %v3930_v58 = vpop.f32.mrb[189].mxu1  ;;  %v3642_v18 = vpop.f32.mrb[190].mxu0 }
 0x35a   : > { %v3929_v50 = vadd.f32 %v3928_v30, %v3640_v38  ;;  %v3643_v53 = vadd.f32 %v3642_v18, %v6124_v21  ;;  %v3931_v25 = vpop.f32.mrb[190].mxu1  ;;  %v3644_v63 = vpop.f32.mrb[191].mxu0 }
 0x35b   : > { %v3933_v11 = vpop.f32.mrb[191].mxu1 }
 0x35c   : > { %v4093_v19 = vadd.f32 %v3929_v50, %v821_v9  ;;  %v3932_v29 = vadd.f32 %v3931_v25, %v3643_v53  ;;  %v829_v50 = vld [vmem:[#allocation2 + $0x130] sm:$0xff] }
 0x35e   : > { %4157 = vst [vmem:[#allocation2 + $0xf0] sm:$0xff] %v4093_v19  ;;  %v4094_v16 = vadd.f32 %v3932_v29, %v822_v46  ;;  %v830_v19 = vld [vmem:[#allocation2 + $0x138] sm:$0xff] }
 0x35f   : > { %v3647_v20 = vpop.f32.mrb[192].mxu0 }
 0x360   : > { %4158 = vst [vmem:[#allocation2 + $0xf8] sm:$0xff] %v4094_v16  ;;  %v3648_v1 = vadd.f32 %v3647_v20, %v6130_v33  ;;  %v3936_v28 = vpop.f32.mrb[192].mxu1  ;;  %v3649_v42 = vpop.f32.mrb[193].mxu0 }
 0x361   : > { %v3938_v52 = vpop.f32.mrb[193].mxu1  ;;  %v3650_v47 = vpop.f32.mrb[194].mxu0  ;;  %v6485_v42 = vld [vmem:[#allocation4_spill] sm:$0xff] }
 0x362   : > { %v3937_v44 = vadd.f32 %v3936_v28, %v3648_v1  ;;  %v3651_v21 = vadd.f32 %v3650_v47, %v6132_v62  ;;  %v3939_v45 = vpop.f32.mrb[194].mxu1  ;;  %v3652_v31 = vpop.f32.mrb[195].mxu0  ;;  %v831_v47 = vld [vmem:[#allocation2 + $0x140] sm:$0xff] }
 0x363   : > { %v3941_v37 = vpop.f32.mrb[195].mxu1  ;;  %v6486_v31 = vld [vmem:[#allocation5_spill] sm:$0xff] }
 0x364   : > { %v4095_v27 = vadd.f32 %v3937_v44, %v823_v34  ;;  %v3940_v55 = vadd.f32 %v3939_v45, %v3651_v21 }
 0x366   : > { %4159 = vst [vmem:[#allocation2 + $0x100] sm:$0xff] %v4095_v27  ;;  %v4096_v22 = vadd.f32 %v3940_v55, %v824_v15  ;;  %v832_v27 = vld [vmem:[#allocation2 + $0x148] sm:$0xff] }
 0x367   : > { %v3655_v57 = vpop.f32.mrb[196].mxu0 }
 0x368   : > { %4160 = vst [vmem:[#allocation2 + $0x108] sm:$0xff] %v4096_v22  ;;  %v3656_v33 = vadd.f32 %v3655_v57, %v6138_v4  ;;  %v3944_v54 = vpop.f32.mrb[196].mxu1  ;;  %v3657_v43 = vpop.f32.mrb[197].mxu0 }
 0x369   : > { %v3946_v36 = vpop.f32.mrb[197].mxu1  ;;  %v3658_v48 = vpop.f32.mrb[198].mxu0  ;;  %v6487_v43 = vld [vmem:[#allocation6_spill] sm:$0xff] }
 0x36a   : > { %v3945_v41 = vadd.f32 %v3944_v54, %v3656_v33  ;;  %v3659_v62 = vadd.f32 %v3658_v48, %v6140_v39  ;;  %v3947_v49 = vpop.f32.mrb[198].mxu1  ;;  %v3660_v0 = vpop.f32.mrb[199].mxu0 }
 0x36b   : > { %v3949_v51 = vpop.f32.mrb[199].mxu1 }
 0x36c   : > { %v4097_v6 = vadd.f32 %v3945_v41, %v825_v61  ;;  %v3948_v56 = vadd.f32 %v3947_v49, %v3659_v62  ;;  %v833_v41 = vld [vmem:[#allocation2 + $0x150] sm:$0xff] }
 0x36e   : > { %4161 = vst [vmem:[#allocation2 + $0x110] sm:$0xff] %v4097_v6  ;;  %v4098_v14 = vadd.f32 %v3948_v56, %v826_v10  ;;  %v6488_v10 = vld [vmem:[#allocation7_spill] sm:$0xff] }
 0x36f   : > { %v3663_v32 = vpop.f32.mrb[200].mxu0 }
 0x370   : > { %4162 = vst [vmem:[#allocation2 + $0x118] sm:$0xff] %v4098_v14  ;;  %v3664_v4 = vadd.f32 %v3663_v32, %v6146_v35  ;;  %v3952_v26 = vpop.f32.mrb[200].mxu1  ;;  %v3665_v23 = vpop.f32.mrb[201].mxu0  ;;  %v834_v14 = vld [vmem:[#allocation2 + $0x158] sm:$0xff] }
 0x371   : > { %v3954_v8 = vpop.f32.mrb[201].mxu1  ;;  %v3666_v12 = vpop.f32.mrb[202].mxu0 }
 0x372   : > { %v3953_v2 = vadd.f32 %v3952_v26, %v3664_v4  ;;  %v3667_v39 = vadd.f32 %v3666_v12, %v6148_v13  ;;  %v3955_v24 = vpop.f32.mrb[202].mxu1  ;;  %v3668_v3 = vpop.f32.mrb[203].mxu0  ;;  %v6489_v8 = vld [vmem:[#allocation8_spill] sm:$0xff] }
 0x373   : > { %v3957_v60 = vpop.f32.mrb[203].mxu1 }
 0x374   : > { %v4099_v38 = vadd.f32 %v3953_v2, %v827_v59  ;;  %v3956_v30 = vadd.f32 %v3955_v24, %v3667_v39  ;;  %v835_v24 = vld [vmem:[#allocation2 + $0x160] sm:$0xff] }
 0x376   : > { %4163 = vst [vmem:[#allocation2 + $0x120] sm:$0xff] %v4099_v38  ;;  %v4100_v17 = vadd.f32 %v3956_v30, %v828_v40  ;;  %v6490_v38 = vld [vmem:[#allocation9_spill] sm:$0xff] }
 0x377   : > { %v3671_v9 = vpop.f32.mrb[204].mxu0 }
 0x378   : > { %4164 = vst [vmem:[#allocation2 + $0x128] sm:$0xff] %v4100_v17  ;;  %v3672_v35 = vadd.f32 %v3671_v9, %v6154_v7  ;;  %v3960_v58 = vpop.f32.mrb[204].mxu1  ;;  %v3673_v18 = vpop.f32.mrb[205].mxu0 }
 0x379   : > { %v3962_v53 = vpop.f32.mrb[205].mxu1  ;;  %v3674_v25 = vpop.f32.mrb[206].mxu0 }
 0x37a   : > { %v3961_v63 = vadd.f32 %v3960_v58, %v3672_v35  ;;  %v3675_v13 = vadd.f32 %v3674_v25, %v6156_v5  ;;  %v3963_v46 = vpop.f32.mrb[206].mxu1  ;;  %v3676_v11 = vpop.f32.mrb[207].mxu0  ;;  %v836_v35 = vld [vmem:[#allocation2 + $0x168] sm:$0xff] }
 0x37b   : > { %v3965_v29 = vpop.f32.mrb[207].mxu1 }
 0x37c   : > { %v4101_v16 = vadd.f32 %v3961_v63, %v829_v50  ;;  %v3964_v20 = vadd.f32 %v3963_v46, %v3675_v13  ;;  %v6491_v63 = vld [vmem:[#allocation10_spill] sm:$0xff] }
 0x37e   : > { %4165 = vst [vmem:[#allocation2 + $0x130] sm:$0xff] %v4101_v16  ;;  %v4102_v1 = vadd.f32 %v3964_v20, %v830_v19  ;;  %v837_v19 = vld [vmem:[#allocation2 + $0x170] sm:$0xff] }
 0x37f   : > { %v3679_v28 = vpop.f32.mrb[208].mxu0 }
 0x380   : > { %4166 = vst [vmem:[#allocation2 + $0x138] sm:$0xff] %v4102_v1  ;;  %v3680_v7 = vadd.f32 %v3679_v28, %v6485_v42  ;;  %v3968_v34 = vpop.f32.mrb[208].mxu1  ;;  %v3681_v52 = vpop.f32.mrb[209].mxu0  ;;  %v6492_v1 = vld [vmem:[#allocation11_spill] sm:$0xff] }
 0x381   : > { %v3970_v44 = vpop.f32.mrb[209].mxu1  ;;  %v3682_v21 = vpop.f32.mrb[210].mxu0 }
 0x382   : > { %v3969_v45 = vadd.f32 %v3968_v34, %v3680_v7  ;;  %v3683_v5 = vadd.f32 %v3682_v21, %v6486_v31  ;;  %v3971_v15 = vpop.f32.mrb[210].mxu1  ;;  %v3684_v37 = vpop.f32.mrb[211].mxu0  ;;  %v838_v34 = vld [vmem:[#allocation2 + $0x178] sm:$0xff]  ;;  %v6493_v31 = vld [vmem:[#allocation12_spill] sm:$0xff] }
 0x383   : > { %v3973_v55 = vpop.f32.mrb[211].mxu1 }
 0x384   : > { %v4103_v22 = vadd.f32 %v3969_v45, %v831_v47  ;;  %v3972_v57 = vadd.f32 %v3971_v15, %v3683_v5 }
 0x386   : > { %4167 = vst [vmem:[#allocation2 + $0x140] sm:$0xff] %v4103_v22  ;;  %v4104_v33 = vadd.f32 %v3972_v57, %v832_v27  ;;  %v839_v27 = vld [vmem:[#allocation2 + $0x180] sm:$0xff] }
 0x387   : > { %v3687_v54 = vpop.f32.mrb[212].mxu0 }
 0x388   : > { %4168 = vst [vmem:[#allocation2 + $0x148] sm:$0xff] %v4104_v33  ;;  %v3688_v61 = vadd.f32 %v3687_v54, %v6487_v43  ;;  %v3976_v36 = vpop.f32.mrb[212].mxu1  ;;  %v3689_v48 = vpop.f32.mrb[213].mxu0  ;;  %v6494_v33 = vld [vmem:[#allocation13_spill] sm:$0xff] }
 0x389   : > { %v3978_v62 = vpop.f32.mrb[213].mxu1  ;;  %v3690_v49 = vpop.f32.mrb[214].mxu0 }
 0x38a   : > { %v3977_v0 = vadd.f32 %v3976_v36, %v3688_v61  ;;  %v3691_v51 = vadd.f32 %v3690_v49, %v6488_v10  ;;  %v3979_v6 = vpop.f32.mrb[214].mxu1  ;;  %v3692_v56 = vpop.f32.mrb[215].mxu0  ;;  %v840_v36 = vld [vmem:[#allocation2 + $0x188] sm:$0xff]  ;;  %v6495_v10 = vld [vmem:[#allocation14_spill] sm:$0xff] }
 0x38b   : > { %v3981_v32 = vpop.f32.mrb[215].mxu1 }
 0x38c   : > { %v4105_v4 = vadd.f32 %v3977_v0, %v833_v41  ;;  %v3980_v26 = vadd.f32 %v3979_v6, %v3691_v51 }
 0x38e   : > { %4169 = vst [vmem:[#allocation2 + $0x150] sm:$0xff] %v4105_v4  ;;  %v4106_v23 = vadd.f32 %v3980_v26, %v834_v14  ;;  %v841_v14 = vld [vmem:[#allocation2 + $0x190] sm:$0xff] }
 0x38f   : > { %v3695_v59 = vpop.f32.mrb[216].mxu0 }
 0x390   : > { %4170 = vst [vmem:[#allocation2 + $0x158] sm:$0xff] %v4106_v23  ;;  %v3696_v12 = vadd.f32 %v3695_v59, %v6489_v8  ;;  %v3984_v2 = vpop.f32.mrb[216].mxu1  ;;  %v3697_v39 = vpop.f32.mrb[217].mxu0  ;;  %v6496_v23 = vld [vmem:[#allocation15_spill] sm:$0xff] }
 0x391   : > { %v3986_v3 = vpop.f32.mrb[217].mxu1  ;;  %v3698_v40 = vpop.f32.mrb[218].mxu0 }
 0x392   : > { %v3985_v60 = vadd.f32 %v3984_v2, %v3696_v12  ;;  %v3699_v30 = vadd.f32 %v3698_v40, %v6490_v38  ;;  %v3987_v17 = vpop.f32.mrb[218].mxu1  ;;  %v3700_v9 = vpop.f32.mrb[219].mxu0  ;;  %v842_v2 = vld [vmem:[#allocation2 + $0x198] sm:$0xff]  ;;  %v6497_v38 = vld [vmem:[#allocation16_spill] sm:$0xff] }
 0x393   : > { %v3989_v58 = vpop.f32.mrb[219].mxu1 }
 0x394   : > { %v4107_v18 = vadd.f32 %v3985_v60, %v835_v24  ;;  %v3988_v50 = vadd.f32 %v3987_v17, %v3699_v30 }
 0x396   : > { %4171 = vst [vmem:[#allocation2 + $0x160] sm:$0xff] %v4107_v18  ;;  %v4108_v53 = vadd.f32 %v3988_v50, %v836_v35  ;;  %v843_v35 = vld [vmem:[#allocation2 + $0x1a0] sm:$0xff] }
 0x397   : > { %v3703_v25 = vpop.f32.mrb[220].mxu0 }
 0x398   : > { %4172 = vst [vmem:[#allocation2 + $0x168] sm:$0xff] %v4108_v53  ;;  %v3704_v13 = vadd.f32 %v3703_v25, %v6491_v63  ;;  %v3992_v46 = vpop.f32.mrb[220].mxu1  ;;  %v3705_v11 = vpop.f32.mrb[221].mxu0  ;;  %v6498_v53 = vld [vmem:[#allocation17_spill] sm:$0xff] }
 0x399   : > { %v3994_v29 = vpop.f32.mrb[221].mxu1  ;;  %v3706_v16 = vpop.f32.mrb[222].mxu0 }
 0x39a   : > { %v3993_v20 = vadd.f32 %v3992_v46, %v3704_v13  ;;  %v3707_v28 = vadd.f32 %v3706_v16, %v6492_v1  ;;  %v3995_v42 = vpop.f32.mrb[222].mxu1  ;;  %v3708_v7 = vpop.f32.mrb[223].mxu0  ;;  %v844_v46 = vld [vmem:[#allocation2 + $0x1a8] sm:$0xff]  ;;  %v6499_v1 = vld [vmem:[#allocation18_spill] sm:$0xff] }
 0x39b   : > { %v3997_v52 = vpop.f32.mrb[223].mxu1 }
 0x39c   : > { %v4109_v47 = vadd.f32 %v3993_v20, %v837_v19  ;;  %v3996_v44 = vadd.f32 %v3995_v42, %v3707_v28 }
 0x39e   : > { %4173 = vst [vmem:[#allocation2 + $0x170] sm:$0xff] %v4109_v47  ;;  %v4110_v21 = vadd.f32 %v3996_v44, %v838_v34  ;;  %v845_v34 = vld [vmem:[#allocation2 + $0x1b0] sm:$0xff] }
 0x39f   : > { %v3711_v45 = vpop.f32.mrb[224].mxu0 }
 0x3a0   : > { %4174 = vst [vmem:[#allocation2 + $0x178] sm:$0xff] %v4110_v21  ;;  %v3712_v5 = vadd.f32 %v3711_v45, %v6493_v31  ;;  %v4000_v15 = vpop.f32.mrb[224].mxu1  ;;  %v3713_v37 = vpop.f32.mrb[225].mxu0  ;;  %v6500_v21 = vld [vmem:[#allocation19_spill] sm:$0xff] }
 0x3a1   : > { %v4002_v55 = vpop.f32.mrb[225].mxu1  ;;  %v3714_v22 = vpop.f32.mrb[226].mxu0 }
 0x3a2   : > { %v4001_v57 = vadd.f32 %v4000_v15, %v3712_v5  ;;  %v3715_v54 = vadd.f32 %v3714_v22, %v6494_v33  ;;  %v4003_v43 = vpop.f32.mrb[226].mxu1  ;;  %v3716_v61 = vpop.f32.mrb[227].mxu0  ;;  %v846_v15 = vld [vmem:[#allocation2 + $0x1b8] sm:$0xff]  ;;  %v6501_v33 = vld [vmem:[#allocation20_spill] sm:$0xff] }
 0x3a3   : > { %v4005_v48 = vpop.f32.mrb[227].mxu1 }
 0x3a4   : > { %v4111_v41 = vadd.f32 %v4001_v57, %v839_v27  ;;  %v4004_v62 = vadd.f32 %v4003_v43, %v3715_v54 }
 0x3a6   : > { %4175 = vst [vmem:[#allocation2 + $0x180] sm:$0xff] %v4111_v41  ;;  %v4112_v49 = vadd.f32 %v4004_v62, %v840_v36  ;;  %v847_v36 = vld [vmem:[#allocation2 + $0x1c0] sm:$0xff] }
 0x3a7   : > { %v3719_v0 = vpop.f32.mrb[228].mxu0 }
 0x3a8   : > { %4176 = vst [vmem:[#allocation2 + $0x188] sm:$0xff] %v4112_v49  ;;  %v3720_v51 = vadd.f32 %v3719_v0, %v6495_v10  ;;  %v4008_v6 = vpop.f32.mrb[228].mxu1  ;;  %v3721_v56 = vpop.f32.mrb[229].mxu0  ;;  %v6502_v49 = vld [vmem:[#allocation21_spill] sm:$0xff] }
 0x3a9   : > { %v4010_v32 = vpop.f32.mrb[229].mxu1  ;;  %v3722_v4 = vpop.f32.mrb[230].mxu0 }
 0x3aa   : > { %v4009_v26 = vadd.f32 %v4008_v6, %v3720_v51  ;;  %v3723_v59 = vadd.f32 %v3722_v4, %v6496_v23  ;;  %v4011_v8 = vpop.f32.mrb[230].mxu1  ;;  %v3724_v12 = vpop.f32.mrb[231].mxu0  ;;  %v848_v6 = vld [vmem:[#allocation2 + $0x1c8] sm:$0xff]  ;;  %v6503_v23 = vld [vmem:[#allocation22_spill] sm:$0xff] }
 0x3ab   : > { %v4013_v39 = vpop.f32.mrb[231].mxu1 }
 0x3ac   : > { %v4113_v24 = vadd.f32 %v4009_v26, %v841_v14  ;;  %v4012_v3 = vadd.f32 %v4011_v8, %v3723_v59 }
 0x3ae   : > { %4177 = vst [vmem:[#allocation2 + $0x190] sm:$0xff] %v4113_v24  ;;  %v4114_v40 = vadd.f32 %v4012_v3, %v842_v2  ;;  %v849_v2 = vld [vmem:[#allocation2 + $0x1d0] sm:$0xff] }
 0x3af   : > { %v3727_v60 = vpop.f32.mrb[232].mxu0 }
 0x3b0   : > { %4178 = vst [vmem:[#allocation2 + $0x198] sm:$0xff] %v4114_v40  ;;  %v3728_v30 = vadd.f32 %v3727_v60, %v6497_v38  ;;  %v4016_v17 = vpop.f32.mrb[232].mxu1  ;;  %v3729_v9 = vpop.f32.mrb[233].mxu0  ;;  %v6504_v40 = vld [vmem:[#allocation23_spill] sm:$0xff] }
 0x3b1   : > { %v4018_v58 = vpop.f32.mrb[233].mxu1  ;;  %v3730_v18 = vpop.f32.mrb[234].mxu0 }
 0x3b2   : > { %v4017_v50 = vadd.f32 %v4016_v17, %v3728_v30  ;;  %v3731_v25 = vadd.f32 %v3730_v18, %v6498_v53  ;;  %v4019_v63 = vpop.f32.mrb[234].mxu1  ;;  %v3732_v13 = vpop.f32.mrb[235].mxu0  ;;  %v850_v17 = vld [vmem:[#allocation2 + $0x1d8] sm:$0xff]  ;;  %v6505_v53 = vld [vmem:[#allocation24_spill] sm:$0xff] }
 0x3b3   : > { %v4021_v11 = vpop.f32.mrb[235].mxu1 }
 0x3b4   : > { %v4115_v19 = vadd.f32 %v4017_v50, %v843_v35  ;;  %v4020_v29 = vadd.f32 %v4019_v63, %v3731_v25 }
 0x3b6   : > { %4179 = vst [vmem:[#allocation2 + $0x1a0] sm:$0xff] %v4115_v19  ;;  %v4116_v16 = vadd.f32 %v4020_v29, %v844_v46  ;;  %v851_v46 = vld [vmem:[#allocation2 + $0x1e0] sm:$0xff] }
 0x3b7   : > { %v3735_v20 = vpop.f32.mrb[236].mxu0 }
 0x3b8   : > { %4180 = vst [vmem:[#allocation2 + $0x1a8] sm:$0xff] %v4116_v16  ;;  %v3736_v28 = vadd.f32 %v3735_v20, %v6499_v1  ;;  %v4024_v42 = vpop.f32.mrb[236].mxu1  ;;  %v3737_v7 = vpop.f32.mrb[237].mxu0  ;;  %v6506_v16 = vld [vmem:[#allocation25_spill] sm:$0xff] }
 0x3b9   : > { %v4026_v52 = vpop.f32.mrb[237].mxu1  ;;  %v3738_v47 = vpop.f32.mrb[238].mxu0 }
 0x3ba   : > { %v4025_v44 = vadd.f32 %v4024_v42, %v3736_v28  ;;  %v3739_v45 = vadd.f32 %v3738_v47, %v6500_v21  ;;  %v4027_v31 = vpop.f32.mrb[238].mxu1  ;;  %v3740_v5 = vpop.f32.mrb[239].mxu0  ;;  %v852_v42 = vld [vmem:[#allocation2 + $0x1e8] sm:$0xff]  ;;  %v6507_v21 = vld [vmem:[#allocation26_spill] sm:$0xff] }
 0x3bb   : > { %v4029_v37 = vpop.f32.mrb[239].mxu1 }
 0x3bc   : > { %v4117_v27 = vadd.f32 %v4025_v44, %v845_v34  ;;  %v4028_v55 = vadd.f32 %v4027_v31, %v3739_v45 }
 0x3be   : > { %4181 = vst [vmem:[#allocation2 + $0x1b0] sm:$0xff] %v4117_v27  ;;  %v4118_v22 = vadd.f32 %v4028_v55, %v846_v15  ;;  %v853_v15 = vld [vmem:[#allocation2 + $0x1f0] sm:$0xff] }
 0x3bf   : > { %v3743_v57 = vpop.f32.mrb[240].mxu0 }
 0x3c0   : > { %4182 = vst [vmem:[#allocation2 + $0x1b8] sm:$0xff] %v4118_v22  ;;  %v3744_v54 = vadd.f32 %v3743_v57, %v6501_v33  ;;  %v4032_v43 = vpop.f32.mrb[240].mxu1  ;;  %v3745_v61 = vpop.f32.mrb[241].mxu0  ;;  %v6508_v22 = vld [vmem:[#allocation27_spill] sm:$0xff] }
 0x3c1   : > { %v4034_v48 = vpop.f32.mrb[241].mxu1  ;;  %v3746_v41 = vpop.f32.mrb[242].mxu0 }
 0x3c2   : > { %v4033_v62 = vadd.f32 %v4032_v43, %v3744_v54  ;;  %v3747_v0 = vadd.f32 %v3746_v41, %v6502_v49  ;;  %v4035_v10 = vpop.f32.mrb[242].mxu1  ;;  %v3748_v51 = vpop.f32.mrb[243].mxu0  ;;  %v854_v43 = vld [vmem:[#allocation2 + $0x1f8] sm:$0xff]  ;;  %v4196_v49 = vld [vmem:[#allocation2 + $0x8] sm:$0xff] (!%p4873_p12) }
 0x3c3   : > { %v4037_v56 = vpop.f32.mrb[243].mxu1 }
 0x3c4   : > { %v4119_v14 = vadd.f32 %v4033_v62, %v847_v36  ;;  %v4036_v32 = vadd.f32 %v4035_v10, %v3747_v0  ;;  %v4195_v62 = vld [vmem:[#allocation2] sm:$0xff] (!%p4873_p12)  ;;  %v6338_v0 = vld [vmem:[%s6459_s2] ss:$0 sm:$0xff] (!%p4873_p12)  ;;  %v4198_v56 = vld [vmem:[#allocation2 + $0x18] sm:$0xff] (!%p4873_p12) }
 0x3c5   : > { %v4266_v10 = vadd.f32 (!%p4873_p12), %v6338_v0, %v4195_v62  ;;  %v4267_v51 = vadd.f32 (!%p4873_p12), %v6338_v0, %v4196_v49  ;;  %v4217_v62 = vld [vmem:[#allocation2 + $0xb0] sm:$0xff] (!%p4873_p12)  ;;  %v4218_v49 = vld [vmem:[#allocation2 + $0xb8] sm:$0xff] (!%p4873_p12) }
 0x3c6   : > { %4183 = vst [vmem:[#allocation2 + $0x1c0] sm:$0xff] %v4119_v14  ;;  %v4120_v4 = vadd.f32 %v4036_v32, %v848_v6  ;;  %v4197_v6 = vld [vmem:[#allocation2 + $0x10] sm:$0xff] (!%p4873_p12)  ;;  %v4199_v14 = vld [vmem:[#allocation2 + $0x20] sm:$0xff] (!%p4873_p12) }
 0x3c7   : > { %v3751_v26 = vpop.f32.mrb[244].mxu0  ;;  %v4268_v32 = vadd.f32 (!%p4873_p12), %v6338_v0, %v4197_v6 }
 0x3c8   : > { %4184 = vst [vmem:[#allocation2 + $0x1c8] sm:$0xff] %v4120_v4  ;;  %v3752_v59 = vadd.f32 %v3751_v26, %v6503_v23  ;;  %v4040_v8 = vpop.f32.mrb[244].mxu1  ;;  %v3753_v12 = vpop.f32.mrb[245].mxu0  ;;  %v4269_v4 = vadd.f32 (!%p4873_p12), %v6338_v0, %v4198_v56  ;;  %v4200_v26 = vld [vmem:[#allocation2 + $0x28] sm:$0xff] (!%p4873_p12)  ;;  %v4270_v23 = vadd.f32 (!%p4873_p12), %v6338_v0, %v4199_v14  ;;  %v4219_v14 = vld [vmem:[#allocation2 + $0xc0] sm:$0xff] (!%p4873_p12) }
 0x3c9   : > { %v4042_v39 = vpop.f32.mrb[245].mxu1  ;;  %v3754_v24 = vpop.f32.mrb[246].mxu0  ;;  %v4330_v12 = vmax.f32 (!%p4873_p12), %v4266_v10, 0.0 }
 0x3ca   : > { %v4041_v3 = vadd.f32 %v4040_v8, %v3752_v59  ;;  %v3755_v60 = vadd.f32 %v3754_v24, %v6504_v40  ;;  %v4043_v38 = vpop.f32.mrb[246].mxu1  ;;  %v3756_v30 = vpop.f32.mrb[247].mxu0  ;;  %v4201_v59 = vld [vmem:[#allocation2 + $0x30] sm:$0xff] (!%p4873_p12)  ;;  %v4202_v8 = vld [vmem:[#allocation2 + $0x38] sm:$0xff] (!%p4873_p12)  ;;  %v4271_v39 = vadd.f32 (!%p4873_p12), %v6338_v0, %v4200_v26  ;;  %v4204_v40 = vld [vmem:[#allocation2 + $0x48] sm:$0xff] (!%p4873_p12) }
 0x3cb   : > { %v4045_v9 = vpop.f32.mrb[247].mxu1  ;;  %v4272_v24 = vadd.f32 (!%p4873_p12), %v6338_v0, %v4201_v59  ;;  %v4333_v30 = vmax.f32 (!%p4873_p12), %v4269_v4, 0.0 }
 0x3cc   : > { %v4121_v35 = vadd.f32 %v4041_v3, %v849_v2  ;;  %v4044_v58 = vadd.f32 %v4043_v38, %v3755_v60  ;;  %v4331_v2 = vmax.f32 (!%p4873_p12), %v4267_v51, 0.0  ;;  %v4203_v3 = vld [vmem:[#allocation2 + $0x40] sm:$0xff] (!%p4873_p12)  ;;  %v4205_v60 = vld [vmem:[#allocation2 + $0x50] sm:$0xff] (!%p4873_p12)  ;;  %v4332_v38 = vmax.f32 (!%p4873_p12), %v4268_v32, 0.0  ;;  %v4220_v32 = vld [vmem:[#allocation2 + $0xc8] sm:$0xff] (!%p4873_p12) }
 0x3cd   : > { %v4273_v9 = vadd.f32 (!%p4873_p12), %v6338_v0, %v4202_v8  ;;  %v4221_v8 = vld [vmem:[#allocation2 + $0xd0] sm:$0xff] (!%p4873_p12) }
 0x3ce   : > { %4185 = vst [vmem:[#allocation2 + $0x1d0] sm:$0xff] %v4121_v35  ;;  %v4122_v18 = vadd.f32 %v4044_v58, %v850_v17  ;;  %v4334_v17 = vmax.f32 (!%p4873_p12), %v4270_v23, 0.0  ;;  %v4206_v35 = vld [vmem:[#allocation2 + $0x58] sm:$0xff] (!%p4873_p12)  ;;  %v4207_v58 = vld [vmem:[#allocation2 + $0x60] sm:$0xff] (!%p4873_p12) }
 0x3cf   : > { %v3759_v50 = vpop.f32.mrb[248].mxu0 }
 0x3d0   : > { %4186 = vst [vmem:[#allocation2 + $0x1d8] sm:$0xff] %v4122_v18  ;;  %v3760_v25 = vadd.f32 %v3759_v50, %v6505_v53  ;;  %v4048_v63 = vpop.f32.mrb[248].mxu1  ;;  %v3761_v13 = vpop.f32.mrb[249].mxu0  ;;  %v4394_v18 = vpack.c.bf16 (!%p4873_p12), %v4331_v2, %v4330_v12  ;;  %v4335_v50 = vmax.f32 (!%p4873_p12), %v4271_v39, 0.0  ;;  %v4336_v53 = vmax.f32 (!%p4873_p12), %v4272_v24, 0.0 }
 0x3d1   : > { %v4050_v11 = vpop.f32.mrb[249].mxu1  ;;  %v3762_v19 = vpop.f32.mrb[250].mxu0  ;;  %v4395_v13 = vpack.c.bf16 (!%p4873_p12), %v4333_v30, %v4332_v38  ;;  %v4288_v39 = vadd.f32 (!%p4873_p12), %v6338_v0, %v4217_v62  ;;  %v4289_v24 = vadd.f32 (!%p4873_p12), %v6338_v0, %v4218_v49  ;;  %v4290_v38 = vadd.f32 (!%p4873_p12), %v6338_v0, %v4219_v14  ;;  %v4236_v62 = vld [vmem:[#allocation2 + $0x148] sm:$0xff] (!%p4873_p12) }
 0x3d2   : > { %v4049_v29 = vadd.f32 %v4048_v63, %v3760_v25  ;;  %v3763_v20 = vadd.f32 %v3762_v19, %v6506_v16  ;;  %v4051_v1 = vpop.f32.mrb[250].mxu1  ;;  %v3764_v28 = vpop.f32.mrb[251].mxu0  ;;  %v4274_v25 = vadd.f32 (!%p4873_p12), %v6338_v0, %v4203_v3  ;;  %v4208_v63 = vld [vmem:[#allocation2 + $0x68] sm:$0xff] (!%p4873_p12)  ;;  %v4275_v11 = vadd.f32 (!%p4873_p12), %v6338_v0, %v4204_v40  ;;  %v4210_v16 = vld [vmem:[#allocation2 + $0x78] sm:$0xff] (!%p4873_p12)  ;;  %4426 = vst [vmem:[%s5661_s24] sm:$0xff] (!%p4873_p12), %v4394_v18 }
 0x3d3   : > { %v4053_v7 = vpop.f32.mrb[251].mxu1  ;;  %v4276_v19 = vadd.f32 (!%p4873_p12), %v6338_v0, %v4205_v60  ;;  %v4277_v28 = vadd.f32 (!%p4873_p12), %v6338_v0, %v4206_v35  ;;  %4427 = vst [vmem:[%s5661_s24 + $0x8] sm:$0xff] (!%p4873_p12), %v4395_v13  ;;  %v4222_v3 = vld [vmem:[#allocation2 + $0xd8] sm:$0xff] (!%p4873_p12)  ;;  %v4291_v30 = vadd.f32 (!%p4873_p12), %v6338_v0, %v4220_v32  ;;  %v4353_v18 = vmax.f32 (!%p4873_p12), %v4289_v24, 0.0  ;;  %v4240_v24 = vld [vmem:[#allocation2 + $0x168] sm:$0xff] (!%p4873_p12) }
 0x3d4   : > { %v4123_v34 = vadd.f32 %v4049_v29, %v851_v46  ;;  %v4052_v52 = vadd.f32 %v4051_v1, %v3763_v20  ;;  %v4337_v46 = vmax.f32 (!%p4873_p12), %v4273_v9, 0.0  ;;  %v4209_v29 = vld [vmem:[#allocation2 + $0x70] sm:$0xff] (!%p4873_p12)  ;;  %v4396_v20 = vpack.c.bf16 (!%p4873_p12), %v4335_v50, %v4334_v17  ;;  %v4211_v7 = vld [vmem:[#allocation2 + $0x80] sm:$0xff] (!%p4873_p12)  ;;  %v4224_v9 = vld [vmem:[#allocation2 + $0xe8] sm:$0xff] (!%p4873_p12) }
 0x3d5   : > { %v4338_v1 = vmax.f32 (!%p4873_p12), %v4274_v25, 0.0  ;;  %v4223_v17 = vld [vmem:[#allocation2 + $0xe0] sm:$0xff] (!%p4873_p12)  ;;  %v4292_v50 = vadd.f32 (!%p4873_p12), %v6338_v0, %v4221_v8  ;;  %v4226_v25 = vld [vmem:[#allocation2 + $0xf8] sm:$0xff] (!%p4873_p12)  ;;  %v4354_v13 = vmax.f32 (!%p4873_p12), %v4290_v38, 0.0 }
 0x3d6   : > { %4187 = vst [vmem:[#allocation2 + $0x1e0] sm:$0xff] %v4123_v34  ;;  %v4124_v47 = vadd.f32 %v4052_v52, %v852_v42  ;;  %v4278_v42 = vadd.f32 (!%p4873_p12), %v6338_v0, %v4207_v58  ;;  %v4212_v34 = vld [vmem:[#allocation2 + $0x88] sm:$0xff] (!%p4873_p12)  ;;  %v4397_v52 = vpack.c.bf16 (!%p4873_p12), %v4337_v46, %v4336_v53  ;;  %4428 = vst [vmem:[%s5661_s24 + $0x10] sm:$0xff] (!%p4873_p12), %v4396_v20  ;;  %v4352_v58 = vmax.f32 (!%p4873_p12), %v4288_v39, 0.0  ;;  %v4225_v53 = vld [vmem:[#allocation2 + $0xf0] sm:$0xff] (!%p4873_p12) }
 0x3d7   : > { %v3767_v44 = vpop.f32.mrb[252].mxu0  ;;  %v4355_v46 = vmax.f32 (!%p4873_p12), %v4291_v30, 0.0  ;;  %v4356_v20 = vmax.f32 (!%p4873_p12), %v4292_v50, 0.0  ;;  %v4239_v39 = vld [vmem:[#allocation2 + $0x160] sm:$0xff] (!%p4873_p12)  ;;  %v4241_v30 = vld [vmem:[#allocation2 + $0x170] sm:$0xff] (!%p4873_p12) }
 0x3d8   : > { %4188 = vst [vmem:[#allocation2 + $0x1e8] sm:$0xff] %v4124_v47  ;;  %v3768_v45 = vadd.f32 %v3767_v44, %v6507_v21  ;;  %v4056_v31 = vpop.f32.mrb[252].mxu1  ;;  %v3769_v5 = vpop.f32.mrb[253].mxu0  ;;  %v4339_v47 = vmax.f32 (!%p4873_p12), %v4275_v11, 0.0  ;;  %v4340_v44 = vmax.f32 (!%p4873_p12), %v4276_v19, 0.0  ;;  %v4279_v21 = vadd.f32 (!%p4873_p12), %v6338_v0, %v4208_v63  ;;  %4429 = vst [vmem:[%s5661_s24 + $0x18] sm:$0xff] (!%p4873_p12), %v4397_v52 }
 0x3d9   : > { %v4058_v37 = vpop.f32.mrb[253].mxu1  ;;  %v3770_v27 = vpop.f32.mrb[254].mxu0  ;;  %v4342_v5 = vmax.f32 (!%p4873_p12), %v4278_v42, 0.0  ;;  %v4293_v11 = vadd.f32 (!%p4873_p12), %v6338_v0, %v4222_v3  ;;  %v4227_v19 = vld [vmem:[#allocation2 + $0x100] sm:$0xff] (!%p4873_p12)  ;;  %v4229_v42 = vld [vmem:[#allocation2 + $0x110] sm:$0xff] (!%p4873_p12)  ;;  %v4296_v52 = vadd.f32 (!%p4873_p12), %v6338_v0, %v4225_v53  ;;  %v4244_v53 = vld [vmem:[#allocation2 + $0x188] sm:$0xff] (!%p4873_p12) }
 0x3da   : > { %v4057_v55 = vadd.f32 %v4056_v31, %v3768_v45  ;;  %v3771_v57 = vadd.f32 %v3770_v27, %v6508_v22  ;;  %v4059_v33 = vpop.f32.mrb[254].mxu1  ;;  %v3772_v54 = vpop.f32.mrb[255].mxu0  ;;  %4194 = sbr.rel (%p4873_p12) target bundleno = 1021 (0x3fd), region = 63  ;;  %v4213_v45 = vld [vmem:[#allocation2 + $0x90] sm:$0xff] (!%p4873_p12)  ;;  %v4341_v31 = vmax.f32 (!%p4873_p12), %v4277_v28, 0.0  ;;  %v4281_v37 = vadd.f32 (!%p4873_p12), %v6338_v0, %v4210_v16  ;;  %v4214_v27 = vld [vmem:[#allocation2 + $0x98] sm:$0xff] (!%p4873_p12) }
 0x3db   : > { %v4061_v61 = vpop.f32.mrb[255].mxu1  ;;  %v4343_v22 = vmax.f32 (!%p4873_p12), %v4279_v21, 0.0  ;;  %v4215_v54 = vld [vmem:[#allocation2 + $0xa0] sm:$0xff] (!%p4873_p12)  ;;  %v4285_v56 = vadd.f32 (!%p4873_p12), %v6338_v0, %v4214_v27  ;;  %v4405_v16 = vpack.c.bf16 (!%p4873_p12), %v4353_v18, %v4352_v58  ;;  %v4295_v28 = vadd.f32 (!%p4873_p12), %v6338_v0, %v4224_v9 }
 0x3dc   : > { %v4125_v36 = vadd.f32 %v4057_v55, %v853_v15  ;;  %v4060_v48 = vadd.f32 %v4059_v33, %v3771_v57  ;;  %v4280_v15 = vadd.f32 (!%p4873_p12), %v6338_v0, %v4209_v29  ;;  %v4398_v55 = vpack.c.bf16 (!%p4873_p12), %v4339_v47, %v4338_v1  ;;  %v4228_v29 = vld [vmem:[#allocation2 + $0x108] sm:$0xff] (!%p4873_p12)  ;;  %v4243_v50 = vld [vmem:[#allocation2 + $0x180] sm:$0xff] (!%p4873_p12) }
 0x3dd   : > { %v4282_v57 = vadd.f32 (!%p4873_p12), %v6338_v0, %v4211_v7  ;;  %v4283_v33 = vadd.f32 (!%p4873_p12), %v6338_v0, %v4212_v34  ;;  %v4399_v61 = vpack.c.bf16 (!%p4873_p12), %v4341_v31, %v4340_v44  ;;  %v4400_v10 = vpack.c.bf16 (!%p4873_p12), %v4343_v22, %v4342_v5  ;;  %v4230_v44 = vld [vmem:[#allocation2 + $0x118] sm:$0xff] (!%p4873_p12)  ;;  %4437 = vst [vmem:[%s5661_s24 + $0x58] sm:$0xff] (!%p4873_p12), %v4405_v16 }
 0x3de   : > { %4189 = vst [vmem:[#allocation2 + $0x1f0] sm:$0xff] %v4125_v36  ;;  %v4126_v41 = vadd.f32 %v4060_v48, %v854_v43  ;;  %v4216_v43 = vld [vmem:[#allocation2 + $0xa8] sm:$0xff] (!%p4873_p12)  ;;  %v4344_v36 = vmax.f32 (!%p4873_p12), %v4280_v15, 0.0  ;;  %v4345_v48 = vmax.f32 (!%p4873_p12), %v4281_v37, 0.0  ;;  %4430 = vst [vmem:[%s5661_s24 + $0x20] sm:$0xff] (!%p4873_p12), %v4398_v55  ;;  %v4286_v23 = vadd.f32 (!%p4873_p12), %v6338_v0, %v4215_v54  ;;  %v4231_v15 = vld [vmem:[#allocation2 + $0x120] sm:$0xff] (!%p4873_p12) }
 0x3df   : > { %v4346_v51 = vmax.f32 (!%p4873_p12), %v4282_v57, 0.0  ;;  %v4347_v6 = vmax.f32 (!%p4873_p12), %v4283_v33, 0.0  ;;  %4431 = vst [vmem:[%s5661_s24 + $0x28] sm:$0xff] (!%p4873_p12), %v4399_v61  ;;  %v4287_v59 = vadd.f32 (!%p4873_p12), %v6338_v0, %v4216_v43  ;;  %4432 = vst [vmem:[%s5661_s24 + $0x30] sm:$0xff] (!%p4873_p12), %v4400_v10  ;;  %v4349_v2 = vmax.f32 (!%p4873_p12), %v4285_v56, 0.0  ;;  %v4232_v37 = vld [vmem:[#allocation2 + $0x128] sm:$0xff] (!%p4873_p12) }
 0x3e0   : > { %4190 = vst [vmem:[#allocation2 + $0x1f8] sm:$0xff] %v4126_v41  ;;  %v4284_v41 = vadd.f32 (!%p4873_p12), %v6338_v0, %v4213_v45  ;;  %v4401_v4 = vpack.c.bf16 (!%p4873_p12), %v4345_v48, %v4344_v36  ;;  %v4350_v40 = vmax.f32 (!%p4873_p12), %v4286_v23, 0.0  ;;  %v4294_v1 = vadd.f32 (!%p4873_p12), %v6338_v0, %v4223_v17  ;;  %v4233_v33 = vld [vmem:[#allocation2 + $0x130] sm:$0xff] (!%p4873_p12)  ;;  %v4234_v54 = vld [vmem:[#allocation2 + $0x138] sm:$0xff] (!%p4873_p12) }
 0x3e1   : > { %v4402_v12 = vpack.c.bf16 %v4347_v6, %v4346_v51  ;;  %v4351_v60 = vmax.f32 %v4287_v59, 0.0  ;;  %v4406_v7 = vpack.c.bf16 %v4355_v46, %v4354_v13  ;;  %v4357_v34 = vmax.f32 %v4293_v11, 0.0  ;;  %v4237_v56 = vld [vmem:[#allocation2 + $0x150] sm:$0xff]  ;;  %v4238_v23 = vld [vmem:[#allocation2 + $0x158] sm:$0xff] }
 0x3e2   : > { %v4348_v26 = vmax.f32 %v4284_v41, 0.0  ;;  %4433 = vst [vmem:[%s5661_s24 + $0x38] sm:$0xff] %v4401_v4  ;;  %v4297_v47 = vadd.f32 %v6338_v0, %v4226_v25  ;;  %v4358_v21 = vmax.f32 %v4294_v1, 0.0  ;;  %v4359_v45 = vmax.f32 %v4295_v28, 0.0  ;;  %v4235_v41 = vld [vmem:[#allocation2 + $0x140] sm:$0xff]  ;;  %v4242_v17 = vld [vmem:[#allocation2 + $0x178] sm:$0xff] }
 0x3e3   : > { %4434 = vst [vmem:[%s5661_s24 + $0x40] sm:$0xff] %v4402_v12  ;;  %v4404_v63 = vpack.c.bf16 %v4351_v60, %v4350_v40  ;;  %v4298_v31 = vadd.f32 %v6338_v0, %v4227_v19  ;;  %v4299_v5 = vadd.f32 %v6338_v0, %v4228_v29  ;;  %4438 = vst [vmem:[%s5661_s24 + $0x60] sm:$0xff] %v4406_v7  ;;  %v4360_v55 = vmax.f32 %v4296_v52, 0.0  ;;  %v4245_v11 = vld [vmem:[#allocation2 + $0x190] sm:$0xff]  ;;  %v4246_v1 = vld [vmem:[#allocation2 + $0x198] sm:$0xff] }
 0x3e4   : > { %v4403_v35 = vpack.c.bf16 %v4349_v2, %v4348_v26  ;;  %v4407_v27 = vpack.c.bf16 %v4357_v34, %v4356_v20  ;;  %v4361_v22 = vmax.f32 %v4297_v47, 0.0  ;;  %v4300_v57 = vadd.f32 %v6338_v0, %v4229_v42  ;;  %v4247_v52 = vld [vmem:[#allocation2 + $0x1a0] sm:$0xff]  ;;  %v4248_v47 = vld [vmem:[#allocation2 + $0x1a8] sm:$0xff] }
 0x3e5   : > { %4436 = vst [vmem:[%s5661_s24 + $0x50] sm:$0xff] %v4404_v63  ;;  %v4408_v43 = vpack.c.bf16 %v4359_v45, %v4358_v21  ;;  %v4362_v61 = vmax.f32 %v4298_v31, 0.0  ;;  %v4363_v36 = vmax.f32 %v4299_v5, 0.0  ;;  %v4301_v48 = vadd.f32 %v6338_v0, %v4230_v44  ;;  %v4249_v5 = vld [vmem:[#allocation2 + $0x1b0] sm:$0xff] }
 0x3e6   : > { %4435 = vst [vmem:[%s5661_s24 + $0x48] sm:$0xff] %v4403_v35  ;;  %4439 = vst [vmem:[%s5661_s24 + $0x68] sm:$0xff] %v4407_v27  ;;  %v4409_v49 = vpack.c.bf16 %v4361_v22, %v4360_v55  ;;  %v4364_v10 = vmax.f32 %v4300_v57, 0.0  ;;  %v4302_v51 = vadd.f32 %v6338_v0, %v4231_v15  ;;  %v4303_v6 = vadd.f32 %v6338_v0, %v4232_v37  ;;  %v4250_v15 = vld [vmem:[#allocation2 + $0x1b8] sm:$0xff]  ;;  %v4251_v57 = vld [vmem:[#allocation2 + $0x1c0] sm:$0xff] }
 0x3e7   : > { %4440 = vst [vmem:[%s5661_s24 + $0x70] sm:$0xff] %v4408_v43  ;;  %v4410_v14 = vpack.c.bf16 %v4363_v36, %v4362_v61  ;;  %v4365_v32 = vmax.f32 %v4301_v48, 0.0  ;;  %v4304_v4 = vadd.f32 %v6338_v0, %v4233_v33  ;;  %v4305_v26 = vadd.f32 %v6338_v0, %v4234_v54  ;;  %v4252_v33 = vld [vmem:[#allocation2 + $0x1c8] sm:$0xff]  ;;  %v4253_v48 = vld [vmem:[#allocation2 + $0x1d0] sm:$0xff] }
 0x3e8   : > { %4441 = vst [vmem:[%s5661_s24 + $0x78] sm:$0xff] %v4409_v49  ;;  %v4366_v59 = vmax.f32 %v4302_v51, 0.0  ;;  %v4367_v8 = vmax.f32 %v4303_v6, 0.0  ;;  %v4306_v12 = vadd.f32 %v6338_v0, %v4235_v41  ;;  %v4307_v2 = vadd.f32 %v6338_v0, %v4236_v62  ;;  %v4254_v51 = vld [vmem:[#allocation2 + $0x1d8] sm:$0xff] }
 0x3e9   : > { %4442 = vst [vmem:[%s5661_s24 + $0x80] sm:$0xff] %v4410_v14  ;;  %v4411_v3 = vpack.c.bf16 %v4365_v32, %v4364_v10  ;;  %v4368_v40 = vmax.f32 %v4304_v4, 0.0  ;;  %v4369_v60 = vmax.f32 %v4305_v26, 0.0  ;;  %v4308_v38 = vadd.f32 %v6338_v0, %v4237_v56  ;;  %v4255_v4 = vld [vmem:[#allocation2 + $0x1e0] sm:$0xff]  ;;  %v4256_v26 = vld [vmem:[#allocation2 + $0x1e8] sm:$0xff] }
 0x3ea   : > { %v4412_v9 = vpack.c.bf16 %v4367_v8, %v4366_v59  ;;  %v4370_v35 = vmax.f32 %v4306_v12, 0.0  ;;  %v4371_v58 = vmax.f32 %v4307_v2, 0.0  ;;  %v4309_v18 = vadd.f32 %v6338_v0, %v4238_v23  ;;  %v4257_v2 = vld [vmem:[#allocation2 + $0x1f0] sm:$0xff] }
 0x3eb   : > { %4443 = vst [vmem:[%s5661_s24 + $0x88] sm:$0xff] %v4411_v3  ;;  %v4413_v25 = vpack.c.bf16 %v4369_v60, %v4368_v40  ;;  %v4372_v63 = vmax.f32 %v4308_v38, 0.0  ;;  %v4310_v13 = vadd.f32 %v6338_v0, %v4239_v39  ;;  %v4311_v46 = vadd.f32 %v6338_v0, %v4240_v24  ;;  %v4258_v39 = vld [vmem:[#allocation2 + $0x1f8] sm:$0xff] }
 0x3ec   : > { %4444 = vst [vmem:[%s5661_s24 + $0x90] sm:$0xff] %v4412_v9  ;;  %v4414_v19 = vpack.c.bf16 %v4371_v58, %v4370_v35  ;;  %v4373_v29 = vmax.f32 %v4309_v18, 0.0  ;;  %v4312_v16 = vadd.f32 %v6338_v0, %v4241_v30  ;;  %v4313_v20 = vadd.f32 %v6338_v0, %v4242_v17 }
 0x3ed   : > { %4445 = vst [vmem:[%s5661_s24 + $0x98] sm:$0xff] %v4413_v25  ;;  %v4374_v28 = vmax.f32 %v4310_v13, 0.0  ;;  %v4375_v42 = vmax.f32 %v4311_v46, 0.0  ;;  %v4314_v7 = vadd.f32 %v6338_v0, %v4243_v50  ;;  %v4315_v34 = vadd.f32 %v6338_v0, %v4244_v53 }
 0x3ee   : > { %4446 = vst [vmem:[%s5661_s24 + $0xa0] sm:$0xff] %v4414_v19  ;;  %v4415_v44 = vpack.c.bf16 %v4373_v29, %v4372_v63  ;;  %v4376_v21 = vmax.f32 %v4312_v16, 0.0  ;;  %v4377_v45 = vmax.f32 %v4313_v20, 0.0  ;;  %v4316_v31 = vadd.f32 %v6338_v0, %v4245_v11 }
 0x3ef   : > { %v4416_v37 = vpack.c.bf16 %v4375_v42, %v4374_v28  ;;  %v4378_v27 = vmax.f32 %v4314_v7, 0.0  ;;  %v4379_v55 = vmax.f32 %v4315_v34, 0.0  ;;  %v4317_v22 = vadd.f32 %v6338_v0, %v4246_v1 }
 0x3f0   : > { %4447 = vst [vmem:[%s5661_s24 + $0xa8] sm:$0xff] %v4415_v44  ;;  %v4417_v54 = vpack.c.bf16 %v4377_v45, %v4376_v21  ;;  %v4380_v43 = vmax.f32 %v4316_v31, 0.0  ;;  %v4318_v61 = vadd.f32 %v6338_v0, %v4247_v52  ;;  %v4319_v36 = vadd.f32 %v6338_v0, %v4248_v47 }
 0x3f1   : > { %4448 = vst [vmem:[%s5661_s24 + $0xb0] sm:$0xff] %v4416_v37  ;;  %v4418_v41 = vpack.c.bf16 %v4379_v55, %v4378_v27  ;;  %v4381_v62 = vmax.f32 %v4317_v22, 0.0  ;;  %v4320_v49 = vadd.f32 %v6338_v0, %v4249_v5  ;;  %v4321_v10 = vadd.f32 %v6338_v0, %v4250_v15 }
 0x3f2   : > { %4449 = vst [vmem:[%s5661_s24 + $0xb8] sm:$0xff] %v4417_v54  ;;  %v4382_v6 = vmax.f32 %v4318_v61, 0.0  ;;  %v4383_v56 = vmax.f32 %v4319_v36, 0.0  ;;  %v4322_v14 = vadd.f32 %v6338_v0, %v4251_v57  ;;  %v4323_v32 = vadd.f32 %v6338_v0, %v4252_v33 }
 0x3f3   : > { %4450 = vst [vmem:[%s5661_s24 + $0xc0] sm:$0xff] %v4418_v41  ;;  %v4419_v23 = vpack.c.bf16 %v4381_v62, %v4380_v43  ;;  %v4384_v59 = vmax.f32 %v4320_v49, 0.0  ;;  %v4385_v8 = vmax.f32 %v4321_v10, 0.0  ;;  %v4324_v12 = vadd.f32 %v6338_v0, %v4253_v48 }
 0x3f4   : > { %v4420_v24 = vpack.c.bf16 %v4383_v56, %v4382_v6  ;;  %v4386_v3 = vmax.f32 %v4322_v14, 0.0  ;;  %v4387_v40 = vmax.f32 %v4323_v32, 0.0  ;;  %v4325_v60 = vadd.f32 %v6338_v0, %v4254_v51 }
 0x3f5   : > { %4451 = vst [vmem:[%s5661_s24 + $0xc8] sm:$0xff] %v4419_v23  ;;  %v4421_v38 = vpack.c.bf16 %v4385_v8, %v4384_v59  ;;  %v4388_v30 = vmax.f32 %v4324_v12, 0.0  ;;  %v4326_v17 = vadd.f32 %v6338_v0, %v4255_v4  ;;  %v4327_v9 = vadd.f32 %v6338_v0, %v4256_v26 }
 0x3f6   : > { %4452 = vst [vmem:[%s5661_s24 + $0xd0] sm:$0xff] %v4420_v24  ;;  %v4422_v35 = vpack.c.bf16 %v4387_v40, %v4386_v3  ;;  %v4389_v58 = vmax.f32 %v4325_v60, 0.0  ;;  %v4328_v18 = vadd.f32 %v6338_v0, %v4257_v2  ;;  %v4329_v50 = vadd.f32 %v6338_v0, %v4258_v39 }
 0x3f7   : > { %4453 = vst [vmem:[%s5661_s24 + $0xd8] sm:$0xff] %v4421_v38  ;;  %v4390_v53 = vmax.f32 %v4326_v17, 0.0  ;;  %v4391_v25 = vmax.f32 %v4327_v9, 0.0 }
 0x3f8   : > { %4454 = vst [vmem:[%s5661_s24 + $0xe0] sm:$0xff] %v4422_v35  ;;  %v4423_v63 = vpack.c.bf16 %v4389_v58, %v4388_v30  ;;  %v4392_v13 = vmax.f32 %v4328_v18, 0.0  ;;  %v4393_v46 = vmax.f32 %v4329_v50, 0.0 }
 0x3f9   : > { %v4424_v11 = vpack.c.bf16 %v4391_v25, %v4390_v53 }
 0x3fa   : > { %4455 = vst [vmem:[%s5661_s24 + $0xe8] sm:$0xff] %v4423_v63  ;;  %v4425_v19 = vpack.c.bf16 %v4393_v46, %v4392_v13 }
 0x3fb   : > { %4456 = vst [vmem:[%s5661_s24 + $0xf0] sm:$0xff] %v4424_v11 }
 0x3fc   : > { %4457 = vst [vmem:[%s5661_s24 + $0xf8] sm:$0xff] %v4425_v19 }
 0x3fd PF: > { %s13_s18 = sadd.s32 1, %s5054_s18   ;;  %s6509_s12 = smov %s5034_s13 }
 0x3fe   : > { %p10_p13 = scmp.ge.s32.totalorder %s13_s18, 10   ;;  %s6510_s13 = smov %s5129_s25 }
 0x3ff   : > { %s6511_s14 = smov %s5046_s16  ;;  %s6512_s15 = smov %s5050_s17 }
 0x400   : > { %s6513_s16 = smov %s6516_s19  ;;  %s6514_s17 = smov %s6520_s20 }
 0x401   :  { %12 = sbr.rel (!%p10_p13) target bundleno = 4 (0x4), region = 99 }

// kernel: gnn_forward.3
= control target key start
LH: loop header
LB: loop body
LE: loop exit
PB: predicated region body
PF: predicated region fallthrough
CT: control target
= control target key end

     0   :  { %s5078_s12 = smov 0   ;;  %s5080_s13 = smov 0   ;;  %s6489_s0 = inlined_call_operand.vmem [shape: bf16[2048,2048], index: 0, kind: input, shape index: {}]   ;;  %s6490_s1 = inlined_call_operand.vmem [shape: bf16[2048,128], index: 1, kind: input, shape index: {}]   ;;  %s6491_s2 = inlined_call_operand.vmem [shape: f32[1,128], index: 2, kind: input, shape index: {}]   ;;  %s6492_s3 = inlined_call_operand.vmem [shape: f32[2048,128], index: 3, kind: output, shape index: {}]  }
   0x1   :  { %s5082_s14 = smov 0   ;;  %s5084_s15 = smov 0  }
   0x2   :  { %s5086_s16 = smov 0   ;;  %s5088_s17 = smov 0  }
   0x3   :  { %s5090_s18 = smov 0  }
   0x4 LB: > { %s22_s19 = sadd.s32 1, %s5046_s16  ;;  %s25_s20 = sadd.s32 1, %s5050_s17  ;;  %s5054_s18 = sphi %s5090_s18, %s13_s18   ;;  %s5050_s17 = sphi %s5088_s17, %s6546_s17   ;;  %s5046_s16 = sphi %s5086_s16, %s6545_s16   ;;  %s5042_s15 = sphi %s5084_s15, %s6544_s15   ;;  %s5038_s14 = sphi %s5082_s14, %s6543_s14   ;;  %s5034_s13 = sphi %s5080_s13, %s6542_s13   ;;  %s5030_s12 = sphi %s5078_s12, %s6541_s12  }
   0x5   : > { %p23_p0 = scmp.ge.s32.totalorder %s22_s19, 2  ;;  %p41_p1 = scmp.ne.s32.totalorder %s5034_s13, %s5030_s12 }
   0x6   : > { %p42_p2 = scmp.eq.s32.totalorder %s5054_s18, 0  ;;  %s34_s24 = sadd.s32 1, %s5034_s13 }
   0x7   : > { %s6548_s19 = smov (%p23_p0, %s22_s19), 0  ;;  %s6550_s20 = smov (!%p23_p0, %s25_s20), %s5050_s17 }
   0x8   : > { %p43_p3 = por %p42_p2, %p41_p1  ;;  %p27_p4 = scmp.ge.s32.totalorder %s6550_s20, 4 }
   0x9   : > { %s30_s21 = ssub.s32 %s5046_s16, %s6548_s19  ;;  %p4540_p6 = scmp.ge.s32.totalorder %s5054_s18, 8 }
   0xa   : > { %s6552_s20 = smov (%p27_p4, %s6550_s20), 0 }
   0xb   : > { %s29_s22 = ssub.s32 %s5050_s17, %s6552_s20  ;;  %141 = sbr.rel (%p4540_p6) target bundleno = 153 (0x99), region = 24 }
   0xc   : > { %s31_s23 = sor.u32 %s30_s21, %s29_s22 }
   0xd   : > { %p32_p5 = scmp.eq.s32.totalorder %s31_s23, 0 }
   0xf   : > { %s5129_s25 = scalar_select %p32_p5, %s5034_s13, %s34_s24  }
  0x12   : > { %144 = sbr.rel (!%p43_p3) target bundleno = 153 (0x99), region = 28  ;;  %s146_s26 = sand.u32 (%p43_p3), 1, %s5034_s13  }
  0x13   : > { %s4543_s27 = sshll.u32 (%p43_p3), %s5046_s16, 3  ;;  %s4541_s28 = sshll.u32 (%p43_p3), %s146_s26, 11 }
  0x14   : > { %s4877_s29 = sshll.u32 (%p43_p3), %s5050_s17, 10  ;;  %s5143_s8 = scalar_lea.vmem (%p43_p3), [#allocation3], %s4541_s28 }
  0x15   : > { %s152_s30 = sadd.s32 (%p43_p3), %s4877_s29, %s4543_s27 }
  0x16   : > { %s4545_s4 = sshll.u32 (%p43_p3), %s152_s30, 2 }
  0x17   : > { %s5138_s7 = scalar_lea.vmem (%p43_p3), %s6489_s0, %s4545_s4 }
  0x18   : > { %v167_v0 = vld [vmem:[%s5138_s7] sm:$0xff] (%p43_p3)  ;;  %v169_v1 = vld [vmem:[%s5138_s7 + $0x8] sm:$0xff] (%p43_p3)  ;;  %v171_v2 = vld [vmem:[%s5138_s7 + $0x10] sm:$0xff] (%p43_p3) }
  0x19   : > { %168 = vst [vmem:[%s5143_s8] sm:$0xff] %v167_v0  ;;  %170 = vst [vmem:[%s5143_s8 + $0x8] sm:$0xff] %v169_v1  ;;  %v173_v3 = vld [vmem:[%s5138_s7 + $0x18] sm:$0xff]  ;;  %v175_v4 = vld [vmem:[%s5138_s7 + $0x40] sm:$0xff] }
  0x1a   : > { %172 = vst [vmem:[%s5143_s8 + $0x10] sm:$0xff] %v171_v2  ;;  %v177_v5 = vld [vmem:[%s5138_s7 + $0x48] sm:$0xff]  ;;  %174 = vst [vmem:[%s5143_s8 + $0x18] sm:$0xff] %v173_v3  ;;  %v179_v6 = vld [vmem:[%s5138_s7 + $0x50] sm:$0xff] }
  0x1b   : > { %176 = vst [vmem:[%s5143_s8 + $0x20] sm:$0xff] %v175_v4  ;;  %178 = vst [vmem:[%s5143_s8 + $0x28] sm:$0xff] %v177_v5  ;;  %v181_v7 = vld [vmem:[%s5138_s7 + $0x58] sm:$0xff]  ;;  %v183_v8 = vld [vmem:[%s5138_s7 + $0x80] sm:$0xff] }
  0x1c   : > { %180 = vst [vmem:[%s5143_s8 + $0x30] sm:$0xff] %v179_v6  ;;  %182 = vst [vmem:[%s5143_s8 + $0x38] sm:$0xff] %v181_v7  ;;  %v185_v9 = vld [vmem:[%s5138_s7 + $0x88] sm:$0xff]  ;;  %v187_v10 = vld [vmem:[%s5138_s7 + $0x90] sm:$0xff] }
  0x1d   : > { %184 = vst [vmem:[%s5143_s8 + $0x40] sm:$0xff] %v183_v8  ;;  %v189_v11 = vld [vmem:[%s5138_s7 + $0x98] sm:$0xff]  ;;  %186 = vst [vmem:[%s5143_s8 + $0x48] sm:$0xff] %v185_v9  ;;  %v191_v12 = vld [vmem:[%s5138_s7 + $0xc0] sm:$0xff] }
  0x1e   : > { %188 = vst [vmem:[%s5143_s8 + $0x50] sm:$0xff] %v187_v10  ;;  %190 = vst [vmem:[%s5143_s8 + $0x58] sm:$0xff] %v189_v11  ;;  %v193_v13 = vld [vmem:[%s5138_s7 + $0xc8] sm:$0xff]  ;;  %v195_v14 = vld [vmem:[%s5138_s7 + $0xd0] sm:$0xff] }
  0x1f   : > { %192 = vst [vmem:[%s5143_s8 + $0x60] sm:$0xff] %v191_v12  ;;  %194 = vst [vmem:[%s5143_s8 + $0x68] sm:$0xff] %v193_v13  ;;  %v197_v15 = vld [vmem:[%s5138_s7 + $0xd8] sm:$0xff]  ;;  %v199_v16 = vld [vmem:[%s5138_s7 + $0x100] sm:$0xff] }
  0x20   : > { %196 = vst [vmem:[%s5143_s8 + $0x70] sm:$0xff] %v195_v14  ;;  %v201_v17 = vld [vmem:[%s5138_s7 + $0x108] sm:$0xff]  ;;  %198 = vst [vmem:[%s5143_s8 + $0x78] sm:$0xff] %v197_v15  ;;  %v203_v18 = vld [vmem:[%s5138_s7 + $0x110] sm:$0xff] }
  0x21   : > { %200 = vst [vmem:[%s5143_s8 + $0x80] sm:$0xff] %v199_v16  ;;  %202 = vst [vmem:[%s5143_s8 + $0x88] sm:$0xff] %v201_v17  ;;  %v205_v19 = vld [vmem:[%s5138_s7 + $0x118] sm:$0xff]  ;;  %v207_v20 = vld [vmem:[%s5138_s7 + $0x140] sm:$0xff] }
  0x22   : > { %204 = vst [vmem:[%s5143_s8 + $0x90] sm:$0xff] %v203_v18  ;;  %206 = vst [vmem:[%s5143_s8 + $0x98] sm:$0xff] %v205_v19  ;;  %v209_v21 = vld [vmem:[%s5138_s7 + $0x148] sm:$0xff]  ;;  %v211_v22 = vld [vmem:[%s5138_s7 + $0x150] sm:$0xff] }
  0x23   : > { %208 = vst [vmem:[%s5143_s8 + $0xa0] sm:$0xff] %v207_v20  ;;  %v213_v23 = vld [vmem:[%s5138_s7 + $0x158] sm:$0xff]  ;;  %210 = vst [vmem:[%s5143_s8 + $0xa8] sm:$0xff] %v209_v21  ;;  %v215_v24 = vld [vmem:[%s5138_s7 + $0x180] sm:$0xff] }
  0x24   : > { %212 = vst [vmem:[%s5143_s8 + $0xb0] sm:$0xff] %v211_v22  ;;  %214 = vst [vmem:[%s5143_s8 + $0xb8] sm:$0xff] %v213_v23  ;;  %v217_v25 = vld [vmem:[%s5138_s7 + $0x188] sm:$0xff]  ;;  %v219_v26 = vld [vmem:[%s5138_s7 + $0x190] sm:$0xff] }
  0x25   : > { %216 = vst [vmem:[%s5143_s8 + $0xc0] sm:$0xff] %v215_v24  ;;  %218 = vst [vmem:[%s5143_s8 + $0xc8] sm:$0xff] %v217_v25  ;;  %v221_v27 = vld [vmem:[%s5138_s7 + $0x198] sm:$0xff]  ;;  %v223_v28 = vld [vmem:[%s5138_s7 + $0x1c0] sm:$0xff] }
  0x26   : > { %220 = vst [vmem:[%s5143_s8 + $0xd0] sm:$0xff] %v219_v26  ;;  %v225_v29 = vld [vmem:[%s5138_s7 + $0x1c8] sm:$0xff]  ;;  %222 = vst [vmem:[%s5143_s8 + $0xd8] sm:$0xff] %v221_v27  ;;  %v227_v30 = vld [vmem:[%s5138_s7 + $0x1d0] sm:$0xff] }
  0x27   : > { %224 = vst [vmem:[%s5143_s8 + $0xe0] sm:$0xff] %v223_v28  ;;  %226 = vst [vmem:[%s5143_s8 + $0xe8] sm:$0xff] %v225_v29  ;;  %v229_v31 = vld [vmem:[%s5138_s7 + $0x1d8] sm:$0xff]  ;;  %v231_v32 = vld [vmem:[%s5138_s7 + $0x200] sm:$0xff] }
  0x28   : > { %228 = vst [vmem:[%s5143_s8 + $0xf0] sm:$0xff] %v227_v30  ;;  %230 = vst [vmem:[%s5143_s8 + $0xf8] sm:$0xff] %v229_v31  ;;  %v233_v33 = vld [vmem:[%s5138_s7 + $0x208] sm:$0xff]  ;;  %v235_v34 = vld [vmem:[%s5138_s7 + $0x210] sm:$0xff] }
  0x29   : > { %232 = vst [vmem:[%s5143_s8 + $0x100] sm:$0xff] %v231_v32  ;;  %v237_v35 = vld [vmem:[%s5138_s7 + $0x218] sm:$0xff]  ;;  %234 = vst [vmem:[%s5143_s8 + $0x108] sm:$0xff] %v233_v33  ;;  %v239_v36 = vld [vmem:[%s5138_s7 + $0x240] sm:$0xff] }
  0x2a   : > { %236 = vst [vmem:[%s5143_s8 + $0x110] sm:$0xff] %v235_v34  ;;  %238 = vst [vmem:[%s5143_s8 + $0x118] sm:$0xff] %v237_v35  ;;  %v241_v37 = vld [vmem:[%s5138_s7 + $0x248] sm:$0xff]  ;;  %v243_v38 = vld [vmem:[%s5138_s7 + $0x250] sm:$0xff] }
  0x2b   : > { %240 = vst [vmem:[%s5143_s8 + $0x120] sm:$0xff] %v239_v36  ;;  %242 = vst [vmem:[%s5143_s8 + $0x128] sm:$0xff] %v241_v37  ;;  %v245_v39 = vld [vmem:[%s5138_s7 + $0x258] sm:$0xff]  ;;  %v247_v40 = vld [vmem:[%s5138_s7 + $0x280] sm:$0xff] }
  0x2c   : > { %244 = vst [vmem:[%s5143_s8 + $0x130] sm:$0xff] %v243_v38  ;;  %v249_v41 = vld [vmem:[%s5138_s7 + $0x288] sm:$0xff]  ;;  %246 = vst [vmem:[%s5143_s8 + $0x138] sm:$0xff] %v245_v39  ;;  %v251_v42 = vld [vmem:[%s5138_s7 + $0x290] sm:$0xff] }
  0x2d   : > { %248 = vst [vmem:[%s5143_s8 + $0x140] sm:$0xff] %v247_v40  ;;  %250 = vst [vmem:[%s5143_s8 + $0x148] sm:$0xff] %v249_v41  ;;  %v253_v43 = vld [vmem:[%s5138_s7 + $0x298] sm:$0xff]  ;;  %v255_v44 = vld [vmem:[%s5138_s7 + $0x2c0] sm:$0xff] }
  0x2e   : > { %252 = vst [vmem:[%s5143_s8 + $0x150] sm:$0xff] %v251_v42  ;;  %254 = vst [vmem:[%s5143_s8 + $0x158] sm:$0xff] %v253_v43  ;;  %v257_v45 = vld [vmem:[%s5138_s7 + $0x2c8] sm:$0xff]  ;;  %v259_v46 = vld [vmem:[%s5138_s7 + $0x2d0] sm:$0xff] }
  0x2f   : > { %256 = vst [vmem:[%s5143_s8 + $0x160] sm:$0xff] %v255_v44  ;;  %v261_v47 = vld [vmem:[%s5138_s7 + $0x2d8] sm:$0xff]  ;;  %258 = vst [vmem:[%s5143_s8 + $0x168] sm:$0xff] %v257_v45  ;;  %v263_v48 = vld [vmem:[%s5138_s7 + $0x300] sm:$0xff] }
  0x30   : > { %260 = vst [vmem:[%s5143_s8 + $0x170] sm:$0xff] %v259_v46  ;;  %262 = vst [vmem:[%s5143_s8 + $0x178] sm:$0xff] %v261_v47  ;;  %v265_v49 = vld [vmem:[%s5138_s7 + $0x308] sm:$0xff]  ;;  %v267_v50 = vld [vmem:[%s5138_s7 + $0x310] sm:$0xff] }
  0x31   : > { %264 = vst [vmem:[%s5143_s8 + $0x180] sm:$0xff] %v263_v48  ;;  %266 = vst [vmem:[%s5143_s8 + $0x188] sm:$0xff] %v265_v49  ;;  %v269_v51 = vld [vmem:[%s5138_s7 + $0x318] sm:$0xff]  ;;  %v271_v52 = vld [vmem:[%s5138_s7 + $0x340] sm:$0xff] }
  0x32   : > { %268 = vst [vmem:[%s5143_s8 + $0x190] sm:$0xff] %v267_v50  ;;  %v273_v53 = vld [vmem:[%s5138_s7 + $0x348] sm:$0xff]  ;;  %270 = vst [vmem:[%s5143_s8 + $0x198] sm:$0xff] %v269_v51  ;;  %v275_v54 = vld [vmem:[%s5138_s7 + $0x350] sm:$0xff] }
  0x33   : > { %272 = vst [vmem:[%s5143_s8 + $0x1a0] sm:$0xff] %v271_v52  ;;  %274 = vst [vmem:[%s5143_s8 + $0x1a8] sm:$0xff] %v273_v53  ;;  %v277_v55 = vld [vmem:[%s5138_s7 + $0x358] sm:$0xff]  ;;  %v279_v56 = vld [vmem:[%s5138_s7 + $0x380] sm:$0xff] }
  0x34   : > { %276 = vst [vmem:[%s5143_s8 + $0x1b0] sm:$0xff] %v275_v54  ;;  %278 = vst [vmem:[%s5143_s8 + $0x1b8] sm:$0xff] %v277_v55  ;;  %v281_v57 = vld [vmem:[%s5138_s7 + $0x388] sm:$0xff]  ;;  %v283_v58 = vld [vmem:[%s5138_s7 + $0x390] sm:$0xff] }
  0x35   : > { %280 = vst [vmem:[%s5143_s8 + $0x1c0] sm:$0xff] %v279_v56  ;;  %v285_v59 = vld [vmem:[%s5138_s7 + $0x398] sm:$0xff]  ;;  %282 = vst [vmem:[%s5143_s8 + $0x1c8] sm:$0xff] %v281_v57  ;;  %v287_v60 = vld [vmem:[%s5138_s7 + $0x3c0] sm:$0xff] }
  0x36   : > { %284 = vst [vmem:[%s5143_s8 + $0x1d0] sm:$0xff] %v283_v58  ;;  %286 = vst [vmem:[%s5143_s8 + $0x1d8] sm:$0xff] %v285_v59  ;;  %v289_v61 = vld [vmem:[%s5138_s7 + $0x3c8] sm:$0xff]  ;;  %v291_v62 = vld [vmem:[%s5138_s7 + $0x3d0] sm:$0xff] }
  0x37   : > { %288 = vst [vmem:[%s5143_s8 + $0x1e0] sm:$0xff] %v287_v60  ;;  %290 = vst [vmem:[%s5143_s8 + $0x1e8] sm:$0xff] %v289_v61  ;;  %v293_v63 = vld [vmem:[%s5138_s7 + $0x3d8] sm:$0xff]  ;;  %v295_v0 = vld [vmem:[%s5138_s7 + $0x400] sm:$0xff] }
  0x38   : > { %292 = vst [vmem:[%s5143_s8 + $0x1f0] sm:$0xff] %v291_v62  ;;  %v297_v1 = vld [vmem:[%s5138_s7 + $0x408] sm:$0xff]  ;;  %294 = vst [vmem:[%s5143_s8 + $0x1f8] sm:$0xff] %v293_v63  ;;  %v299_v2 = vld [vmem:[%s5138_s7 + $0x410] sm:$0xff] }
  0x39   : > { %296 = vst [vmem:[%s5143_s8 + $0x200] sm:$0xff] %v295_v0  ;;  %298 = vst [vmem:[%s5143_s8 + $0x208] sm:$0xff] %v297_v1  ;;  %v301_v3 = vld [vmem:[%s5138_s7 + $0x418] sm:$0xff]  ;;  %v303_v4 = vld [vmem:[%s5138_s7 + $0x440] sm:$0xff] }
  0x3a   : > { %300 = vst [vmem:[%s5143_s8 + $0x210] sm:$0xff] %v299_v2  ;;  %302 = vst [vmem:[%s5143_s8 + $0x218] sm:$0xff] %v301_v3  ;;  %v305_v5 = vld [vmem:[%s5138_s7 + $0x448] sm:$0xff]  ;;  %v307_v6 = vld [vmem:[%s5138_s7 + $0x450] sm:$0xff] }
  0x3b   : > { %304 = vst [vmem:[%s5143_s8 + $0x220] sm:$0xff] %v303_v4  ;;  %v309_v7 = vld [vmem:[%s5138_s7 + $0x458] sm:$0xff]  ;;  %306 = vst [vmem:[%s5143_s8 + $0x228] sm:$0xff] %v305_v5  ;;  %v311_v8 = vld [vmem:[%s5138_s7 + $0x480] sm:$0xff] }
  0x3c   : > { %308 = vst [vmem:[%s5143_s8 + $0x230] sm:$0xff] %v307_v6  ;;  %310 = vst [vmem:[%s5143_s8 + $0x238] sm:$0xff] %v309_v7  ;;  %v313_v9 = vld [vmem:[%s5138_s7 + $0x488] sm:$0xff]  ;;  %v315_v10 = vld [vmem:[%s5138_s7 + $0x490] sm:$0xff] }
  0x3d   : > { %312 = vst [vmem:[%s5143_s8 + $0x240] sm:$0xff] %v311_v8  ;;  %314 = vst [vmem:[%s5143_s8 + $0x248] sm:$0xff] %v313_v9  ;;  %v317_v11 = vld [vmem:[%s5138_s7 + $0x498] sm:$0xff]  ;;  %v319_v12 = vld [vmem:[%s5138_s7 + $0x4c0] sm:$0xff] }
  0x3e   : > { %316 = vst [vmem:[%s5143_s8 + $0x250] sm:$0xff] %v315_v10  ;;  %v321_v13 = vld [vmem:[%s5138_s7 + $0x4c8] sm:$0xff]  ;;  %318 = vst [vmem:[%s5143_s8 + $0x258] sm:$0xff] %v317_v11  ;;  %v323_v14 = vld [vmem:[%s5138_s7 + $0x4d0] sm:$0xff] }
  0x3f   : > { %320 = vst [vmem:[%s5143_s8 + $0x260] sm:$0xff] %v319_v12  ;;  %322 = vst [vmem:[%s5143_s8 + $0x268] sm:$0xff] %v321_v13  ;;  %v325_v15 = vld [vmem:[%s5138_s7 + $0x4d8] sm:$0xff]  ;;  %v327_v16 = vld [vmem:[%s5138_s7 + $0x500] sm:$0xff] }
  0x40   : > { %324 = vst [vmem:[%s5143_s8 + $0x270] sm:$0xff] %v323_v14  ;;  %326 = vst [vmem:[%s5143_s8 + $0x278] sm:$0xff] %v325_v15  ;;  %v329_v17 = vld [vmem:[%s5138_s7 + $0x508] sm:$0xff]  ;;  %v331_v18 = vld [vmem:[%s5138_s7 + $0x510] sm:$0xff] }
  0x41   : > { %328 = vst [vmem:[%s5143_s8 + $0x280] sm:$0xff] %v327_v16  ;;  %v333_v19 = vld [vmem:[%s5138_s7 + $0x518] sm:$0xff]  ;;  %330 = vst [vmem:[%s5143_s8 + $0x288] sm:$0xff] %v329_v17  ;;  %v335_v20 = vld [vmem:[%s5138_s7 + $0x540] sm:$0xff] }
  0x42   : > { %332 = vst [vmem:[%s5143_s8 + $0x290] sm:$0xff] %v331_v18  ;;  %334 = vst [vmem:[%s5143_s8 + $0x298] sm:$0xff] %v333_v19  ;;  %v337_v21 = vld [vmem:[%s5138_s7 + $0x548] sm:$0xff]  ;;  %v339_v22 = vld [vmem:[%s5138_s7 + $0x550] sm:$0xff] }
  0x43   : > { %336 = vst [vmem:[%s5143_s8 + $0x2a0] sm:$0xff] %v335_v20  ;;  %338 = vst [vmem:[%s5143_s8 + $0x2a8] sm:$0xff] %v337_v21  ;;  %v341_v23 = vld [vmem:[%s5138_s7 + $0x558] sm:$0xff]  ;;  %v343_v24 = vld [vmem:[%s5138_s7 + $0x580] sm:$0xff] }
  0x44   : > { %340 = vst [vmem:[%s5143_s8 + $0x2b0] sm:$0xff] %v339_v22  ;;  %v345_v25 = vld [vmem:[%s5138_s7 + $0x588] sm:$0xff]  ;;  %342 = vst [vmem:[%s5143_s8 + $0x2b8] sm:$0xff] %v341_v23  ;;  %v347_v26 = vld [vmem:[%s5138_s7 + $0x590] sm:$0xff] }
  0x45   : > { %344 = vst [vmem:[%s5143_s8 + $0x2c0] sm:$0xff] %v343_v24  ;;  %346 = vst [vmem:[%s5143_s8 + $0x2c8] sm:$0xff] %v345_v25  ;;  %v349_v27 = vld [vmem:[%s5138_s7 + $0x598] sm:$0xff]  ;;  %v351_v28 = vld [vmem:[%s5138_s7 + $0x5c0] sm:$0xff] }
  0x46   : > { %348 = vst [vmem:[%s5143_s8 + $0x2d0] sm:$0xff] %v347_v26  ;;  %350 = vst [vmem:[%s5143_s8 + $0x2d8] sm:$0xff] %v349_v27  ;;  %v353_v29 = vld [vmem:[%s5138_s7 + $0x5c8] sm:$0xff]  ;;  %v355_v30 = vld [vmem:[%s5138_s7 + $0x5d0] sm:$0xff] }
  0x47   : > { %352 = vst [vmem:[%s5143_s8 + $0x2e0] sm:$0xff] %v351_v28  ;;  %v357_v31 = vld [vmem:[%s5138_s7 + $0x5d8] sm:$0xff]  ;;  %354 = vst [vmem:[%s5143_s8 + $0x2e8] sm:$0xff] %v353_v29  ;;  %v359_v32 = vld [vmem:[%s5138_s7 + $0x600] sm:$0xff] }
  0x48   : > { %356 = vst [vmem:[%s5143_s8 + $0x2f0] sm:$0xff] %v355_v30  ;;  %358 = vst [vmem:[%s5143_s8 + $0x2f8] sm:$0xff] %v357_v31  ;;  %v361_v33 = vld [vmem:[%s5138_s7 + $0x608] sm:$0xff]  ;;  %v363_v34 = vld [vmem:[%s5138_s7 + $0x610] sm:$0xff] }
  0x49   : > { %360 = vst [vmem:[%s5143_s8 + $0x300] sm:$0xff] %v359_v32  ;;  %362 = vst [vmem:[%s5143_s8 + $0x308] sm:$0xff] %v361_v33  ;;  %v365_v35 = vld [vmem:[%s5138_s7 + $0x618] sm:$0xff]  ;;  %v367_v36 = vld [vmem:[%s5138_s7 + $0x640] sm:$0xff] }
  0x4a   : > { %364 = vst [vmem:[%s5143_s8 + $0x310] sm:$0xff] %v363_v34  ;;  %v369_v37 = vld [vmem:[%s5138_s7 + $0x648] sm:$0xff]  ;;  %366 = vst [vmem:[%s5143_s8 + $0x318] sm:$0xff] %v365_v35  ;;  %v371_v38 = vld [vmem:[%s5138_s7 + $0x650] sm:$0xff] }
  0x4b   : > { %368 = vst [vmem:[%s5143_s8 + $0x320] sm:$0xff] %v367_v36  ;;  %370 = vst [vmem:[%s5143_s8 + $0x328] sm:$0xff] %v369_v37  ;;  %v373_v39 = vld [vmem:[%s5138_s7 + $0x658] sm:$0xff]  ;;  %v375_v40 = vld [vmem:[%s5138_s7 + $0x680] sm:$0xff] }
  0x4c   : > { %372 = vst [vmem:[%s5143_s8 + $0x330] sm:$0xff] %v371_v38  ;;  %374 = vst [vmem:[%s5143_s8 + $0x338] sm:$0xff] %v373_v39  ;;  %v377_v41 = vld [vmem:[%s5138_s7 + $0x688] sm:$0xff]  ;;  %v379_v42 = vld [vmem:[%s5138_s7 + $0x690] sm:$0xff] }
  0x4d   : > { %376 = vst [vmem:[%s5143_s8 + $0x340] sm:$0xff] %v375_v40  ;;  %v381_v43 = vld [vmem:[%s5138_s7 + $0x698] sm:$0xff]  ;;  %378 = vst [vmem:[%s5143_s8 + $0x348] sm:$0xff] %v377_v41  ;;  %v383_v44 = vld [vmem:[%s5138_s7 + $0x6c0] sm:$0xff] }
  0x4e   : > { %380 = vst [vmem:[%s5143_s8 + $0x350] sm:$0xff] %v379_v42  ;;  %382 = vst [vmem:[%s5143_s8 + $0x358] sm:$0xff] %v381_v43  ;;  %v385_v45 = vld [vmem:[%s5138_s7 + $0x6c8] sm:$0xff]  ;;  %v387_v46 = vld [vmem:[%s5138_s7 + $0x6d0] sm:$0xff] }
  0x4f   : > { %384 = vst [vmem:[%s5143_s8 + $0x360] sm:$0xff] %v383_v44  ;;  %386 = vst [vmem:[%s5143_s8 + $0x368] sm:$0xff] %v385_v45  ;;  %v389_v47 = vld [vmem:[%s5138_s7 + $0x6d8] sm:$0xff]  ;;  %v391_v48 = vld [vmem:[%s5138_s7 + $0x700] sm:$0xff] }
  0x50   : > { %388 = vst [vmem:[%s5143_s8 + $0x370] sm:$0xff] %v387_v46  ;;  %v393_v49 = vld [vmem:[%s5138_s7 + $0x708] sm:$0xff]  ;;  %390 = vst [vmem:[%s5143_s8 + $0x378] sm:$0xff] %v389_v47  ;;  %v395_v50 = vld [vmem:[%s5138_s7 + $0x710] sm:$0xff] }
  0x51   : > { %392 = vst [vmem:[%s5143_s8 + $0x380] sm:$0xff] %v391_v48  ;;  %394 = vst [vmem:[%s5143_s8 + $0x388] sm:$0xff] %v393_v49  ;;  %v397_v51 = vld [vmem:[%s5138_s7 + $0x718] sm:$0xff]  ;;  %v399_v52 = vld [vmem:[%s5138_s7 + $0x740] sm:$0xff] }
  0x52   : > { %396 = vst [vmem:[%s5143_s8 + $0x390] sm:$0xff] %v395_v50  ;;  %398 = vst [vmem:[%s5143_s8 + $0x398] sm:$0xff] %v397_v51  ;;  %v401_v53 = vld [vmem:[%s5138_s7 + $0x748] sm:$0xff]  ;;  %v403_v54 = vld [vmem:[%s5138_s7 + $0x750] sm:$0xff] }
  0x53   : > { %400 = vst [vmem:[%s5143_s8 + $0x3a0] sm:$0xff] %v399_v52  ;;  %v405_v55 = vld [vmem:[%s5138_s7 + $0x758] sm:$0xff]  ;;  %402 = vst [vmem:[%s5143_s8 + $0x3a8] sm:$0xff] %v401_v53  ;;  %v407_v56 = vld [vmem:[%s5138_s7 + $0x780] sm:$0xff] }
  0x54   : > { %404 = vst [vmem:[%s5143_s8 + $0x3b0] sm:$0xff] %v403_v54  ;;  %406 = vst [vmem:[%s5143_s8 + $0x3b8] sm:$0xff] %v405_v55  ;;  %v409_v57 = vld [vmem:[%s5138_s7 + $0x788] sm:$0xff]  ;;  %v411_v58 = vld [vmem:[%s5138_s7 + $0x790] sm:$0xff] }
  0x55   : > { %408 = vst [vmem:[%s5143_s8 + $0x3c0] sm:$0xff] %v407_v56  ;;  %410 = vst [vmem:[%s5143_s8 + $0x3c8] sm:$0xff] %v409_v57  ;;  %v413_v59 = vld [vmem:[%s5138_s7 + $0x798] sm:$0xff]  ;;  %v415_v60 = vld [vmem:[%s5138_s7 + $0x7c0] sm:$0xff] }
  0x56   : > { %412 = vst [vmem:[%s5143_s8 + $0x3d0] sm:$0xff] %v411_v58  ;;  %v417_v61 = vld [vmem:[%s5138_s7 + $0x7c8] sm:$0xff]  ;;  %414 = vst [vmem:[%s5143_s8 + $0x3d8] sm:$0xff] %v413_v59  ;;  %v419_v62 = vld [vmem:[%s5138_s7 + $0x7d0] sm:$0xff] }
  0x57   : > { %416 = vst [vmem:[%s5143_s8 + $0x3e0] sm:$0xff] %v415_v60  ;;  %418 = vst [vmem:[%s5143_s8 + $0x3e8] sm:$0xff] %v417_v61  ;;  %v421_v63 = vld [vmem:[%s5138_s7 + $0x7d8] sm:$0xff]  ;;  %v423_v0 = vld [vmem:[%s5138_s7 + $0x800] sm:$0xff] }
  0x58   : > { %420 = vst [vmem:[%s5143_s8 + $0x3f0] sm:$0xff] %v419_v62  ;;  %422 = vst [vmem:[%s5143_s8 + $0x3f8] sm:$0xff] %v421_v63  ;;  %v425_v1 = vld [vmem:[%s5138_s7 + $0x808] sm:$0xff]  ;;  %v427_v2 = vld [vmem:[%s5138_s7 + $0x810] sm:$0xff] }
  0x59   : > { %424 = vst [vmem:[%s5143_s8 + $0x400] sm:$0xff] %v423_v0  ;;  %v429_v3 = vld [vmem:[%s5138_s7 + $0x818] sm:$0xff]  ;;  %426 = vst [vmem:[%s5143_s8 + $0x408] sm:$0xff] %v425_v1  ;;  %v431_v4 = vld [vmem:[%s5138_s7 + $0x840] sm:$0xff] }
  0x5a   : > { %428 = vst [vmem:[%s5143_s8 + $0x410] sm:$0xff] %v427_v2  ;;  %430 = vst [vmem:[%s5143_s8 + $0x418] sm:$0xff] %v429_v3  ;;  %v433_v5 = vld [vmem:[%s5138_s7 + $0x848] sm:$0xff]  ;;  %v435_v6 = vld [vmem:[%s5138_s7 + $0x850] sm:$0xff] }
  0x5b   : > { %432 = vst [vmem:[%s5143_s8 + $0x420] sm:$0xff] %v431_v4  ;;  %434 = vst [vmem:[%s5143_s8 + $0x428] sm:$0xff] %v433_v5  ;;  %v437_v7 = vld [vmem:[%s5138_s7 + $0x858] sm:$0xff]  ;;  %v439_v8 = vld [vmem:[%s5138_s7 + $0x880] sm:$0xff] }
  0x5c   : > { %436 = vst [vmem:[%s5143_s8 + $0x430] sm:$0xff] %v435_v6  ;;  %v441_v9 = vld [vmem:[%s5138_s7 + $0x888] sm:$0xff]  ;;  %438 = vst [vmem:[%s5143_s8 + $0x438] sm:$0xff] %v437_v7  ;;  %v443_v10 = vld [vmem:[%s5138_s7 + $0x890] sm:$0xff] }
  0x5d   : > { %440 = vst [vmem:[%s5143_s8 + $0x440] sm:$0xff] %v439_v8  ;;  %442 = vst [vmem:[%s5143_s8 + $0x448] sm:$0xff] %v441_v9  ;;  %v445_v11 = vld [vmem:[%s5138_s7 + $0x898] sm:$0xff]  ;;  %v447_v12 = vld [vmem:[%s5138_s7 + $0x8c0] sm:$0xff] }
  0x5e   : > { %444 = vst [vmem:[%s5143_s8 + $0x450] sm:$0xff] %v443_v10  ;;  %446 = vst [vmem:[%s5143_s8 + $0x458] sm:$0xff] %v445_v11  ;;  %v449_v13 = vld [vmem:[%s5138_s7 + $0x8c8] sm:$0xff]  ;;  %v451_v14 = vld [vmem:[%s5138_s7 + $0x8d0] sm:$0xff] }
  0x5f   : > { %448 = vst [vmem:[%s5143_s8 + $0x460] sm:$0xff] %v447_v12  ;;  %v453_v15 = vld [vmem:[%s5138_s7 + $0x8d8] sm:$0xff]  ;;  %450 = vst [vmem:[%s5143_s8 + $0x468] sm:$0xff] %v449_v13  ;;  %v455_v16 = vld [vmem:[%s5138_s7 + $0x900] sm:$0xff] }
  0x60   : > { %452 = vst [vmem:[%s5143_s8 + $0x470] sm:$0xff] %v451_v14  ;;  %454 = vst [vmem:[%s5143_s8 + $0x478] sm:$0xff] %v453_v15  ;;  %v457_v17 = vld [vmem:[%s5138_s7 + $0x908] sm:$0xff]  ;;  %v459_v18 = vld [vmem:[%s5138_s7 + $0x910] sm:$0xff] }
  0x61   : > { %456 = vst [vmem:[%s5143_s8 + $0x480] sm:$0xff] %v455_v16  ;;  %458 = vst [vmem:[%s5143_s8 + $0x488] sm:$0xff] %v457_v17  ;;  %v461_v19 = vld [vmem:[%s5138_s7 + $0x918] sm:$0xff]  ;;  %v463_v20 = vld [vmem:[%s5138_s7 + $0x940] sm:$0xff] }
  0x62   : > { %460 = vst [vmem:[%s5143_s8 + $0x490] sm:$0xff] %v459_v18  ;;  %v465_v21 = vld [vmem:[%s5138_s7 + $0x948] sm:$0xff]  ;;  %462 = vst [vmem:[%s5143_s8 + $0x498] sm:$0xff] %v461_v19  ;;  %v467_v22 = vld [vmem:[%s5138_s7 + $0x950] sm:$0xff] }
  0x63   : > { %464 = vst [vmem:[%s5143_s8 + $0x4a0] sm:$0xff] %v463_v20  ;;  %466 = vst [vmem:[%s5143_s8 + $0x4a8] sm:$0xff] %v465_v21  ;;  %v469_v23 = vld [vmem:[%s5138_s7 + $0x958] sm:$0xff]  ;;  %v471_v24 = vld [vmem:[%s5138_s7 + $0x980] sm:$0xff] }
  0x64   : > { %468 = vst [vmem:[%s5143_s8 + $0x4b0] sm:$0xff] %v467_v22  ;;  %470 = vst [vmem:[%s5143_s8 + $0x4b8] sm:$0xff] %v469_v23  ;;  %v473_v25 = vld [vmem:[%s5138_s7 + $0x988] sm:$0xff]  ;;  %v475_v26 = vld [vmem:[%s5138_s7 + $0x990] sm:$0xff] }
  0x65   : > { %472 = vst [vmem:[%s5143_s8 + $0x4c0] sm:$0xff] %v471_v24  ;;  %v477_v27 = vld [vmem:[%s5138_s7 + $0x998] sm:$0xff]  ;;  %474 = vst [vmem:[%s5143_s8 + $0x4c8] sm:$0xff] %v473_v25  ;;  %v479_v28 = vld [vmem:[%s5138_s7 + $0x9c0] sm:$0xff] }
  0x66   : > { %476 = vst [vmem:[%s5143_s8 + $0x4d0] sm:$0xff] %v475_v26  ;;  %478 = vst [vmem:[%s5143_s8 + $0x4d8] sm:$0xff] %v477_v27  ;;  %v481_v29 = vld [vmem:[%s5138_s7 + $0x9c8] sm:$0xff]  ;;  %v483_v30 = vld [vmem:[%s5138_s7 + $0x9d0] sm:$0xff] }
  0x67   : > { %480 = vst [vmem:[%s5143_s8 + $0x4e0] sm:$0xff] %v479_v28  ;;  %482 = vst [vmem:[%s5143_s8 + $0x4e8] sm:$0xff] %v481_v29  ;;  %v485_v31 = vld [vmem:[%s5138_s7 + $0x9d8] sm:$0xff]  ;;  %v487_v32 = vld [vmem:[%s5138_s7 + $0xa00] sm:$0xff] }
  0x68   : > { %484 = vst [vmem:[%s5143_s8 + $0x4f0] sm:$0xff] %v483_v30  ;;  %v489_v33 = vld [vmem:[%s5138_s7 + $0xa08] sm:$0xff]  ;;  %486 = vst [vmem:[%s5143_s8 + $0x4f8] sm:$0xff] %v485_v31  ;;  %v491_v34 = vld [vmem:[%s5138_s7 + $0xa10] sm:$0xff] }
  0x69   : > { %488 = vst [vmem:[%s5143_s8 + $0x500] sm:$0xff] %v487_v32  ;;  %490 = vst [vmem:[%s5143_s8 + $0x508] sm:$0xff] %v489_v33  ;;  %v493_v35 = vld [vmem:[%s5138_s7 + $0xa18] sm:$0xff]  ;;  %v495_v36 = vld [vmem:[%s5138_s7 + $0xa40] sm:$0xff] }
  0x6a   : > { %492 = vst [vmem:[%s5143_s8 + $0x510] sm:$0xff] %v491_v34  ;;  %494 = vst [vmem:[%s5143_s8 + $0x518] sm:$0xff] %v493_v35  ;;  %v497_v37 = vld [vmem:[%s5138_s7 + $0xa48] sm:$0xff]  ;;  %v499_v38 = vld [vmem:[%s5138_s7 + $0xa50] sm:$0xff] }
  0x6b   : > { %496 = vst [vmem:[%s5143_s8 + $0x520] sm:$0xff] %v495_v36  ;;  %v501_v39 = vld [vmem:[%s5138_s7 + $0xa58] sm:$0xff]  ;;  %498 = vst [vmem:[%s5143_s8 + $0x528] sm:$0xff] %v497_v37  ;;  %v503_v40 = vld [vmem:[%s5138_s7 + $0xa80] sm:$0xff] }
  0x6c   : > { %500 = vst [vmem:[%s5143_s8 + $0x530] sm:$0xff] %v499_v38  ;;  %502 = vst [vmem:[%s5143_s8 + $0x538] sm:$0xff] %v501_v39  ;;  %v505_v41 = vld [vmem:[%s5138_s7 + $0xa88] sm:$0xff]  ;;  %v507_v42 = vld [vmem:[%s5138_s7 + $0xa90] sm:$0xff] }
  0x6d   : > { %504 = vst [vmem:[%s5143_s8 + $0x540] sm:$0xff] %v503_v40  ;;  %506 = vst [vmem:[%s5143_s8 + $0x548] sm:$0xff] %v505_v41  ;;  %v509_v43 = vld [vmem:[%s5138_s7 + $0xa98] sm:$0xff]  ;;  %v511_v44 = vld [vmem:[%s5138_s7 + $0xac0] sm:$0xff] }
  0x6e   : > { %508 = vst [vmem:[%s5143_s8 + $0x550] sm:$0xff] %v507_v42  ;;  %v513_v45 = vld [vmem:[%s5138_s7 + $0xac8] sm:$0xff]  ;;  %510 = vst [vmem:[%s5143_s8 + $0x558] sm:$0xff] %v509_v43  ;;  %v515_v46 = vld [vmem:[%s5138_s7 + $0xad0] sm:$0xff] }
  0x6f   : > { %512 = vst [vmem:[%s5143_s8 + $0x560] sm:$0xff] %v511_v44  ;;  %514 = vst [vmem:[%s5143_s8 + $0x568] sm:$0xff] %v513_v45  ;;  %v517_v47 = vld [vmem:[%s5138_s7 + $0xad8] sm:$0xff]  ;;  %v519_v48 = vld [vmem:[%s5138_s7 + $0xb00] sm:$0xff] }
  0x70   : > { %516 = vst [vmem:[%s5143_s8 + $0x570] sm:$0xff] %v515_v46  ;;  %518 = vst [vmem:[%s5143_s8 + $0x578] sm:$0xff] %v517_v47  ;;  %v521_v49 = vld [vmem:[%s5138_s7 + $0xb08] sm:$0xff]  ;;  %v523_v50 = vld [vmem:[%s5138_s7 + $0xb10] sm:$0xff] }
  0x71   : > { %520 = vst [vmem:[%s5143_s8 + $0x580] sm:$0xff] %v519_v48  ;;  %v525_v51 = vld [vmem:[%s5138_s7 + $0xb18] sm:$0xff]  ;;  %522 = vst [vmem:[%s5143_s8 + $0x588] sm:$0xff] %v521_v49  ;;  %v527_v52 = vld [vmem:[%s5138_s7 + $0xb40] sm:$0xff] }
  0x72   : > { %524 = vst [vmem:[%s5143_s8 + $0x590] sm:$0xff] %v523_v50  ;;  %526 = vst [vmem:[%s5143_s8 + $0x598] sm:$0xff] %v525_v51  ;;  %v529_v53 = vld [vmem:[%s5138_s7 + $0xb48] sm:$0xff]  ;;  %v531_v54 = vld [vmem:[%s5138_s7 + $0xb50] sm:$0xff] }
  0x73   : > { %528 = vst [vmem:[%s5143_s8 + $0x5a0] sm:$0xff] %v527_v52  ;;  %530 = vst [vmem:[%s5143_s8 + $0x5a8] sm:$0xff] %v529_v53  ;;  %v533_v55 = vld [vmem:[%s5138_s7 + $0xb58] sm:$0xff]  ;;  %v535_v56 = vld [vmem:[%s5138_s7 + $0xb80] sm:$0xff] }
  0x74   : > { %532 = vst [vmem:[%s5143_s8 + $0x5b0] sm:$0xff] %v531_v54  ;;  %v537_v57 = vld [vmem:[%s5138_s7 + $0xb88] sm:$0xff]  ;;  %534 = vst [vmem:[%s5143_s8 + $0x5b8] sm:$0xff] %v533_v55  ;;  %v539_v58 = vld [vmem:[%s5138_s7 + $0xb90] sm:$0xff] }
  0x75   : > { %536 = vst [vmem:[%s5143_s8 + $0x5c0] sm:$0xff] %v535_v56  ;;  %538 = vst [vmem:[%s5143_s8 + $0x5c8] sm:$0xff] %v537_v57  ;;  %v541_v59 = vld [vmem:[%s5138_s7 + $0xb98] sm:$0xff]  ;;  %v543_v60 = vld [vmem:[%s5138_s7 + $0xbc0] sm:$0xff] }
  0x76   : > { %540 = vst [vmem:[%s5143_s8 + $0x5d0] sm:$0xff] %v539_v58  ;;  %542 = vst [vmem:[%s5143_s8 + $0x5d8] sm:$0xff] %v541_v59  ;;  %v545_v61 = vld [vmem:[%s5138_s7 + $0xbc8] sm:$0xff]  ;;  %v547_v62 = vld [vmem:[%s5138_s7 + $0xbd0] sm:$0xff] }
  0x77   : > { %544 = vst [vmem:[%s5143_s8 + $0x5e0] sm:$0xff] %v543_v60  ;;  %v549_v63 = vld [vmem:[%s5138_s7 + $0xbd8] sm:$0xff]  ;;  %546 = vst [vmem:[%s5143_s8 + $0x5e8] sm:$0xff] %v545_v61  ;;  %v551_v0 = vld [vmem:[%s5138_s7 + $0xc00] sm:$0xff] }
  0x78   : > { %548 = vst [vmem:[%s5143_s8 + $0x5f0] sm:$0xff] %v547_v62  ;;  %550 = vst [vmem:[%s5143_s8 + $0x5f8] sm:$0xff] %v549_v63  ;;  %v553_v1 = vld [vmem:[%s5138_s7 + $0xc08] sm:$0xff]  ;;  %v555_v2 = vld [vmem:[%s5138_s7 + $0xc10] sm:$0xff] }
  0x79   : > { %552 = vst [vmem:[%s5143_s8 + $0x600] sm:$0xff] %v551_v0  ;;  %554 = vst [vmem:[%s5143_s8 + $0x608] sm:$0xff] %v553_v1  ;;  %v557_v3 = vld [vmem:[%s5138_s7 + $0xc18] sm:$0xff]  ;;  %v559_v4 = vld [vmem:[%s5138_s7 + $0xc40] sm:$0xff] }
  0x7a   : > { %556 = vst [vmem:[%s5143_s8 + $0x610] sm:$0xff] %v555_v2  ;;  %v561_v5 = vld [vmem:[%s5138_s7 + $0xc48] sm:$0xff]  ;;  %558 = vst [vmem:[%s5143_s8 + $0x618] sm:$0xff] %v557_v3  ;;  %v563_v6 = vld [vmem:[%s5138_s7 + $0xc50] sm:$0xff] }
  0x7b   : > { %560 = vst [vmem:[%s5143_s8 + $0x620] sm:$0xff] %v559_v4  ;;  %562 = vst [vmem:[%s5143_s8 + $0x628] sm:$0xff] %v561_v5  ;;  %v565_v7 = vld [vmem:[%s5138_s7 + $0xc58] sm:$0xff]  ;;  %v567_v8 = vld [vmem:[%s5138_s7 + $0xc80] sm:$0xff] }
  0x7c   : > { %564 = vst [vmem:[%s5143_s8 + $0x630] sm:$0xff] %v563_v6  ;;  %566 = vst [vmem:[%s5143_s8 + $0x638] sm:$0xff] %v565_v7  ;;  %v569_v9 = vld [vmem:[%s5138_s7 + $0xc88] sm:$0xff]  ;;  %v571_v10 = vld [vmem:[%s5138_s7 + $0xc90] sm:$0xff] }
  0x7d   : > { %568 = vst [vmem:[%s5143_s8 + $0x640] sm:$0xff] %v567_v8  ;;  %v573_v11 = vld [vmem:[%s5138_s7 + $0xc98] sm:$0xff]  ;;  %570 = vst [vmem:[%s5143_s8 + $0x648] sm:$0xff] %v569_v9  ;;  %v575_v12 = vld [vmem:[%s5138_s7 + $0xcc0] sm:$0xff] }
  0x7e   : > { %572 = vst [vmem:[%s5143_s8 + $0x650] sm:$0xff] %v571_v10  ;;  %574 = vst [vmem:[%s5143_s8 + $0x658] sm:$0xff] %v573_v11  ;;  %v577_v13 = vld [vmem:[%s5138_s7 + $0xcc8] sm:$0xff]  ;;  %v579_v14 = vld [vmem:[%s5138_s7 + $0xcd0] sm:$0xff] }
  0x7f   : > { %576 = vst [vmem:[%s5143_s8 + $0x660] sm:$0xff] %v575_v12  ;;  %578 = vst [vmem:[%s5143_s8 + $0x668] sm:$0xff] %v577_v13  ;;  %v581_v15 = vld [vmem:[%s5138_s7 + $0xcd8] sm:$0xff]  ;;  %v583_v16 = vld [vmem:[%s5138_s7 + $0xd00] sm:$0xff] }
  0x80   : > { %580 = vst [vmem:[%s5143_s8 + $0x670] sm:$0xff] %v579_v14  ;;  %v585_v17 = vld [vmem:[%s5138_s7 + $0xd08] sm:$0xff]  ;;  %582 = vst [vmem:[%s5143_s8 + $0x678] sm:$0xff] %v581_v15  ;;  %v587_v18 = vld [vmem:[%s5138_s7 + $0xd10] sm:$0xff] }
  0x81   : > { %584 = vst [vmem:[%s5143_s8 + $0x680] sm:$0xff] %v583_v16  ;;  %586 = vst [vmem:[%s5143_s8 + $0x688] sm:$0xff] %v585_v17  ;;  %v589_v19 = vld [vmem:[%s5138_s7 + $0xd18] sm:$0xff]  ;;  %v591_v20 = vld [vmem:[%s5138_s7 + $0xd40] sm:$0xff] }
  0x82   : > { %588 = vst [vmem:[%s5143_s8 + $0x690] sm:$0xff] %v587_v18  ;;  %590 = vst [vmem:[%s5143_s8 + $0x698] sm:$0xff] %v589_v19  ;;  %v593_v21 = vld [vmem:[%s5138_s7 + $0xd48] sm:$0xff]  ;;  %v595_v22 = vld [vmem:[%s5138_s7 + $0xd50] sm:$0xff] }
  0x83   : > { %592 = vst [vmem:[%s5143_s8 + $0x6a0] sm:$0xff] %v591_v20  ;;  %v597_v23 = vld [vmem:[%s5138_s7 + $0xd58] sm:$0xff]  ;;  %594 = vst [vmem:[%s5143_s8 + $0x6a8] sm:$0xff] %v593_v21  ;;  %v599_v24 = vld [vmem:[%s5138_s7 + $0xd80] sm:$0xff] }
  0x84   : > { %596 = vst [vmem:[%s5143_s8 + $0x6b0] sm:$0xff] %v595_v22  ;;  %598 = vst [vmem:[%s5143_s8 + $0x6b8] sm:$0xff] %v597_v23  ;;  %v601_v25 = vld [vmem:[%s5138_s7 + $0xd88] sm:$0xff]  ;;  %v603_v26 = vld [vmem:[%s5138_s7 + $0xd90] sm:$0xff] }
  0x85   : > { %600 = vst [vmem:[%s5143_s8 + $0x6c0] sm:$0xff] %v599_v24  ;;  %602 = vst [vmem:[%s5143_s8 + $0x6c8] sm:$0xff] %v601_v25  ;;  %v605_v27 = vld [vmem:[%s5138_s7 + $0xd98] sm:$0xff]  ;;  %v607_v28 = vld [vmem:[%s5138_s7 + $0xdc0] sm:$0xff] }
  0x86   : > { %604 = vst [vmem:[%s5143_s8 + $0x6d0] sm:$0xff] %v603_v26  ;;  %v609_v29 = vld [vmem:[%s5138_s7 + $0xdc8] sm:$0xff]  ;;  %606 = vst [vmem:[%s5143_s8 + $0x6d8] sm:$0xff] %v605_v27  ;;  %v611_v30 = vld [vmem:[%s5138_s7 + $0xdd0] sm:$0xff] }
  0x87   : > { %608 = vst [vmem:[%s5143_s8 + $0x6e0] sm:$0xff] %v607_v28  ;;  %610 = vst [vmem:[%s5143_s8 + $0x6e8] sm:$0xff] %v609_v29  ;;  %v613_v31 = vld [vmem:[%s5138_s7 + $0xdd8] sm:$0xff]  ;;  %v615_v32 = vld [vmem:[%s5138_s7 + $0xe00] sm:$0xff] }
  0x88   : > { %612 = vst [vmem:[%s5143_s8 + $0x6f0] sm:$0xff] %v611_v30  ;;  %614 = vst [vmem:[%s5143_s8 + $0x6f8] sm:$0xff] %v613_v31  ;;  %v617_v33 = vld [vmem:[%s5138_s7 + $0xe08] sm:$0xff]  ;;  %v619_v34 = vld [vmem:[%s5138_s7 + $0xe10] sm:$0xff] }
  0x89   : > { %616 = vst [vmem:[%s5143_s8 + $0x700] sm:$0xff] %v615_v32  ;;  %v621_v35 = vld [vmem:[%s5138_s7 + $0xe18] sm:$0xff]  ;;  %618 = vst [vmem:[%s5143_s8 + $0x708] sm:$0xff] %v617_v33  ;;  %v623_v36 = vld [vmem:[%s5138_s7 + $0xe40] sm:$0xff] }
  0x8a   : > { %620 = vst [vmem:[%s5143_s8 + $0x710] sm:$0xff] %v619_v34  ;;  %622 = vst [vmem:[%s5143_s8 + $0x718] sm:$0xff] %v621_v35  ;;  %v625_v37 = vld [vmem:[%s5138_s7 + $0xe48] sm:$0xff]  ;;  %v627_v38 = vld [vmem:[%s5138_s7 + $0xe50] sm:$0xff] }
  0x8b   : > { %624 = vst [vmem:[%s5143_s8 + $0x720] sm:$0xff] %v623_v36  ;;  %626 = vst [vmem:[%s5143_s8 + $0x728] sm:$0xff] %v625_v37  ;;  %v629_v39 = vld [vmem:[%s5138_s7 + $0xe58] sm:$0xff]  ;;  %v631_v40 = vld [vmem:[%s5138_s7 + $0xe80] sm:$0xff] }
  0x8c   : > { %628 = vst [vmem:[%s5143_s8 + $0x730] sm:$0xff] %v627_v38  ;;  %v633_v41 = vld [vmem:[%s5138_s7 + $0xe88] sm:$0xff]  ;;  %630 = vst [vmem:[%s5143_s8 + $0x738] sm:$0xff] %v629_v39  ;;  %v635_v42 = vld [vmem:[%s5138_s7 + $0xe90] sm:$0xff] }
  0x8d   : > { %632 = vst [vmem:[%s5143_s8 + $0x740] sm:$0xff] %v631_v40  ;;  %634 = vst [vmem:[%s5143_s8 + $0x748] sm:$0xff] %v633_v41  ;;  %v637_v43 = vld [vmem:[%s5138_s7 + $0xe98] sm:$0xff]  ;;  %v639_v44 = vld [vmem:[%s5138_s7 + $0xec0] sm:$0xff] }
  0x8e   : > { %636 = vst [vmem:[%s5143_s8 + $0x750] sm:$0xff] %v635_v42  ;;  %638 = vst [vmem:[%s5143_s8 + $0x758] sm:$0xff] %v637_v43  ;;  %v641_v45 = vld [vmem:[%s5138_s7 + $0xec8] sm:$0xff]  ;;  %v643_v46 = vld [vmem:[%s5138_s7 + $0xed0] sm:$0xff] }
  0x8f   : > { %640 = vst [vmem:[%s5143_s8 + $0x760] sm:$0xff] %v639_v44  ;;  %v645_v47 = vld [vmem:[%s5138_s7 + $0xed8] sm:$0xff]  ;;  %642 = vst [vmem:[%s5143_s8 + $0x768] sm:$0xff] %v641_v45  ;;  %v647_v48 = vld [vmem:[%s5138_s7 + $0xf00] sm:$0xff] }
  0x90   : > { %644 = vst [vmem:[%s5143_s8 + $0x770] sm:$0xff] %v643_v46  ;;  %646 = vst [vmem:[%s5143_s8 + $0x778] sm:$0xff] %v645_v47  ;;  %v649_v49 = vld [vmem:[%s5138_s7 + $0xf08] sm:$0xff]  ;;  %v651_v50 = vld [vmem:[%s5138_s7 + $0xf10] sm:$0xff] }
  0x91   : > { %648 = vst [vmem:[%s5143_s8 + $0x780] sm:$0xff] %v647_v48  ;;  %650 = vst [vmem:[%s5143_s8 + $0x788] sm:$0xff] %v649_v49  ;;  %v653_v51 = vld [vmem:[%s5138_s7 + $0xf18] sm:$0xff]  ;;  %v655_v52 = vld [vmem:[%s5138_s7 + $0xf40] sm:$0xff] }
  0x92   : > { %652 = vst [vmem:[%s5143_s8 + $0x790] sm:$0xff] %v651_v50  ;;  %v657_v53 = vld [vmem:[%s5138_s7 + $0xf48] sm:$0xff]  ;;  %654 = vst [vmem:[%s5143_s8 + $0x798] sm:$0xff] %v653_v51  ;;  %v659_v54 = vld [vmem:[%s5138_s7 + $0xf50] sm:$0xff] }
  0x93   : > { %656 = vst [vmem:[%s5143_s8 + $0x7a0] sm:$0xff] %v655_v52  ;;  %658 = vst [vmem:[%s5143_s8 + $0x7a8] sm:$0xff] %v657_v53  ;;  %v661_v55 = vld [vmem:[%s5138_s7 + $0xf58] sm:$0xff]  ;;  %v663_v56 = vld [vmem:[%s5138_s7 + $0xf80] sm:$0xff] }
  0x94   : > { %660 = vst [vmem:[%s5143_s8 + $0x7b0] sm:$0xff] %v659_v54  ;;  %662 = vst [vmem:[%s5143_s8 + $0x7b8] sm:$0xff] %v661_v55  ;;  %v665_v57 = vld [vmem:[%s5138_s7 + $0xf88] sm:$0xff]  ;;  %v667_v58 = vld [vmem:[%s5138_s7 + $0xf90] sm:$0xff] }
  0x95   : > { %664 = vst [vmem:[%s5143_s8 + $0x7c0] sm:$0xff] %v663_v56  ;;  %v669_v59 = vld [vmem:[%s5138_s7 + $0xf98] sm:$0xff]  ;;  %666 = vst [vmem:[%s5143_s8 + $0x7c8] sm:$0xff] %v665_v57  ;;  %v671_v60 = vld [vmem:[%s5138_s7 + $0xfc0] sm:$0xff] }
  0x96   : > { %668 = vst [vmem:[%s5143_s8 + $0x7d0] sm:$0xff] %v667_v58  ;;  %670 = vst [vmem:[%s5143_s8 + $0x7d8] sm:$0xff] %v669_v59  ;;  %v673_v61 = vld [vmem:[%s5138_s7 + $0xfc8] sm:$0xff]  ;;  %v675_v62 = vld [vmem:[%s5138_s7 + $0xfd0] sm:$0xff] }
  0x97   : > { %672 = vst [vmem:[%s5143_s8 + $0x7e0] sm:$0xff] %v671_v60  ;;  %674 = vst [vmem:[%s5143_s8 + $0x7e8] sm:$0xff] %v673_v61  ;;  %v677_v63 = vld [vmem:[%s5138_s7 + $0xfd8] sm:$0xff] }
  0x98   : > { %676 = vst [vmem:[%s5143_s8 + $0x7f0] sm:$0xff] %v675_v62  ;;  %678 = vst [vmem:[%s5143_s8 + $0x7f8] sm:$0xff] %v677_v63 }
  0x99 PF: > { %p4546_p7 = scmp.ge.s32.totalorder %s5054_s18, 1  ;;  %p683_p8 = scmp.lt.s32.totalorder %s5054_s18, 9 }
  0x9b   : > { %p684_p9 = pnand %p4546_p7, %p683_p8 }
  0x9d   : > { %687 = sbr.rel (%p684_p9) target bundleno = 1015 (0x3f7), region = 51 }
  0xa4   : > { %s690_s9 = sand.u32 1, %s5030_s12   ;;  %s4548_s10 = sshll.u32 %s5042_s15, 6 }
  0xa5   : > { %s4547_s11 = sshll.u32 %s690_s9, 11  ;;  %p716_p10 = scmp.lt.s32.totalorder %s4548_s10, 255 }
  0xa6   : > { %s5663_s26 = scalar_lea.vmem [#allocation3], %s4547_s11  ;;  %p4550_p11 = scmp.ne.s32.totalorder %s5038_s14, 0 }
  0xa7   : > { %s6554_s10 = smov (!%p716_p10, %s4548_s10), 255  ;;  %v5056_v0 = vmov (!%p4550_p11), 0.0  }
  0xa8   : > { %s4549_s21 = sshll.u32 %s6554_s10, 3  ;;  %725 = sbr.rel (%p4550_p11) target bundleno = 200 (0xc8), region = 59  ;;  %726 = vst [vmem:[#allocation2] sm:$0xff] (!%p4550_p11), %v5056_v0  ;;  %727 = vst [vmem:[#allocation2 + $0x8] sm:$0xff] (!%p4550_p11), %v5056_v0 }
  0xa9   : > { %s5661_s24 = scalar_lea.vmem %s6492_s3, %s4549_s21  ;;  %728 = vst [vmem:[#allocation2 + $0x10] sm:$0xff] (!%p4550_p11), %v5056_v0  ;;  %729 = vst [vmem:[#allocation2 + $0x18] sm:$0xff] (!%p4550_p11), %v5056_v0 }
  0xaa   : > { %730 = vst [vmem:[#allocation2 + $0x20] sm:$0xff] (!%p4550_p11), %v5056_v0  ;;  %731 = vst [vmem:[#allocation2 + $0x28] sm:$0xff] (!%p4550_p11), %v5056_v0 }
  0xab   : > { %732 = vst [vmem:[#allocation2 + $0x30] sm:$0xff] (!%p4550_p11), %v5056_v0  ;;  %733 = vst [vmem:[#allocation2 + $0x38] sm:$0xff] (!%p4550_p11), %v5056_v0 }
  0xac   : > { %734 = vst [vmem:[#allocation2 + $0x40] sm:$0xff] (!%p4550_p11), %v5056_v0  ;;  %735 = vst [vmem:[#allocation2 + $0x48] sm:$0xff] (!%p4550_p11), %v5056_v0 }
  0xad   : > { %736 = vst [vmem:[#allocation2 + $0x50] sm:$0xff] (!%p4550_p11), %v5056_v0  ;;  %737 = vst [vmem:[#allocation2 + $0x58] sm:$0xff] (!%p4550_p11), %v5056_v0 }
  0xae   : > { %738 = vst [vmem:[#allocation2 + $0x60] sm:$0xff] (!%p4550_p11), %v5056_v0  ;;  %739 = vst [vmem:[#allocation2 + $0x68] sm:$0xff] (!%p4550_p11), %v5056_v0 }
  0xaf   : > { %740 = vst [vmem:[#allocation2 + $0x70] sm:$0xff] %v5056_v0  ;;  %741 = vst [vmem:[#allocation2 + $0x78] sm:$0xff] %v5056_v0 }
  0xb0   : > { %742 = vst [vmem:[#allocation2 + $0x80] sm:$0xff] %v5056_v0  ;;  %743 = vst [vmem:[#allocation2 + $0x88] sm:$0xff] %v5056_v0 }
  0xb1   : > { %744 = vst [vmem:[#allocation2 + $0x90] sm:$0xff] %v5056_v0  ;;  %745 = vst [vmem:[#allocation2 + $0x98] sm:$0xff] %v5056_v0 }
  0xb2   : > { %746 = vst [vmem:[#allocation2 + $0xa0] sm:$0xff] %v5056_v0  ;;  %747 = vst [vmem:[#allocation2 + $0xa8] sm:$0xff] %v5056_v0 }
  0xb3   : > { %748 = vst [vmem:[#allocation2 + $0xb0] sm:$0xff] %v5056_v0  ;;  %749 = vst [vmem:[#allocation2 + $0xb8] sm:$0xff] %v5056_v0 }
  0xb4   : > { %750 = vst [vmem:[#allocation2 + $0xc0] sm:$0xff] %v5056_v0  ;;  %751 = vst [vmem:[#allocation2 + $0xc8] sm:$0xff] %v5056_v0 }
  0xb5   : > { %752 = vst [vmem:[#allocation2 + $0xd0] sm:$0xff] %v5056_v0  ;;  %753 = vst [vmem:[#allocation2 + $0xd8] sm:$0xff] %v5056_v0 }
  0xb6   : > { %754 = vst [vmem:[#allocation2 + $0xe0] sm:$0xff] %v5056_v0  ;;  %755 = vst [vmem:[#allocation2 + $0xe8] sm:$0xff] %v5056_v0 }
  0xb7   : > { %756 = vst [vmem:[#allocation2 + $0xf0] sm:$0xff] %v5056_v0  ;;  %757 = vst [vmem:[#allocation2 + $0xf8] sm:$0xff] %v5056_v0 }
  0xb8   : > { %758 = vst [vmem:[#allocation2 + $0x100] sm:$0xff] %v5056_v0  ;;  %759 = vst [vmem:[#allocation2 + $0x108] sm:$0xff] %v5056_v0 }
  0xb9   : > { %760 = vst [vmem:[#allocation2 + $0x110] sm:$0xff] %v5056_v0  ;;  %761 = vst [vmem:[#allocation2 + $0x118] sm:$0xff] %v5056_v0 }
  0xba   : > { %762 = vst [vmem:[#allocation2 + $0x120] sm:$0xff] %v5056_v0  ;;  %763 = vst [vmem:[#allocation2 + $0x128] sm:$0xff] %v5056_v0 }
  0xbb   : > { %764 = vst [vmem:[#allocation2 + $0x130] sm:$0xff] %v5056_v0  ;;  %765 = vst [vmem:[#allocation2 + $0x138] sm:$0xff] %v5056_v0 }
  0xbc   : > { %766 = vst [vmem:[#allocation2 + $0x140] sm:$0xff] %v5056_v0  ;;  %767 = vst [vmem:[#allocation2 + $0x148] sm:$0xff] %v5056_v0 }
  0xbd   : > { %768 = vst [vmem:[#allocation2 + $0x150] sm:$0xff] %v5056_v0  ;;  %769 = vst [vmem:[#allocation2 + $0x158] sm:$0xff] %v5056_v0 }
  0xbe   : > { %770 = vst [vmem:[#allocation2 + $0x160] sm:$0xff] %v5056_v0  ;;  %771 = vst [vmem:[#allocation2 + $0x168] sm:$0xff] %v5056_v0 }
  0xbf   : > { %772 = vst [vmem:[#allocation2 + $0x170] sm:$0xff] %v5056_v0  ;;  %773 = vst [vmem:[#allocation2 + $0x178] sm:$0xff] %v5056_v0 }
  0xc0   : > { %774 = vst [vmem:[#allocation2 + $0x180] sm:$0xff] %v5056_v0  ;;  %775 = vst [vmem:[#allocation2 + $0x188] sm:$0xff] %v5056_v0 }
  0xc1   : > { %776 = vst [vmem:[#allocation2 + $0x190] sm:$0xff] %v5056_v0  ;;  %777 = vst [vmem:[#allocation2 + $0x198] sm:$0xff] %v5056_v0 }
  0xc2   : > { %778 = vst [vmem:[#allocation2 + $0x1a0] sm:$0xff] %v5056_v0  ;;  %779 = vst [vmem:[#allocation2 + $0x1a8] sm:$0xff] %v5056_v0 }
  0xc3   : > { %780 = vst [vmem:[#allocation2 + $0x1b0] sm:$0xff] %v5056_v0  ;;  %781 = vst [vmem:[#allocation2 + $0x1b8] sm:$0xff] %v5056_v0 }
  0xc4   : > { %782 = vst [vmem:[#allocation2 + $0x1c0] sm:$0xff] %v5056_v0  ;;  %783 = vst [vmem:[#allocation2 + $0x1c8] sm:$0xff] %v5056_v0 }
  0xc5   : > { %784 = vst [vmem:[#allocation2 + $0x1d0] sm:$0xff] %v5056_v0  ;;  %785 = vst [vmem:[#allocation2 + $0x1d8] sm:$0xff] %v5056_v0 }
  0xc6   : > { %786 = vst [vmem:[#allocation2 + $0x1e0] sm:$0xff] %v5056_v0  ;;  %787 = vst [vmem:[#allocation2 + $0x1e8] sm:$0xff] %v5056_v0 }
  0xc7   : > { %788 = vst [vmem:[#allocation2 + $0x1f0] sm:$0xff] %v5056_v0  ;;  %789 = vst [vmem:[#allocation2 + $0x1f8] sm:$0xff] %v5056_v0 }
  0xc8 PF: > { %s4551_s12 = sshll.u32 %s5038_s14, 10  ;;  %v5732_v1 = vld [vmem:[%s5663_s26] sm:$0xff]  ;;  %v5738_v3 = vld [vmem:[%s5663_s26 + $0x8] sm:$0xff]  ;;  %v5057_v4 = vmov 0   ;;  %p4873_p12 = scmp.ne.s32.totalorder %s5038_s14, 1 }
  0xc9   : > { %v5735_v2 = vld [vmem:[%s5663_s26 + $0x20] sm:$0xff]  ;;  %2907 = vmatprep.subr.bf16.mxu0 %v5057_v4  ;;  %3196 = vmatprep.subr.bf16.mxu1 %v5057_v4  ;;  %s1111_s15 = sshra.s32 %s4551_s12, 3  ;;  %v5747_v7 = vld [vmem:[%s5663_s26 + $0x28] sm:$0xff] }
  0xca   : > { %v4553_v5 = vcombine.low %v5732_v1, %v5735_v2  ;;  %v4554_v6 = vcombine.high %v5732_v1, %v5735_v2  ;;  %s4552_s27 = sshll.u32 %s1111_s15, 2  ;;  %v4555_v8 = vcombine.low %v5738_v3, %v5747_v7  ;;  %v4556_v9 = vcombine.high %v5738_v3, %v5747_v7  ;;  %v863_v42 = vld [vmem:[%s5663_s26 + $0x40] sm:$0xff]  ;;  %v864_v44 = vld [vmem:[%s5663_s26 + $0x48] sm:$0xff] }
  0xcb   : > { %s5756_s30 = scalar_lea.vmem %s6490_s1, %s4552_s27  ;;  %v867_v43 = vld [vmem:[%s5663_s26 + $0x60] sm:$0xff]  ;;  %v868_v45 = vld [vmem:[%s5663_s26 + $0x68] sm:$0xff] }
  0xcc   : > { %2939 = vmatprep.mubr.bf16.mxu0 %v4554_v6  ;;  %v4936_v10 = vld [vmem:[%s5756_s30] sm:$0xff]   ;;  %3228 = vmatprep.mubr.bf16.mxu1 %v4556_v9  ;;  %v4938_v12 = vld [vmem:[%s5756_s30 + $0x8] sm:$0xff]   ;;  %v4940_v14 = vld [vmem:[%s5756_s30 + $0x10] sm:$0xff]   ;;  %v4562_v48 = vcombine.high %v863_v42, %v867_v43  ;;  %v4564_v49 = vcombine.high %v864_v44, %v868_v45  ;;  %v4561_v56 = vcombine.low %v863_v42, %v867_v43 }
  0xcd   : > { %v4937_v11 = vld [vmem:[%s5756_s30 + $0x80] sm:$0xff]   ;;  %2908 = vmatpush1.bf16.msra.mxu0 %v4936_v10  ;;  %v4939_v13 = vld [vmem:[%s5756_s30 + $0x88] sm:$0xff]   ;;  %v4941_v15 = vld [vmem:[%s5756_s30 + $0x90] sm:$0xff]   ;;  %v4563_v58 = vcombine.low %v864_v44, %v868_v45 }
  0xce   : > { %3197 = vmatpush1.bf16.msra.mxu1 %v4937_v11  ;;  %2909 = vmatprep.subr.bf16.mxu0 %v5057_v4  ;;  %v4942_v16 = vld [vmem:[%s5756_s30 + $0x18] sm:$0xff]   ;;  %v4944_v18 = vld [vmem:[%s5756_s30 + $0x20] sm:$0xff]   ;;  %v4946_v20 = vld [vmem:[%s5756_s30 + $0x28] sm:$0xff]  }
  0xcf   : > { %3198 = vmatprep.subr.bf16.mxu1 %v5057_v4  ;;  %v4943_v17 = vld [vmem:[%s5756_s30 + $0x98] sm:$0xff]   ;;  %v4945_v19 = vld [vmem:[%s5756_s30 + $0xa0] sm:$0xff]   ;;  %v4947_v21 = vld [vmem:[%s5756_s30 + $0xa8] sm:$0xff]  }
  0xd0   : > { %v4948_v22 = vld [vmem:[%s5756_s30 + $0x30] sm:$0xff]   ;;  %v4950_v24 = vld [vmem:[%s5756_s30 + $0x38] sm:$0xff]   ;;  %v4952_v26 = vld [vmem:[%s5756_s30 + $0x40] sm:$0xff]  }
  0xd1   : > { %2910 = vmatpush1.bf16.msra.mxu0 %v4938_v12  ;;  %v4949_v23 = vld [vmem:[%s5756_s30 + $0xb0] sm:$0xff]   ;;  %v4951_v25 = vld [vmem:[%s5756_s30 + $0xb8] sm:$0xff]   ;;  %v4953_v27 = vld [vmem:[%s5756_s30 + $0xc0] sm:$0xff]  }
  0xd2   : > { %3199 = vmatpush1.bf16.msra.mxu1 %v4939_v13  ;;  %2911 = vmatprep.subr.bf16.mxu0 %v5057_v4  ;;  %v4954_v28 = vld [vmem:[%s5756_s30 + $0x48] sm:$0xff]   ;;  %v4956_v30 = vld [vmem:[%s5756_s30 + $0x50] sm:$0xff]   ;;  %v4958_v32 = vld [vmem:[%s5756_s30 + $0x58] sm:$0xff]  }
  0xd3   : > { %3200 = vmatprep.subr.bf16.mxu1 %v5057_v4  ;;  %v4955_v29 = vld [vmem:[%s5756_s30 + $0xc8] sm:$0xff]   ;;  %v4957_v31 = vld [vmem:[%s5756_s30 + $0xd0] sm:$0xff]   ;;  %v4959_v33 = vld [vmem:[%s5756_s30 + $0xd8] sm:$0xff]  }
  0xd4   : > { %v4960_v34 = vld [vmem:[%s5756_s30 + $0x60] sm:$0xff]   ;;  %v4962_v36 = vld [vmem:[%s5756_s30 + $0x68] sm:$0xff]   ;;  %v4964_v38 = vld [vmem:[%s5756_s30 + $0x70] sm:$0xff]  }
  0xd5   : > { %2912 = vmatpush1.bf16.msra.mxu0 %v4940_v14  ;;  %v4961_v35 = vld [vmem:[%s5756_s30 + $0xe0] sm:$0xff]   ;;  %v4963_v37 = vld [vmem:[%s5756_s30 + $0xe8] sm:$0xff]   ;;  %v4965_v39 = vld [vmem:[%s5756_s30 + $0xf0] sm:$0xff]  }
  0xd6   : > { %3201 = vmatpush1.bf16.msra.mxu1 %v4941_v15  ;;  %2913 = vmatprep.subr.bf16.mxu0 %v5057_v4  ;;  %v4966_v40 = vld [vmem:[%s5756_s30 + $0x78] sm:$0xff]   ;;  %v4968_v46 = vld [vmem:[%s5756_s30 + $0x100] sm:$0xff]   ;;  %v4970_v52 = vld [vmem:[%s5756_s30 + $0x108] sm:$0xff]  }
  0xd7   : > { %3202 = vmatprep.subr.bf16.mxu1 %v5057_v4  ;;  %v4967_v41 = vld [vmem:[%s5756_s30 + $0xf8] sm:$0xff]   ;;  %v4969_v47 = vld [vmem:[%s5756_s30 + $0x180] sm:$0xff]   ;;  %v4971_v53 = vld [vmem:[%s5756_s30 + $0x188] sm:$0xff]  }
  0xd8   : > { %v871_v50 = vld [vmem:[%s5663_s26 + $0x80] sm:$0xff]  ;;  %v872_v54 = vld [vmem:[%s5663_s26 + $0x88] sm:$0xff]  ;;  %v4972_v57 = vld [vmem:[%s5756_s30 + $0x110] sm:$0xff]  }
  0xd9   : > { %2914 = vmatpush1.bf16.msra.mxu0 %v4942_v16  ;;  %v875_v51 = vld [vmem:[%s5663_s26 + $0xa0] sm:$0xff]  ;;  %v876_v55 = vld [vmem:[%s5663_s26 + $0xa8] sm:$0xff]  ;;  %v4973_v60 = vld [vmem:[%s5756_s30 + $0x190] sm:$0xff]  }
  0xda   : > { %3203 = vmatpush1.bf16.msra.mxu1 %v4943_v17  ;;  %2915 = vmatprep.subr.bf16.mxu0 %v5057_v4  ;;  %v4570_v59 = vcombine.high %v871_v50, %v875_v51  ;;  %v4572_v61 = vcombine.high %v872_v54, %v876_v55  ;;  %v879_v62 = vld [vmem:[%s5663_s26 + $0xc0] sm:$0xff]  ;;  %v880_v0 = vld [vmem:[%s5663_s26 + $0xc8] sm:$0xff]  ;;  %v4571_v7 = vcombine.low %v872_v54, %v876_v55  ;;  %v4978_v13 = vld [vmem:[%s5756_s30 + $0x128] sm:$0xff]  }
  0xdb   : > { %3204 = vmatprep.subr.bf16.mxu1 %v5057_v4  ;;  %v883_v63 = vld [vmem:[%s5663_s26 + $0xe0] sm:$0xff]  ;;  %v884_v1 = vld [vmem:[%s5663_s26 + $0xe8] sm:$0xff]  ;;  %v4979_v16 = vld [vmem:[%s5756_s30 + $0x1a8] sm:$0xff]  }
  0xdc   : > { %v4974_v2 = vld [vmem:[%s5756_s30 + $0x118] sm:$0xff]   ;;  %v4976_v6 = vld [vmem:[%s5756_s30 + $0x120] sm:$0xff]   ;;  %v4580_v9 = vcombine.high %v880_v0, %v884_v1  ;;  %v4577_v17 = vcombine.low %v879_v62, %v883_v63  ;;  %v4988_v45 = vld [vmem:[%s5756_s30 + $0x150] sm:$0xff]  }
  0xdd   : > { %2916 = vmatpush1.bf16.msra.mxu0 %v4944_v18  ;;  %v4975_v3 = vld [vmem:[%s5756_s30 + $0x198] sm:$0xff]   ;;  %v4977_v10 = vld [vmem:[%s5756_s30 + $0x1a0] sm:$0xff]   ;;  %v4579_v18 = vcombine.low %v880_v0, %v884_v1 }
  0xde   : > { %3205 = vmatpush1.bf16.msra.mxu1 %v4945_v19  ;;  %2917 = vmatprep.subr.bf16.mxu0 %v5057_v4  ;;  %v887_v11 = vld [vmem:[%s5663_s26 + $0x100] sm:$0xff]  ;;  %v888_v14 = vld [vmem:[%s5663_s26 + $0x108] sm:$0xff] }
  0xdf   : > { %3206 = vmatprep.subr.bf16.mxu1 %v5057_v4  ;;  %v891_v12 = vld [vmem:[%s5663_s26 + $0x120] sm:$0xff]  ;;  %v892_v15 = vld [vmem:[%s5663_s26 + $0x128] sm:$0xff] }
  0xe0   : > { %v4586_v19 = vcombine.high %v887_v11, %v891_v12  ;;  %v4990_v55 = vld [vmem:[%s5756_s30 + $0x158] sm:$0xff]  }
  0xe1   : > { %2918 = vmatpush1.bf16.msra.mxu0 %v4946_v20  ;;  %v4588_v20 = vcombine.high %v888_v14, %v892_v15  ;;  %v927_v1 = vld [vmem:[%s5663_s26 + $0x240] sm:$0xff] }
  0xe2   : > { %3207 = vmatpush1.bf16.msra.mxu1 %v4947_v21  ;;  %2919 = vmatprep.subr.bf16.mxu0 %v5057_v4  ;;  %v4980_v21 = vld [vmem:[%s5756_s30 + $0x130] sm:$0xff]  }
  0xe3   : > { %3208 = vmatprep.subr.bf16.mxu1 %v5057_v4 }
  0xe5   : > { %2920 = vmatpush1.bf16.msra.mxu0 %v4948_v22  ;;  %v4981_v22 = vld [vmem:[%s5756_s30 + $0x1b0] sm:$0xff]  }
  0xe6   : > { %3209 = vmatpush1.bf16.msra.mxu1 %v4949_v23  ;;  %2921 = vmatprep.subr.bf16.mxu0 %v5057_v4  ;;  %v895_v23 = vld [vmem:[%s5663_s26 + $0x140] sm:$0xff] }
  0xe7   : > { %3210 = vmatprep.subr.bf16.mxu1 %v5057_v4 }
  0xe9   : > { %2922 = vmatpush1.bf16.msra.mxu0 %v4950_v24  ;;  %v899_v24 = vld [vmem:[%s5663_s26 + $0x160] sm:$0xff] }
  0xea   : > { %3211 = vmatpush1.bf16.msra.mxu1 %v4951_v25  ;;  %2923 = vmatprep.subr.bf16.mxu0 %v5057_v4  ;;  %v4982_v25 = vld [vmem:[%s5756_s30 + $0x138] sm:$0xff]  }
  0xeb   : > { %3212 = vmatprep.subr.bf16.mxu1 %v5057_v4 }
  0xed   : > { %2924 = vmatpush1.bf16.msra.mxu0 %v4952_v26  ;;  %v896_v26 = vld [vmem:[%s5663_s26 + $0x148] sm:$0xff] }
  0xee   : > { %3213 = vmatpush1.bf16.msra.mxu1 %v4953_v27  ;;  %2925 = vmatprep.subr.bf16.mxu0 %v5057_v4  ;;  %v900_v27 = vld [vmem:[%s5663_s26 + $0x168] sm:$0xff] }
  0xef   : > { %3214 = vmatprep.subr.bf16.mxu1 %v5057_v4  ;;  %v4595_v42 = vcombine.low %v896_v26, %v900_v27 }
  0xf1   : > { %2926 = vmatpush1.bf16.msra.mxu0 %v4954_v28  ;;  %v4983_v28 = vld [vmem:[%s5756_s30 + $0x1b8] sm:$0xff]  }
  0xf2   : > { %3215 = vmatpush1.bf16.msra.mxu1 %v4955_v29  ;;  %2927 = vmatprep.subr.bf16.mxu0 %v5057_v4  ;;  %v4585_v29 = vcombine.low %v887_v11, %v891_v12  ;;  %v4993_v11 = vld [vmem:[%s5756_s30 + $0x1e0] sm:$0xff]   ;;  %v935_v12 = vld [vmem:[%s5663_s26 + $0x280] sm:$0xff] }
  0xf3   : > { %3216 = vmatprep.subr.bf16.mxu1 %v5057_v4 }
  0xf5   : > { %2928 = vmatpush1.bf16.msra.mxu0 %v4956_v30  ;;  %v4587_v30 = vcombine.low %v888_v14, %v892_v15  ;;  %v936_v14 = vld [vmem:[%s5663_s26 + $0x288] sm:$0xff] }
  0xf6   : > { %3217 = vmatpush1.bf16.msra.mxu1 %v4957_v31  ;;  %2929 = vmatprep.subr.bf16.mxu0 %v5057_v4  ;;  %v4594_v31 = vcombine.high %v895_v23, %v899_v24  ;;  %v940_v15 = vld [vmem:[%s5663_s26 + $0x2a8] sm:$0xff] }
  0xf7   : > { %3218 = vmatprep.subr.bf16.mxu1 %v5057_v4 }
  0xf9   : > { %2930 = vmatpush1.bf16.msra.mxu0 %v4958_v32  ;;  %v4596_v32 = vcombine.high %v896_v26, %v900_v27 }
  0xfa   : > { %3219 = vmatpush1.bf16.msra.mxu1 %v4959_v33  ;;  %2931 = vmatprep.subr.bf16.mxu0 %v5057_v4  ;;  %v4984_v33 = vld [vmem:[%s5756_s30 + $0x140] sm:$0xff]  }
  0xfb   : > { %3220 = vmatprep.subr.bf16.mxu1 %v5057_v4 }
  0xfd   : > { %2932 = vmatpush1.bf16.msra.mxu0 %v4960_v34  ;;  %v4985_v34 = vld [vmem:[%s5756_s30 + $0x1c0] sm:$0xff]  }
  0xfe   : > { %3221 = vmatpush1.bf16.msra.mxu1 %v4961_v35  ;;  %2933 = vmatprep.subr.bf16.mxu0 %v5057_v4  ;;  %v903_v35 = vld [vmem:[%s5663_s26 + $0x180] sm:$0xff] }
  0xff   : > { %3222 = vmatprep.subr.bf16.mxu1 %v5057_v4 }
 0x101   : > { %2934 = vmatpush1.bf16.msra.mxu0 %v4962_v36  ;;  %v907_v36 = vld [vmem:[%s5663_s26 + $0x1a0] sm:$0xff] }
 0x102   : > { %3223 = vmatpush1.bf16.msra.mxu1 %v4963_v37  ;;  %2935 = vmatprep.subr.bf16.mxu0 %v5057_v4  ;;  %v4986_v37 = vld [vmem:[%s5756_s30 + $0x148] sm:$0xff]   ;;  %v4602_v43 = vcombine.high %v903_v35, %v907_v36 }
 0x103   : > { %3224 = vmatprep.subr.bf16.mxu1 %v5057_v4 }
 0x105   : > { %2936 = vmatpush1.bf16.msra.mxu0 %v4964_v38  ;;  %v904_v38 = vld [vmem:[%s5663_s26 + $0x188] sm:$0xff] }
 0x106   : > { %3225 = vmatpush1.bf16.msra.mxu1 %v4965_v39  ;;  %2937 = vmatprep.subr.bf16.mxu0 %v5057_v4  ;;  %v908_v39 = vld [vmem:[%s5663_s26 + $0x1a8] sm:$0xff] }
 0x107   : > { %3226 = vmatprep.subr.bf16.mxu1 %v5057_v4  ;;  %v4604_v44 = vcombine.high %v904_v38, %v908_v39 }
 0x109   : > { %2938 = vmatpush1.bf16.msra.mxu0 %v4966_v40  ;;  %v4987_v40 = vld [vmem:[%s5756_s30 + $0x1c8] sm:$0xff]  }
 0x10a   : > { %3227 = vmatpush1.bf16.msra.mxu1 %v4967_v41  ;;  %3485 = vmatprep.subr.bf16.mxu0 %v5057_v4  ;;  %v4593_v41 = vcombine.low %v895_v23, %v899_v24  ;;  %v948_v23 = vld [vmem:[%s5663_s26 + $0x2e8] sm:$0xff] }
 0x10b   : > { %3774 = vmatprep.subr.bf16.mxu1 %v5057_v4 }
 0x10c   : > { %2940 = vmatmul.mubr.bf16.vlgmr.msra.gmra.mrb[0].mxu0 %v4553_v5  ;;  %v4569_v5 = vcombine.low %v871_v50, %v875_v51  ;;  %v916_v50 = vld [vmem:[%s5663_s26 + $0x1e8] sm:$0xff]  ;;  %v4601_v51 = vcombine.low %v903_v35, %v907_v36  ;;  %v4995_v36 = vld [vmem:[%s5756_s30 + $0x1e8] sm:$0xff]  }
 0x10d   : > { %3229 = vmatmul.mubr.bf16.vlgmr.msra.gmra.mrb[0].mxu1 %v4555_v8  ;;  %3486 = vmatpush1.bf16.msra.mxu0 %v4968_v46  ;;  %v4578_v8 = vcombine.high %v879_v62, %v883_v63  ;;  %v4989_v46 = vld [vmem:[%s5756_s30 + $0x1d0] sm:$0xff]  }
 0x10e   : > { %3775 = vmatpush1.bf16.msra.mxu1 %v4969_v47  ;;  %2947 = vmatprep.mubr.bf16.mxu0 %v4562_v48  ;;  %v911_v47 = vld [vmem:[%s5663_s26 + $0x1c0] sm:$0xff] }
 0x10f   : > { %3236 = vmatprep.mubr.bf16.mxu1 %v4564_v49  ;;  %3487 = vmatprep.subr.bf16.mxu0 %v5057_v4  ;;  %v915_v48 = vld [vmem:[%s5663_s26 + $0x1e0] sm:$0xff]  ;;  %v912_v49 = vld [vmem:[%s5663_s26 + $0x1c8] sm:$0xff] }
 0x110   : > { %3776 = vmatprep.subr.bf16.mxu1 %v5057_v4  ;;  %v4612_v54 = vcombine.high %v912_v49, %v916_v50  ;;  %v4611_v62 = vcombine.low %v912_v49, %v916_v50  ;;  %v968_v49 = vld [vmem:[%s5663_s26 + $0x388] sm:$0xff] }
 0x111   : > { %3488 = vmatpush1.bf16.msra.mxu0 %v4970_v52  ;;  %v4603_v52 = vcombine.low %v904_v38, %v908_v39  ;;  %v959_v38 = vld [vmem:[%s5663_s26 + $0x340] sm:$0xff]  ;;  %v972_v50 = vld [vmem:[%s5663_s26 + $0x3a8] sm:$0xff] }
 0x112   : > { %3777 = vmatpush1.bf16.msra.mxu1 %v4971_v53  ;;  %3489 = vmatprep.subr.bf16.mxu0 %v5057_v4  ;;  %v4610_v53 = vcombine.high %v911_v47, %v915_v48  ;;  %v963_v39 = vld [vmem:[%s5663_s26 + $0x360] sm:$0xff] }
 0x113   : > { %3778 = vmatprep.subr.bf16.mxu1 %v5057_v4 }
 0x114   : > { %2948 = vmatmul.mubr.bf16.gmra.mrb[4].mxu0 %v4561_v56  ;;  %v4991_v56 = vld [vmem:[%s5756_s30 + $0x1d8] sm:$0xff]  }
 0x115   : > { %3237 = vmatmul.mubr.bf16.gmra.mrb[4].mxu1 %v4563_v58  ;;  %2955 = vmatprep.mubr.bf16.mxu0 %v4570_v59  ;;  %v923_v58 = vld [vmem:[%s5663_s26 + $0x220] sm:$0xff]  ;;  %v920_v59 = vld [vmem:[%s5663_s26 + $0x208] sm:$0xff] }
 0x116   : > { %3244 = vmatprep.mubr.bf16.mxu1 %v4572_v61  ;;  %3490 = vmatpush1.bf16.msra.mxu0 %v4972_v57  ;;  %v919_v57 = vld [vmem:[%s5663_s26 + $0x200] sm:$0xff]  ;;  %v4609_v61 = vcombine.low %v911_v47, %v915_v48 }
 0x117   : > { %3779 = vmatpush1.bf16.msra.mxu1 %v4973_v60  ;;  %3491 = vmatprep.subr.bf16.mxu0 %v5057_v4  ;;  %v924_v60 = vld [vmem:[%s5663_s26 + $0x228] sm:$0xff]  ;;  %v4618_v63 = vcombine.high %v919_v57, %v923_v58  ;;  %v967_v47 = vld [vmem:[%s5663_s26 + $0x380] sm:$0xff] }
 0x118   : > { %3780 = vmatprep.subr.bf16.mxu1 %v5057_v4  ;;  %v4620_v0 = vcombine.high %v920_v59, %v924_v60  ;;  %v971_v48 = vld [vmem:[%s5663_s26 + $0x3a0] sm:$0xff] }
 0x11a   : > { %3492 = vmatpush1.bf16.msra.mxu0 %v4974_v2  ;;  %v931_v2 = vld [vmem:[%s5663_s26 + $0x260] sm:$0xff] }
 0x11b   : > { %3781 = vmatpush1.bf16.msra.mxu1 %v4975_v3  ;;  %3493 = vmatprep.subr.bf16.mxu0 %v5057_v4  ;;  %v928_v3 = vld [vmem:[%s5663_s26 + $0x248] sm:$0xff] }
 0x11c   : > { %2956 = vmatmul.mubr.bf16.gmra.mrb[8].mxu0 %v4569_v5  ;;  %3782 = vmatprep.subr.bf16.mxu1 %v5057_v4  ;;  %v932_v5 = vld [vmem:[%s5663_s26 + $0x268] sm:$0xff] }
 0x11d   : > { %3245 = vmatmul.mubr.bf16.gmra.mrb[8].mxu1 %v4571_v7  ;;  %2963 = vmatprep.mubr.bf16.mxu0 %v4578_v8  ;;  %v4619_v7 = vcombine.low %v920_v59, %v924_v60  ;;  %v4626_v8 = vcombine.high %v927_v1, %v931_v2  ;;  %v980_v59 = vld [vmem:[%s5663_s26 + $0x3e8] sm:$0xff]  ;;  %v4665_v60 = vcombine.low %v967_v47, %v971_v48 }
 0x11e   : > { %3252 = vmatprep.mubr.bf16.mxu1 %v4580_v9  ;;  %3494 = vmatpush1.bf16.msra.mxu0 %v4976_v6  ;;  %v4617_v6 = vcombine.low %v919_v57, %v923_v58  ;;  %v4628_v9 = vcombine.high %v928_v3, %v932_v5  ;;  %v979_v57 = vld [vmem:[%s5663_s26 + $0x3e0] sm:$0xff]  ;;  %v976_v58 = vld [vmem:[%s5663_s26 + $0x3c8] sm:$0xff] }
 0x11f   : > { %3783 = vmatpush1.bf16.msra.mxu1 %v4977_v10  ;;  %3495 = vmatprep.subr.bf16.mxu0 %v5057_v4  ;;  %v4992_v10 = vld [vmem:[%s5756_s30 + $0x160] sm:$0xff]  }
 0x120   : > { %3784 = vmatprep.subr.bf16.mxu1 %v5057_v4 }
 0x122   : > { %3496 = vmatpush1.bf16.msra.mxu0 %v4978_v13  ;;  %v939_v13 = vld [vmem:[%s5663_s26 + $0x2a0] sm:$0xff] }
 0x123   : > { %3785 = vmatpush1.bf16.msra.mxu1 %v4979_v16  ;;  %3497 = vmatprep.subr.bf16.mxu0 %v5057_v4  ;;  %v4625_v16 = vcombine.low %v927_v1, %v931_v2  ;;  %v4633_v24 = vcombine.low %v935_v12, %v939_v13  ;;  %v987_v1 = vld [vmem:[%s5663_s26 + $0x420] sm:$0xff]  ;;  %v984_v2 = vld [vmem:[%s5663_s26 + $0x408] sm:$0xff] }
 0x124   : > { %2964 = vmatmul.mubr.bf16.gmra.mrb[12].mxu0 %v4577_v17  ;;  %3786 = vmatprep.subr.bf16.mxu1 %v5057_v4  ;;  %v4627_v17 = vcombine.low %v928_v3, %v932_v5  ;;  %v988_v3 = vld [vmem:[%s5663_s26 + $0x428] sm:$0xff] }
 0x125   : > { %3253 = vmatmul.mubr.bf16.gmra.mrb[12].mxu1 %v4579_v18  ;;  %2971 = vmatprep.mubr.bf16.mxu0 %v4586_v19  ;;  %v4634_v18 = vcombine.high %v935_v12, %v939_v13  ;;  %v4636_v19 = vcombine.high %v936_v14, %v940_v15  ;;  %v992_v12 = vld [vmem:[%s5663_s26 + $0x448] sm:$0xff] }
 0x126   : > { %3260 = vmatprep.mubr.bf16.mxu1 %v4588_v20  ;;  %3498 = vmatpush1.bf16.msra.mxu0 %v4980_v21  ;;  %v943_v20 = vld [vmem:[%s5663_s26 + $0x2c0] sm:$0xff]  ;;  %v996_v13 = vld [vmem:[%s5663_s26 + $0x468] sm:$0xff] }
 0x127   : > { %3787 = vmatpush1.bf16.msra.mxu1 %v4981_v22  ;;  %3499 = vmatprep.subr.bf16.mxu0 %v5057_v4  ;;  %v947_v21 = vld [vmem:[%s5663_s26 + $0x2e0] sm:$0xff]  ;;  %v944_v22 = vld [vmem:[%s5663_s26 + $0x2c8] sm:$0xff] }
 0x128   : > { %3788 = vmatprep.subr.bf16.mxu1 %v5057_v4  ;;  %v4642_v26 = vcombine.high %v943_v20, %v947_v21  ;;  %v4644_v27 = vcombine.high %v944_v22, %v948_v23 }
 0x12a   : > { %3500 = vmatpush1.bf16.msra.mxu0 %v4982_v25  ;;  %v4635_v25 = vcombine.low %v936_v14, %v940_v15  ;;  %v4683_v15 = vcombine.low %v984_v2, %v988_v3 }
 0x12b   : > { %3789 = vmatpush1.bf16.msra.mxu1 %v4983_v28  ;;  %3501 = vmatprep.subr.bf16.mxu0 %v5057_v4  ;;  %v4994_v28 = vld [vmem:[%s5756_s30 + $0x168] sm:$0xff]  }
 0x12c   : > { %2972 = vmatmul.mubr.bf16.gmra.mrb[16].mxu0 %v4585_v29  ;;  %3790 = vmatprep.subr.bf16.mxu1 %v5057_v4  ;;  %v951_v29 = vld [vmem:[%s5663_s26 + $0x300] sm:$0xff] }
 0x12d   : > { %3261 = vmatmul.mubr.bf16.gmra.mrb[16].mxu1 %v4587_v30  ;;  %2979 = vmatprep.mubr.bf16.mxu0 %v4594_v31  ;;  %v955_v30 = vld [vmem:[%s5663_s26 + $0x320] sm:$0xff]  ;;  %v952_v31 = vld [vmem:[%s5663_s26 + $0x308] sm:$0xff] }
 0x12e   : > { %3268 = vmatprep.mubr.bf16.mxu1 %v4596_v32  ;;  %3502 = vmatpush1.bf16.msra.mxu0 %v4984_v33  ;;  %v956_v32 = vld [vmem:[%s5663_s26 + $0x328] sm:$0xff]  ;;  %v4641_v33 = vcombine.low %v943_v20, %v947_v21  ;;  %v4650_v35 = vcombine.high %v951_v29, %v955_v30 }
 0x12f   : > { %3791 = vmatpush1.bf16.msra.mxu1 %v4985_v34  ;;  %3503 = vmatprep.subr.bf16.mxu0 %v5057_v4  ;;  %v4643_v34 = vcombine.low %v944_v22, %v948_v23  ;;  %v1000_v20 = vld [vmem:[%s5663_s26 + $0x488] sm:$0xff]  ;;  %v4691_v23 = vcombine.low %v992_v12, %v996_v13 }
 0x130   : > { %3792 = vmatprep.subr.bf16.mxu1 %v5057_v4  ;;  %v1004_v21 = vld [vmem:[%s5663_s26 + $0x4a8] sm:$0xff] }
 0x132   : > { %3504 = vmatpush1.bf16.msra.mxu0 %v4986_v37  ;;  %v4652_v37 = vcombine.high %v952_v31, %v956_v32 }
 0x133   : > { %3793 = vmatpush1.bf16.msra.mxu1 %v4987_v40  ;;  %3505 = vmatprep.subr.bf16.mxu0 %v5057_v4  ;;  %v960_v40 = vld [vmem:[%s5663_s26 + $0x348] sm:$0xff] }
 0x134   : > { %2980 = vmatmul.mubr.bf16.gmra.mrb[20].mxu0 %v4593_v41  ;;  %3794 = vmatprep.subr.bf16.mxu1 %v5057_v4  ;;  %v964_v41 = vld [vmem:[%s5663_s26 + $0x368] sm:$0xff] }
 0x135   : > { %3269 = vmatmul.mubr.bf16.gmra.mrb[20].mxu1 %v4595_v42  ;;  %2987 = vmatprep.mubr.bf16.mxu0 %v4602_v43  ;;  %v4649_v42 = vcombine.low %v951_v29, %v955_v30  ;;  %v4651_v43 = vcombine.low %v952_v31, %v956_v32  ;;  %v1012_v29 = vld [vmem:[%s5663_s26 + $0x4e8] sm:$0xff]  ;;  %v4699_v31 = vcombine.low %v1000_v20, %v1004_v21 }
 0x136   : > { %3276 = vmatprep.mubr.bf16.mxu1 %v4604_v44  ;;  %3506 = vmatpush1.bf16.msra.mxu0 %v4988_v45  ;;  %v4658_v44 = vcombine.high %v959_v38, %v963_v39  ;;  %v4660_v45 = vcombine.high %v960_v40, %v964_v41 }
 0x137   : > { %3795 = vmatpush1.bf16.msra.mxu1 %v4989_v46  ;;  %3507 = vmatprep.subr.bf16.mxu0 %v5057_v4  ;;  %v4996_v46 = vld [vmem:[%s5756_s30 + $0x170] sm:$0xff]  }
 0x138   : > { %3796 = vmatprep.subr.bf16.mxu1 %v5057_v4 }
 0x13a   : > { %3508 = vmatpush1.bf16.msra.mxu0 %v4990_v55  ;;  %v4668_v55 = vcombine.high %v968_v49, %v972_v50 }
 0x13b   : > { %3797 = vmatpush1.bf16.msra.mxu1 %v4991_v56  ;;  %3509 = vmatprep.subr.bf16.mxu0 %v5057_v4  ;;  %v975_v56 = vld [vmem:[%s5663_s26 + $0x3c0] sm:$0xff] }
 0x13c   : > { %2988 = vmatmul.mubr.bf16.gmra.mrb[24].mxu0 %v4601_v51  ;;  %3798 = vmatprep.subr.bf16.mxu1 %v5057_v4  ;;  %v4657_v51 = vcombine.low %v959_v38, %v963_v39  ;;  %v4673_v5 = vcombine.low %v975_v56, %v979_v57 }
 0x13d   : > { %3277 = vmatmul.mubr.bf16.gmra.mrb[24].mxu1 %v4603_v52  ;;  %2995 = vmatprep.mubr.bf16.mxu0 %v4610_v53  ;;  %v4659_v52 = vcombine.low %v960_v40, %v964_v41  ;;  %v4666_v53 = vcombine.high %v967_v47, %v971_v48 }
 0x13e   : > { %3284 = vmatprep.mubr.bf16.mxu1 %v4612_v54  ;;  %3510 = vmatpush1.bf16.msra.mxu0 %v4992_v10  ;;  %v4997_v54 = vld [vmem:[%s5756_s30 + $0x1f0] sm:$0xff]   ;;  %v991_v10 = vld [vmem:[%s5663_s26 + $0x440] sm:$0xff] }
 0x13f   : > { %3799 = vmatpush1.bf16.msra.mxu1 %v4993_v11  ;;  %3511 = vmatprep.subr.bf16.mxu0 %v5057_v4  ;;  %v995_v11 = vld [vmem:[%s5663_s26 + $0x460] sm:$0xff] }
 0x140   : > { %3800 = vmatprep.subr.bf16.mxu1 %v5057_v4  ;;  %v4689_v22 = vcombine.low %v991_v10, %v995_v11 }
 0x142   : > { %3512 = vmatpush1.bf16.msra.mxu0 %v4994_v28  ;;  %v1008_v28 = vld [vmem:[%s5663_s26 + $0x4c8] sm:$0xff] }
 0x143   : > { %3513 = vmatprep.subr.bf16.mxu0 %v5057_v4  ;;  %3801 = vmatpush1.bf16.msra.mxu1 %v4995_v36  ;;  %v1016_v36 = vld [vmem:[%s5663_s26 + $0x508] sm:$0xff]  ;;  %v4707_v39 = vcombine.low %v1008_v28, %v1012_v29 }
 0x144   : > { %2996 = vmatmul.mubr.bf16.gmra.mrb[28].mxu0 %v4609_v61  ;;  %3802 = vmatprep.subr.bf16.mxu1 %v5057_v4  ;;  %v4667_v61 = vcombine.low %v968_v49, %v972_v50  ;;  %v1031_v50 = vld [vmem:[%s5663_s26 + $0x580] sm:$0xff] }
 0x145   : > { %3285 = vmatmul.mubr.bf16.gmra.mrb[28].mxu1 %v4611_v62  ;;  %3003 = vmatprep.mubr.bf16.mxu0 %v4618_v63  ;;  %v4674_v62 = vcombine.high %v975_v56, %v979_v57  ;;  %v4676_v63 = vcombine.high %v976_v58, %v980_v59 }
 0x146   : > { %3292 = vmatprep.mubr.bf16.mxu1 %v4620_v0  ;;  %3514 = vmatpush1.bf16.msra.mxu0 %v4996_v46  ;;  %v983_v0 = vld [vmem:[%s5663_s26 + $0x400] sm:$0xff] }
 0x147   : > { %3515 = vmatprep.subr.bf16.mxu0 %v5057_v4  ;;  %3803 = vmatpush1.bf16.msra.mxu1 %v4997_v54  ;;  %v4681_v14 = vcombine.low %v983_v0, %v987_v1 }
 0x148   : > { %3804 = vmatprep.subr.bf16.mxu1 %v5057_v4  ;;  %v4998_v4 = vld [vmem:[%s5756_s30 + $0x178] sm:$0xff]  }
 0x14a   : > { %3516 = vmatpush1.bf16.msra.mxu0 %v4998_v4 }
 0x14c   : > { %3004 = vmatmul.mubr.bf16.gmra.mrb[32].mxu0 %v4617_v6  ;;  %v4675_v6 = vcombine.low %v976_v58, %v980_v59  ;;  %v1039_v58 = vld [vmem:[%s5663_s26 + $0x5c0] sm:$0xff] }
 0x14d   : > { %3293 = vmatmul.mubr.bf16.gmra.mrb[32].mxu1 %v4619_v7  ;;  %3011 = vmatprep.mubr.bf16.mxu0 %v4626_v8  ;;  %v4682_v7 = vcombine.high %v983_v0, %v987_v1  ;;  %v4999_v8 = vld [vmem:[%s5756_s30 + $0x1f8] sm:$0xff]  }
 0x14e   : > { %3300 = vmatprep.mubr.bf16.mxu1 %v4628_v9  ;;  %v4684_v9 = vcombine.high %v984_v2, %v988_v3  ;;  %3805 = vmatpush1.bf16.msra.mxu1 %v4999_v8  ;;  %v1043_v59 = vld [vmem:[%s5663_s26 + $0x5e0] sm:$0xff]  ;;  %v1048_v3 = vld [vmem:[%s5663_s26 + $0x608] sm:$0xff] }
 0x14f   : > { %v4738_v4 = vcombine.high %v1039_v58, %v1043_v59  ;;  %v1047_v1 = vld [vmem:[%s5663_s26 + $0x600] sm:$0xff] }
 0x150   : > { %v1051_v2 = vld [vmem:[%s5663_s26 + $0x620] sm:$0xff] }
 0x151   : > { %v4746_v8 = vcombine.high %v1047_v1, %v1051_v2 }
 0x154   : > { %3012 = vmatmul.mubr.bf16.gmra.mrb[36].mxu0 %v4625_v16  ;;  %v4690_v16 = vcombine.high %v991_v10, %v995_v11  ;;  %v1055_v10 = vld [vmem:[%s5663_s26 + $0x640] sm:$0xff] }
 0x155   : > { %3301 = vmatmul.mubr.bf16.gmra.mrb[36].mxu1 %v4627_v17  ;;  %3019 = vmatprep.mubr.bf16.mxu0 %v4634_v18  ;;  %v4692_v17 = vcombine.high %v992_v12, %v996_v13  ;;  %v999_v18 = vld [vmem:[%s5663_s26 + $0x480] sm:$0xff]  ;;  %v1056_v12 = vld [vmem:[%s5663_s26 + $0x648] sm:$0xff] }
 0x156   : > { %3308 = vmatprep.mubr.bf16.mxu1 %v4636_v19  ;;  %v1003_v19 = vld [vmem:[%s5663_s26 + $0x4a0] sm:$0xff]  ;;  %v1060_v13 = vld [vmem:[%s5663_s26 + $0x668] sm:$0xff] }
 0x157   : > { %v4697_v30 = vcombine.low %v999_v18, %v1003_v19  ;;  %v1059_v11 = vld [vmem:[%s5663_s26 + $0x660] sm:$0xff] }
 0x15c   : > { %3020 = vmatmul.mubr.bf16.gmra.mrb[40].mxu0 %v4633_v24  ;;  %v4698_v24 = vcombine.high %v999_v18, %v1003_v19  ;;  %v1063_v18 = vld [vmem:[%s5663_s26 + $0x680] sm:$0xff] }
 0x15d   : > { %3309 = vmatmul.mubr.bf16.gmra.mrb[40].mxu1 %v4635_v25  ;;  %3027 = vmatprep.mubr.bf16.mxu0 %v4642_v26  ;;  %v4700_v25 = vcombine.high %v1000_v20, %v1004_v21  ;;  %v1007_v26 = vld [vmem:[%s5663_s26 + $0x4c0] sm:$0xff]  ;;  %v1064_v20 = vld [vmem:[%s5663_s26 + $0x688] sm:$0xff] }
 0x15e   : > { %3316 = vmatprep.mubr.bf16.mxu1 %v4644_v27  ;;  %v1011_v27 = vld [vmem:[%s5663_s26 + $0x4e0] sm:$0xff]  ;;  %v1068_v21 = vld [vmem:[%s5663_s26 + $0x6a8] sm:$0xff] }
 0x15f   : > { %v4706_v32 = vcombine.high %v1007_v26, %v1011_v27  ;;  %v4705_v38 = vcombine.low %v1007_v26, %v1011_v27  ;;  %v1067_v19 = vld [vmem:[%s5663_s26 + $0x6a0] sm:$0xff] }
 0x160   : > { %v1071_v26 = vld [vmem:[%s5663_s26 + $0x6c0] sm:$0xff] }
 0x161   : > { %v1075_v27 = vld [vmem:[%s5663_s26 + $0x6e0] sm:$0xff] }
 0x164   : > { %3028 = vmatmul.mubr.bf16.gmra.mrb[44].mxu0 %v4641_v33  ;;  %v4708_v33 = vcombine.high %v1008_v28, %v1012_v29  ;;  %v1072_v28 = vld [vmem:[%s5663_s26 + $0x6c8] sm:$0xff] }
 0x165   : > { %3317 = vmatmul.mubr.bf16.gmra.mrb[44].mxu1 %v4643_v34  ;;  %3035 = vmatprep.mubr.bf16.mxu0 %v4650_v35  ;;  %v1015_v34 = vld [vmem:[%s5663_s26 + $0x500] sm:$0xff]  ;;  %v1076_v29 = vld [vmem:[%s5663_s26 + $0x6e8] sm:$0xff] }
 0x166   : > { %3324 = vmatprep.mubr.bf16.mxu1 %v4652_v37  ;;  %v1019_v35 = vld [vmem:[%s5663_s26 + $0x520] sm:$0xff]  ;;  %v1020_v37 = vld [vmem:[%s5663_s26 + $0x528] sm:$0xff] }
 0x167   : > { %v4714_v40 = vcombine.high %v1015_v34, %v1019_v35  ;;  %v4716_v41 = vcombine.high %v1016_v36, %v1020_v37  ;;  %v4713_v46 = vcombine.low %v1015_v34, %v1019_v35  ;;  %v4715_v47 = vcombine.low %v1016_v36, %v1020_v37  ;;  %v1079_v34 = vld [vmem:[%s5663_s26 + $0x700] sm:$0xff]  ;;  %v1080_v37 = vld [vmem:[%s5663_s26 + $0x708] sm:$0xff] }
 0x168   : > { %v1083_v35 = vld [vmem:[%s5663_s26 + $0x720] sm:$0xff] }
 0x16c   : > { %3036 = vmatmul.mubr.bf16.gmra.mrb[48].mxu0 %v4649_v42  ;;  %v1023_v42 = vld [vmem:[%s5663_s26 + $0x540] sm:$0xff] }
 0x16d   : > { %3325 = vmatmul.mubr.bf16.gmra.mrb[48].mxu1 %v4651_v43  ;;  %3043 = vmatprep.mubr.bf16.mxu0 %v4658_v44  ;;  %v1027_v43 = vld [vmem:[%s5663_s26 + $0x560] sm:$0xff]  ;;  %v1024_v44 = vld [vmem:[%s5663_s26 + $0x548] sm:$0xff] }
 0x16e   : > { %3332 = vmatprep.mubr.bf16.mxu1 %v4660_v45  ;;  %v1028_v45 = vld [vmem:[%s5663_s26 + $0x568] sm:$0xff]  ;;  %v4722_v48 = vcombine.high %v1023_v42, %v1027_v43  ;;  %v4721_v54 = vcombine.low %v1023_v42, %v1027_v43 }
 0x16f   : > { %v4724_v49 = vcombine.high %v1024_v44, %v1028_v45 }
 0x174   : > { %3044 = vmatmul.mubr.bf16.gmra.mrb[52].mxu0 %v4657_v51  ;;  %v1035_v51 = vld [vmem:[%s5663_s26 + $0x5a0] sm:$0xff] }
 0x175   : > { %3333 = vmatmul.mubr.bf16.gmra.mrb[52].mxu1 %v4659_v52  ;;  %3051 = vmatprep.mubr.bf16.mxu0 %v4666_v53  ;;  %v1032_v52 = vld [vmem:[%s5663_s26 + $0x588] sm:$0xff]  ;;  %v4730_v56 = vcombine.high %v1031_v50, %v1035_v51 }
 0x176   : > { %3340 = vmatprep.mubr.bf16.mxu1 %v4668_v55  ;;  %v1036_v53 = vld [vmem:[%s5663_s26 + $0x5a8] sm:$0xff]  ;;  %v4723_v55 = vcombine.low %v1024_v44, %v1028_v45  ;;  %v4771_v45 = vcombine.low %v1072_v28, %v1076_v29 }
 0x177   : > { %v4732_v57 = vcombine.high %v1032_v52, %v1036_v53 }
 0x17c   : > { %3052 = vmatmul.mubr.bf16.gmra.mrb[56].mxu0 %v4665_v60  ;;  %v1040_v60 = vld [vmem:[%s5663_s26 + $0x5c8] sm:$0xff] }
 0x17d   : > { %3341 = vmatmul.mubr.bf16.gmra.mrb[56].mxu1 %v4667_v61  ;;  %3059 = vmatprep.mubr.bf16.mxu0 %v4674_v62  ;;  %v1044_v61 = vld [vmem:[%s5663_s26 + $0x5e8] sm:$0xff]  ;;  %v4729_v62 = vcombine.low %v1031_v50, %v1035_v51 }
 0x17e   : > { %3348 = vmatprep.mubr.bf16.mxu1 %v4676_v63  ;;  %v4731_v63 = vcombine.low %v1032_v52, %v1036_v53  ;;  %v4740_v0 = vcombine.high %v1040_v60, %v1044_v61  ;;  %v1087_v52 = vld [vmem:[%s5663_s26 + $0x740] sm:$0xff] }
 0x17f   : > { %v1091_v53 = vld [vmem:[%s5663_s26 + $0x760] sm:$0xff] }
 0x184   : > { %3060 = vmatmul.mubr.bf16.gmra.mrb[60].mxu0 %v4673_v5  ;;  %v1052_v5 = vld [vmem:[%s5663_s26 + $0x628] sm:$0xff] }
 0x185   : > { %3349 = vmatmul.mubr.bf16.gmra.mrb[60].mxu1 %v4675_v6  ;;  %3067 = vmatprep.mubr.bf16.mxu0 %v4682_v7  ;;  %v4737_v6 = vcombine.low %v1039_v58, %v1043_v59  ;;  %v4739_v7 = vcombine.low %v1040_v60, %v1044_v61  ;;  %v4777_v59 = vcombine.low %v1079_v34, %v1083_v35 }
 0x186   : > { %3356 = vmatprep.mubr.bf16.mxu1 %v4684_v9  ;;  %v4748_v9 = vcombine.high %v1048_v3, %v1052_v5 }
 0x18c   : > { %3068 = vmatmul.mubr.bf16.gmra.mrb[64].mxu0 %v4681_v14  ;;  %v4745_v14 = vcombine.low %v1047_v1, %v1051_v2 }
 0x18d   : > { %3357 = vmatmul.mubr.bf16.gmra.mrb[64].mxu1 %v4683_v15  ;;  %3075 = vmatprep.mubr.bf16.mxu0 %v4690_v16  ;;  %v4747_v15 = vcombine.low %v1048_v3, %v1052_v5  ;;  %v4754_v16 = vcombine.high %v1055_v10, %v1059_v11 }
 0x18e   : > { %3364 = vmatprep.mubr.bf16.mxu1 %v4692_v17  ;;  %v4756_v17 = vcombine.high %v1056_v12, %v1060_v13 }
 0x194   : > { %3076 = vmatmul.mubr.bf16.gmra.mrb[68].mxu0 %v4689_v22  ;;  %v4753_v22 = vcombine.low %v1055_v10, %v1059_v11  ;;  %v1100_v10 = vld [vmem:[%s5663_s26 + $0x7a8] sm:$0xff] }
 0x195   : > { %3365 = vmatmul.mubr.bf16.gmra.mrb[68].mxu1 %v4691_v23  ;;  %3083 = vmatprep.mubr.bf16.mxu0 %v4698_v24  ;;  %v4755_v23 = vcombine.low %v1056_v12, %v1060_v13  ;;  %v4762_v24 = vcombine.high %v1063_v18, %v1067_v19  ;;  %v4785_v13 = vcombine.low %v1087_v52, %v1091_v53 }
 0x196   : > { %3372 = vmatprep.mubr.bf16.mxu1 %v4700_v25  ;;  %v4764_v25 = vcombine.high %v1064_v20, %v1068_v21 }
 0x19c   : > { %3084 = vmatmul.mubr.bf16.gmra.mrb[72].mxu0 %v4697_v30  ;;  %v4761_v30 = vcombine.low %v1063_v18, %v1067_v19 }
 0x19d   : > { %3373 = vmatmul.mubr.bf16.gmra.mrb[72].mxu1 %v4699_v31  ;;  %3091 = vmatprep.mubr.bf16.mxu0 %v4706_v32  ;;  %v4763_v31 = vcombine.low %v1064_v20, %v1068_v21  ;;  %v4770_v32 = vcombine.high %v1071_v26, %v1075_v27 }
 0x19e   : > { %3380 = vmatprep.mubr.bf16.mxu1 %v4708_v33  ;;  %v4772_v33 = vcombine.high %v1072_v28, %v1076_v29  ;;  %v1108_v28 = vld [vmem:[%s5663_s26 + $0x7e8] sm:$0xff] }
 0x1a4   : > { %3092 = vmatmul.mubr.bf16.gmra.mrb[76].mxu0 %v4705_v38  ;;  %v1084_v38 = vld [vmem:[%s5663_s26 + $0x728] sm:$0xff] }
 0x1a5   : > { %3381 = vmatmul.mubr.bf16.gmra.mrb[76].mxu1 %v4707_v39  ;;  %3099 = vmatprep.mubr.bf16.mxu0 %v4714_v40 }
 0x1a6   : > { %3388 = vmatprep.mubr.bf16.mxu1 %v4716_v41  ;;  %v4769_v41 = vcombine.low %v1071_v26, %v1075_v27  ;;  %v1104_v27 = vld [vmem:[%s5663_s26 + $0x7c8] sm:$0xff] }
 0x1ac   : > { %3100 = vmatmul.mubr.bf16.gmra.mrb[80].mxu0 %v4713_v46  ;;  %v4778_v46 = vcombine.high %v1079_v34, %v1083_v35 }
 0x1ad   : > { %3389 = vmatmul.mubr.bf16.gmra.mrb[80].mxu1 %v4715_v47  ;;  %3107 = vmatprep.mubr.bf16.mxu0 %v4722_v48 }
 0x1ae   : > { %3396 = vmatprep.mubr.bf16.mxu1 %v4724_v49  ;;  %v4780_v49 = vcombine.high %v1080_v37, %v1084_v38 }
 0x1b4   : > { %3108 = vmatmul.mubr.bf16.gmra.mrb[84].mxu0 %v4721_v54 }
 0x1b5   : > { %3397 = vmatmul.mubr.bf16.gmra.mrb[84].mxu1 %v4723_v55  ;;  %3115 = vmatprep.mubr.bf16.mxu0 %v4730_v56  ;;  %v1088_v55 = vld [vmem:[%s5663_s26 + $0x748] sm:$0xff] }
 0x1b6   : > { %3404 = vmatprep.mubr.bf16.mxu1 %v4732_v57  ;;  %v1092_v56 = vld [vmem:[%s5663_s26 + $0x768] sm:$0xff] }
 0x1b7   : > { %v4788_v2 = vcombine.high %v1088_v55, %v1092_v56 }
 0x1bc   : > { %3116 = vmatmul.mubr.bf16.gmra.mrb[88].mxu0 %v4729_v62 }
 0x1bd   : > { %3405 = vmatmul.mubr.bf16.gmra.mrb[88].mxu1 %v4731_v63  ;;  %3123 = vmatprep.mubr.bf16.mxu0 %v4738_v4  ;;  %v4779_v63 = vcombine.low %v1080_v37, %v1084_v38  ;;  %v4786_v4 = vcombine.high %v1087_v52, %v1091_v53 }
 0x1be   : > { %3412 = vmatprep.mubr.bf16.mxu1 %v4740_v0 }
 0x1c4   : > { %3124 = vmatmul.mubr.bf16.gmra.mrb[92].mxu0 %v4737_v6  ;;  %v1095_v6 = vld [vmem:[%s5663_s26 + $0x780] sm:$0xff] }
 0x1c5   : > { %3413 = vmatmul.mubr.bf16.gmra.mrb[92].mxu1 %v4739_v7  ;;  %3131 = vmatprep.mubr.bf16.mxu0 %v4746_v8  ;;  %v1099_v7 = vld [vmem:[%s5663_s26 + $0x7a0] sm:$0xff] }
 0x1c6   : > { %3420 = vmatprep.mubr.bf16.mxu1 %v4748_v9  ;;  %v1096_v9 = vld [vmem:[%s5663_s26 + $0x788] sm:$0xff]  ;;  %v4794_v18 = vcombine.high %v1095_v6, %v1099_v7 }
 0x1c7   : > { %v4796_v21 = vcombine.high %v1096_v9, %v1100_v10  ;;  %v4795_v35 = vcombine.low %v1096_v9, %v1100_v10 }
 0x1cc   : > { %3132 = vmatmul.mubr.bf16.gmra.mrb[96].mxu0 %v4745_v14 }
 0x1cd   : > { %3421 = vmatmul.mubr.bf16.gmra.mrb[96].mxu1 %v4747_v15  ;;  %3139 = vmatprep.mubr.bf16.mxu0 %v4754_v16 }
 0x1ce   : > { %3428 = vmatprep.mubr.bf16.mxu1 %v4756_v17  ;;  %v4787_v17 = vcombine.low %v1088_v55, %v1092_v56  ;;  %v4803_v55 = vcombine.low %v1104_v27, %v1108_v28 }
 0x1d4   : > { %3140 = vmatmul.mubr.bf16.gmra.mrb[100].mxu0 %v4753_v22 }
 0x1d5   : > { %3429 = vmatmul.mubr.bf16.gmra.mrb[100].mxu1 %v4755_v23  ;;  %3147 = vmatprep.mubr.bf16.mxu0 %v4762_v24  ;;  %v1103_v24 = vld [vmem:[%s5663_s26 + $0x7c0] sm:$0xff] }
 0x1d6   : > { %3436 = vmatprep.mubr.bf16.mxu1 %v4764_v25  ;;  %v1107_v25 = vld [vmem:[%s5663_s26 + $0x7e0] sm:$0xff] }
 0x1dc   : > { %3148 = vmatmul.mubr.bf16.gmra.mrb[104].mxu0 %v4761_v30 }
 0x1dd   : > { %3437 = vmatmul.mubr.bf16.gmra.mrb[104].mxu1 %v4763_v31  ;;  %3155 = vmatprep.mubr.bf16.mxu0 %v4770_v32  ;;  %v4793_v31 = vcombine.low %v1095_v6, %v1099_v7 }
 0x1de   : > { %3444 = vmatprep.mubr.bf16.mxu1 %v4772_v33 }
 0x1df   : > { %v2941_v36 = vpop.f32.mrb[0].mxu0 }
 0x1e0   : > { %v3230_v39 = vpop.f32.mrb[0].mxu1  ;;  %v2943_v40 = vpop.f32.mrb[1].mxu0 }
 0x1e1   : > { %v6002_v42 = vadd.f32 %v3230_v39, %v2941_v36  ;;  %v3232_v43 = vpop.f32.mrb[1].mxu1  ;;  %v2944_v44 = vpop.f32.mrb[2].mxu0  ;;  %v4802_v36 = vcombine.high %v1103_v24, %v1107_v25  ;;  %v4804_v39 = vcombine.high %v1104_v27, %v1108_v28 }
 0x1e2   : > { %v3233_v47 = vpop.f32.mrb[2].mxu1  ;;  %v2946_v48 = vpop.f32.mrb[3].mxu0  ;;  %v857_v43 = vld [vmem:[%s5663_s26 + $0x10] sm:$0xff] }
 0x1e3   : > { %v6004_v50 = vadd.f32 %v3233_v47, %v2944_v44  ;;  %v3235_v51 = vpop.f32.mrb[3].mxu1  ;;  %v861_v44 = vld [vmem:[%s5663_s26 + $0x30] sm:$0xff]  ;;  %v862_v47 = vld [vmem:[%s5663_s26 + $0x38] sm:$0xff] }
 0x1e4   : > { %3156 = vmatmul.mubr.bf16.gmra.mrb[108].mxu0 %v4769_v41  ;;  %v4801_v51 = vcombine.low %v1103_v24, %v1107_v25  ;;  %v4558_v56 = vcombine.high %v857_v43, %v861_v44  ;;  %v4557_v7 = vcombine.low %v857_v43, %v861_v44  ;;  %v878_v24 = vld [vmem:[%s5663_s26 + $0xb8] sm:$0xff] }
 0x1e5   : > { %3445 = vmatmul.mubr.bf16.gmra.mrb[108].mxu1 %v4771_v45  ;;  %3163 = vmatprep.mubr.bf16.mxu0 %v4778_v46  ;;  %v858_v46 = vld [vmem:[%s5663_s26 + $0x18] sm:$0xff] }
 0x1e6   : > { %3452 = vmatprep.mubr.bf16.mxu1 %v4780_v49  ;;  %v882_v44 = vld [vmem:[%s5663_s26 + $0xd8] sm:$0xff] }
 0x1e7   : > { %v2949_v54 = vpop.f32.mrb[4].mxu0 }
 0x1e8   : > { %v3238_v57 = vpop.f32.mrb[4].mxu1  ;;  %v2951_v58 = vpop.f32.mrb[5].mxu0 }
 0x1e9   : > { %v6010_v60 = vadd.f32 %v3238_v57, %v2949_v54  ;;  %v3240_v61 = vpop.f32.mrb[5].mxu1  ;;  %v2952_v62 = vpop.f32.mrb[6].mxu0 }
 0x1ea   : > { %v3241_v0 = vpop.f32.mrb[6].mxu1  ;;  %v2954_v1 = vpop.f32.mrb[7].mxu0 }
 0x1eb   : > { %v6012_v3 = vadd.f32 %v3241_v0, %v2952_v62  ;;  %v3243_v5 = vpop.f32.mrb[7].mxu1  ;;  %v866_v1 = vld [vmem:[%s5663_s26 + $0x58] sm:$0xff] }
 0x1ec   : > { %3164 = vmatmul.mubr.bf16.gmra.mrb[112].mxu0 %v4777_v59  ;;  %v4560_v59 = vcombine.high %v858_v46, %v862_v47 }
 0x1ed   : > { %3453 = vmatmul.mubr.bf16.gmra.mrb[112].mxu1 %v4779_v63  ;;  %3171 = vmatprep.mubr.bf16.mxu0 %v4786_v4  ;;  %v865_v63 = vld [vmem:[%s5663_s26 + $0x50] sm:$0xff] }
 0x1ee   : > { %3460 = vmatprep.mubr.bf16.mxu1 %v4788_v2  ;;  %v869_v4 = vld [vmem:[%s5663_s26 + $0x70] sm:$0xff]  ;;  %v870_v2 = vld [vmem:[%s5663_s26 + $0x78] sm:$0xff] }
 0x1ef   : > { %v2957_v8 = vpop.f32.mrb[8].mxu0  ;;  %v4565_v27 = vcombine.low %v865_v63, %v869_v4 }
 0x1f0   : > { %v3246_v11 = vpop.f32.mrb[8].mxu1  ;;  %v2959_v12 = vpop.f32.mrb[9].mxu0 }
 0x1f1   : > { %v6018_v14 = vadd.f32 %v3246_v11, %v2957_v8  ;;  %v3248_v15 = vpop.f32.mrb[9].mxu1  ;;  %v2960_v16 = vpop.f32.mrb[10].mxu0  ;;  %v4559_v11 = vcombine.low %v858_v46, %v862_v47  ;;  %v4566_v12 = vcombine.high %v865_v63, %v869_v4  ;;  %v889_v63 = vld [vmem:[%s5663_s26 + $0x110] sm:$0xff] }
 0x1f2   : > { %v3249_v19 = vpop.f32.mrb[10].mxu1  ;;  %v2962_v20 = vpop.f32.mrb[11].mxu0  ;;  %v893_v4 = vld [vmem:[%s5663_s26 + $0x130] sm:$0xff] }
 0x1f3   : > { %v6020_v22 = vadd.f32 %v3249_v19, %v2960_v16  ;;  %v3251_v23 = vpop.f32.mrb[11].mxu1  ;;  %v4568_v16 = vcombine.high %v866_v1, %v870_v2  ;;  %v873_v19 = vld [vmem:[%s5663_s26 + $0x90] sm:$0xff] }
 0x1f4   : > { %3172 = vmatmul.mubr.bf16.gmra.mrb[116].mxu0 %v4785_v13  ;;  %v877_v20 = vld [vmem:[%s5663_s26 + $0xb0] sm:$0xff]  ;;  %v874_v23 = vld [vmem:[%s5663_s26 + $0x98] sm:$0xff] }
 0x1f5   : > { %3461 = vmatmul.mubr.bf16.gmra.mrb[116].mxu1 %v4787_v17  ;;  %3179 = vmatprep.mubr.bf16.mxu0 %v4794_v18 }
 0x1f6   : > { %3468 = vmatprep.mubr.bf16.mxu1 %v4796_v21 }
 0x1f7   : > { %v2965_v26 = vpop.f32.mrb[12].mxu0 }
 0x1f8   : > { %v3254_v29 = vpop.f32.mrb[12].mxu1  ;;  %v2967_v30 = vpop.f32.mrb[13].mxu0 }
 0x1f9   : > { %v6026_v32 = vadd.f32 %v3254_v29, %v2965_v26  ;;  %v3256_v33 = vpop.f32.mrb[13].mxu1  ;;  %v2968_v34 = vpop.f32.mrb[14].mxu0 }
 0x1fa   : > { %v3257_v37 = vpop.f32.mrb[14].mxu1  ;;  %v2970_v38 = vpop.f32.mrb[15].mxu0  ;;  %v4574_v33 = vcombine.high %v873_v19, %v877_v20 }
 0x1fb   : > { %v6028_v40 = vadd.f32 %v3257_v37, %v2968_v34  ;;  %v3259_v41 = vpop.f32.mrb[15].mxu1 }
 0x1fc   : > { %3180 = vmatmul.mubr.bf16.gmra.mrb[120].mxu0 %v4793_v31  ;;  %v4567_v31 = vcombine.low %v866_v1, %v870_v2  ;;  %v885_v41 = vld [vmem:[%s5663_s26 + $0xf0] sm:$0xff]  ;;  %v890_v1 = vld [vmem:[%s5663_s26 + $0x118] sm:$0xff] }
 0x1fd   : > { %3469 = vmatmul.mubr.bf16.gmra.mrb[120].mxu1 %v4795_v35  ;;  %3187 = vmatprep.mubr.bf16.mxu0 %v4802_v36  ;;  %v4576_v36 = vcombine.high %v874_v23, %v878_v24  ;;  %v894_v2 = vld [vmem:[%s5663_s26 + $0x138] sm:$0xff] }
 0x1fe   : > { %3476 = vmatprep.mubr.bf16.mxu1 %v4804_v39  ;;  %v881_v39 = vld [vmem:[%s5663_s26 + $0xd0] sm:$0xff] }
 0x1ff   : > { %v2973_v45 = vpop.f32.mrb[16].mxu0 }
 0x200   : > { %v3262_v48 = vpop.f32.mrb[16].mxu1  ;;  %v2975_v49 = vpop.f32.mrb[17].mxu0 }
 0x201   : > { %v6034_v52 = vadd.f32 %v3262_v48, %v2973_v45  ;;  %v3264_v53 = vpop.f32.mrb[17].mxu1  ;;  %v2976_v54 = vpop.f32.mrb[18].mxu0  ;;  %v886_v45 = vld [vmem:[%s5663_s26 + $0xf8] sm:$0xff]  ;;  %v4573_v48 = vcombine.low %v873_v19, %v877_v20 }
 0x202   : > { %v3265_v57 = vpop.f32.mrb[18].mxu1  ;;  %v2978_v58 = vpop.f32.mrb[19].mxu0 }
 0x203   : > { %v6036_v61 = vadd.f32 %v3265_v57, %v2976_v54  ;;  %v3267_v62 = vpop.f32.mrb[19].mxu1  ;;  %v4575_v54 = vcombine.low %v874_v23, %v878_v24  ;;  %v4584_v58 = vcombine.high %v882_v44, %v886_v45  ;;  %v901_v23 = vld [vmem:[%s5663_s26 + $0x170] sm:$0xff] }
 0x204   : > { %3188 = vmatmul.mubr.bf16.gmra.mrb[124].mxu0 %v4801_v51 }
 0x205   : > { %3477 = vmatmul.mubr.bf16.gmra.mrb[124].mxu1 %v4803_v55  ;;  %3517 = vmatprep.mubr.bf16.mxu0 %v4558_v56  ;;  %v4582_v55 = vcombine.high %v881_v39, %v885_v41 }
 0x206   : > { %3806 = vmatprep.mubr.bf16.mxu1 %v4560_v59 }
 0x207   : > { %v2981_v0 = vpop.f32.mrb[20].mxu0 }
 0x208   : > { %v3270_v5 = vpop.f32.mrb[20].mxu1  ;;  %v2983_v6 = vpop.f32.mrb[21].mxu0 }
 0x209   : > { %v6042_v8 = vadd.f32 %v3270_v5, %v2981_v0  ;;  %v3272_v9 = vpop.f32.mrb[21].mxu1  ;;  %v2984_v10 = vpop.f32.mrb[22].mxu0 }
 0x20a   : > { %v3273_v13 = vpop.f32.mrb[22].mxu1  ;;  %v2986_v15 = vpop.f32.mrb[23].mxu0 }
 0x20b   : > { %v6044_v17 = vadd.f32 %v3273_v13, %v2984_v10  ;;  %v3275_v18 = vpop.f32.mrb[23].mxu1  ;;  %v4590_v13 = vcombine.high %v889_v63, %v893_v4 }
 0x20c   : > { %3518 = vmatmul.mubr.bf16.vlgmr.msra.gmra.mrb[128].mxu0 %v4557_v7  ;;  %v4581_v7 = vcombine.low %v881_v39, %v885_v41  ;;  %v4592_v18 = vcombine.high %v890_v1, %v894_v2 }
 0x20d   : > { %3807 = vmatmul.mubr.bf16.vlgmr.msra.gmra.mrb[128].mxu1 %v4559_v11  ;;  %3525 = vmatprep.mubr.bf16.mxu0 %v4566_v12  ;;  %v4583_v12 = vcombine.low %v882_v44, %v886_v45  ;;  %v905_v45 = vld [vmem:[%s5663_s26 + $0x190] sm:$0xff] }
 0x20e   : > { %3814 = vmatprep.mubr.bf16.mxu1 %v4568_v16 }
 0x20f   : > { %v2989_v21 = vpop.f32.mrb[24].mxu0 }
 0x210   : > { %v3278_v25 = vpop.f32.mrb[24].mxu1  ;;  %v2991_v26 = vpop.f32.mrb[25].mxu0 }
 0x211   : > { %v6050_v28 = vadd.f32 %v3278_v25, %v2989_v21  ;;  %v3280_v29 = vpop.f32.mrb[25].mxu1  ;;  %v2992_v30 = vpop.f32.mrb[26].mxu0  ;;  %v897_v21 = vld [vmem:[%s5663_s26 + $0x150] sm:$0xff]  ;;  %v898_v25 = vld [vmem:[%s5663_s26 + $0x158] sm:$0xff] }
 0x212   : > { %v3281_v34 = vpop.f32.mrb[26].mxu1  ;;  %v2994_v35 = vpop.f32.mrb[27].mxu0  ;;  %v902_v26 = vld [vmem:[%s5663_s26 + $0x178] sm:$0xff] }
 0x213   : > { %v6052_v37 = vadd.f32 %v3281_v34, %v2992_v30  ;;  %v3283_v38 = vpop.f32.mrb[27].mxu1  ;;  %v4589_v30 = vcombine.low %v889_v63, %v893_v4  ;;  %v4591_v35 = vcombine.low %v890_v1, %v894_v2  ;;  %v4600_v41 = vcombine.high %v898_v25, %v902_v26 }
 0x214   : > { %3526 = vmatmul.mubr.bf16.gmra.mrb[132].mxu0 %v4565_v27 }
 0x215   : > { %3815 = vmatmul.mubr.bf16.gmra.mrb[132].mxu1 %v4567_v31  ;;  %3533 = vmatprep.mubr.bf16.mxu0 %v4574_v33 }
 0x216   : > { %3822 = vmatprep.mubr.bf16.mxu1 %v4576_v36  ;;  %v4598_v36 = vcombine.high %v897_v21, %v901_v23 }
 0x217   : > { %v2997_v43 = vpop.f32.mrb[28].mxu0 }
 0x218   : > { %v3286_v46 = vpop.f32.mrb[28].mxu1  ;;  %v2999_v47 = vpop.f32.mrb[29].mxu0 }
 0x219   : > { %v6058_v49 = vadd.f32 %v3286_v46, %v2997_v43  ;;  %v3288_v51 = vpop.f32.mrb[29].mxu1  ;;  %v3000_v53 = vpop.f32.mrb[30].mxu0  ;;  %v909_v46 = vld [vmem:[%s5663_s26 + $0x1b0] sm:$0xff] }
 0x21a   : > { %v3289_v56 = vpop.f32.mrb[30].mxu1  ;;  %v3002_v57 = vpop.f32.mrb[31].mxu0  ;;  %v910_v51 = vld [vmem:[%s5663_s26 + $0x1b8] sm:$0xff]  ;;  %v4606_v63 = vcombine.high %v905_v45, %v909_v46 }
 0x21b   : > { %v6060_v59 = vadd.f32 %v3289_v56, %v3000_v53  ;;  %v3291_v62 = vpop.f32.mrb[31].mxu1 }
 0x21c   : > { %3534 = vmatmul.mubr.bf16.gmra.mrb[136].mxu0 %v4573_v48  ;;  %v906_v48 = vld [vmem:[%s5663_s26 + $0x198] sm:$0xff]  ;;  %v4599_v62 = vcombine.low %v898_v25, %v902_v26 }
 0x21d   : > { %3823 = vmatmul.mubr.bf16.gmra.mrb[136].mxu1 %v4575_v54  ;;  %3541 = vmatprep.mubr.bf16.mxu0 %v4582_v55  ;;  %v4597_v55 = vcombine.low %v897_v21, %v901_v23  ;;  %v4608_v1 = vcombine.high %v906_v48, %v910_v51  ;;  %v4607_v23 = vcombine.low %v906_v48, %v910_v51 }
 0x21e   : > { %3830 = vmatprep.mubr.bf16.mxu1 %v4584_v58 }
 0x21f   : > { %v3005_v0 = vpop.f32.mrb[32].mxu0 }
 0x220   : > { %v3294_v5 = vpop.f32.mrb[32].mxu1  ;;  %v3007_v6 = vpop.f32.mrb[33].mxu0 }
 0x221   : > { %v6066_v9 = vadd.f32 %v3294_v5, %v3005_v0  ;;  %v3296_v10 = vpop.f32.mrb[33].mxu1  ;;  %v3008_v11 = vpop.f32.mrb[34].mxu0  ;;  %v913_v6 = vld [vmem:[%s5663_s26 + $0x1d0] sm:$0xff] }
 0x222   : > { %v3297_v15 = vpop.f32.mrb[34].mxu1  ;;  %v3010_v16 = vpop.f32.mrb[35].mxu0 }
 0x223   : > { %v6068_v19 = vadd.f32 %v3297_v15, %v3008_v11  ;;  %v3299_v20 = vpop.f32.mrb[35].mxu1  ;;  %v914_v11 = vld [vmem:[%s5663_s26 + $0x1d8] sm:$0xff]  ;;  %v4605_v16 = vcombine.low %v905_v45, %v909_v46 }
 0x224   : > { %3542 = vmatmul.mubr.bf16.gmra.mrb[140].mxu0 %v4581_v7  ;;  %v917_v7 = vld [vmem:[%s5663_s26 + $0x1f0] sm:$0xff] }
 0x225   : > { %3831 = vmatmul.mubr.bf16.gmra.mrb[140].mxu1 %v4583_v12  ;;  %3549 = vmatprep.mubr.bf16.mxu0 %v4590_v13  ;;  %v918_v12 = vld [vmem:[%s5663_s26 + $0x1f8] sm:$0xff] }
 0x226   : > { %3838 = vmatprep.mubr.bf16.mxu1 %v4592_v18  ;;  %v4615_v48 = vcombine.low %v914_v11, %v918_v12 }
 0x227   : > { %v3013_v24 = vpop.f32.mrb[36].mxu0 }
 0x228   : > { %v3302_v27 = vpop.f32.mrb[36].mxu1  ;;  %v3015_v29 = vpop.f32.mrb[37].mxu0 }
 0x229   : > { %v6074_v31 = vadd.f32 %v3302_v27, %v3013_v24  ;;  %v3304_v33 = vpop.f32.mrb[37].mxu1  ;;  %v3016_v34 = vpop.f32.mrb[38].mxu0  ;;  %v4614_v24 = vcombine.high %v913_v6, %v917_v7  ;;  %v4616_v27 = vcombine.high %v914_v11, %v918_v12 }
 0x22a   : > { %v3305_v38 = vpop.f32.mrb[38].mxu1  ;;  %v3018_v39 = vpop.f32.mrb[39].mxu0  ;;  %v921_v33 = vld [vmem:[%s5663_s26 + $0x210] sm:$0xff] }
 0x22b   : > { %v6076_v43 = vadd.f32 %v3305_v38, %v3016_v34  ;;  %v3307_v44 = vpop.f32.mrb[39].mxu1  ;;  %v925_v34 = vld [vmem:[%s5663_s26 + $0x230] sm:$0xff]  ;;  %v926_v38 = vld [vmem:[%s5663_s26 + $0x238] sm:$0xff] }
 0x22c   : > { %3550 = vmatmul.mubr.bf16.gmra.mrb[144].mxu0 %v4589_v30  ;;  %v4613_v44 = vcombine.low %v913_v6, %v917_v7  ;;  %v4622_v51 = vcombine.high %v921_v33, %v925_v34  ;;  %v4621_v7 = vcombine.low %v921_v33, %v925_v34  ;;  %v942_v33 = vld [vmem:[%s5663_s26 + $0x2b8] sm:$0xff] }
 0x22d   : > { %3839 = vmatmul.mubr.bf16.gmra.mrb[144].mxu1 %v4591_v35  ;;  %3557 = vmatprep.mubr.bf16.mxu0 %v4598_v36  ;;  %v922_v36 = vld [vmem:[%s5663_s26 + $0x218] sm:$0xff] }
 0x22e   : > { %3846 = vmatprep.mubr.bf16.mxu1 %v4600_v41 }
 0x22f   : > { %v3021_v47 = vpop.f32.mrb[40].mxu0 }
 0x230   : > { %v3310_v53 = vpop.f32.mrb[40].mxu1  ;;  %v3023_v54 = vpop.f32.mrb[41].mxu0 }
 0x231   : > { %v6082_v56 = vadd.f32 %v3310_v53, %v3021_v47  ;;  %v3312_v57 = vpop.f32.mrb[41].mxu1  ;;  %v3024_v58 = vpop.f32.mrb[42].mxu0 }
 0x232   : > { %v3313_v4 = vpop.f32.mrb[42].mxu1  ;;  %v3026_v0 = vpop.f32.mrb[43].mxu0 }
 0x233   : > { %v6084_v2 = vadd.f32 %v3313_v4, %v3024_v58  ;;  %v3315_v5 = vpop.f32.mrb[43].mxu1  ;;  %v930_v0 = vld [vmem:[%s5663_s26 + $0x258] sm:$0xff] }
 0x234   : > { %3558 = vmatmul.mubr.bf16.gmra.mrb[148].mxu0 %v4597_v55  ;;  %v4624_v55 = vcombine.high %v922_v36, %v926_v38 }
 0x235   : > { %3847 = vmatmul.mubr.bf16.gmra.mrb[148].mxu1 %v4599_v62  ;;  %3565 = vmatprep.mubr.bf16.mxu0 %v4606_v63  ;;  %v929_v62 = vld [vmem:[%s5663_s26 + $0x250] sm:$0xff] }
 0x236   : > { %3854 = vmatprep.mubr.bf16.mxu1 %v4608_v1  ;;  %v933_v63 = vld [vmem:[%s5663_s26 + $0x270] sm:$0xff]  ;;  %v934_v1 = vld [vmem:[%s5663_s26 + $0x278] sm:$0xff] }
 0x237   : > { %v3029_v10 = vpop.f32.mrb[44].mxu0 }
 0x238   : > { %v3318_v13 = vpop.f32.mrb[44].mxu1  ;;  %v3031_v15 = vpop.f32.mrb[45].mxu0 }
 0x239   : > { %v6090_v18 = vadd.f32 %v3318_v13, %v3029_v10  ;;  %v3320_v20 = vpop.f32.mrb[45].mxu1  ;;  %v3032_v21 = vpop.f32.mrb[46].mxu0  ;;  %v4623_v13 = vcombine.low %v922_v36, %v926_v38  ;;  %v4630_v15 = vcombine.high %v929_v62, %v933_v63  ;;  %v4629_v36 = vcombine.low %v929_v62, %v933_v63  ;;  %v946_v63 = vld [vmem:[%s5663_s26 + $0x2d8] sm:$0xff] }
 0x23a   : > { %v3321_v25 = vpop.f32.mrb[46].mxu1  ;;  %v3034_v26 = vpop.f32.mrb[47].mxu0 }
 0x23b   : > { %v6092_v29 = vadd.f32 %v3321_v25, %v3032_v21  ;;  %v3323_v30 = vpop.f32.mrb[47].mxu1  ;;  %v4632_v21 = vcombine.high %v930_v0, %v934_v1  ;;  %v937_v25 = vld [vmem:[%s5663_s26 + $0x290] sm:$0xff] }
 0x23c   : > { %3566 = vmatmul.mubr.bf16.gmra.mrb[152].mxu0 %v4605_v16  ;;  %v941_v26 = vld [vmem:[%s5663_s26 + $0x2b0] sm:$0xff]  ;;  %v938_v30 = vld [vmem:[%s5663_s26 + $0x298] sm:$0xff] }
 0x23d   : > { %3855 = vmatmul.mubr.bf16.gmra.mrb[152].mxu1 %v4607_v23  ;;  %3573 = vmatprep.mubr.bf16.mxu0 %v4614_v24 }
 0x23e   : > { %3862 = vmatprep.mubr.bf16.mxu1 %v4616_v27 }
 0x23f   : > { %v3037_v35 = vpop.f32.mrb[48].mxu0 }
 0x240   : > { %v3326_v39 = vpop.f32.mrb[48].mxu1  ;;  %v3039_v41 = vpop.f32.mrb[49].mxu0 }
 0x241   : > { %v6098_v45 = vadd.f32 %v3326_v39, %v3037_v35  ;;  %v3328_v46 = vpop.f32.mrb[49].mxu1  ;;  %v3040_v47 = vpop.f32.mrb[50].mxu0 }
 0x242   : > { %v3329_v53 = vpop.f32.mrb[50].mxu1  ;;  %v3042_v54 = vpop.f32.mrb[51].mxu0  ;;  %v4638_v46 = vcombine.high %v937_v25, %v941_v26 }
 0x243   : > { %v6100_v57 = vadd.f32 %v3329_v53, %v3040_v47  ;;  %v3331_v58 = vpop.f32.mrb[51].mxu1 }
 0x244   : > { %3574 = vmatmul.mubr.bf16.gmra.mrb[156].mxu0 %v4613_v44  ;;  %v4631_v44 = vcombine.low %v930_v0, %v934_v1  ;;  %v949_v58 = vld [vmem:[%s5663_s26 + $0x2f0] sm:$0xff]  ;;  %v4637_v0 = vcombine.low %v937_v25, %v941_v26 }
 0x245   : > { %3863 = vmatmul.mubr.bf16.gmra.mrb[156].mxu1 %v4615_v48  ;;  %3581 = vmatprep.mubr.bf16.mxu0 %v4622_v51  ;;  %v4640_v51 = vcombine.high %v938_v30, %v942_v33  ;;  %v953_v25 = vld [vmem:[%s5663_s26 + $0x310] sm:$0xff] }
 0x246   : > { %3870 = vmatprep.mubr.bf16.mxu1 %v4624_v55  ;;  %v945_v55 = vld [vmem:[%s5663_s26 + $0x2d0] sm:$0xff] }
 0x247   : > { %v3045_v4 = vpop.f32.mrb[52].mxu0  ;;  %v957_v26 = vld [vmem:[%s5663_s26 + $0x330] sm:$0xff] }
 0x248   : > { %v3334_v5 = vpop.f32.mrb[52].mxu1  ;;  %v3047_v6 = vpop.f32.mrb[53].mxu0 }
 0x249   : > { %v6106_v10 = vadd.f32 %v3334_v5, %v3045_v4  ;;  %v3336_v11 = vpop.f32.mrb[53].mxu1  ;;  %v3048_v12 = vpop.f32.mrb[54].mxu0  ;;  %v950_v4 = vld [vmem:[%s5663_s26 + $0x2f8] sm:$0xff] }
 0x24a   : > { %v3337_v16 = vpop.f32.mrb[54].mxu1  ;;  %v3050_v20 = vpop.f32.mrb[55].mxu0 }
 0x24b   : > { %v6108_v23 = vadd.f32 %v3337_v16, %v3048_v12  ;;  %v3339_v24 = vpop.f32.mrb[55].mxu1  ;;  %v4639_v12 = vcombine.low %v938_v30, %v942_v33  ;;  %v4648_v20 = vcombine.high %v946_v63, %v950_v4  ;;  %v4645_v30 = vcombine.low %v945_v55, %v949_v58 }
 0x24c   : > { %3582 = vmatmul.mubr.bf16.gmra.mrb[160].mxu0 %v4621_v7 }
 0x24d   : > { %3871 = vmatmul.mubr.bf16.gmra.mrb[160].mxu1 %v4623_v13  ;;  %3589 = vmatprep.mubr.bf16.mxu0 %v4630_v15  ;;  %v4646_v13 = vcombine.high %v945_v55, %v949_v58  ;;  %v961_v55 = vld [vmem:[%s5663_s26 + $0x350] sm:$0xff] }
 0x24e   : > { %3878 = vmatprep.mubr.bf16.mxu1 %v4632_v21  ;;  %v965_v58 = vld [vmem:[%s5663_s26 + $0x370] sm:$0xff] }
 0x24f   : > { %v3053_v27 = vpop.f32.mrb[56].mxu0 }
 0x250   : > { %v3342_v34 = vpop.f32.mrb[56].mxu1  ;;  %v3055_v35 = vpop.f32.mrb[57].mxu0 }
 0x251   : > { %v6114_v38 = vadd.f32 %v3342_v34, %v3053_v27  ;;  %v3344_v39 = vpop.f32.mrb[57].mxu1  ;;  %v3056_v41 = vpop.f32.mrb[58].mxu0  ;;  %v954_v34 = vld [vmem:[%s5663_s26 + $0x318] sm:$0xff] }
 0x252   : > { %v3345_v47 = vpop.f32.mrb[58].mxu1  ;;  %v3058_v48 = vpop.f32.mrb[59].mxu0  ;;  %v958_v35 = vld [vmem:[%s5663_s26 + $0x338] sm:$0xff] }
 0x253   : > { %v6116_v53 = vadd.f32 %v3345_v47, %v3056_v41  ;;  %v3347_v54 = vpop.f32.mrb[59].mxu1  ;;  %v4654_v47 = vcombine.high %v953_v25, %v957_v26 }
 0x254   : > { %3590 = vmatmul.mubr.bf16.gmra.mrb[164].mxu0 %v4629_v36  ;;  %v4656_v54 = vcombine.high %v954_v34, %v958_v35 }
 0x255   : > { %3879 = vmatmul.mubr.bf16.gmra.mrb[164].mxu1 %v4631_v44  ;;  %3597 = vmatprep.mubr.bf16.mxu0 %v4638_v46  ;;  %v4647_v46 = vcombine.low %v946_v63, %v950_v4  ;;  %v4653_v63 = vcombine.low %v953_v25, %v957_v26  ;;  %v969_v25 = vld [vmem:[%s5663_s26 + $0x390] sm:$0xff] }
 0x256   : > { %3886 = vmatprep.mubr.bf16.mxu1 %v4640_v51  ;;  %v973_v26 = vld [vmem:[%s5663_s26 + $0x3b0] sm:$0xff] }
 0x257   : > { %v3061_v62 = vpop.f32.mrb[60].mxu0 }
 0x258   : > { %v3350_v5 = vpop.f32.mrb[60].mxu1  ;;  %v3063_v6 = vpop.f32.mrb[61].mxu0 }
 0x259   : > { %v6122_v1 = vadd.f32 %v3350_v5, %v3061_v62  ;;  %v3352_v7 = vpop.f32.mrb[61].mxu1  ;;  %v3064_v11 = vpop.f32.mrb[62].mxu0 }
 0x25a   : > { %v3353_v15 = vpop.f32.mrb[62].mxu1  ;;  %v3066_v16 = vpop.f32.mrb[63].mxu0  ;;  %v966_v7 = vld [vmem:[%s5663_s26 + $0x378] sm:$0xff] }
 0x25b   : > { %v6124_v21 = vadd.f32 %v3353_v15, %v3064_v11  ;;  %v3355_v24 = vpop.f32.mrb[63].mxu1  ;;  %v4655_v16 = vcombine.low %v954_v34, %v958_v35  ;;  %v4661_v34 = vcombine.low %v961_v55, %v965_v58 }
 0x25c   : > { %3598 = vmatmul.mubr.bf16.gmra.mrb[168].mxu0 %v4637_v0  ;;  %v962_v0 = vld [vmem:[%s5663_s26 + $0x358] sm:$0xff] }
 0x25d   : > { %3887 = vmatmul.mubr.bf16.gmra.mrb[168].mxu1 %v4639_v12  ;;  %3605 = vmatprep.mubr.bf16.mxu0 %v4646_v13 }
 0x25e   : > { %3894 = vmatprep.mubr.bf16.mxu1 %v4648_v20  ;;  %v4662_v20 = vcombine.high %v961_v55, %v965_v58  ;;  %v977_v55 = vld [vmem:[%s5663_s26 + $0x3d0] sm:$0xff] }
 0x25f   : > { %v3069_v27 = vpop.f32.mrb[64].mxu0  ;;  %v981_v58 = vld [vmem:[%s5663_s26 + $0x3f0] sm:$0xff] }
 0x260   : > { %v3358_v36 = vpop.f32.mrb[64].mxu1  ;;  %v3071_v39 = vpop.f32.mrb[65].mxu0 }
 0x261   : > { %v6130_v33 = vadd.f32 %v3358_v36, %v3069_v27  ;;  %v3360_v41 = vpop.f32.mrb[65].mxu1  ;;  %v3072_v44 = vpop.f32.mrb[66].mxu0  ;;  %v4664_v36 = vcombine.high %v962_v0, %v966_v7 }
 0x262   : > { %v3361_v48 = vpop.f32.mrb[66].mxu1  ;;  %v3074_v51 = vpop.f32.mrb[67].mxu0 }
 0x263   : > { %v6132_v62 = vadd.f32 %v3361_v48, %v3072_v44  ;;  %v3363_v5 = vpop.f32.mrb[67].mxu1  ;;  %v970_v44 = vld [vmem:[%s5663_s26 + $0x398] sm:$0xff] }
 0x264   : > { %3606 = vmatmul.mubr.bf16.gmra.mrb[172].mxu0 %v4645_v30  ;;  %v4663_v5 = vcombine.low %v962_v0, %v966_v7  ;;  %v4669_v0 = vcombine.low %v969_v25, %v973_v26 }
 0x265   : > { %3895 = vmatmul.mubr.bf16.gmra.mrb[172].mxu1 %v4647_v46  ;;  %3613 = vmatprep.mubr.bf16.mxu0 %v4654_v47  ;;  %v974_v46 = vld [vmem:[%s5663_s26 + $0x3b8] sm:$0xff] }
 0x266   : > { %3902 = vmatprep.mubr.bf16.mxu1 %v4656_v54 }
 0x267   : > { %v3077_v6 = vpop.f32.mrb[68].mxu0 }
 0x268   : > { %v3366_v11 = vpop.f32.mrb[68].mxu1  ;;  %v3079_v12 = vpop.f32.mrb[69].mxu0 }
 0x269   : > { %v6138_v4 = vadd.f32 %v3366_v11, %v3077_v6  ;;  %v3368_v13 = vpop.f32.mrb[69].mxu1  ;;  %v3080_v15 = vpop.f32.mrb[70].mxu0  ;;  %v4670_v6 = vcombine.high %v969_v25, %v973_v26  ;;  %v985_v25 = vld [vmem:[%s5663_s26 + $0x410] sm:$0xff] }
 0x26a   : > { %v3369_v24 = vpop.f32.mrb[70].mxu1  ;;  %v3082_v27 = vpop.f32.mrb[71].mxu0  ;;  %v989_v26 = vld [vmem:[%s5663_s26 + $0x430] sm:$0xff] }
 0x26b   : > { %v6140_v39 = vadd.f32 %v3369_v24, %v3080_v15  ;;  %v3371_v30 = vpop.f32.mrb[71].mxu1  ;;  %v982_v24 = vld [vmem:[%s5663_s26 + $0x3f8] sm:$0xff] }
 0x26c   : > { %3614 = vmatmul.mubr.bf16.gmra.mrb[176].mxu0 %v4653_v63  ;;  %v4672_v63 = vcombine.high %v970_v44, %v974_v46 }
 0x26d   : > { %3903 = vmatmul.mubr.bf16.gmra.mrb[176].mxu1 %v4655_v16  ;;  %3621 = vmatprep.mubr.bf16.mxu0 %v4662_v20  ;;  %v978_v20 = vld [vmem:[%s5663_s26 + $0x3d8] sm:$0xff] }
 0x26e   : > { %3910 = vmatprep.mubr.bf16.mxu1 %v4664_v36 }
 0x26f   : > { %v3085_v41 = vpop.f32.mrb[72].mxu0 }
 0x270   : > { %v3374_v47 = vpop.f32.mrb[72].mxu1  ;;  %v3087_v48 = vpop.f32.mrb[73].mxu0 }
 0x271   : > { %v6146_v35 = vadd.f32 %v3374_v47, %v3085_v41  ;;  %v3376_v51 = vpop.f32.mrb[73].mxu1  ;;  %v3088_v54 = vpop.f32.mrb[74].mxu0  ;;  %v4671_v47 = vcombine.low %v970_v44, %v974_v46  ;;  %v4678_v48 = vcombine.high %v977_v55, %v981_v58  ;;  %v4677_v44 = vcombine.low %v977_v55, %v981_v58  ;;  %v993_v55 = vld [vmem:[%s5663_s26 + $0x450] sm:$0xff] }
 0x272   : > { %v3377_v11 = vpop.f32.mrb[74].mxu1  ;;  %v3090_v12 = vpop.f32.mrb[75].mxu0  ;;  %v997_v58 = vld [vmem:[%s5663_s26 + $0x470] sm:$0xff] }
 0x273   : > { %v6148_v13 = vadd.f32 %v3377_v11, %v3088_v54  ;;  %v3379_v15 = vpop.f32.mrb[75].mxu1  ;;  %v4680_v54 = vcombine.high %v978_v20, %v982_v24  ;;  %v986_v12 = vld [vmem:[%s5663_s26 + $0x418] sm:$0xff] }
 0x274   : > { %3622 = vmatmul.mubr.bf16.gmra.mrb[180].mxu0 %v4661_v34 }
 0x275   : > { %3911 = vmatmul.mubr.bf16.gmra.mrb[180].mxu1 %v4663_v5  ;;  %3629 = vmatprep.mubr.bf16.mxu0 %v4670_v6 }
 0x276   : > { %3918 = vmatprep.mubr.bf16.mxu1 %v4672_v63  ;;  %v990_v63 = vld [vmem:[%s5663_s26 + $0x438] sm:$0xff] }
 0x277   : > { %v3093_v16 = vpop.f32.mrb[76].mxu0 }
 0x278   : > { %v3382_v27 = vpop.f32.mrb[76].mxu1  ;;  %v3095_v36 = vpop.f32.mrb[77].mxu0 }
 0x279   : > { %v6154_v7 = vadd.f32 %v3382_v27, %v3093_v16  ;;  %v3384_v30 = vpop.f32.mrb[77].mxu1  ;;  %v3096_v41 = vpop.f32.mrb[78].mxu0 }
 0x27a   : > { %v3385_v34 = vpop.f32.mrb[78].mxu1  ;;  %v3098_v51 = vpop.f32.mrb[79].mxu0  ;;  %v4686_v30 = vcombine.high %v985_v25, %v989_v26 }
 0x27b   : > { %v6156_v5 = vadd.f32 %v3385_v34, %v3096_v41  ;;  %v3387_v6 = vpop.f32.mrb[79].mxu1 }
 0x27c   : > { %3630 = vmatmul.mubr.bf16.gmra.mrb[184].mxu0 %v4669_v0  ;;  %v4679_v0 = vcombine.low %v978_v20, %v982_v24  ;;  %v994_v6 = vld [vmem:[%s5663_s26 + $0x458] sm:$0xff]  ;;  %v4685_v20 = vcombine.low %v985_v25, %v989_v26  ;;  %v1001_v25 = vld [vmem:[%s5663_s26 + $0x490] sm:$0xff] }
 0x27d   : > { %3919 = vmatmul.mubr.bf16.gmra.mrb[184].mxu1 %v4671_v47  ;;  %3637 = vmatprep.mubr.bf16.mxu0 %v4678_v48  ;;  %v4688_v48 = vcombine.high %v986_v12, %v990_v63  ;;  %v1005_v26 = vld [vmem:[%s5663_s26 + $0x4b0] sm:$0xff] }
 0x27e   : > { %3926 = vmatprep.mubr.bf16.mxu1 %v4680_v54 }
 0x27f   : > { %v3101_v11 = vpop.f32.mrb[80].mxu0 }
 0x280   : > { %v3390_v15 = vpop.f32.mrb[80].mxu1  ;;  %v3103_v16 = vpop.f32.mrb[81].mxu0 }
 0x281   : > { %v6162_v46 = vadd.f32 %v3390_v15, %v3101_v11  ;;  %v3392_v27 = vpop.f32.mrb[81].mxu1  ;;  %v3104_v36 = vpop.f32.mrb[82].mxu0  ;;  %v998_v11 = vld [vmem:[%s5663_s26 + $0x478] sm:$0xff] }
 0x282   : > { %v3393_v41 = vpop.f32.mrb[82].mxu1  ;;  %v3106_v47 = vpop.f32.mrb[83].mxu0 }
 0x283   : > { %6493 = vst [vmem:[#allocation4_spill] sm:$0xff] %v6162_v46  ;;  %v6164_v34 = vadd.f32 %v3393_v41, %v3104_v36  ;;  %v3395_v51 = vpop.f32.mrb[83].mxu1  ;;  %v4696_v47 = vcombine.high %v994_v6, %v998_v11 }
 0x284   : > { %3638 = vmatmul.mubr.bf16.gmra.mrb[188].mxu0 %v4677_v44  ;;  %v4687_v44 = vcombine.low %v986_v12, %v990_v63  ;;  %v4693_v12 = vcombine.low %v993_v55, %v997_v58 }
 0x285   : > { %6494 = vst [vmem:[#allocation5_spill] sm:$0xff] %v6164_v34  ;;  %3927 = vmatmul.mubr.bf16.gmra.mrb[188].mxu1 %v4679_v0  ;;  %3645 = vmatprep.mubr.bf16.mxu0 %v4686_v30  ;;  %v4694_v0 = vcombine.high %v993_v55, %v997_v58  ;;  %v1009_v55 = vld [vmem:[%s5663_s26 + $0x4d0] sm:$0xff]  ;;  %v791_v34 = vld [vmem:[#allocation2] sm:$0xff] }
 0x286   : > { %3934 = vmatprep.mubr.bf16.mxu1 %v4688_v48  ;;  %v1013_v58 = vld [vmem:[%s5663_s26 + $0x4f0] sm:$0xff] }
 0x287   : > { %v3109_v54 = vpop.f32.mrb[84].mxu0 }
 0x288   : > { %v3398_v15 = vpop.f32.mrb[84].mxu1  ;;  %v3111_v16 = vpop.f32.mrb[85].mxu0 }
 0x289   : > { %v6170_v24 = vadd.f32 %v3398_v15, %v3109_v54  ;;  %v3400_v27 = vpop.f32.mrb[85].mxu1  ;;  %v3112_v36 = vpop.f32.mrb[86].mxu0  ;;  %v1002_v15 = vld [vmem:[%s5663_s26 + $0x498] sm:$0xff] }
 0x28a   : > { %v3401_v30 = vpop.f32.mrb[86].mxu1  ;;  %v3114_v41 = vpop.f32.mrb[87].mxu0  ;;  %v1006_v16 = vld [vmem:[%s5663_s26 + $0x4b8] sm:$0xff] }
 0x28b   : > { %6495 = vst [vmem:[#allocation6_spill] sm:$0xff] %v6170_v24  ;;  %v6172_v48 = vadd.f32 %v3401_v30, %v3112_v36  ;;  %v3403_v51 = vpop.f32.mrb[87].mxu1 }
 0x28c   : > { %3646 = vmatmul.mubr.bf16.gmra.mrb[192].mxu0 %v4685_v20  ;;  %v4695_v20 = vcombine.low %v994_v6, %v998_v11  ;;  %v4701_v6 = vcombine.low %v1001_v25, %v1005_v26 }
 0x28d   : > { %6496 = vst [vmem:[#allocation7_spill] sm:$0xff] %v6172_v48  ;;  %3935 = vmatmul.mubr.bf16.gmra.mrb[192].mxu1 %v4687_v44  ;;  %3653 = vmatprep.mubr.bf16.mxu0 %v4694_v0  ;;  %v4702_v44 = vcombine.high %v1001_v25, %v1005_v26  ;;  %v1017_v25 = vld [vmem:[%s5663_s26 + $0x510] sm:$0xff] }
 0x28e   : > { %3942 = vmatprep.mubr.bf16.mxu1 %v4696_v47  ;;  %v4704_v47 = vcombine.high %v1002_v15, %v1006_v16  ;;  %v1021_v26 = vld [vmem:[%s5663_s26 + $0x530] sm:$0xff] }
 0x28f   : > { %v3117_v54 = vpop.f32.mrb[88].mxu0 }
 0x290   : > { %v3406_v27 = vpop.f32.mrb[88].mxu1  ;;  %v3119_v24 = vpop.f32.mrb[89].mxu0 }
 0x291   : > { %v6178_v63 = vadd.f32 %v3406_v27, %v3117_v54  ;;  %v3408_v41 = vpop.f32.mrb[89].mxu1  ;;  %v3120_v36 = vpop.f32.mrb[90].mxu0  ;;  %v1010_v54 = vld [vmem:[%s5663_s26 + $0x4d8] sm:$0xff] }
 0x292   : > { %v3409_v0 = vpop.f32.mrb[90].mxu1  ;;  %v3122_v30 = vpop.f32.mrb[91].mxu0  ;;  %v1014_v27 = vld [vmem:[%s5663_s26 + $0x4f8] sm:$0xff] }
 0x293   : > { %6497 = vst [vmem:[#allocation8_spill] sm:$0xff] %v6178_v63  ;;  %v6180_v51 = vadd.f32 %v3409_v0, %v3120_v36  ;;  %v3411_v48 = vpop.f32.mrb[91].mxu1  ;;  %v4712_v0 = vcombine.high %v1010_v54, %v1014_v27 }
 0x294   : > { %3654 = vmatmul.mubr.bf16.gmra.mrb[196].mxu0 %v4693_v12  ;;  %v4703_v48 = vcombine.low %v1002_v15, %v1006_v16  ;;  %v4710_v12 = vcombine.high %v1009_v55, %v1013_v58  ;;  %v4709_v15 = vcombine.low %v1009_v55, %v1013_v58  ;;  %v1025_v55 = vld [vmem:[%s5663_s26 + $0x550] sm:$0xff] }
 0x295   : > { %6498 = vst [vmem:[#allocation9_spill] sm:$0xff] %v6180_v51  ;;  %3943 = vmatmul.mubr.bf16.gmra.mrb[196].mxu1 %v4695_v20  ;;  %3661 = vmatprep.mubr.bf16.mxu0 %v4702_v44  ;;  %v1029_v58 = vld [vmem:[%s5663_s26 + $0x570] sm:$0xff] }
 0x296   : > { %3950 = vmatprep.mubr.bf16.mxu1 %v4704_v47 }
 0x297   : > { %v3125_v24 = vpop.f32.mrb[92].mxu0 }
 0x298   : > { %v3414_v41 = vpop.f32.mrb[92].mxu1  ;;  %v3127_v63 = vpop.f32.mrb[93].mxu0 }
 0x299   : > { %v6186_v11 = vadd.f32 %v3414_v41, %v3125_v24  ;;  %v3416_v30 = vpop.f32.mrb[93].mxu1  ;;  %v3128_v36 = vpop.f32.mrb[94].mxu0  ;;  %v1018_v24 = vld [vmem:[%s5663_s26 + $0x518] sm:$0xff] }
 0x29a   : > { %v3417_v20 = vpop.f32.mrb[94].mxu1  ;;  %v3130_v44 = vpop.f32.mrb[95].mxu0  ;;  %v1022_v41 = vld [vmem:[%s5663_s26 + $0x538] sm:$0xff] }
 0x29b   : > { %6499 = vst [vmem:[#allocation10_spill] sm:$0xff] %v6186_v11  ;;  %v6188_v47 = vadd.f32 %v3417_v20, %v3128_v36  ;;  %v3419_v51 = vpop.f32.mrb[95].mxu1  ;;  %v4720_v20 = vcombine.high %v1018_v24, %v1022_v41 }
 0x29c   : > { %3662 = vmatmul.mubr.bf16.gmra.mrb[200].mxu0 %v4701_v6  ;;  %v4711_v51 = vcombine.low %v1010_v54, %v1014_v27  ;;  %v4718_v6 = vcombine.high %v1017_v25, %v1021_v26  ;;  %v4717_v54 = vcombine.low %v1017_v25, %v1021_v26  ;;  %v1033_v25 = vld [vmem:[%s5663_s26 + $0x590] sm:$0xff] }
 0x29d   : > { %6500 = vst [vmem:[#allocation11_spill] sm:$0xff] %v6188_v47  ;;  %3951 = vmatmul.mubr.bf16.gmra.mrb[200].mxu1 %v4703_v48  ;;  %3669 = vmatprep.mubr.bf16.mxu0 %v4710_v12  ;;  %v1037_v26 = vld [vmem:[%s5663_s26 + $0x5b0] sm:$0xff] }
 0x29e   : > { %3958 = vmatprep.mubr.bf16.mxu1 %v4712_v0 }
 0x29f   : > { %v3133_v63 = vpop.f32.mrb[96].mxu0 }
 0x2a0   : > { %v3422_v30 = vpop.f32.mrb[96].mxu1  ;;  %v3135_v11 = vpop.f32.mrb[97].mxu0 }
 0x2a1   : > { %v6194_v16 = vadd.f32 %v3422_v30, %v3133_v63  ;;  %v3424_v44 = vpop.f32.mrb[97].mxu1  ;;  %v3136_v36 = vpop.f32.mrb[98].mxu0  ;;  %v1026_v63 = vld [vmem:[%s5663_s26 + $0x558] sm:$0xff] }
 0x2a2   : > { %v3425_v48 = vpop.f32.mrb[98].mxu1  ;;  %v3138_v12 = vpop.f32.mrb[99].mxu0  ;;  %v1030_v30 = vld [vmem:[%s5663_s26 + $0x578] sm:$0xff] }
 0x2a3   : > { %6501 = vst [vmem:[#allocation12_spill] sm:$0xff] %v6194_v16  ;;  %v6196_v0 = vadd.f32 %v3425_v48, %v3136_v36  ;;  %v3427_v47 = vpop.f32.mrb[99].mxu1  ;;  %v4728_v48 = vcombine.high %v1026_v63, %v1030_v30 }
 0x2a4   : > { %3670 = vmatmul.mubr.bf16.gmra.mrb[204].mxu0 %v4709_v15  ;;  %v4719_v47 = vcombine.low %v1018_v24, %v1022_v41  ;;  %v4726_v15 = vcombine.high %v1025_v55, %v1029_v58  ;;  %v4725_v24 = vcombine.low %v1025_v55, %v1029_v58  ;;  %v1041_v55 = vld [vmem:[%s5663_s26 + $0x5d0] sm:$0xff] }
 0x2a5   : > { %6502 = vst [vmem:[#allocation13_spill] sm:$0xff] %v6196_v0  ;;  %3959 = vmatmul.mubr.bf16.gmra.mrb[204].mxu1 %v4711_v51  ;;  %3677 = vmatprep.mubr.bf16.mxu0 %v4718_v6  ;;  %v1045_v58 = vld [vmem:[%s5663_s26 + $0x5f0] sm:$0xff] }
 0x2a6   : > { %3966 = vmatprep.mubr.bf16.mxu1 %v4720_v20 }
 0x2a7   : > { %v3141_v11 = vpop.f32.mrb[100].mxu0 }
 0x2a8   : > { %v3430_v44 = vpop.f32.mrb[100].mxu1  ;;  %v3143_v16 = vpop.f32.mrb[101].mxu0 }
 0x2a9   : > { %v6202_v27 = vadd.f32 %v3430_v44, %v3141_v11  ;;  %v3432_v12 = vpop.f32.mrb[101].mxu1  ;;  %v3144_v36 = vpop.f32.mrb[102].mxu0  ;;  %v1034_v11 = vld [vmem:[%s5663_s26 + $0x598] sm:$0xff] }
 0x2aa   : > { %v3433_v51 = vpop.f32.mrb[102].mxu1  ;;  %v3146_v6 = vpop.f32.mrb[103].mxu0  ;;  %v1038_v44 = vld [vmem:[%s5663_s26 + $0x5b8] sm:$0xff] }
 0x2ab   : > { %6503 = vst [vmem:[#allocation14_spill] sm:$0xff] %v6202_v27  ;;  %v6204_v20 = vadd.f32 %v3433_v51, %v3144_v36  ;;  %v3435_v0 = vpop.f32.mrb[103].mxu1  ;;  %v4736_v51 = vcombine.high %v1034_v11, %v1038_v44 }
 0x2ac   : > { %3678 = vmatmul.mubr.bf16.gmra.mrb[208].mxu0 %v4717_v54  ;;  %v4727_v0 = vcombine.low %v1026_v63, %v1030_v30  ;;  %v4734_v54 = vcombine.high %v1033_v25, %v1037_v26  ;;  %v4733_v63 = vcombine.low %v1033_v25, %v1037_v26  ;;  %v1049_v25 = vld [vmem:[%s5663_s26 + $0x610] sm:$0xff] }
 0x2ad   : > { %6504 = vst [vmem:[#allocation15_spill] sm:$0xff] %v6204_v20  ;;  %3967 = vmatmul.mubr.bf16.gmra.mrb[208].mxu1 %v4719_v47  ;;  %3685 = vmatprep.mubr.bf16.mxu0 %v4726_v15  ;;  %v1053_v26 = vld [vmem:[%s5663_s26 + $0x630] sm:$0xff] }
 0x2ae   : > { %3974 = vmatprep.mubr.bf16.mxu1 %v4728_v48 }
 0x2af   : > { %v3149_v16 = vpop.f32.mrb[104].mxu0 }
 0x2b0   : > { %v3438_v12 = vpop.f32.mrb[104].mxu1  ;;  %v3151_v27 = vpop.f32.mrb[105].mxu0 }
 0x2b1   : > { %v6210_v41 = vadd.f32 %v3438_v12, %v3149_v16  ;;  %v3440_v6 = vpop.f32.mrb[105].mxu1  ;;  %v3152_v36 = vpop.f32.mrb[106].mxu0  ;;  %v1042_v16 = vld [vmem:[%s5663_s26 + $0x5d8] sm:$0xff] }
 0x2b2   : > { %v3441_v47 = vpop.f32.mrb[106].mxu1  ;;  %v3154_v15 = vpop.f32.mrb[107].mxu0  ;;  %v1046_v12 = vld [vmem:[%s5663_s26 + $0x5f8] sm:$0xff] }
 0x2b3   : > { %6505 = vst [vmem:[#allocation16_spill] sm:$0xff] %v6210_v41  ;;  %v6212_v48 = vadd.f32 %v3441_v47, %v3152_v36  ;;  %v3443_v20 = vpop.f32.mrb[107].mxu1  ;;  %v4744_v47 = vcombine.high %v1042_v16, %v1046_v12 }
 0x2b4   : > { %3686 = vmatmul.mubr.bf16.gmra.mrb[212].mxu0 %v4725_v24  ;;  %v4735_v20 = vcombine.low %v1034_v11, %v1038_v44  ;;  %v4742_v24 = vcombine.high %v1041_v55, %v1045_v58  ;;  %v4741_v11 = vcombine.low %v1041_v55, %v1045_v58  ;;  %v1057_v55 = vld [vmem:[%s5663_s26 + $0x650] sm:$0xff] }
 0x2b5   : > { %6506 = vst [vmem:[#allocation17_spill] sm:$0xff] %v6212_v48  ;;  %3975 = vmatmul.mubr.bf16.gmra.mrb[212].mxu1 %v4727_v0  ;;  %3693 = vmatprep.mubr.bf16.mxu0 %v4734_v54  ;;  %v1061_v58 = vld [vmem:[%s5663_s26 + $0x670] sm:$0xff] }
 0x2b6   : > { %3982 = vmatprep.mubr.bf16.mxu1 %v4736_v51 }
 0x2b7   : > { %v3157_v27 = vpop.f32.mrb[108].mxu0 }
 0x2b8   : > { %v3446_v6 = vpop.f32.mrb[108].mxu1  ;;  %v3159_v41 = vpop.f32.mrb[109].mxu0 }
 0x2b9   : > { %v6218_v30 = vadd.f32 %v3446_v6, %v3157_v27  ;;  %v3448_v15 = vpop.f32.mrb[109].mxu1  ;;  %v3160_v36 = vpop.f32.mrb[110].mxu0  ;;  %v1050_v27 = vld [vmem:[%s5663_s26 + $0x618] sm:$0xff] }
 0x2ba   : > { %v3449_v0 = vpop.f32.mrb[110].mxu1  ;;  %v3162_v54 = vpop.f32.mrb[111].mxu0  ;;  %v1054_v6 = vld [vmem:[%s5663_s26 + $0x638] sm:$0xff] }
 0x2bb   : > { %6507 = vst [vmem:[#allocation18_spill] sm:$0xff] %v6218_v30  ;;  %v6220_v51 = vadd.f32 %v3449_v0, %v3160_v36  ;;  %v3451_v48 = vpop.f32.mrb[111].mxu1  ;;  %v4752_v0 = vcombine.high %v1050_v27, %v1054_v6 }
 0x2bc   : > { %3694 = vmatmul.mubr.bf16.gmra.mrb[216].mxu0 %v4733_v63  ;;  %v4743_v48 = vcombine.low %v1042_v16, %v1046_v12  ;;  %v4750_v63 = vcombine.high %v1049_v25, %v1053_v26  ;;  %v4749_v16 = vcombine.low %v1049_v25, %v1053_v26  ;;  %v1065_v25 = vld [vmem:[%s5663_s26 + $0x690] sm:$0xff] }
 0x2bd   : > { %6508 = vst [vmem:[#allocation19_spill] sm:$0xff] %v6220_v51  ;;  %3983 = vmatmul.mubr.bf16.gmra.mrb[216].mxu1 %v4735_v20  ;;  %3701 = vmatprep.mubr.bf16.mxu0 %v4742_v24  ;;  %v1069_v26 = vld [vmem:[%s5663_s26 + $0x6b0] sm:$0xff] }
 0x2be   : > { %3990 = vmatprep.mubr.bf16.mxu1 %v4744_v47 }
 0x2bf   : > { %v3165_v41 = vpop.f32.mrb[112].mxu0 }
 0x2c0   : > { %v3454_v15 = vpop.f32.mrb[112].mxu1  ;;  %v3167_v30 = vpop.f32.mrb[113].mxu0 }
 0x2c1   : > { %v6226_v44 = vadd.f32 %v3454_v15, %v3165_v41  ;;  %v3456_v54 = vpop.f32.mrb[113].mxu1  ;;  %v3168_v36 = vpop.f32.mrb[114].mxu0  ;;  %v1058_v41 = vld [vmem:[%s5663_s26 + $0x658] sm:$0xff] }
 0x2c2   : > { %v3457_v20 = vpop.f32.mrb[114].mxu1  ;;  %v3170_v24 = vpop.f32.mrb[115].mxu0  ;;  %v1062_v15 = vld [vmem:[%s5663_s26 + $0x678] sm:$0xff] }
 0x2c3   : > { %6509 = vst [vmem:[#allocation20_spill] sm:$0xff] %v6226_v44  ;;  %v6228_v47 = vadd.f32 %v3457_v20, %v3168_v36  ;;  %v3459_v51 = vpop.f32.mrb[115].mxu1  ;;  %v4760_v20 = vcombine.high %v1058_v41, %v1062_v15 }
 0x2c4   : > { %3702 = vmatmul.mubr.bf16.gmra.mrb[220].mxu0 %v4741_v11  ;;  %v4751_v51 = vcombine.low %v1050_v27, %v1054_v6  ;;  %v4758_v11 = vcombine.high %v1057_v55, %v1061_v58  ;;  %v4757_v27 = vcombine.low %v1057_v55, %v1061_v58  ;;  %v1073_v55 = vld [vmem:[%s5663_s26 + $0x6d0] sm:$0xff] }
 0x2c5   : > { %6510 = vst [vmem:[#allocation21_spill] sm:$0xff] %v6228_v47  ;;  %3991 = vmatmul.mubr.bf16.gmra.mrb[220].mxu1 %v4743_v48  ;;  %3709 = vmatprep.mubr.bf16.mxu0 %v4750_v63  ;;  %v1077_v58 = vld [vmem:[%s5663_s26 + $0x6f0] sm:$0xff] }
 0x2c6   : > { %3998 = vmatprep.mubr.bf16.mxu1 %v4752_v0 }
 0x2c7   : > { %v3173_v30 = vpop.f32.mrb[116].mxu0 }
 0x2c8   : > { %v3462_v54 = vpop.f32.mrb[116].mxu1  ;;  %v3175_v44 = vpop.f32.mrb[117].mxu0 }
 0x2c9   : > { %v6234_v12 = vadd.f32 %v3462_v54, %v3173_v30  ;;  %v3464_v24 = vpop.f32.mrb[117].mxu1  ;;  %v3176_v36 = vpop.f32.mrb[118].mxu0  ;;  %v1066_v30 = vld [vmem:[%s5663_s26 + $0x698] sm:$0xff] }
 0x2ca   : > { %v3465_v48 = vpop.f32.mrb[118].mxu1  ;;  %v3178_v63 = vpop.f32.mrb[119].mxu0  ;;  %v1070_v54 = vld [vmem:[%s5663_s26 + $0x6b8] sm:$0xff] }
 0x2cb   : > { %6511 = vst [vmem:[#allocation22_spill] sm:$0xff] %v6234_v12  ;;  %v6236_v0 = vadd.f32 %v3465_v48, %v3176_v36  ;;  %v3467_v47 = vpop.f32.mrb[119].mxu1  ;;  %v4768_v48 = vcombine.high %v1066_v30, %v1070_v54 }
 0x2cc   : > { %3710 = vmatmul.mubr.bf16.gmra.mrb[224].mxu0 %v4749_v16  ;;  %v4759_v47 = vcombine.low %v1058_v41, %v1062_v15  ;;  %v4766_v16 = vcombine.high %v1065_v25, %v1069_v26  ;;  %v4765_v41 = vcombine.low %v1065_v25, %v1069_v26  ;;  %v1081_v25 = vld [vmem:[%s5663_s26 + $0x710] sm:$0xff] }
 0x2cd   : > { %6512 = vst [vmem:[#allocation23_spill] sm:$0xff] %v6236_v0  ;;  %3999 = vmatmul.mubr.bf16.gmra.mrb[224].mxu1 %v4751_v51  ;;  %3717 = vmatprep.mubr.bf16.mxu0 %v4758_v11  ;;  %v1085_v26 = vld [vmem:[%s5663_s26 + $0x730] sm:$0xff] }
 0x2ce   : > { %4006 = vmatprep.mubr.bf16.mxu1 %v4760_v20 }
 0x2cf   : > { %v3181_v44 = vpop.f32.mrb[120].mxu0 }
 0x2d0   : > { %v3470_v24 = vpop.f32.mrb[120].mxu1  ;;  %v3183_v12 = vpop.f32.mrb[121].mxu0 }
 0x2d1   : > { %v6242_v6 = vadd.f32 %v3470_v24, %v3181_v44  ;;  %v3472_v63 = vpop.f32.mrb[121].mxu1  ;;  %v3184_v36 = vpop.f32.mrb[122].mxu0  ;;  %v1074_v44 = vld [vmem:[%s5663_s26 + $0x6d8] sm:$0xff] }
 0x2d2   : > { %v3473_v51 = vpop.f32.mrb[122].mxu1  ;;  %v3186_v11 = vpop.f32.mrb[123].mxu0  ;;  %v1078_v24 = vld [vmem:[%s5663_s26 + $0x6f8] sm:$0xff] }
 0x2d3   : > { %6513 = vst [vmem:[#allocation24_spill] sm:$0xff] %v6242_v6  ;;  %v6244_v20 = vadd.f32 %v3473_v51, %v3184_v36  ;;  %v3475_v0 = vpop.f32.mrb[123].mxu1  ;;  %v4776_v51 = vcombine.high %v1074_v44, %v1078_v24 }
 0x2d4   : > { %3718 = vmatmul.mubr.bf16.gmra.mrb[228].mxu0 %v4757_v27  ;;  %v4767_v0 = vcombine.low %v1066_v30, %v1070_v54  ;;  %v4774_v27 = vcombine.high %v1073_v55, %v1077_v58  ;;  %v4773_v54 = vcombine.low %v1073_v55, %v1077_v58  ;;  %v1089_v58 = vld [vmem:[%s5663_s26 + $0x750] sm:$0xff] }
 0x2d5   : > { %6514 = vst [vmem:[#allocation25_spill] sm:$0xff] %v6244_v20  ;;  %4007 = vmatmul.mubr.bf16.gmra.mrb[228].mxu1 %v4759_v47  ;;  %3725 = vmatprep.mubr.bf16.mxu0 %v4766_v16 }
 0x2d6   : > { %4014 = vmatprep.mubr.bf16.mxu1 %v4768_v48 }
 0x2d7   : > { %v3189_v12 = vpop.f32.mrb[124].mxu0 }
 0x2d8   : > { %v3478_v63 = vpop.f32.mrb[124].mxu1  ;;  %v3191_v6 = vpop.f32.mrb[125].mxu0 }
 0x2d9   : > { %v6250_v15 = vadd.f32 %v3478_v63, %v3189_v12  ;;  %v3480_v11 = vpop.f32.mrb[125].mxu1  ;;  %v3192_v36 = vpop.f32.mrb[126].mxu0  ;;  %v1082_v12 = vld [vmem:[%s5663_s26 + $0x718] sm:$0xff] }
 0x2da   : > { %v3481_v47 = vpop.f32.mrb[126].mxu1  ;;  %v3194_v16 = vpop.f32.mrb[127].mxu0  ;;  %v1086_v63 = vld [vmem:[%s5663_s26 + $0x738] sm:$0xff] }
 0x2db   : > { %6515 = vst [vmem:[#allocation26_spill] sm:$0xff] %v6250_v15  ;;  %v6252_v48 = vadd.f32 %v3481_v47, %v3192_v36  ;;  %v3483_v20 = vpop.f32.mrb[127].mxu1  ;;  %v4775_v36 = vcombine.low %v1074_v44, %v1078_v24  ;;  %v4782_v47 = vcombine.high %v1081_v25, %v1085_v26  ;;  %v1093_v44 = vld [vmem:[%s5663_s26 + $0x770] sm:$0xff] }
 0x2dc   : > { %3726 = vmatmul.mubr.bf16.gmra.mrb[232].mxu0 %v4765_v41 }
 0x2dd   : > { %6516 = vst [vmem:[#allocation27_spill] sm:$0xff] %v6252_v48  ;;  %4015 = vmatmul.mubr.bf16.gmra.mrb[232].mxu1 %v4767_v0  ;;  %3733 = vmatprep.mubr.bf16.mxu0 %v4774_v27  ;;  %v792_v48 = vld [vmem:[#allocation2 + $0x8] sm:$0xff] }
 0x2de   : > { %4022 = vmatprep.mubr.bf16.mxu1 %v4776_v51  ;;  %v4784_v51 = vcombine.high %v1082_v12, %v1086_v63 }
 0x2df   : > { %v3519_v6 = vpop.f32.mrb[128].mxu0 }
 0x2e0   : > { %v3520_v11 = vadd.f32 %v3519_v6, %v6002_v42  ;;  %v3808_v15 = vpop.f32.mrb[128].mxu1  ;;  %v3521_v30 = vpop.f32.mrb[129].mxu0 }
 0x2e1   : > { %v3810_v16 = vpop.f32.mrb[129].mxu1  ;;  %v3522_v46 = vpop.f32.mrb[130].mxu0 }
 0x2e2   : > { %v3809_v20 = vadd.f32 %v3808_v15, %v3520_v11  ;;  %v3523_v41 = vadd.f32 %v3522_v46, %v6004_v50  ;;  %v3811_v0 = vpop.f32.mrb[130].mxu1  ;;  %v3524_v27 = vpop.f32.mrb[131].mxu0  ;;  %v1090_v15 = vld [vmem:[%s5663_s26 + $0x758] sm:$0xff] }
 0x2e3   : > { %v3813_v42 = vpop.f32.mrb[131].mxu1  ;;  %v1094_v50 = vld [vmem:[%s5663_s26 + $0x778] sm:$0xff]  ;;  %v4781_v27 = vcombine.low %v1081_v25, %v1085_v26  ;;  %v1097_v26 = vld [vmem:[%s5663_s26 + $0x790] sm:$0xff] }
 0x2e4   : > { %v4063_v6 = vadd.f32 %v3809_v20, %v791_v34  ;;  %v3812_v30 = vadd.f32 %v3811_v0, %v3523_v41  ;;  %3734 = vmatmul.mubr.bf16.gmra.mrb[236].mxu0 %v4773_v54  ;;  %v793_v42 = vld [vmem:[#allocation2 + $0x10] sm:$0xff]  ;;  %v4783_v54 = vcombine.low %v1082_v12, %v1086_v63 }
 0x2e5   : > { %4023 = vmatmul.mubr.bf16.gmra.mrb[236].mxu1 %v4775_v36  ;;  %3741 = vmatprep.mubr.bf16.mxu0 %v4782_v47  ;;  %v4790_v36 = vcombine.high %v1089_v58, %v1093_v44  ;;  %v1101_v12 = vld [vmem:[%s5663_s26 + $0x7b0] sm:$0xff] }
 0x2e6   : > { %4127 = vst [vmem:[#allocation2] sm:$0xff] %v4063_v6  ;;  %v4064_v55 = vadd.f32 %v3812_v30, %v792_v48  ;;  %4030 = vmatprep.mubr.bf16.mxu1 %v4784_v51  ;;  %v4792_v51 = vcombine.high %v1090_v15, %v1094_v50  ;;  %v794_v6 = vld [vmem:[#allocation2 + $0x18] sm:$0xff] }
 0x2e7   : > { %v3527_v24 = vpop.f32.mrb[132].mxu0 }
 0x2e8   : > { %4128 = vst [vmem:[#allocation2 + $0x8] sm:$0xff] %v4064_v55  ;;  %v3528_v46 = vadd.f32 %v3527_v24, %v6010_v60  ;;  %v3816_v11 = vpop.f32.mrb[132].mxu1  ;;  %v3529_v16 = vpop.f32.mrb[133].mxu0  ;;  %v1098_v24 = vld [vmem:[%s5663_s26 + $0x798] sm:$0xff] }
 0x2e9   : > { %v3818_v34 = vpop.f32.mrb[133].mxu1  ;;  %v3530_v20 = vpop.f32.mrb[134].mxu0 }
 0x2ea   : > { %v3817_v47 = vadd.f32 %v3816_v11, %v3528_v46  ;;  %v3531_v48 = vadd.f32 %v3530_v20, %v6012_v3  ;;  %v3819_v41 = vpop.f32.mrb[134].mxu1  ;;  %v3532_v0 = vpop.f32.mrb[135].mxu0  ;;  %v1102_v3 = vld [vmem:[%s5663_s26 + $0x7b8] sm:$0xff]  ;;  %v4789_v34 = vcombine.low %v1089_v58, %v1093_v44  ;;  %v795_v20 = vld [vmem:[#allocation2 + $0x20] sm:$0xff]  ;;  %v1105_v44 = vld [vmem:[%s5663_s26 + $0x7d0] sm:$0xff] }
 0x2eb   : > { %v3821_v60 = vpop.f32.mrb[135].mxu1 }
 0x2ec   : > { %v4065_v30 = vadd.f32 %v3817_v47, %v793_v42  ;;  %v3820_v55 = vadd.f32 %v3819_v41, %v3531_v48  ;;  %3742 = vmatmul.mubr.bf16.gmra.mrb[240].mxu0 %v4781_v27  ;;  %v4791_v27 = vcombine.low %v1090_v15, %v1094_v50  ;;  %v1109_v15 = vld [vmem:[%s5663_s26 + $0x7f0] sm:$0xff] }
 0x2ed   : > { %4031 = vmatmul.mubr.bf16.gmra.mrb[240].mxu1 %v4783_v54  ;;  %3749 = vmatprep.mubr.bf16.mxu0 %v4790_v36  ;;  %v4798_v54 = vcombine.high %v1097_v26, %v1101_v12 }
 0x2ee   : > { %4129 = vst [vmem:[#allocation2 + $0x10] sm:$0xff] %v4065_v30  ;;  %v4066_v25 = vadd.f32 %v3820_v55, %v794_v6  ;;  %4038 = vmatprep.mubr.bf16.mxu1 %v4792_v51  ;;  %v4800_v51 = vcombine.high %v1098_v24, %v1102_v3  ;;  %v796_v6 = vld [vmem:[#allocation2 + $0x28] sm:$0xff]  ;;  %v1106_v55 = vld [vmem:[%s5663_s26 + $0x7d8] sm:$0xff] }
 0x2ef   : > { %v3535_v63 = vpop.f32.mrb[136].mxu0 }
 0x2f0   : > { %4130 = vst [vmem:[#allocation2 + $0x18] sm:$0xff] %v4066_v25  ;;  %v3536_v46 = vadd.f32 %v3535_v63, %v6018_v14  ;;  %v3824_v11 = vpop.f32.mrb[136].mxu1  ;;  %v3537_v16 = vpop.f32.mrb[137].mxu0 }
 0x2f1   : > { %v3826_v42 = vpop.f32.mrb[137].mxu1  ;;  %v3538_v47 = vpop.f32.mrb[138].mxu0  ;;  %v797_v16 = vld [vmem:[#allocation2 + $0x30] sm:$0xff] }
 0x2f2   : > { %v3825_v36 = vadd.f32 %v3824_v11, %v3536_v46  ;;  %v3539_v48 = vadd.f32 %v3538_v47, %v6020_v22  ;;  %v3827_v41 = vpop.f32.mrb[138].mxu1  ;;  %v3540_v0 = vpop.f32.mrb[139].mxu0  ;;  %v1110_v22 = vld [vmem:[%s5663_s26 + $0x7f8] sm:$0xff]  ;;  %v4797_v11 = vcombine.low %v1097_v26, %v1101_v12  ;;  %v4806_v47 = vcombine.high %v1105_v44, %v1109_v15 }
 0x2f3   : > { %v3829_v14 = vpop.f32.mrb[139].mxu1  ;;  %v798_v0 = vld [vmem:[#allocation2 + $0x38] sm:$0xff] }
 0x2f4   : > { %v4067_v60 = vadd.f32 %v3825_v36, %v795_v20  ;;  %v3828_v30 = vadd.f32 %v3827_v41, %v3539_v48  ;;  %3750 = vmatmul.mubr.bf16.gmra.mrb[244].mxu0 %v4789_v34  ;;  %v4799_v34 = vcombine.low %v1098_v24, %v1102_v3  ;;  %v4808_v41 = vcombine.high %v1106_v55, %v1110_v22 }
 0x2f5   : > { %4039 = vmatmul.mubr.bf16.gmra.mrb[244].mxu1 %v4791_v27  ;;  %3757 = vmatprep.mubr.bf16.mxu0 %v4798_v54 }
 0x2f6   : > { %4131 = vst [vmem:[#allocation2 + $0x20] sm:$0xff] %v4067_v60  ;;  %v4068_v58 = vadd.f32 %v3828_v30, %v796_v6  ;;  %4046 = vmatprep.mubr.bf16.mxu1 %v4800_v51  ;;  %v799_v60 = vld [vmem:[#allocation2 + $0x40] sm:$0xff] }
 0x2f7   : > { %v3543_v50 = vpop.f32.mrb[140].mxu0 }
 0x2f8   : > { %4132 = vst [vmem:[#allocation2 + $0x28] sm:$0xff] %v4068_v58  ;;  %v3544_v25 = vadd.f32 %v3543_v50, %v6026_v32  ;;  %v3832_v63 = vpop.f32.mrb[140].mxu1  ;;  %v3545_v46 = vpop.f32.mrb[141].mxu0  ;;  %v4807_v50 = vcombine.low %v1106_v55, %v1110_v22  ;;  %v801_v55 = vld [vmem:[#allocation2 + $0x50] sm:$0xff] }
 0x2f9   : > { %v3834_v20 = vpop.f32.mrb[141].mxu1  ;;  %v3546_v42 = vpop.f32.mrb[142].mxu0 }
 0x2fa   : > { %v3833_v27 = vadd.f32 %v3832_v63, %v3544_v25  ;;  %v3547_v54 = vadd.f32 %v3546_v42, %v6028_v40  ;;  %v3835_v36 = vpop.f32.mrb[142].mxu1  ;;  %v3548_v48 = vpop.f32.mrb[143].mxu0  ;;  %v4805_v40 = vcombine.low %v1105_v44, %v1109_v15 }
 0x2fb   : > { %v3837_v51 = vpop.f32.mrb[143].mxu1 }
 0x2fc   : > { %v4069_v6 = vadd.f32 %v3833_v27, %v797_v16  ;;  %v3836_v14 = vadd.f32 %v3835_v36, %v3547_v54  ;;  %3758 = vmatmul.mubr.bf16.gmra.mrb[248].mxu0 %v4797_v11  ;;  %v800_v16 = vld [vmem:[#allocation2 + $0x48] sm:$0xff] }
 0x2fd   : > { %4047 = vmatmul.mubr.bf16.gmra.mrb[248].mxu1 %v4799_v34  ;;  %3765 = vmatprep.mubr.bf16.mxu0 %v4806_v47 }
 0x2fe   : > { %4133 = vst [vmem:[#allocation2 + $0x30] sm:$0xff] %v4069_v6  ;;  %v4070_v32 = vadd.f32 %v3836_v14, %v798_v0  ;;  %4054 = vmatprep.mubr.bf16.mxu1 %v4808_v41  ;;  %v802_v0 = vld [vmem:[#allocation2 + $0x58] sm:$0xff] }
 0x2ff   : > { %v3551_v26 = vpop.f32.mrb[144].mxu0 }
 0x300   : > { %4134 = vst [vmem:[#allocation2 + $0x38] sm:$0xff] %v4070_v32  ;;  %v3552_v12 = vadd.f32 %v3551_v26, %v6034_v52  ;;  %v3840_v24 = vpop.f32.mrb[144].mxu1  ;;  %v3553_v3 = vpop.f32.mrb[145].mxu0 }
 0x301   : > { %v3842_v30 = vpop.f32.mrb[145].mxu1  ;;  %v3554_v58 = vpop.f32.mrb[146].mxu0  ;;  %v803_v3 = vld [vmem:[#allocation2 + $0x60] sm:$0xff] }
 0x302   : > { %v3841_v25 = vadd.f32 %v3840_v24, %v3552_v12  ;;  %v3555_v63 = vadd.f32 %v3554_v58, %v6036_v61  ;;  %v3843_v46 = vpop.f32.mrb[146].mxu1  ;;  %v3556_v11 = vpop.f32.mrb[147].mxu0 }
 0x303   : > { %v3845_v20 = vpop.f32.mrb[147].mxu1 }
 0x304   : > { %v4071_v42 = vadd.f32 %v3841_v25, %v799_v60  ;;  %v3844_v34 = vadd.f32 %v3843_v46, %v3555_v63  ;;  %3766 = vmatmul.mubr.bf16.gmra.mrb[252].mxu0 %v4805_v40  ;;  %v804_v25 = vld [vmem:[#allocation2 + $0x68] sm:$0xff] }
 0x305   : > { %4055 = vmatmul.mubr.bf16.gmra.mrb[252].mxu1 %v4807_v50 }
 0x306   : > { %4135 = vst [vmem:[#allocation2 + $0x40] sm:$0xff] %v4071_v42  ;;  %v4072_v52 = vadd.f32 %v3844_v34, %v800_v16 }
 0x307   : > { %v3559_v47 = vpop.f32.mrb[148].mxu0 }
 0x308   : > { %4136 = vst [vmem:[#allocation2 + $0x48] sm:$0xff] %v4072_v52  ;;  %v3560_v44 = vadd.f32 %v3559_v47, %v6042_v8  ;;  %v3848_v15 = vpop.f32.mrb[148].mxu1  ;;  %v3561_v27 = vpop.f32.mrb[149].mxu0  ;;  %v805_v52 = vld [vmem:[#allocation2 + $0x70] sm:$0xff] }
 0x309   : > { %v3850_v22 = vpop.f32.mrb[149].mxu1  ;;  %v3562_v54 = vpop.f32.mrb[150].mxu0 }
 0x30a   : > { %v3849_v61 = vadd.f32 %v3848_v15, %v3560_v44  ;;  %v3563_v36 = vadd.f32 %v3562_v54, %v6044_v17  ;;  %v3851_v48 = vpop.f32.mrb[150].mxu1  ;;  %v3564_v41 = vpop.f32.mrb[151].mxu0  ;;  %v806_v22 = vld [vmem:[#allocation2 + $0x78] sm:$0xff] }
 0x30b   : > { %v3853_v51 = vpop.f32.mrb[151].mxu1 }
 0x30c   : > { %v4073_v6 = vadd.f32 %v3849_v61, %v801_v55  ;;  %v3852_v14 = vadd.f32 %v3851_v48, %v3563_v36 }
 0x30e   : > { %4137 = vst [vmem:[#allocation2 + $0x50] sm:$0xff] %v4073_v6  ;;  %v4074_v32 = vadd.f32 %v3852_v14, %v802_v0  ;;  %v807_v6 = vld [vmem:[#allocation2 + $0x80] sm:$0xff] }
 0x30f   : > { %v3567_v26 = vpop.f32.mrb[152].mxu0 }
 0x310   : > { %4138 = vst [vmem:[#allocation2 + $0x58] sm:$0xff] %v4074_v32  ;;  %v3568_v8 = vadd.f32 %v3567_v26, %v6050_v28  ;;  %v3856_v12 = vpop.f32.mrb[152].mxu1  ;;  %v3569_v24 = vpop.f32.mrb[153].mxu0 }
 0x311   : > { %v3858_v40 = vpop.f32.mrb[153].mxu1  ;;  %v3570_v60 = vpop.f32.mrb[154].mxu0  ;;  %v808_v24 = vld [vmem:[#allocation2 + $0x88] sm:$0xff] }
 0x312   : > { %v3857_v30 = vadd.f32 %v3856_v12, %v3568_v8  ;;  %v3571_v17 = vadd.f32 %v3570_v60, %v6052_v37  ;;  %v3859_v58 = vpop.f32.mrb[154].mxu1  ;;  %v3572_v50 = vpop.f32.mrb[155].mxu0 }
 0x313   : > { %v3861_v63 = vpop.f32.mrb[155].mxu1 }
 0x314   : > { %v4075_v46 = vadd.f32 %v3857_v30, %v803_v3  ;;  %v3860_v11 = vadd.f32 %v3859_v58, %v3571_v17 }
 0x316   : > { %4139 = vst [vmem:[#allocation2 + $0x60] sm:$0xff] %v4075_v46  ;;  %v4076_v16 = vadd.f32 %v3860_v11, %v804_v25  ;;  %v809_v25 = vld [vmem:[#allocation2 + $0x90] sm:$0xff] }
 0x317   : > { %v3575_v20 = vpop.f32.mrb[156].mxu0 }
 0x318   : > { %4140 = vst [vmem:[#allocation2 + $0x68] sm:$0xff] %v4076_v16  ;;  %v3576_v28 = vadd.f32 %v3575_v20, %v6058_v49  ;;  %v3864_v42 = vpop.f32.mrb[156].mxu1  ;;  %v3577_v34 = vpop.f32.mrb[157].mxu0 }
 0x319   : > { %v3866_v47 = vpop.f32.mrb[157].mxu1  ;;  %v3578_v44 = vpop.f32.mrb[158].mxu0 }
 0x31a   : > { %v3865_v15 = vadd.f32 %v3864_v42, %v3576_v28  ;;  %v3579_v37 = vadd.f32 %v3578_v44, %v6060_v59  ;;  %v3867_v27 = vpop.f32.mrb[158].mxu1  ;;  %v3580_v55 = vpop.f32.mrb[159].mxu0  ;;  %v810_v28 = vld [vmem:[#allocation2 + $0x98] sm:$0xff] }
 0x31b   : > { %v3869_v54 = vpop.f32.mrb[159].mxu1 }
 0x31c   : > { %v4077_v61 = vadd.f32 %v3865_v15, %v805_v52  ;;  %v3868_v36 = vadd.f32 %v3867_v27, %v3579_v37  ;;  %v811_v27 = vld [vmem:[#allocation2 + $0xa0] sm:$0xff] }
 0x31e   : > { %4141 = vst [vmem:[#allocation2 + $0x70] sm:$0xff] %v4077_v61  ;;  %v4078_v48 = vadd.f32 %v3868_v36, %v806_v22 }
 0x31f   : > { %v3583_v41 = vpop.f32.mrb[160].mxu0 }
 0x320   : > { %4142 = vst [vmem:[#allocation2 + $0x78] sm:$0xff] %v4078_v48  ;;  %v3584_v49 = vadd.f32 %v3583_v41, %v6066_v9  ;;  %v3872_v0 = vpop.f32.mrb[160].mxu1  ;;  %v3585_v51 = vpop.f32.mrb[161].mxu0  ;;  %v812_v48 = vld [vmem:[#allocation2 + $0xa8] sm:$0xff] }
 0x321   : > { %v3874_v14 = vpop.f32.mrb[161].mxu1  ;;  %v3586_v32 = vpop.f32.mrb[162].mxu0 }
 0x322   : > { %v3873_v26 = vadd.f32 %v3872_v0, %v3584_v49  ;;  %v3587_v59 = vadd.f32 %v3586_v32, %v6068_v19  ;;  %v3875_v8 = vpop.f32.mrb[162].mxu1  ;;  %v3588_v12 = vpop.f32.mrb[163].mxu0 }
 0x323   : > { %v3877_v3 = vpop.f32.mrb[163].mxu1 }
 0x324   : > { %v4079_v40 = vadd.f32 %v3873_v26, %v807_v6  ;;  %v3876_v60 = vadd.f32 %v3875_v8, %v3587_v59  ;;  %v813_v26 = vld [vmem:[#allocation2 + $0xb0] sm:$0xff] }
 0x326   : > { %4143 = vst [vmem:[#allocation2 + $0x80] sm:$0xff] %v4079_v40  ;;  %v4080_v30 = vadd.f32 %v3876_v60, %v808_v24  ;;  %v814_v40 = vld [vmem:[#allocation2 + $0xb8] sm:$0xff] }
 0x327   : > { %v3591_v17 = vpop.f32.mrb[164].mxu0 }
 0x328   : > { %4144 = vst [vmem:[#allocation2 + $0x88] sm:$0xff] %v4080_v30  ;;  %v3592_v9 = vadd.f32 %v3591_v17, %v6074_v31  ;;  %v3880_v58 = vpop.f32.mrb[164].mxu1  ;;  %v3593_v50 = vpop.f32.mrb[165].mxu0 }
 0x329   : > { %v3882_v63 = vpop.f32.mrb[165].mxu1  ;;  %v3594_v46 = vpop.f32.mrb[166].mxu0 }
 0x32a   : > { %v3881_v11 = vadd.f32 %v3880_v58, %v3592_v9  ;;  %v3595_v19 = vadd.f32 %v3594_v46, %v6076_v43  ;;  %v3883_v16 = vpop.f32.mrb[166].mxu1  ;;  %v3596_v20 = vpop.f32.mrb[167].mxu0  ;;  %v815_v63 = vld [vmem:[#allocation2 + $0xc0] sm:$0xff] }
 0x32b   : > { %v3885_v42 = vpop.f32.mrb[167].mxu1 }
 0x32c   : > { %v4081_v34 = vadd.f32 %v3881_v11, %v809_v25  ;;  %v3884_v52 = vadd.f32 %v3883_v16, %v3595_v19 }
 0x32e   : > { %4145 = vst [vmem:[#allocation2 + $0x90] sm:$0xff] %v4081_v34  ;;  %v4082_v47 = vadd.f32 %v3884_v52, %v810_v28  ;;  %v816_v28 = vld [vmem:[#allocation2 + $0xc8] sm:$0xff] }
 0x32f   : > { %v3599_v44 = vpop.f32.mrb[168].mxu0 }
 0x330   : > { %4146 = vst [vmem:[#allocation2 + $0x98] sm:$0xff] %v4082_v47  ;;  %v3600_v31 = vadd.f32 %v3599_v44, %v6082_v56  ;;  %v3888_v15 = vpop.f32.mrb[168].mxu1  ;;  %v3601_v37 = vpop.f32.mrb[169].mxu0 }
 0x331   : > { %v3890_v55 = vpop.f32.mrb[169].mxu1  ;;  %v3602_v22 = vpop.f32.mrb[170].mxu0  ;;  %v817_v37 = vld [vmem:[#allocation2 + $0xd0] sm:$0xff] }
 0x332   : > { %v3889_v54 = vadd.f32 %v3888_v15, %v3600_v31  ;;  %v3603_v43 = vadd.f32 %v3602_v22, %v6084_v2  ;;  %v3891_v61 = vpop.f32.mrb[170].mxu1  ;;  %v3604_v36 = vpop.f32.mrb[171].mxu0 }
 0x333   : > { %v3893_v41 = vpop.f32.mrb[171].mxu1 }
 0x334   : > { %v4083_v49 = vadd.f32 %v3889_v54, %v811_v27  ;;  %v3892_v0 = vadd.f32 %v3891_v61, %v3603_v43  ;;  %v818_v61 = vld [vmem:[#allocation2 + $0xd8] sm:$0xff] }
 0x336   : > { %4147 = vst [vmem:[#allocation2 + $0xa0] sm:$0xff] %v4083_v49  ;;  %v4084_v51 = vadd.f32 %v3892_v0, %v812_v48 }
 0x337   : > { %v3607_v6 = vpop.f32.mrb[172].mxu0 }
 0x338   : > { %4148 = vst [vmem:[#allocation2 + $0xa8] sm:$0xff] %v4084_v51  ;;  %v3608_v56 = vadd.f32 %v3607_v6, %v6090_v18  ;;  %v3896_v14 = vpop.f32.mrb[172].mxu1  ;;  %v3609_v32 = vpop.f32.mrb[173].mxu0 }
 0x339   : > { %v3898_v59 = vpop.f32.mrb[173].mxu1  ;;  %v3610_v8 = vpop.f32.mrb[174].mxu0 }
 0x33a   : > { %v3897_v12 = vadd.f32 %v3896_v14, %v3608_v56  ;;  %v3611_v2 = vadd.f32 %v3610_v8, %v6092_v29  ;;  %v3899_v24 = vpop.f32.mrb[174].mxu1  ;;  %v3612_v3 = vpop.f32.mrb[175].mxu0  ;;  %v819_v56 = vld [vmem:[#allocation2 + $0xe0] sm:$0xff] }
 0x33b   : > { %v3901_v60 = vpop.f32.mrb[175].mxu1 }
 0x33c   : > { %v4085_v30 = vadd.f32 %v3897_v12, %v813_v26  ;;  %v3900_v17 = vadd.f32 %v3899_v24, %v3611_v2  ;;  %v820_v12 = vld [vmem:[#allocation2 + $0xe8] sm:$0xff] }
 0x33e   : > { %4149 = vst [vmem:[#allocation2 + $0xb0] sm:$0xff] %v4085_v30  ;;  %v4086_v9 = vadd.f32 %v3900_v17, %v814_v40 }
 0x33f   : > { %v3615_v58 = vpop.f32.mrb[176].mxu0 }
 0x340   : > { %4150 = vst [vmem:[#allocation2 + $0xb8] sm:$0xff] %v4086_v9  ;;  %v3616_v18 = vadd.f32 %v3615_v58, %v6098_v45  ;;  %v3904_v50 = vpop.f32.mrb[176].mxu1  ;;  %v3617_v25 = vpop.f32.mrb[177].mxu0  ;;  %v821_v9 = vld [vmem:[#allocation2 + $0xf0] sm:$0xff] }
 0x341   : > { %v3906_v46 = vpop.f32.mrb[177].mxu1  ;;  %v3618_v11 = vpop.f32.mrb[178].mxu0 }
 0x342   : > { %v3905_v19 = vadd.f32 %v3904_v50, %v3616_v18  ;;  %v3619_v29 = vadd.f32 %v3618_v11, %v6100_v57  ;;  %v3907_v16 = vpop.f32.mrb[178].mxu1  ;;  %v3620_v20 = vpop.f32.mrb[179].mxu0  ;;  %v822_v46 = vld [vmem:[#allocation2 + $0xf8] sm:$0xff] }
 0x343   : > { %v3909_v42 = vpop.f32.mrb[179].mxu1 }
 0x344   : > { %v4087_v34 = vadd.f32 %v3905_v19, %v815_v63  ;;  %v3908_v52 = vadd.f32 %v3907_v16, %v3619_v29 }
 0x346   : > { %4151 = vst [vmem:[#allocation2 + $0xc0] sm:$0xff] %v4087_v34  ;;  %v4088_v47 = vadd.f32 %v3908_v52, %v816_v28  ;;  %v823_v34 = vld [vmem:[#allocation2 + $0x100] sm:$0xff] }
 0x347   : > { %v3623_v44 = vpop.f32.mrb[180].mxu0 }
 0x348   : > { %4152 = vst [vmem:[#allocation2 + $0xc8] sm:$0xff] %v4088_v47  ;;  %v3624_v45 = vadd.f32 %v3623_v44, %v6106_v10  ;;  %v3912_v31 = vpop.f32.mrb[180].mxu1  ;;  %v3625_v15 = vpop.f32.mrb[181].mxu0 }
 0x349   : > { %v3914_v27 = vpop.f32.mrb[181].mxu1  ;;  %v3626_v55 = vpop.f32.mrb[182].mxu0  ;;  %v824_v15 = vld [vmem:[#allocation2 + $0x108] sm:$0xff] }
 0x34a   : > { %v3913_v22 = vadd.f32 %v3912_v31, %v3624_v45  ;;  %v3627_v57 = vadd.f32 %v3626_v55, %v6108_v23  ;;  %v3915_v54 = vpop.f32.mrb[182].mxu1  ;;  %v3628_v43 = vpop.f32.mrb[183].mxu0 }
 0x34b   : > { %v3917_v36 = vpop.f32.mrb[183].mxu1 }
 0x34c   : > { %v4089_v48 = vadd.f32 %v3913_v22, %v817_v37  ;;  %v3916_v41 = vadd.f32 %v3915_v54, %v3627_v57 }
 0x34e   : > { %4153 = vst [vmem:[#allocation2 + $0xd0] sm:$0xff] %v4089_v48  ;;  %v4090_v49 = vadd.f32 %v3916_v41, %v818_v61  ;;  %v825_v61 = vld [vmem:[#allocation2 + $0x110] sm:$0xff] }
 0x34f   : > { %v3631_v0 = vpop.f32.mrb[184].mxu0 }
 0x350   : > { %4154 = vst [vmem:[#allocation2 + $0xd8] sm:$0xff] %v4090_v49  ;;  %v3632_v10 = vadd.f32 %v3631_v0, %v6114_v38  ;;  %v3920_v51 = vpop.f32.mrb[184].mxu1  ;;  %v3633_v6 = vpop.f32.mrb[185].mxu0 }
 0x351   : > { %v3922_v14 = vpop.f32.mrb[185].mxu1  ;;  %v3634_v32 = vpop.f32.mrb[186].mxu0 }
 0x352   : > { %v3921_v26 = vadd.f32 %v3920_v51, %v3632_v10  ;;  %v3635_v23 = vadd.f32 %v3634_v32, %v6116_v53  ;;  %v3923_v59 = vpop.f32.mrb[186].mxu1  ;;  %v3636_v8 = vpop.f32.mrb[187].mxu0  ;;  %v826_v10 = vld [vmem:[#allocation2 + $0x118] sm:$0xff] }
 0x353   : > { %v3925_v2 = vpop.f32.mrb[187].mxu1 }
 0x354   : > { %v4091_v24 = vadd.f32 %v3921_v26, %v819_v56  ;;  %v3924_v3 = vadd.f32 %v3923_v59, %v3635_v23  ;;  %v827_v59 = vld [vmem:[#allocation2 + $0x120] sm:$0xff] }
 0x356   : > { %4155 = vst [vmem:[#allocation2 + $0xe0] sm:$0xff] %v4091_v24  ;;  %v4092_v40 = vadd.f32 %v3924_v3, %v820_v12 }
 0x357   : > { %v3639_v60 = vpop.f32.mrb[188].mxu0 }
 0x358   : > { %4156 = vst [vmem:[#allocation2 + $0xe8] sm:$0xff] %v4092_v40  ;;  %v3640_v38 = vadd.f32 %v3639_v60, %v6122_v1  ;;  %v3928_v30 = vpop.f32.mrb[188].mxu1  ;;  %v3641_v17 = vpop.f32.mrb[189].mxu0  ;;  %v828_v40 = vld [vmem:[#allocation2 + $0x128] sm:$0xff] }
 0x359   : > { %v3930_v58 = vpop.f32.mrb[189].mxu1  ;;  %v3642_v18 = vpop.f32.mrb[190].mxu0 }
 0x35a   : > { %v3929_v50 = vadd.f32 %v3928_v30, %v3640_v38  ;;  %v3643_v53 = vadd.f32 %v3642_v18, %v6124_v21  ;;  %v3931_v25 = vpop.f32.mrb[190].mxu1  ;;  %v3644_v63 = vpop.f32.mrb[191].mxu0 }
 0x35b   : > { %v3933_v11 = vpop.f32.mrb[191].mxu1 }
 0x35c   : > { %v4093_v19 = vadd.f32 %v3929_v50, %v821_v9  ;;  %v3932_v29 = vadd.f32 %v3931_v25, %v3643_v53  ;;  %v829_v50 = vld [vmem:[#allocation2 + $0x130] sm:$0xff] }
 0x35e   : > { %4157 = vst [vmem:[#allocation2 + $0xf0] sm:$0xff] %v4093_v19  ;;  %v4094_v16 = vadd.f32 %v3932_v29, %v822_v46  ;;  %v830_v19 = vld [vmem:[#allocation2 + $0x138] sm:$0xff] }
 0x35f   : > { %v3647_v20 = vpop.f32.mrb[192].mxu0 }
 0x360   : > { %4158 = vst [vmem:[#allocation2 + $0xf8] sm:$0xff] %v4094_v16  ;;  %v3648_v1 = vadd.f32 %v3647_v20, %v6130_v33  ;;  %v3936_v28 = vpop.f32.mrb[192].mxu1  ;;  %v3649_v42 = vpop.f32.mrb[193].mxu0 }
 0x361   : > { %v3938_v52 = vpop.f32.mrb[193].mxu1  ;;  %v3650_v47 = vpop.f32.mrb[194].mxu0  ;;  %v6517_v42 = vld [vmem:[#allocation4_spill] sm:$0xff] }
 0x362   : > { %v3937_v44 = vadd.f32 %v3936_v28, %v3648_v1  ;;  %v3651_v21 = vadd.f32 %v3650_v47, %v6132_v62  ;;  %v3939_v45 = vpop.f32.mrb[194].mxu1  ;;  %v3652_v31 = vpop.f32.mrb[195].mxu0  ;;  %v831_v47 = vld [vmem:[#allocation2 + $0x140] sm:$0xff] }
 0x363   : > { %v3941_v37 = vpop.f32.mrb[195].mxu1  ;;  %v6518_v31 = vld [vmem:[#allocation5_spill] sm:$0xff] }
 0x364   : > { %v4095_v27 = vadd.f32 %v3937_v44, %v823_v34  ;;  %v3940_v55 = vadd.f32 %v3939_v45, %v3651_v21 }
 0x366   : > { %4159 = vst [vmem:[#allocation2 + $0x100] sm:$0xff] %v4095_v27  ;;  %v4096_v22 = vadd.f32 %v3940_v55, %v824_v15  ;;  %v832_v27 = vld [vmem:[#allocation2 + $0x148] sm:$0xff] }
 0x367   : > { %v3655_v57 = vpop.f32.mrb[196].mxu0 }
 0x368   : > { %4160 = vst [vmem:[#allocation2 + $0x108] sm:$0xff] %v4096_v22  ;;  %v3656_v33 = vadd.f32 %v3655_v57, %v6138_v4  ;;  %v3944_v54 = vpop.f32.mrb[196].mxu1  ;;  %v3657_v43 = vpop.f32.mrb[197].mxu0 }
 0x369   : > { %v3946_v36 = vpop.f32.mrb[197].mxu1  ;;  %v3658_v48 = vpop.f32.mrb[198].mxu0  ;;  %v6519_v43 = vld [vmem:[#allocation6_spill] sm:$0xff] }
 0x36a   : > { %v3945_v41 = vadd.f32 %v3944_v54, %v3656_v33  ;;  %v3659_v62 = vadd.f32 %v3658_v48, %v6140_v39  ;;  %v3947_v49 = vpop.f32.mrb[198].mxu1  ;;  %v3660_v0 = vpop.f32.mrb[199].mxu0 }
 0x36b   : > { %v3949_v51 = vpop.f32.mrb[199].mxu1 }
 0x36c   : > { %v4097_v6 = vadd.f32 %v3945_v41, %v825_v61  ;;  %v3948_v56 = vadd.f32 %v3947_v49, %v3659_v62  ;;  %v833_v41 = vld [vmem:[#allocation2 + $0x150] sm:$0xff] }
 0x36e   : > { %4161 = vst [vmem:[#allocation2 + $0x110] sm:$0xff] %v4097_v6  ;;  %v4098_v14 = vadd.f32 %v3948_v56, %v826_v10  ;;  %v6520_v10 = vld [vmem:[#allocation7_spill] sm:$0xff] }
 0x36f   : > { %v3663_v32 = vpop.f32.mrb[200].mxu0 }
 0x370   : > { %4162 = vst [vmem:[#allocation2 + $0x118] sm:$0xff] %v4098_v14  ;;  %v3664_v4 = vadd.f32 %v3663_v32, %v6146_v35  ;;  %v3952_v26 = vpop.f32.mrb[200].mxu1  ;;  %v3665_v23 = vpop.f32.mrb[201].mxu0  ;;  %v834_v14 = vld [vmem:[#allocation2 + $0x158] sm:$0xff] }
 0x371   : > { %v3954_v8 = vpop.f32.mrb[201].mxu1  ;;  %v3666_v12 = vpop.f32.mrb[202].mxu0 }
 0x372   : > { %v3953_v2 = vadd.f32 %v3952_v26, %v3664_v4  ;;  %v3667_v39 = vadd.f32 %v3666_v12, %v6148_v13  ;;  %v3955_v24 = vpop.f32.mrb[202].mxu1  ;;  %v3668_v3 = vpop.f32.mrb[203].mxu0  ;;  %v6521_v8 = vld [vmem:[#allocation8_spill] sm:$0xff] }
 0x373   : > { %v3957_v60 = vpop.f32.mrb[203].mxu1 }
 0x374   : > { %v4099_v38 = vadd.f32 %v3953_v2, %v827_v59  ;;  %v3956_v30 = vadd.f32 %v3955_v24, %v3667_v39  ;;  %v835_v24 = vld [vmem:[#allocation2 + $0x160] sm:$0xff] }
 0x376   : > { %4163 = vst [vmem:[#allocation2 + $0x120] sm:$0xff] %v4099_v38  ;;  %v4100_v17 = vadd.f32 %v3956_v30, %v828_v40  ;;  %v6522_v38 = vld [vmem:[#allocation9_spill] sm:$0xff] }
 0x377   : > { %v3671_v9 = vpop.f32.mrb[204].mxu0 }
 0x378   : > { %4164 = vst [vmem:[#allocation2 + $0x128] sm:$0xff] %v4100_v17  ;;  %v3672_v35 = vadd.f32 %v3671_v9, %v6154_v7  ;;  %v3960_v58 = vpop.f32.mrb[204].mxu1  ;;  %v3673_v18 = vpop.f32.mrb[205].mxu0 }
 0x379   : > { %v3962_v53 = vpop.f32.mrb[205].mxu1  ;;  %v3674_v25 = vpop.f32.mrb[206].mxu0 }
 0x37a   : > { %v3961_v63 = vadd.f32 %v3960_v58, %v3672_v35  ;;  %v3675_v13 = vadd.f32 %v3674_v25, %v6156_v5  ;;  %v3963_v46 = vpop.f32.mrb[206].mxu1  ;;  %v3676_v11 = vpop.f32.mrb[207].mxu0  ;;  %v836_v35 = vld [vmem:[#allocation2 + $0x168] sm:$0xff] }
 0x37b   : > { %v3965_v29 = vpop.f32.mrb[207].mxu1 }
 0x37c   : > { %v4101_v16 = vadd.f32 %v3961_v63, %v829_v50  ;;  %v3964_v20 = vadd.f32 %v3963_v46, %v3675_v13  ;;  %v6523_v63 = vld [vmem:[#allocation10_spill] sm:$0xff] }
 0x37e   : > { %4165 = vst [vmem:[#allocation2 + $0x130] sm:$0xff] %v4101_v16  ;;  %v4102_v1 = vadd.f32 %v3964_v20, %v830_v19  ;;  %v837_v19 = vld [vmem:[#allocation2 + $0x170] sm:$0xff] }
 0x37f   : > { %v3679_v28 = vpop.f32.mrb[208].mxu0 }
 0x380   : > { %4166 = vst [vmem:[#allocation2 + $0x138] sm:$0xff] %v4102_v1  ;;  %v3680_v7 = vadd.f32 %v3679_v28, %v6517_v42  ;;  %v3968_v34 = vpop.f32.mrb[208].mxu1  ;;  %v3681_v52 = vpop.f32.mrb[209].mxu0  ;;  %v6524_v1 = vld [vmem:[#allocation11_spill] sm:$0xff] }
 0x381   : > { %v3970_v44 = vpop.f32.mrb[209].mxu1  ;;  %v3682_v21 = vpop.f32.mrb[210].mxu0 }
 0x382   : > { %v3969_v45 = vadd.f32 %v3968_v34, %v3680_v7  ;;  %v3683_v5 = vadd.f32 %v3682_v21, %v6518_v31  ;;  %v3971_v15 = vpop.f32.mrb[210].mxu1  ;;  %v3684_v37 = vpop.f32.mrb[211].mxu0  ;;  %v838_v34 = vld [vmem:[#allocation2 + $0x178] sm:$0xff]  ;;  %v6525_v31 = vld [vmem:[#allocation12_spill] sm:$0xff] }
 0x383   : > { %v3973_v55 = vpop.f32.mrb[211].mxu1 }
 0x384   : > { %v4103_v22 = vadd.f32 %v3969_v45, %v831_v47  ;;  %v3972_v57 = vadd.f32 %v3971_v15, %v3683_v5 }
 0x386   : > { %4167 = vst [vmem:[#allocation2 + $0x140] sm:$0xff] %v4103_v22  ;;  %v4104_v33 = vadd.f32 %v3972_v57, %v832_v27  ;;  %v839_v27 = vld [vmem:[#allocation2 + $0x180] sm:$0xff] }
 0x387   : > { %v3687_v54 = vpop.f32.mrb[212].mxu0 }
 0x388   : > { %4168 = vst [vmem:[#allocation2 + $0x148] sm:$0xff] %v4104_v33  ;;  %v3688_v61 = vadd.f32 %v3687_v54, %v6519_v43  ;;  %v3976_v36 = vpop.f32.mrb[212].mxu1  ;;  %v3689_v48 = vpop.f32.mrb[213].mxu0  ;;  %v6526_v33 = vld [vmem:[#allocation13_spill] sm:$0xff] }
 0x389   : > { %v3978_v62 = vpop.f32.mrb[213].mxu1  ;;  %v3690_v49 = vpop.f32.mrb[214].mxu0 }
 0x38a   : > { %v3977_v0 = vadd.f32 %v3976_v36, %v3688_v61  ;;  %v3691_v51 = vadd.f32 %v3690_v49, %v6520_v10  ;;  %v3979_v6 = vpop.f32.mrb[214].mxu1  ;;  %v3692_v56 = vpop.f32.mrb[215].mxu0  ;;  %v840_v36 = vld [vmem:[#allocation2 + $0x188] sm:$0xff]  ;;  %v6527_v10 = vld [vmem:[#allocation14_spill] sm:$0xff] }
 0x38b   : > { %v3981_v32 = vpop.f32.mrb[215].mxu1 }
 0x38c   : > { %v4105_v4 = vadd.f32 %v3977_v0, %v833_v41  ;;  %v3980_v26 = vadd.f32 %v3979_v6, %v3691_v51 }
 0x38e   : > { %4169 = vst [vmem:[#allocation2 + $0x150] sm:$0xff] %v4105_v4  ;;  %v4106_v23 = vadd.f32 %v3980_v26, %v834_v14  ;;  %v841_v14 = vld [vmem:[#allocation2 + $0x190] sm:$0xff] }
 0x38f   : > { %v3695_v59 = vpop.f32.mrb[216].mxu0 }
 0x390   : > { %4170 = vst [vmem:[#allocation2 + $0x158] sm:$0xff] %v4106_v23  ;;  %v3696_v12 = vadd.f32 %v3695_v59, %v6521_v8  ;;  %v3984_v2 = vpop.f32.mrb[216].mxu1  ;;  %v3697_v39 = vpop.f32.mrb[217].mxu0  ;;  %v6528_v23 = vld [vmem:[#allocation15_spill] sm:$0xff] }
 0x391   : > { %v3986_v3 = vpop.f32.mrb[217].mxu1  ;;  %v3698_v40 = vpop.f32.mrb[218].mxu0 }
 0x392   : > { %v3985_v60 = vadd.f32 %v3984_v2, %v3696_v12  ;;  %v3699_v30 = vadd.f32 %v3698_v40, %v6522_v38  ;;  %v3987_v17 = vpop.f32.mrb[218].mxu1  ;;  %v3700_v9 = vpop.f32.mrb[219].mxu0  ;;  %v842_v2 = vld [vmem:[#allocation2 + $0x198] sm:$0xff]  ;;  %v6529_v38 = vld [vmem:[#allocation16_spill] sm:$0xff] }
 0x393   : > { %v3989_v58 = vpop.f32.mrb[219].mxu1 }
 0x394   : > { %v4107_v18 = vadd.f32 %v3985_v60, %v835_v24  ;;  %v3988_v50 = vadd.f32 %v3987_v17, %v3699_v30 }
 0x396   : > { %4171 = vst [vmem:[#allocation2 + $0x160] sm:$0xff] %v4107_v18  ;;  %v4108_v53 = vadd.f32 %v3988_v50, %v836_v35  ;;  %v843_v35 = vld [vmem:[#allocation2 + $0x1a0] sm:$0xff] }
 0x397   : > { %v3703_v25 = vpop.f32.mrb[220].mxu0 }
 0x398   : > { %4172 = vst [vmem:[#allocation2 + $0x168] sm:$0xff] %v4108_v53  ;;  %v3704_v13 = vadd.f32 %v3703_v25, %v6523_v63  ;;  %v3992_v46 = vpop.f32.mrb[220].mxu1  ;;  %v3705_v11 = vpop.f32.mrb[221].mxu0  ;;  %v6530_v53 = vld [vmem:[#allocation17_spill] sm:$0xff] }
 0x399   : > { %v3994_v29 = vpop.f32.mrb[221].mxu1  ;;  %v3706_v16 = vpop.f32.mrb[222].mxu0 }
 0x39a   : > { %v3993_v20 = vadd.f32 %v3992_v46, %v3704_v13  ;;  %v3707_v28 = vadd.f32 %v3706_v16, %v6524_v1  ;;  %v3995_v42 = vpop.f32.mrb[222].mxu1  ;;  %v3708_v7 = vpop.f32.mrb[223].mxu0  ;;  %v844_v46 = vld [vmem:[#allocation2 + $0x1a8] sm:$0xff]  ;;  %v6531_v1 = vld [vmem:[#allocation18_spill] sm:$0xff] }
 0x39b   : > { %v3997_v52 = vpop.f32.mrb[223].mxu1 }
 0x39c   : > { %v4109_v47 = vadd.f32 %v3993_v20, %v837_v19  ;;  %v3996_v44 = vadd.f32 %v3995_v42, %v3707_v28 }
 0x39e   : > { %4173 = vst [vmem:[#allocation2 + $0x170] sm:$0xff] %v4109_v47  ;;  %v4110_v21 = vadd.f32 %v3996_v44, %v838_v34  ;;  %v845_v34 = vld [vmem:[#allocation2 + $0x1b0] sm:$0xff] }
 0x39f   : > { %v3711_v45 = vpop.f32.mrb[224].mxu0 }
 0x3a0   : > { %4174 = vst [vmem:[#allocation2 + $0x178] sm:$0xff] %v4110_v21  ;;  %v3712_v5 = vadd.f32 %v3711_v45, %v6525_v31  ;;  %v4000_v15 = vpop.f32.mrb[224].mxu1  ;;  %v3713_v37 = vpop.f32.mrb[225].mxu0  ;;  %v6532_v21 = vld [vmem:[#allocation19_spill] sm:$0xff] }
 0x3a1   : > { %v4002_v55 = vpop.f32.mrb[225].mxu1  ;;  %v3714_v22 = vpop.f32.mrb[226].mxu0 }
 0x3a2   : > { %v4001_v57 = vadd.f32 %v4000_v15, %v3712_v5  ;;  %v3715_v54 = vadd.f32 %v3714_v22, %v6526_v33  ;;  %v4003_v43 = vpop.f32.mrb[226].mxu1  ;;  %v3716_v61 = vpop.f32.mrb[227].mxu0  ;;  %v846_v15 = vld [vmem:[#allocation2 + $0x1b8] sm:$0xff]  ;;  %v6533_v33 = vld [vmem:[#allocation20_spill] sm:$0xff] }
 0x3a3   : > { %v4005_v48 = vpop.f32.mrb[227].mxu1 }
 0x3a4   : > { %v4111_v41 = vadd.f32 %v4001_v57, %v839_v27  ;;  %v4004_v62 = vadd.f32 %v4003_v43, %v3715_v54 }
 0x3a6   : > { %4175 = vst [vmem:[#allocation2 + $0x180] sm:$0xff] %v4111_v41  ;;  %v4112_v49 = vadd.f32 %v4004_v62, %v840_v36  ;;  %v847_v36 = vld [vmem:[#allocation2 + $0x1c0] sm:$0xff] }
 0x3a7   : > { %v3719_v0 = vpop.f32.mrb[228].mxu0 }
 0x3a8   : > { %4176 = vst [vmem:[#allocation2 + $0x188] sm:$0xff] %v4112_v49  ;;  %v3720_v51 = vadd.f32 %v3719_v0, %v6527_v10  ;;  %v4008_v6 = vpop.f32.mrb[228].mxu1  ;;  %v3721_v56 = vpop.f32.mrb[229].mxu0  ;;  %v6534_v49 = vld [vmem:[#allocation21_spill] sm:$0xff] }
 0x3a9   : > { %v4010_v32 = vpop.f32.mrb[229].mxu1  ;;  %v3722_v4 = vpop.f32.mrb[230].mxu0 }
 0x3aa   : > { %v4009_v26 = vadd.f32 %v4008_v6, %v3720_v51  ;;  %v3723_v59 = vadd.f32 %v3722_v4, %v6528_v23  ;;  %v4011_v8 = vpop.f32.mrb[230].mxu1  ;;  %v3724_v12 = vpop.f32.mrb[231].mxu0  ;;  %v848_v6 = vld [vmem:[#allocation2 + $0x1c8] sm:$0xff]  ;;  %v6535_v23 = vld [vmem:[#allocation22_spill] sm:$0xff] }
 0x3ab   : > { %v4013_v39 = vpop.f32.mrb[231].mxu1 }
 0x3ac   : > { %v4113_v24 = vadd.f32 %v4009_v26, %v841_v14  ;;  %v4012_v3 = vadd.f32 %v4011_v8, %v3723_v59 }
 0x3ae   : > { %4177 = vst [vmem:[#allocation2 + $0x190] sm:$0xff] %v4113_v24  ;;  %v4114_v40 = vadd.f32 %v4012_v3, %v842_v2  ;;  %v849_v2 = vld [vmem:[#allocation2 + $0x1d0] sm:$0xff] }
 0x3af   : > { %v3727_v60 = vpop.f32.mrb[232].mxu0 }
 0x3b0   : > { %4178 = vst [vmem:[#allocation2 + $0x198] sm:$0xff] %v4114_v40  ;;  %v3728_v30 = vadd.f32 %v3727_v60, %v6529_v38  ;;  %v4016_v17 = vpop.f32.mrb[232].mxu1  ;;  %v3729_v9 = vpop.f32.mrb[233].mxu0  ;;  %v6536_v40 = vld [vmem:[#allocation23_spill] sm:$0xff] }
 0x3b1   : > { %v4018_v58 = vpop.f32.mrb[233].mxu1  ;;  %v3730_v18 = vpop.f32.mrb[234].mxu0 }
 0x3b2   : > { %v4017_v50 = vadd.f32 %v4016_v17, %v3728_v30  ;;  %v3731_v25 = vadd.f32 %v3730_v18, %v6530_v53  ;;  %v4019_v63 = vpop.f32.mrb[234].mxu1  ;;  %v3732_v13 = vpop.f32.mrb[235].mxu0  ;;  %v850_v17 = vld [vmem:[#allocation2 + $0x1d8] sm:$0xff]  ;;  %v6537_v53 = vld [vmem:[#allocation24_spill] sm:$0xff] }
 0x3b3   : > { %v4021_v11 = vpop.f32.mrb[235].mxu1 }
 0x3b4   : > { %v4115_v19 = vadd.f32 %v4017_v50, %v843_v35  ;;  %v4020_v29 = vadd.f32 %v4019_v63, %v3731_v25 }
 0x3b6   : > { %4179 = vst [vmem:[#allocation2 + $0x1a0] sm:$0xff] %v4115_v19  ;;  %v4116_v16 = vadd.f32 %v4020_v29, %v844_v46  ;;  %v851_v46 = vld [vmem:[#allocation2 + $0x1e0] sm:$0xff] }
 0x3b7   : > { %v3735_v20 = vpop.f32.mrb[236].mxu0 }
 0x3b8   : > { %4180 = vst [vmem:[#allocation2 + $0x1a8] sm:$0xff] %v4116_v16  ;;  %v3736_v28 = vadd.f32 %v3735_v20, %v6531_v1  ;;  %v4024_v42 = vpop.f32.mrb[236].mxu1  ;;  %v3737_v7 = vpop.f32.mrb[237].mxu0  ;;  %v6538_v16 = vld [vmem:[#allocation25_spill] sm:$0xff] }
 0x3b9   : > { %v4026_v52 = vpop.f32.mrb[237].mxu1  ;;  %v3738_v47 = vpop.f32.mrb[238].mxu0 }
 0x3ba   : > { %v4025_v44 = vadd.f32 %v4024_v42, %v3736_v28  ;;  %v3739_v45 = vadd.f32 %v3738_v47, %v6532_v21  ;;  %v4027_v31 = vpop.f32.mrb[238].mxu1  ;;  %v3740_v5 = vpop.f32.mrb[239].mxu0  ;;  %v852_v42 = vld [vmem:[#allocation2 + $0x1e8] sm:$0xff]  ;;  %v6539_v21 = vld [vmem:[#allocation26_spill] sm:$0xff] }
 0x3bb   : > { %v4029_v37 = vpop.f32.mrb[239].mxu1 }
 0x3bc   : > { %v4117_v27 = vadd.f32 %v4025_v44, %v845_v34  ;;  %v4028_v55 = vadd.f32 %v4027_v31, %v3739_v45 }
 0x3be   : > { %4181 = vst [vmem:[#allocation2 + $0x1b0] sm:$0xff] %v4117_v27  ;;  %v4118_v22 = vadd.f32 %v4028_v55, %v846_v15  ;;  %v853_v15 = vld [vmem:[#allocation2 + $0x1f0] sm:$0xff] }
 0x3bf   : > { %v3743_v57 = vpop.f32.mrb[240].mxu0 }
 0x3c0   : > { %4182 = vst [vmem:[#allocation2 + $0x1b8] sm:$0xff] %v4118_v22  ;;  %v3744_v54 = vadd.f32 %v3743_v57, %v6533_v33  ;;  %v4032_v43 = vpop.f32.mrb[240].mxu1  ;;  %v3745_v61 = vpop.f32.mrb[241].mxu0  ;;  %v6540_v22 = vld [vmem:[#allocation27_spill] sm:$0xff] }
 0x3c1   : > { %v4034_v48 = vpop.f32.mrb[241].mxu1  ;;  %v3746_v41 = vpop.f32.mrb[242].mxu0 }
 0x3c2   : > { %v4033_v62 = vadd.f32 %v4032_v43, %v3744_v54  ;;  %v3747_v0 = vadd.f32 %v3746_v41, %v6534_v49  ;;  %v4035_v10 = vpop.f32.mrb[242].mxu1  ;;  %v3748_v51 = vpop.f32.mrb[243].mxu0  ;;  %v854_v43 = vld [vmem:[#allocation2 + $0x1f8] sm:$0xff]  ;;  %v6338_v49 = vld [vmem:[%s6491_s2] ss:$0 sm:$0xff] (!%p4873_p12) }
 0x3c3   : > { %v4037_v56 = vpop.f32.mrb[243].mxu1 }
 0x3c4   : > { %v4119_v14 = vadd.f32 %v4033_v62, %v847_v36  ;;  %v4036_v32 = vadd.f32 %v4035_v10, %v3747_v0  ;;  %v4195_v62 = vld [vmem:[#allocation2] sm:$0xff] (!%p4873_p12)  ;;  %v4196_v0 = vld [vmem:[#allocation2 + $0x8] sm:$0xff] (!%p4873_p12)  ;;  %v4198_v56 = vld [vmem:[#allocation2 + $0x18] sm:$0xff] (!%p4873_p12) }
 0x3c5   : > { %v4266_v10 = vadd.f32 (!%p4873_p12), %v6338_v49, %v4195_v62  ;;  %v4267_v51 = vadd.f32 (!%p4873_p12), %v6338_v49, %v4196_v0 }
 0x3c6   : > { %4183 = vst [vmem:[#allocation2 + $0x1c0] sm:$0xff] %v4119_v14  ;;  %v4120_v4 = vadd.f32 %v4036_v32, %v848_v6  ;;  %v4197_v6 = vld [vmem:[#allocation2 + $0x10] sm:$0xff] (!%p4873_p12)  ;;  %v4199_v14 = vld [vmem:[#allocation2 + $0x20] sm:$0xff] (!%p4873_p12) }
 0x3c7   : > { %v3751_v26 = vpop.f32.mrb[244].mxu0  ;;  %v4268_v32 = vadd.f32 (!%p4873_p12), %v6338_v49, %v4197_v6  ;;  %v4221_v6 = vld [vmem:[#allocation2 + $0xd0] sm:$0xff] (!%p4873_p12) }
 0x3c8   : > { %4184 = vst [vmem:[#allocation2 + $0x1c8] sm:$0xff] %v4120_v4  ;;  %v3752_v59 = vadd.f32 %v3751_v26, %v6535_v23  ;;  %v4040_v8 = vpop.f32.mrb[244].mxu1  ;;  %v3753_v12 = vpop.f32.mrb[245].mxu0  ;;  %v4269_v4 = vadd.f32 (!%p4873_p12), %v6338_v49, %v4198_v56  ;;  %v4270_v26 = vadd.f32 (!%p4873_p12), %v6338_v49, %v4199_v14  ;;  %v4200_v23 = vld [vmem:[#allocation2 + $0x28] sm:$0xff] (!%p4873_p12)  ;;  %v4222_v56 = vld [vmem:[#allocation2 + $0xd8] sm:$0xff] (!%p4873_p12)  ;;  %v4223_v14 = vld [vmem:[#allocation2 + $0xe0] sm:$0xff] (!%p4873_p12) }
 0x3c9   : > { %v4042_v39 = vpop.f32.mrb[245].mxu1  ;;  %v3754_v24 = vpop.f32.mrb[246].mxu0  ;;  %v4330_v12 = vmax.f32 (!%p4873_p12), %v4266_v10, 0.0 }
 0x3ca   : > { %v4041_v3 = vadd.f32 %v4040_v8, %v3752_v59  ;;  %v3755_v60 = vadd.f32 %v3754_v24, %v6536_v40  ;;  %v4043_v38 = vpop.f32.mrb[246].mxu1  ;;  %v3756_v30 = vpop.f32.mrb[247].mxu0  ;;  %v4201_v59 = vld [vmem:[#allocation2 + $0x30] sm:$0xff] (!%p4873_p12)  ;;  %v4202_v8 = vld [vmem:[#allocation2 + $0x38] sm:$0xff] (!%p4873_p12)  ;;  %v4271_v39 = vadd.f32 (!%p4873_p12), %v6338_v49, %v4200_v23  ;;  %v4204_v40 = vld [vmem:[#allocation2 + $0x48] sm:$0xff] (!%p4873_p12) }
 0x3cb   : > { %v4045_v9 = vpop.f32.mrb[247].mxu1  ;;  %v4272_v24 = vadd.f32 (!%p4873_p12), %v6338_v49, %v4201_v59  ;;  %v4333_v30 = vmax.f32 (!%p4873_p12), %v4269_v4, 0.0  ;;  %4394 = vst [vmem:[%s5661_s24] sm:$0xff] (!%p4873_p12), %v4330_v12  ;;  %v4224_v59 = vld [vmem:[#allocation2 + $0xe8] sm:$0xff] (!%p4873_p12) }
 0x3cc   : > { %v4121_v35 = vadd.f32 %v4041_v3, %v849_v2  ;;  %v4044_v58 = vadd.f32 %v4043_v38, %v3755_v60  ;;  %v4331_v2 = vmax.f32 (!%p4873_p12), %v4267_v51, 0.0  ;;  %v4203_v3 = vld [vmem:[#allocation2 + $0x40] sm:$0xff] (!%p4873_p12)  ;;  %v4205_v60 = vld [vmem:[#allocation2 + $0x50] sm:$0xff] (!%p4873_p12)  ;;  %v4332_v38 = vmax.f32 (!%p4873_p12), %v4268_v32, 0.0 }
 0x3cd   : > { %v4273_v9 = vadd.f32 (!%p4873_p12), %v6338_v49, %v4202_v8  ;;  %4397 = vst [vmem:[%s5661_s24 + $0x18] sm:$0xff] (!%p4873_p12), %v4333_v30  ;;  %v4225_v8 = vld [vmem:[#allocation2 + $0xf0] sm:$0xff] (!%p4873_p12)  ;;  %v4294_v30 = vadd.f32 (!%p4873_p12), %v6338_v49, %v4223_v14 }
 0x3ce   : > { %4185 = vst [vmem:[#allocation2 + $0x1d0] sm:$0xff] %v4121_v35  ;;  %v4122_v18 = vadd.f32 %v4044_v58, %v850_v17  ;;  %v4334_v17 = vmax.f32 (!%p4873_p12), %v4270_v26, 0.0  ;;  %v4206_v35 = vld [vmem:[#allocation2 + $0x58] sm:$0xff] (!%p4873_p12)  ;;  %v4207_v58 = vld [vmem:[#allocation2 + $0x60] sm:$0xff] (!%p4873_p12)  ;;  %4395 = vst [vmem:[%s5661_s24 + $0x8] sm:$0xff] (!%p4873_p12), %v4331_v2 }
 0x3cf   : > { %v3759_v50 = vpop.f32.mrb[248].mxu0  ;;  %4396 = vst [vmem:[%s5661_s24 + $0x10] sm:$0xff] (!%p4873_p12), %v4332_v38  ;;  %v4293_v38 = vadd.f32 (!%p4873_p12), %v6338_v49, %v4222_v56 }
 0x3d0   : > { %4186 = vst [vmem:[#allocation2 + $0x1d8] sm:$0xff] %v4122_v18  ;;  %v3760_v25 = vadd.f32 %v3759_v50, %v6537_v53  ;;  %v4048_v63 = vpop.f32.mrb[248].mxu1  ;;  %v3761_v13 = vpop.f32.mrb[249].mxu0  ;;  %v4208_v18 = vld [vmem:[#allocation2 + $0x68] sm:$0xff] (!%p4873_p12)  ;;  %v4335_v50 = vmax.f32 (!%p4873_p12), %v4271_v39, 0.0  ;;  %v4336_v53 = vmax.f32 (!%p4873_p12), %v4272_v24, 0.0 }
 0x3d1   : > { %v4050_v11 = vpop.f32.mrb[249].mxu1  ;;  %v3762_v19 = vpop.f32.mrb[250].mxu0  ;;  %v4209_v13 = vld [vmem:[#allocation2 + $0x70] sm:$0xff] (!%p4873_p12)  ;;  %4398 = vst [vmem:[%s5661_s24 + $0x20] sm:$0xff] (!%p4873_p12), %v4334_v17  ;;  %v4227_v17 = vld [vmem:[#allocation2 + $0x100] sm:$0xff] (!%p4873_p12) }
 0x3d2   : > { %v4049_v29 = vadd.f32 %v4048_v63, %v3760_v25  ;;  %v3763_v20 = vadd.f32 %v3762_v19, %v6538_v16  ;;  %v4051_v1 = vpop.f32.mrb[250].mxu1  ;;  %v3764_v28 = vpop.f32.mrb[251].mxu0  ;;  %v4274_v25 = vadd.f32 (!%p4873_p12), %v6338_v49, %v4203_v3  ;;  %v4275_v63 = vadd.f32 (!%p4873_p12), %v6338_v49, %v4204_v40  ;;  %4399 = vst [vmem:[%s5661_s24 + $0x28] sm:$0xff] (!%p4873_p12), %v4335_v50  ;;  %v4226_v3 = vld [vmem:[#allocation2 + $0xf8] sm:$0xff] (!%p4873_p12) }
 0x3d3   : > { %v4053_v7 = vpop.f32.mrb[251].mxu1  ;;  %v4337_v11 = vmax.f32 (!%p4873_p12), %v4273_v9, 0.0  ;;  %v4276_v19 = vadd.f32 (!%p4873_p12), %v6338_v49, %v4205_v60  ;;  %v4278_v16 = vadd.f32 (!%p4873_p12), %v6338_v49, %v4207_v58  ;;  %4400 = vst [vmem:[%s5661_s24 + $0x30] sm:$0xff] (!%p4873_p12), %v4336_v53  ;;  %v4292_v60 = vadd.f32 (!%p4873_p12), %v6338_v49, %v4221_v6  ;;  %v4228_v9 = vld [vmem:[#allocation2 + $0x108] sm:$0xff] (!%p4873_p12)  ;;  %v4229_v53 = vld [vmem:[#allocation2 + $0x110] sm:$0xff] (!%p4873_p12) }
 0x3d4   : > { %v4123_v34 = vadd.f32 %v4049_v29, %v851_v46  ;;  %v4052_v52 = vadd.f32 %v4051_v1, %v3763_v20  ;;  %v4210_v46 = vld [vmem:[#allocation2 + $0x78] sm:$0xff] (!%p4873_p12)  ;;  %v4277_v29 = vadd.f32 (!%p4873_p12), %v6338_v49, %v4206_v35  ;;  %v4211_v20 = vld [vmem:[#allocation2 + $0x80] sm:$0xff] (!%p4873_p12)  ;;  %v4212_v1 = vld [vmem:[#allocation2 + $0x88] sm:$0xff] (!%p4873_p12)  ;;  %v4338_v28 = vmax.f32 (!%p4873_p12), %v4274_v25, 0.0 }
 0x3d5   : > { %v4279_v7 = vadd.f32 (!%p4873_p12), %v6338_v49, %v4208_v18  ;;  %4401 = vst [vmem:[%s5661_s24 + $0x38] sm:$0xff] (!%p4873_p12), %v4337_v11  ;;  %v4295_v18 = vadd.f32 (!%p4873_p12), %v6338_v49, %v4224_v59  ;;  %v4296_v50 = vadd.f32 (!%p4873_p12), %v6338_v49, %v4225_v8  ;;  %v4230_v25 = vld [vmem:[#allocation2 + $0x118] sm:$0xff] (!%p4873_p12)  ;;  %v4358_v11 = vmax.f32 (!%p4873_p12), %v4294_v30, 0.0  ;;  %v4249_v30 = vld [vmem:[#allocation2 + $0x1b0] sm:$0xff] (!%p4873_p12) }
 0x3d6   : > { %4187 = vst [vmem:[#allocation2 + $0x1e0] sm:$0xff] %v4123_v34  ;;  %v4124_v47 = vadd.f32 %v4052_v52, %v852_v42  ;;  %v4339_v42 = vmax.f32 (!%p4873_p12), %v4275_v63, 0.0  ;;  %v4280_v34 = vadd.f32 (!%p4873_p12), %v6338_v49, %v4209_v13  ;;  %v4213_v52 = vld [vmem:[#allocation2 + $0x90] sm:$0xff] (!%p4873_p12)  ;;  %4402 = vst [vmem:[%s5661_s24 + $0x40] sm:$0xff] (!%p4873_p12), %v4338_v28  ;;  %v4231_v63 = vld [vmem:[#allocation2 + $0x120] sm:$0xff] (!%p4873_p12)  ;;  %v4356_v13 = vmax.f32 (!%p4873_p12), %v4292_v60, 0.0 }
 0x3d7   : > { %v3767_v44 = vpop.f32.mrb[252].mxu0  ;;  %v4298_v28 = vadd.f32 (!%p4873_p12), %v6338_v49, %v4227_v17  ;;  %4422 = vst [vmem:[%s5661_s24 + $0xe0] sm:$0xff] (!%p4873_p12), %v4358_v11 }
 0x3d8   : > { %4188 = vst [vmem:[#allocation2 + $0x1e8] sm:$0xff] %v4124_v47  ;;  %v3768_v45 = vadd.f32 %v3767_v44, %v6539_v21  ;;  %v4056_v31 = vpop.f32.mrb[252].mxu1  ;;  %v3769_v5 = vpop.f32.mrb[253].mxu0  ;;  %v4214_v47 = vld [vmem:[#allocation2 + $0x98] sm:$0xff] (!%p4873_p12)  ;;  %v4215_v44 = vld [vmem:[#allocation2 + $0xa0] sm:$0xff] (!%p4873_p12)  ;;  %v4340_v21 = vmax.f32 (!%p4873_p12), %v4276_v19, 0.0  ;;  %v4297_v19 = vadd.f32 (!%p4873_p12), %v6338_v49, %v4226_v3 }
 0x3d9   : > { %v4058_v37 = vpop.f32.mrb[253].mxu1  ;;  %v3770_v27 = vpop.f32.mrb[254].mxu0  ;;  %v4281_v5 = vadd.f32 (!%p4873_p12), %v6338_v49, %v4210_v46  ;;  %4403 = vst [vmem:[%s5661_s24 + $0x48] sm:$0xff] (!%p4873_p12), %v4339_v42  ;;  %v4357_v46 = vmax.f32 (!%p4873_p12), %v4293_v38, 0.0  ;;  %v4299_v42 = vadd.f32 (!%p4873_p12), %v6338_v49, %v4228_v9  ;;  %4420 = vst [vmem:[%s5661_s24 + $0xd0] sm:$0xff] (!%p4873_p12), %v4356_v13  ;;  %v4248_v38 = vld [vmem:[#allocation2 + $0x1a8] sm:$0xff] (!%p4873_p12) }
 0x3da   : > { %v4057_v55 = vadd.f32 %v4056_v31, %v3768_v45  ;;  %v3771_v57 = vadd.f32 %v3770_v27, %v6540_v22  ;;  %v4059_v33 = vpop.f32.mrb[254].mxu1  ;;  %v3772_v54 = vpop.f32.mrb[255].mxu0  ;;  %4194 = sbr.rel (%p4873_p12) target bundleno = 1015 (0x3f7), region = 63  ;;  %v4341_v45 = vmax.f32 (!%p4873_p12), %v4277_v29, 0.0  ;;  %v4342_v31 = vmax.f32 (!%p4873_p12), %v4278_v16, 0.0  ;;  %v4217_v37 = vld [vmem:[#allocation2 + $0xb0] sm:$0xff] (!%p4873_p12) }
 0x3db   : > { %v4061_v61 = vpop.f32.mrb[255].mxu1  ;;  %v4343_v27 = vmax.f32 (!%p4873_p12), %v4279_v7, 0.0  ;;  %v4282_v22 = vadd.f32 (!%p4873_p12), %v6338_v49, %v4211_v20  ;;  %4404 = vst [vmem:[%s5661_s24 + $0x50] sm:$0xff] (!%p4873_p12), %v4340_v21  ;;  %v4345_v54 = vmax.f32 (!%p4873_p12), %v4281_v5, 0.0  ;;  %v4288_v51 = vadd.f32 (!%p4873_p12), %v6338_v49, %v4217_v37  ;;  %v4232_v29 = vld [vmem:[#allocation2 + $0x128] sm:$0xff] (!%p4873_p12)  ;;  %v4233_v16 = vld [vmem:[#allocation2 + $0x130] sm:$0xff] (!%p4873_p12) }
 0x3dc   : > { %v4125_v36 = vadd.f32 %v4057_v55, %v853_v15  ;;  %v4060_v48 = vadd.f32 %v4059_v33, %v3771_v57  ;;  %v4216_v15 = vld [vmem:[#allocation2 + $0xa8] sm:$0xff] (!%p4873_p12)  ;;  %v4344_v55 = vmax.f32 (!%p4873_p12), %v4280_v34, 0.0  ;;  %v4283_v57 = vadd.f32 (!%p4873_p12), %v6338_v49, %v4212_v1  ;;  %v4218_v33 = vld [vmem:[#allocation2 + $0xb8] sm:$0xff] (!%p4873_p12)  ;;  %4405 = vst [vmem:[%s5661_s24 + $0x58] sm:$0xff] (!%p4873_p12), %v4341_v45  ;;  %4406 = vst [vmem:[%s5661_s24 + $0x60] sm:$0xff] (!%p4873_p12), %v4342_v31 }
 0x3dd   : > { %v4285_v61 = vadd.f32 (!%p4873_p12), %v6338_v49, %v4214_v47  ;;  %4407 = vst [vmem:[%s5661_s24 + $0x68] sm:$0xff] (!%p4873_p12), %v4343_v27  ;;  %v4346_v62 = vmax.f32 (!%p4873_p12), %v4282_v22, 0.0  ;;  %v4287_v10 = vadd.f32 (!%p4873_p12), %v6338_v49, %v4216_v15  ;;  %4409 = vst [vmem:[%s5661_s24 + $0x78] sm:$0xff] (!%p4873_p12), %v4345_v54  ;;  %v4289_v23 = vadd.f32 (!%p4873_p12), %v6338_v49, %v4218_v33  ;;  %v4234_v7 = vld [vmem:[#allocation2 + $0x138] sm:$0xff] (!%p4873_p12)  ;;  %v4235_v21 = vld [vmem:[#allocation2 + $0x140] sm:$0xff] (!%p4873_p12) }
 0x3de   : > { %4189 = vst [vmem:[#allocation2 + $0x1f0] sm:$0xff] %v4125_v36  ;;  %v4126_v41 = vadd.f32 %v4060_v48, %v854_v43  ;;  %v4284_v43 = vadd.f32 (!%p4873_p12), %v6338_v49, %v4213_v52  ;;  %v4286_v36 = vadd.f32 (!%p4873_p12), %v6338_v49, %v4215_v44  ;;  %v4219_v48 = vld [vmem:[#allocation2 + $0xc0] sm:$0xff] (!%p4873_p12)  ;;  %4408 = vst [vmem:[%s5661_s24 + $0x70] sm:$0xff] (!%p4873_p12), %v4344_v55  ;;  %v4347_v0 = vmax.f32 (!%p4873_p12), %v4283_v57, 0.0  ;;  %v4236_v45 = vld [vmem:[#allocation2 + $0x148] sm:$0xff] (!%p4873_p12) }
 0x3df   : > { %v4349_v4 = vmax.f32 (!%p4873_p12), %v4285_v61, 0.0  ;;  %4410 = vst [vmem:[%s5661_s24 + $0x80] sm:$0xff] (!%p4873_p12), %v4346_v62  ;;  %v4351_v12 = vmax.f32 (!%p4873_p12), %v4287_v10, 0.0  ;;  %v4352_v2 = vmax.f32 (!%p4873_p12), %v4288_v51, 0.0  ;;  %v4290_v39 = vadd.f32 (!%p4873_p12), %v6338_v49, %v4219_v48  ;;  %4421 = vst [vmem:[%s5661_s24 + $0xd8] sm:$0xff] (!%p4873_p12), %v4357_v46  ;;  %v4237_v27 = vld [vmem:[#allocation2 + $0x150] sm:$0xff] (!%p4873_p12) }
 0x3e0   : > { %4190 = vst [vmem:[#allocation2 + $0x1f8] sm:$0xff] %v4126_v41  ;;  %v4220_v41 = vld [vmem:[#allocation2 + $0xc8] sm:$0xff] (!%p4873_p12)  ;;  %v4348_v32 = vmax.f32 (!%p4873_p12), %v4284_v43, 0.0  ;;  %v4350_v26 = vmax.f32 (!%p4873_p12), %v4286_v36, 0.0  ;;  %4411 = vst [vmem:[%s5661_s24 + $0x88] sm:$0xff] (!%p4873_p12), %v4347_v0  ;;  %v4353_v40 = vmax.f32 (!%p4873_p12), %v4289_v23, 0.0  ;;  %v4300_v52 = vadd.f32 (!%p4873_p12), %v6338_v49, %v4229_v53 }
 0x3e1   : > { %v4291_v24 = vadd.f32 %v6338_v49, %v4220_v41  ;;  %4413 = vst [vmem:[%s5661_s24 + $0x98] sm:$0xff] %v4349_v4  ;;  %4415 = vst [vmem:[%s5661_s24 + $0xa8] sm:$0xff] %v4351_v12  ;;  %v4354_v35 = vmax.f32 %v4290_v39, 0.0  ;;  %v4359_v20 = vmax.f32 %v4295_v18, 0.0  ;;  %v4360_v1 = vmax.f32 %v4296_v50, 0.0  ;;  %v4238_v55 = vld [vmem:[#allocation2 + $0x158] sm:$0xff] }
 0x3e2   : > { %4412 = vst [vmem:[%s5661_s24 + $0x90] sm:$0xff] %v4348_v32  ;;  %4414 = vst [vmem:[%s5661_s24 + $0xa0] sm:$0xff] %v4350_v26  ;;  %v4361_v34 = vmax.f32 %v4297_v19, 0.0  ;;  %v4301_v47 = vadd.f32 %v6338_v49, %v4230_v25  ;;  %v4302_v44 = vadd.f32 %v6338_v49, %v4231_v63  ;;  %v4362_v31 = vmax.f32 %v4298_v28, 0.0  ;;  %v4239_v22 = vld [vmem:[#allocation2 + $0x160] sm:$0xff]  ;;  %v4240_v61 = vld [vmem:[#allocation2 + $0x168] sm:$0xff] }
 0x3e3   : > { %4416 = vst [vmem:[%s5661_s24 + $0xb0] sm:$0xff] %v4352_v2  ;;  %v4355_v58 = vmax.f32 %v4291_v24, 0.0  ;;  %4417 = vst [vmem:[%s5661_s24 + $0xb8] sm:$0xff] %v4353_v40  ;;  %v4363_v5 = vmax.f32 %v4299_v42, 0.0  ;;  %v4303_v15 = vadd.f32 %v6338_v49, %v4232_v29  ;;  %v4304_v37 = vadd.f32 %v6338_v49, %v4233_v16  ;;  %v4241_v36 = vld [vmem:[#allocation2 + $0x170] sm:$0xff]  ;;  %v4242_v10 = vld [vmem:[#allocation2 + $0x178] sm:$0xff] }
 0x3e4   : > { %4418 = vst [vmem:[%s5661_s24 + $0xc0] sm:$0xff] %v4354_v35  ;;  %4423 = vst [vmem:[%s5661_s24 + $0xe8] sm:$0xff] %v4359_v20  ;;  %v4364_v57 = vmax.f32 %v4300_v52, 0.0  ;;  %v4365_v33 = vmax.f32 %v4301_v47, 0.0  ;;  %v4366_v54 = vmax.f32 %v4302_v44, 0.0  ;;  %v4305_v43 = vadd.f32 %v6338_v49, %v4234_v7  ;;  %v4243_v32 = vld [vmem:[#allocation2 + $0x180] sm:$0xff] }
 0x3e5   : > { %4419 = vst [vmem:[%s5661_s24 + $0xc8] sm:$0xff] %v4355_v58  ;;  %4424 = vst [vmem:[%s5661_s24 + $0xf0] sm:$0xff] %v4360_v1  ;;  %v4367_v48 = vmax.f32 %v4303_v15, 0.0  ;;  %v4368_v41 = vmax.f32 %v4304_v37, 0.0  ;;  %v4306_v62 = vadd.f32 %v6338_v49, %v4235_v21  ;;  %v4307_v0 = vadd.f32 %v6338_v49, %v4236_v45  ;;  %v4244_v4 = vld [vmem:[#allocation2 + $0x188] sm:$0xff]  ;;  %v4245_v12 = vld [vmem:[#allocation2 + $0x190] sm:$0xff] }
 0x3e6   : > { %4425 = vst [vmem:[%s5661_s24 + $0xf8] sm:$0xff] %v4361_v34  ;;  %4426 = vst [vmem:[%s5661_s24 + $0x100] sm:$0xff] %v4362_v31  ;;  %v4369_v51 = vmax.f32 %v4305_v43, 0.0  ;;  %v4308_v6 = vadd.f32 %v6338_v49, %v4237_v27  ;;  %v4309_v56 = vadd.f32 %v6338_v49, %v4238_v55  ;;  %v4310_v14 = vadd.f32 %v6338_v49, %v4239_v22  ;;  %v4246_v2 = vld [vmem:[#allocation2 + $0x198] sm:$0xff]  ;;  %v4247_v39 = vld [vmem:[#allocation2 + $0x1a0] sm:$0xff] }
 0x3e7   : > { %4427 = vst [vmem:[%s5661_s24 + $0x108] sm:$0xff] %v4363_v5  ;;  %4428 = vst [vmem:[%s5661_s24 + $0x110] sm:$0xff] %v4364_v57  ;;  %v4370_v26 = vmax.f32 %v4306_v62, 0.0  ;;  %v4371_v23 = vmax.f32 %v4307_v0, 0.0  ;;  %v4311_v59 = vadd.f32 %v6338_v49, %v4240_v61  ;;  %v4312_v8 = vadd.f32 %v6338_v49, %v4241_v36  ;;  %v4250_v18 = vld [vmem:[#allocation2 + $0x1b8] sm:$0xff]  ;;  %v4251_v13 = vld [vmem:[#allocation2 + $0x1c0] sm:$0xff] }
 0x3e8   : > { %4429 = vst [vmem:[%s5661_s24 + $0x118] sm:$0xff] %v4365_v33  ;;  %4430 = vst [vmem:[%s5661_s24 + $0x120] sm:$0xff] %v4366_v54  ;;  %v4372_v24 = vmax.f32 %v4308_v6, 0.0  ;;  %v4373_v3 = vmax.f32 %v4309_v56, 0.0  ;;  %v4374_v40 = vmax.f32 %v4310_v14, 0.0  ;;  %v4313_v60 = vadd.f32 %v6338_v49, %v4242_v10  ;;  %v4252_v46 = vld [vmem:[#allocation2 + $0x1c8] sm:$0xff] }
 0x3e9   : > { %4431 = vst [vmem:[%s5661_s24 + $0x128] sm:$0xff] %v4367_v48  ;;  %4432 = vst [vmem:[%s5661_s24 + $0x130] sm:$0xff] %v4368_v41  ;;  %v4375_v17 = vmax.f32 %v4311_v59, 0.0  ;;  %v4376_v9 = vmax.f32 %v4312_v8, 0.0  ;;  %v4314_v35 = vadd.f32 %v6338_v49, %v4243_v32  ;;  %v4315_v58 = vadd.f32 %v6338_v49, %v4244_v4  ;;  %v4253_v20 = vld [vmem:[#allocation2 + $0x1d0] sm:$0xff]  ;;  %v4254_v1 = vld [vmem:[#allocation2 + $0x1d8] sm:$0xff] }
 0x3ea   : > { %4433 = vst [vmem:[%s5661_s24 + $0x138] sm:$0xff] %v4369_v51  ;;  %4434 = vst [vmem:[%s5661_s24 + $0x140] sm:$0xff] %v4370_v26  ;;  %v4377_v50 = vmax.f32 %v4313_v60, 0.0  ;;  %v4316_v53 = vadd.f32 %v6338_v49, %v4245_v12  ;;  %v4317_v25 = vadd.f32 %v6338_v49, %v4246_v2  ;;  %v4318_v63 = vadd.f32 %v6338_v49, %v4247_v39  ;;  %v4255_v28 = vld [vmem:[#allocation2 + $0x1e0] sm:$0xff]  ;;  %v4256_v47 = vld [vmem:[#allocation2 + $0x1e8] sm:$0xff] }
 0x3eb   : > { %4435 = vst [vmem:[%s5661_s24 + $0x148] sm:$0xff] %v4371_v23  ;;  %4436 = vst [vmem:[%s5661_s24 + $0x150] sm:$0xff] %v4372_v24  ;;  %v4378_v11 = vmax.f32 %v4314_v35, 0.0  ;;  %v4379_v19 = vmax.f32 %v4315_v58, 0.0  ;;  %v4319_v29 = vadd.f32 %v6338_v49, %v4248_v38  ;;  %v4320_v16 = vadd.f32 %v6338_v49, %v4249_v30  ;;  %v4257_v44 = vld [vmem:[#allocation2 + $0x1f0] sm:$0xff]  ;;  %v4258_v15 = vld [vmem:[#allocation2 + $0x1f8] sm:$0xff] }
 0x3ec   : > { %4437 = vst [vmem:[%s5661_s24 + $0x158] sm:$0xff] %v4373_v3  ;;  %4438 = vst [vmem:[%s5661_s24 + $0x160] sm:$0xff] %v4374_v40  ;;  %v4380_v42 = vmax.f32 %v4316_v53, 0.0  ;;  %v4381_v7 = vmax.f32 %v4317_v25, 0.0  ;;  %v4382_v34 = vmax.f32 %v4318_v63, 0.0  ;;  %v4321_v52 = vadd.f32 %v6338_v49, %v4250_v18 }
 0x3ed   : > { %4439 = vst [vmem:[%s5661_s24 + $0x168] sm:$0xff] %v4375_v17  ;;  %4440 = vst [vmem:[%s5661_s24 + $0x170] sm:$0xff] %v4376_v9  ;;  %v4383_v21 = vmax.f32 %v4319_v29, 0.0  ;;  %v4384_v45 = vmax.f32 %v4320_v16, 0.0  ;;  %v4322_v31 = vadd.f32 %v6338_v49, %v4251_v13  ;;  %v4323_v5 = vadd.f32 %v6338_v49, %v4252_v46 }
 0x3ee   : > { %4441 = vst [vmem:[%s5661_s24 + $0x178] sm:$0xff] %v4377_v50  ;;  %4442 = vst [vmem:[%s5661_s24 + $0x180] sm:$0xff] %v4378_v11  ;;  %v4385_v37 = vmax.f32 %v4321_v52, 0.0  ;;  %v4324_v27 = vadd.f32 %v6338_v49, %v4253_v20  ;;  %v4325_v55 = vadd.f32 %v6338_v49, %v4254_v1  ;;  %v4326_v22 = vadd.f32 %v6338_v49, %v4255_v28 }
 0x3ef   : > { %4443 = vst [vmem:[%s5661_s24 + $0x188] sm:$0xff] %v4379_v19  ;;  %4444 = vst [vmem:[%s5661_s24 + $0x190] sm:$0xff] %v4380_v42  ;;  %v4386_v57 = vmax.f32 %v4322_v31, 0.0  ;;  %v4387_v33 = vmax.f32 %v4323_v5, 0.0  ;;  %v4327_v54 = vadd.f32 %v6338_v49, %v4256_v47  ;;  %v4328_v43 = vadd.f32 %v6338_v49, %v4257_v44 }
 0x3f0   : > { %4445 = vst [vmem:[%s5661_s24 + $0x198] sm:$0xff] %v4381_v7  ;;  %4446 = vst [vmem:[%s5661_s24 + $0x1a0] sm:$0xff] %v4382_v34  ;;  %v4388_v61 = vmax.f32 %v4324_v27, 0.0  ;;  %v4389_v36 = vmax.f32 %v4325_v55, 0.0  ;;  %v4390_v48 = vmax.f32 %v4326_v22, 0.0  ;;  %v4329_v41 = vadd.f32 %v6338_v49, %v4258_v15 }
 0x3f1   : > { %4447 = vst [vmem:[%s5661_s24 + $0x1a8] sm:$0xff] %v4383_v21  ;;  %4448 = vst [vmem:[%s5661_s24 + $0x1b0] sm:$0xff] %v4384_v45  ;;  %v4391_v62 = vmax.f32 %v4327_v54, 0.0  ;;  %v4392_v0 = vmax.f32 %v4328_v43, 0.0 }
 0x3f2   : > { %4449 = vst [vmem:[%s5661_s24 + $0x1b8] sm:$0xff] %v4385_v37  ;;  %4450 = vst [vmem:[%s5661_s24 + $0x1c0] sm:$0xff] %v4386_v57  ;;  %v4393_v10 = vmax.f32 %v4329_v41, 0.0 }
 0x3f3   : > { %4451 = vst [vmem:[%s5661_s24 + $0x1c8] sm:$0xff] %v4387_v33  ;;  %4452 = vst [vmem:[%s5661_s24 + $0x1d0] sm:$0xff] %v4388_v61 }
 0x3f4   : > { %4453 = vst [vmem:[%s5661_s24 + $0x1d8] sm:$0xff] %v4389_v36  ;;  %4454 = vst [vmem:[%s5661_s24 + $0x1e0] sm:$0xff] %v4390_v48 }
 0x3f5   : > { %4455 = vst [vmem:[%s5661_s24 + $0x1e8] sm:$0xff] %v4391_v62  ;;  %4456 = vst [vmem:[%s5661_s24 + $0x1f0] sm:$0xff] %v4392_v0 }
 0x3f6   : > { %4457 = vst [vmem:[%s5661_s24 + $0x1f8] sm:$0xff] %v4393_v10 }
 0x3f7 PF: > { %s13_s18 = sadd.s32 1, %s5054_s18   ;;  %s6541_s12 = smov %s5034_s13 }
 0x3f8   : > { %p10_p13 = scmp.ge.s32.totalorder %s13_s18, 10   ;;  %s6542_s13 = smov %s5129_s25 }
 0x3f9   : > { %s6543_s14 = smov %s5046_s16  ;;  %s6544_s15 = smov %s5050_s17 }
 0x3fa   : > { %s6545_s16 = smov %s6548_s19  ;;  %s6546_s17 = smov %s6552_s20 }
 0x3fb   :  { %12 = sbr.rel (!%p10_p13) target bundleno = 4 (0x4), region = 99 }

</bundles_post_ra>
